<compile_context>
chip_gen: v7x
topology: tpu7x:2x2x1
jax: 0.10.0
libtpu: 0.0.40
codegen_flags: <defaults>
</compile_context>

<pallas_src>
import functools

import jax
import jax.numpy as jnp
from jax.experimental import pallas as pl
from jax.experimental.pallas import tpu as pltpu


def _round_up(x, m):
    return (x + m - 1) // m * m


_FUSE_Q_BYTES_LIMIT = 8 * 1024 * 1024   # gate for the fused-N (Q) temporary


def _vmem_limit_bytes():
    """~20% headroom below physical VMEM (v5e/v6e: 128 MiB, v7x: 64 MiB)."""
    try:
        cap = int(pltpu.get_tpu_info().vmem_capacity_bytes)
    except Exception:
        cap = 0
    if cap <= 0:
        cap = 64 * 1024 * 1024          # conservative fallback
    return int(cap * 0.8)


def _vdsr_kernel(x_ref, w_in_ref, w_res_ref, w_out_ref, o_ref, buf0, buf1,
                 *, H, W, Wp, num_layers):
    """Fused VDSR forward for one image.

    Flat padded layout: pixel (y, x) of the H x W plane lives at flat row
    OFF + y*Wp + x.  Columns x in [W, Wp) and the OFF-row top/bottom slabs are
    zero padding, so every +-1 / +-Wp row shift reads either a real neighbour
    or a zero (the 3x3 "same" halo).
    """
    OFF = Wp + 8                  # top/bottom zero slab (8-aligned, >= Wp+1)
    M = H * Wp                    # rows of the valid (output) region
    SIZE = M + 2 * OFF            # total flat rows of the ping-pong buffers
    ESTART = OFF - Wp             # first row needed by the dy=-1 taps (== 8)
    E_ROWS = M + 2 * Wp           # rows of the dx-expanded operand

    f32 = jnp.float32
    bf16 = jnp.bfloat16

    # Column-validity mask, generated in-kernel (no lane-padded HBM input) and
    # hoisted out of the layer loop: 1.0 on real image columns, 0.0 on the
    # Wp - W pad columns.  Uses an f32 floor-div sawtooth for (r mod Wp) to
    # avoid vector integer division.  Exact while H*Wp < 2^22.
    r_f = jax.lax.broadcasted_iota(jnp.int32, (M, 64), 0).astype(f32)
    col = r_f - float(Wp) * jnp.floor((r_f + 0.5) * (1.0 / Wp))
    mask_b = jnp.where(col < (W - 0.5), 1.0, 0.0).astype(bf16)     # (M, 64)

    # Zero the halo slabs of both ping-pong buffers once (interior rows are
    # fully overwritten by every layer's store; pad columns stay zero thanks
    # to mask_b).
    zero_slab = jnp.zeros((OFF, 64), bf16)
    buf0[0:OFF, :] = zero_slab
    buf0[OFF + M:SIZE, :] = zero_slab
    buf1[0:OFF, :] = zero_slab
    buf1[OFF + M:SIZE, :] = zero_slab

    def conv3x3(src, w, cout):
        """3x3 'same' conv over the flat padded layout.

        src: (SIZE, cin) bf16 ref.  w: (3*cin, 3*cout) bf16 -> fused-N form
        (one MXU pass, lane-sliced shifted sum), or (3, 3*cin, cout) bf16 ->
        3-matmul per-dy form.  Returns the (M, cout) f32 pre-activation,
        accumulated in a single expression (no VMEM scratch round trip).
        """
        e = jnp.concatenate(
            [src[ESTART - 1:ESTART - 1 + E_ROWS, :],
             src[ESTART:ESTART + E_ROWS, :],
             src[ESTART + 1:ESTART + 1 + E_ROWS, :]],
            axis=-1)                                   # (E_ROWS, 3*cin) bf16
        if w.ndim == 2:        # fused output columns: N = 3*cout
            q = jnp.dot(e, w, preferred_element_type=f32)   # (E_ROWS, 3*cout)
            return (q[0:M, 0:cout]
                    + q[Wp:Wp + M, cout:2 * cout]
                    + q[2 * Wp:2 * Wp + M, 2 * cout:3 * cout])
        return (jnp.dot(e[0:M, :], w[0], preferred_element_type=f32)
                + jnp.dot(e[Wp:Wp + M, :], w[1], preferred_element_type=f32)
                + jnp.dot(e[2 * Wp:2 * Wp + M, :], w[2],
                          preferred_element_type=f32))

    def store_act(dst, h_f32, relu):
        if relu:
            h_f32 = jnp.maximum(h_f32, 0.0)
        # bf16 epilogue: cast first, mask (keeps pad columns zero) in bf16.
        dst[OFF:OFF + M, :] = h_f32.astype(bf16) * mask_b

    # ---- in_conv (no ReLU) ----
    store_act(buf0, conv3x3(x_ref, w_in_ref[...], 64), relu=False)

    # ---- residual conv+ReLU stack: fori_loop unrolled by 2 (ping/pong) ----
    num_pairs = num_layers // 2
    if num_pairs > 0:
        def pair_body(i, carry):
            store_act(buf1, conv3x3(buf0, w_res_ref[2 * i], 64), relu=True)
            store_act(buf0, conv3x3(buf1, w_res_ref[2 * i + 1], 64), relu=True)
            return carry
        jax.lax.fori_loop(0, num_pairs, pair_body, 0)
    if num_layers % 2 == 1:
        store_act(buf1, conv3x3(buf0, w_res_ref[num_layers - 1], 64),
                  relu=True)
    last = buf1 if (num_layers % 2 == 1) else buf0

    # ---- out_conv + residual add (f32) ----
    cout = o_ref.shape[-1]
    h = conv3x3(last, w_out_ref[...], cout)
    identity = x_ref[OFF:OFF + M, :].astype(f32)
    o_ref[...] = (h + identity).astype(o_ref.dtype)


def vdsr_forward(x_nchw, params):
    """Matches VDSR.forward: in_conv -> (conv+ReLU)*L -> out_conv -> +x."""
    w_in, w_res, w_out = params
    N, C, H, W = x_nchw.shape
    L = len(w_res)

    Wp = _round_up(W + 2, 8)           # padded row stride (>= W+2, 8-aligned)
    OFF = Wp + 8                       # must match the kernel
    M = H * Wp
    SIZE = M + 2 * OFF
    E_ROWS = M + 2 * Wp

    # Fused-N (Q = E @ [w0|w1|w2]) form only while the Q temporary (lane-
    # padded 192 -> 256, f32) stays small; otherwise keep the 3-matmul form
    # (also the better choice on v5e's 128-wide MXU).
    fuse_dy = (E_ROWS * 256 * 4) <= _FUSE_Q_BYTES_LIMIT

    # One-time layout transform: NCHW -> flat padded bf16 (N, SIZE, C), with
    # pixel (y, x) at row OFF + y*Wp + x and zeros elsewhere (the conv halo).
    x_nhwc = jnp.transpose(x_nchw, (0, 2, 3, 1)).astype(jnp.bfloat16)
    x_wide = jnp.pad(x_nhwc, ((0, 0), (0, 0), (0, Wp - W), (0, 0)))
    x_flat = jnp.pad(x_wide.reshape(N, M, C), ((0, 0), (OFF, OFF), (0, 0)))

    def per_dy(w):        # (3,3,cin,cout) -> (3, 3*cin, cout), K = kx*cin+ci
        return w.reshape(3, 3 * w.shape[2], w.shape[3])

    def fused(w):         # (3,3,cin,cout) -> (3*cin, 3*cout): [w0 | w1 | w2]
        w3 = per_dy(w)
        return jnp.concatenate([w3[0], w3[1], w3[2]], axis=-1)

    if fuse_dy:
        w_in_k = fused(w_in).astype(jnp.bfloat16)
        if L > 0:
            w_res_k = jnp.stack([fused(w) for w in w_res]).astype(jnp.bfloat16)
        else:
            w_res_k = jnp.zeros((1, 3 * 64, 3 * 64), jnp.bfloat16)  # never read
    else:
        w_in_k = per_dy(w_in).astype(jnp.bfloat16)
        if L > 0:
            w_res_k = jnp.stack([per_dy(w) for w in w_res]).astype(jnp.bfloat16)
        else:
            w_res_k = jnp.zeros((1, 3, 3 * 64, 64), jnp.bfloat16)   # never read
    w_out_k = per_dy(w_out).astype(jnp.bfloat16)                    # (3,192,C)

    kernel = functools.partial(_vdsr_kernel, H=H, W=W, Wp=Wp, num_layers=L)

    out_flat = pl.pallas_call(
        kernel,
        out_shape=jax.ShapeDtypeStruct((N, M, C), x_nchw.dtype),
        grid_spec=pltpu.PrefetchScalarGridSpec(
            num_scalar_prefetch=0,
            grid=(N,),
            in_specs=[
                pl.BlockSpec((None, SIZE, C), lambda n: (n, 0, 0)),       # x
                pl.BlockSpec(w_in_k.shape, lambda n: (0,) * w_in_k.ndim),
                pl.BlockSpec(w_res_k.shape, lambda n: (0,) * w_res_k.ndim),
                pl.BlockSpec(w_out_k.shape, lambda n: (0,) * w_out_k.ndim),
            ],
            out_specs=pl.BlockSpec((None, M, C), lambda n: (n, 0, 0)),
            scratch_shapes=[
                pltpu.VMEM((SIZE, 64), jnp.bfloat16),   # activation ping
                pltpu.VMEM((SIZE, 64), jnp.bfloat16),   # activation pong
            ],
        ),
        compiler_params=pltpu.CompilerParams(
            dimension_semantics=("parallel",),
            vmem_limit_bytes=_vmem_limit_bytes(),
        ),
    )(x_flat, w_in_k, w_res_k, w_out_k)

    out = out_flat.reshape(N, H, Wp, C)[:, :, :W, :]
    return jnp.transpose(out, (0, 3, 1, 2))               # NHWC -> NCHW


def init_vdsr_params(key, in_channel, num_layers):
    """Deterministic kaiming-normal init (fan_in = Cin*3*3, gain sqrt(2))."""
    ks = jax.random.split(key, num_layers + 2)

    def kaiming(k, cin, cout):
        std = (2.0 / (cin * 9)) ** 0.5
        return jax.random.normal(k, (3, 3, cin, cout), jnp.float32) * std

    w_in = kaiming(ks[0], in_channel, 64)
    w_res = [kaiming(ks[1 + i], 64, 64) for i in range(num_layers)]
    w_out = kaiming(ks[num_layers + 1], 64, in_channel)
    return w_in, w_res, w_out


def _reference_forward(x_nchw, params):
    """Pure-JAX reference with the same bf16-matmul / f32-accumulate recipe."""
    w_in, w_res, w_out = params
    x = jnp.transpose(x_nchw, (0, 2, 3, 1))
    identity = x
    dn = ("NHWC", "HWIO", "NHWC")

    def conv(h, w):
        return jax.lax.conv_general_dilated(
            h.astype(jnp.bfloat16), w.astype(jnp.bfloat16),
            window_strides=(1, 1), padding="SAME", dimension_numbers=dn,
            preferred_element_type=jnp.float32)

    h = conv(x, w_in)
    for w in w_res:
        h = jnp.maximum(conv(h, w), 0.0)
    out = conv(h, w_out) + identity
    return jnp.transpose(out, (0, 3, 1, 2))


if __name__ == "__main__":
    batch, in_channel, H, W = 2, 4, 16, 16
    num_layers = 3

    key = jax.random.PRNGKey(0)
    k_x, k_p = jax.random.split(key)
    x = jax.random.normal(k_x, (batch, in_channel, H, W), jnp.float32)
    params = init_vdsr_params(k_p, in_channel, num_layers)

    fwd = jax.jit(vdsr_forward)
    out = jax.block_until_ready(fwd(x, params))

    ref = _reference_forward(x, params)
    assert out.shape == (batch, in_channel, H, W)
    # Slightly looser atol than before: the residual identity is now taken
    # from the bf16 input block (the reference keeps it f32).
    assert jnp.allclose(out, ref, atol=3e-2, rtol=2e-2), (
        float(jnp.max(jnp.abs(out - ref))))

    print("KERNEL_OK")
</pallas_src>

<mosaic_0001>
module attributes {stable_mosaic.version = 11 : i64} {
  func.func @_vdsr_kernel(%arg0: i32, %arg1: memref<1x448x4xbf16, #tpu.memory_space<vmem>>, %arg2: memref<12x192xbf16, #tpu.memory_space<vmem>>, %arg3: memref<3x192x192xbf16, #tpu.memory_space<vmem>>, %arg4: memref<3x192x4xbf16, #tpu.memory_space<vmem>>, %arg5: memref<1x384x4xf32, #tpu.memory_space<vmem>>, %arg6: memref<448x64xbf16, #tpu.memory_space<vmem>>, %arg7: memref<448x64xbf16, #tpu.memory_space<vmem>>) attributes {dimension_semantics = [#tpu.dimension_semantics<parallel>], iteration_bounds = array<i64: 2>, scalar_prefetch = 0 : i64, scratch_operands = 2 : i64, tpu.core_type = #tpu.core_type<tc>, window_params = [{transform_indices = @transform_0, window_bounds = array<i64: 1, 448, 4>}, {pipeline_mode = #tpu.pipeline_mode<synchronous>, transform_indices = @transform_1, window_bounds = array<i64: 12, 192>}, {pipeline_mode = #tpu.pipeline_mode<synchronous>, transform_indices = @transform_2, window_bounds = array<i64: 3, 192, 192>}, {pipeline_mode = #tpu.pipeline_mode<synchronous>, transform_indices = @transform_3, window_bounds = array<i64: 3, 192, 4>}, {transform_indices = @transform_4, window_bounds = array<i64: 1, 384, 4>}]} {
    %0 = tpu.iota {dimensions = array<i32: 0>} : vector<384x64xi32>
    %1 = arith.sitofp %0 : vector<384x64xi32> to vector<384x64xf32>
    %cst = arith.constant 5.000000e-01 : f32
    %2 = vector.broadcast %cst : f32 to vector<384x64xf32>
    %3 = arith.addf %1, %2 : vector<384x64xf32>
    %cst_0 = arith.constant 0.0416666679 : f32
    %4 = vector.broadcast %cst_0 : f32 to vector<384x64xf32>
    %5 = arith.mulf %3, %4 : vector<384x64xf32>
    %6 = math.floor %5 : vector<384x64xf32>
    %cst_1 = arith.constant 2.400000e+01 : f32
    %7 = vector.broadcast %cst_1 : f32 to vector<384x64xf32>
    %8 = arith.mulf %7, %6 : vector<384x64xf32>
    %9 = arith.subf %1, %8 : vector<384x64xf32>
    %cst_2 = arith.constant 1.550000e+01 : f32
    %10 = vector.broadcast %cst_2 : f32 to vector<384x64xf32>
    %11 = arith.cmpf olt, %9, %10 : vector<384x64xf32>
    %cst_3 = arith.constant 1.000000e+00 : f32
    %cst_4 = arith.constant 0.000000e+00 : f32
    %12 = vector.broadcast %cst_3 : f32 to vector<384x64xf32>
    %13 = vector.broadcast %cst_4 : f32 to vector<384x64xf32>
    %14 = arith.select %11, %12, %13 : vector<384x64xi1>, vector<384x64xf32>
    %15 = arith.truncf %14 : vector<384x64xf32> to vector<384x64xbf16>
    %cst_5 = arith.constant 0.000000e+00 : bf16
    %16 = vector.broadcast %cst_5 : bf16 to vector<32x64xbf16>
    %c0 = arith.constant 0 : index
    %c0_6 = arith.constant 0 : index
    %17 = vector.load %arg6[%c0, %c0_6] : memref<448x64xbf16, #tpu.memory_space<vmem>>, vector<32x64xbf16>
    tpu.vector_store %arg6[%c0, %c0_6], %16 {strides = array<i32>} : memref<448x64xbf16, #tpu.memory_space<vmem>>, vector<32x64xbf16>,
    %c416 = arith.constant 416 : index
    %c0_7 = arith.constant 0 : index
    %18 = vector.load %arg6[%c416, %c0_7] : memref<448x64xbf16, #tpu.memory_space<vmem>>, vector<32x64xbf16>
    tpu.vector_store %arg6[%c416, %c0_7], %16 {strides = array<i32>} : memref<448x64xbf16, #tpu.memory_space<vmem>>, vector<32x64xbf16>,
    %c0_8 = arith.constant 0 : index
    %c0_9 = arith.constant 0 : index
    %19 = vector.load %arg7[%c0_8, %c0_9] : memref<448x64xbf16, #tpu.memory_space<vmem>>, vector<32x64xbf16>
    tpu.vector_store %arg7[%c0_8, %c0_9], %16 {strides = array<i32>} : memref<448x64xbf16, #tpu.memory_space<vmem>>, vector<32x64xbf16>,
    %c416_10 = arith.constant 416 : index
    %c0_11 = arith.constant 0 : index
    %20 = vector.load %arg7[%c416_10, %c0_11] : memref<448x64xbf16, #tpu.memory_space<vmem>>, vector<32x64xbf16>
    tpu.vector_store %arg7[%c416_10, %c0_11], %16 {strides = array<i32>} : memref<448x64xbf16, #tpu.memory_space<vmem>>, vector<32x64xbf16>,
    %c0_12 = arith.constant 0 : index
    %c0_13 = arith.constant 0 : index
    %21 = vector.load %arg2[%c0_12, %c0_13] : memref<12x192xbf16, #tpu.memory_space<vmem>>, vector<12x192xbf16>
    %c0_14 = arith.constant 0 : index
    %c7 = arith.constant 7 : index
    %c0_15 = arith.constant 0 : index
    %22 = vector.load %arg1[%c0_14, %c7, %c0_15] : memref<1x448x4xbf16, #tpu.memory_space<vmem>>, vector<1x432x4xbf16>
    %23 = vector.shape_cast %22 : vector<1x432x4xbf16> to vector<432x4xbf16>
    %c0_16 = arith.constant 0 : index
    %c8 = arith.constant 8 : index
    %c0_17 = arith.constant 0 : index
    %24 = vector.load %arg1[%c0_16, %c8, %c0_17] : memref<1x448x4xbf16, #tpu.memory_space<vmem>>, vector<1x432x4xbf16>
    %25 = vector.shape_cast %24 : vector<1x432x4xbf16> to vector<432x4xbf16>
    %c0_18 = arith.constant 0 : index
    %c9 = arith.constant 9 : index
    %c0_19 = arith.constant 0 : index
    %26 = vector.load %arg1[%c0_18, %c9, %c0_19] : memref<1x448x4xbf16, #tpu.memory_space<vmem>>, vector<1x432x4xbf16>
    %27 = vector.shape_cast %26 : vector<1x432x4xbf16> to vector<432x4xbf16>
    %28 = tpu.concatenate %23, %25, %27 in 1 : vector<432x4xbf16>, vector<432x4xbf16>, vector<432x4xbf16> -> vector<432x12xbf16>
    %cst_20 = arith.constant dense<0.000000e+00> : vector<432x192xf32>
    %29 = tpu.matmul %28, %21, %cst_20 {dimension_numbers = #tpu.dot_dimension_numbers<[1], [0], [0], [1], [0, 0, 1, 1], [], []>} : vector<432x12xbf16>, vector<12x192xbf16>, vector<432x192xf32> -> vector<432x192xf32>
    %30 = vector.extract_strided_slice %29 {offsets = [0, 0], sizes = [384, 64], strides = [1, 1]} : vector<432x192xf32> to vector<384x64xf32>
    %31 = vector.extract_strided_slice %29 {offsets = [24, 64], sizes = [384, 64], strides = [1, 1]} : vector<432x192xf32> to vector<384x64xf32>
    %32 = arith.addf %30, %31 : vector<384x64xf32>
    %33 = vector.extract_strided_slice %29 {offsets = [48, 128], sizes = [384, 64], strides = [1, 1]} : vector<432x192xf32> to vector<384x64xf32>
    %34 = arith.addf %32, %33 : vector<384x64xf32>
    %35 = arith.truncf %34 : vector<384x64xf32> to vector<384x64xbf16>
    %36 = arith.mulf %35, %15 : vector<384x64xbf16>
    %c32 = arith.constant 32 : index
    %c0_21 = arith.constant 0 : index
    %37 = vector.load %arg6[%c32, %c0_21] : memref<448x64xbf16, #tpu.memory_space<vmem>>, vector<384x64xbf16>
    tpu.vector_store %arg6[%c32, %c0_21], %36 {strides = array<i32>} : memref<448x64xbf16, #tpu.memory_space<vmem>>, vector<384x64xbf16>,
    %c0_i32 = arith.constant 0 : i32
    %c2_i32 = arith.constant 2 : i32
    %38 = arith.muli %c2_i32, %c0_i32 : i32
    %39 = arith.index_cast %38 : i32 to index
    %c0_22 = arith.constant 0 : index
    %c0_23 = arith.constant 0 : index
    %40 = vector.load %arg3[%39, %c0_22, %c0_23] : memref<3x192x192xbf16, #tpu.memory_space<vmem>>, vector<1x192x192xbf16>
    %41 = vector.shape_cast %40 : vector<1x192x192xbf16> to vector<192x192xbf16>
    %c7_24 = arith.constant 7 : index
    %c0_25 = arith.constant 0 : index
    %42 = vector.load %arg6[%c7_24, %c0_25] : memref<448x64xbf16, #tpu.memory_space<vmem>>, vector<432x64xbf16>
    %c8_26 = arith.constant 8 : index
    %c0_27 = arith.constant 0 : index
    %43 = vector.load %arg6[%c8_26, %c0_27] : memref<448x64xbf16, #tpu.memory_space<vmem>>, vector<432x64xbf16>
    %c9_28 = arith.constant 9 : index
    %c0_29 = arith.constant 0 : index
    %44 = vector.load %arg6[%c9_28, %c0_29] : memref<448x64xbf16, #tpu.memory_space<vmem>>, vector<432x64xbf16>
    %45 = tpu.concatenate %42, %43, %44 in 1 : vector<432x64xbf16>, vector<432x64xbf16>, vector<432x64xbf16> -> vector<432x192xbf16>
    %cst_30 = arith.constant dense<0.000000e+00> : vector<432x192xf32>
    %46 = tpu.matmul %45, %41, %cst_30 {dimension_numbers = #tpu.dot_dimension_numbers<[1], [0], [0], [1], [0, 0, 1, 1], [], []>} : vector<432x192xbf16>, vector<192x192xbf16>, vector<432x192xf32> -> vector<432x192xf32>
    %47 = vector.extract_strided_slice %46 {offsets = [0, 0], sizes = [384, 64], strides = [1, 1]} : vector<432x192xf32> to vector<384x64xf32>
    %48 = vector.extract_strided_slice %46 {offsets = [24, 64], sizes = [384, 64], strides = [1, 1]} : vector<432x192xf32> to vector<384x64xf32>
    %49 = arith.addf %47, %48 : vector<384x64xf32>
    %50 = vector.extract_strided_slice %46 {offsets = [48, 128], sizes = [384, 64], strides = [1, 1]} : vector<432x192xf32> to vector<384x64xf32>
    %51 = arith.addf %49, %50 : vector<384x64xf32>
    %cst_31 = arith.constant 0.000000e+00 : f32
    %52 = vector.broadcast %cst_31 : f32 to vector<384x64xf32>
    %53 = arith.maximumf %51, %52 : vector<384x64xf32>
    %54 = arith.truncf %53 : vector<384x64xf32> to vector<384x64xbf16>
    %55 = arith.mulf %54, %15 : vector<384x64xbf16>
    %c32_32 = arith.constant 32 : index
    %c0_33 = arith.constant 0 : index
    %56 = vector.load %arg7[%c32_32, %c0_33] : memref<448x64xbf16, #tpu.memory_space<vmem>>, vector<384x64xbf16>
    tpu.vector_store %arg7[%c32_32, %c0_33], %55 {strides = array<i32>} : memref<448x64xbf16, #tpu.memory_space<vmem>>, vector<384x64xbf16>,
    %c2_i32_34 = arith.constant 2 : i32
    %57 = arith.muli %c2_i32_34, %c0_i32 : i32
    %c1_i32 = arith.constant 1 : i32
    %58 = arith.addi %57, %c1_i32 : i32
    %59 = arith.index_cast %58 : i32 to index
    %c0_35 = arith.constant 0 : index
    %c0_36 = arith.constant 0 : index
    %60 = vector.load %arg3[%59, %c0_35, %c0_36] : memref<3x192x192xbf16, #tpu.memory_space<vmem>>, vector<1x192x192xbf16>
    %61 = vector.shape_cast %60 : vector<1x192x192xbf16> to vector<192x192xbf16>
    %c7_37 = arith.constant 7 : index
    %c0_38 = arith.constant 0 : index
    %62 = vector.load %arg7[%c7_37, %c0_38] : memref<448x64xbf16, #tpu.memory_space<vmem>>, vector<432x64xbf16>
    %c8_39 = arith.constant 8 : index
    %c0_40 = arith.constant 0 : index
    %63 = vector.load %arg7[%c8_39, %c0_40] : memref<448x64xbf16, #tpu.memory_space<vmem>>, vector<432x64xbf16>
    %c9_41 = arith.constant 9 : index
    %c0_42 = arith.constant 0 : index
    %64 = vector.load %arg7[%c9_41, %c0_42] : memref<448x64xbf16, #tpu.memory_space<vmem>>, vector<432x64xbf16>
    %65 = tpu.concatenate %62, %63, %64 in 1 : vector<432x64xbf16>, vector<432x64xbf16>, vector<432x64xbf16> -> vector<432x192xbf16>
    %cst_43 = arith.constant dense<0.000000e+00> : vector<432x192xf32>
    %66 = tpu.matmul %65, %61, %cst_43 {dimension_numbers = #tpu.dot_dimension_numbers<[1], [0], [0], [1], [0, 0, 1, 1], [], []>} : vector<432x192xbf16>, vector<192x192xbf16>, vector<432x192xf32> -> vector<432x192xf32>
    %67 = vector.extract_strided_slice %66 {offsets = [0, 0], sizes = [384, 64], strides = [1, 1]} : vector<432x192xf32> to vector<384x64xf32>
    %68 = vector.extract_strided_slice %66 {offsets = [24, 64], sizes = [384, 64], strides = [1, 1]} : vector<432x192xf32> to vector<384x64xf32>
    %69 = arith.addf %67, %68 : vector<384x64xf32>
    %70 = vector.extract_strided_slice %66 {offsets = [48, 128], sizes = [384, 64], strides = [1, 1]} : vector<432x192xf32> to vector<384x64xf32>
    %71 = arith.addf %69, %70 : vector<384x64xf32>
    %cst_44 = arith.constant 0.000000e+00 : f32
    %72 = vector.broadcast %cst_44 : f32 to vector<384x64xf32>
    %73 = arith.maximumf %71, %72 : vector<384x64xf32>
    %74 = arith.truncf %73 : vector<384x64xf32> to vector<384x64xbf16>
    %75 = arith.mulf %74, %15 : vector<384x64xbf16>
    %c32_45 = arith.constant 32 : index
    %c0_46 = arith.constant 0 : index
    %76 = vector.load %arg6[%c32_45, %c0_46] : memref<448x64xbf16, #tpu.memory_space<vmem>>, vector<384x64xbf16>
    tpu.vector_store %arg6[%c32_45, %c0_46], %75 {strides = array<i32>} : memref<448x64xbf16, #tpu.memory_space<vmem>>, vector<384x64xbf16>,
    %c1_i32_47 = arith.constant 1 : i32
    %c2 = arith.constant 2 : index
    %c0_48 = arith.constant 0 : index
    %c0_49 = arith.constant 0 : index
    %77 = vector.load %arg3[%c2, %c0_48, %c0_49] : memref<3x192x192xbf16, #tpu.memory_space<vmem>>, vector<1x192x192xbf16>
    %78 = vector.shape_cast %77 : vector<1x192x192xbf16> to vector<192x192xbf16>
    %c7_50 = arith.constant 7 : index
    %c0_51 = arith.constant 0 : index
    %79 = vector.load %arg6[%c7_50, %c0_51] : memref<448x64xbf16, #tpu.memory_space<vmem>>, vector<432x64xbf16>
    %c8_52 = arith.constant 8 : index
    %c0_53 = arith.constant 0 : index
    %80 = vector.load %arg6[%c8_52, %c0_53] : memref<448x64xbf16, #tpu.memory_space<vmem>>, vector<432x64xbf16>
    %c9_54 = arith.constant 9 : index
    %c0_55 = arith.constant 0 : index
    %81 = vector.load %arg6[%c9_54, %c0_55] : memref<448x64xbf16, #tpu.memory_space<vmem>>, vector<432x64xbf16>
    %82 = tpu.concatenate %79, %80, %81 in 1 : vector<432x64xbf16>, vector<432x64xbf16>, vector<432x64xbf16> -> vector<432x192xbf16>
    %cst_56 = arith.constant dense<0.000000e+00> : vector<432x192xf32>
    %83 = tpu.matmul %82, %78, %cst_56 {dimension_numbers = #tpu.dot_dimension_numbers<[1], [0], [0], [1], [0, 0, 1, 1], [], []>} : vector<432x192xbf16>, vector<192x192xbf16>, vector<432x192xf32> -> vector<432x192xf32>
    %84 = vector.extract_strided_slice %83 {offsets = [0, 0], sizes = [384, 64], strides = [1, 1]} : vector<432x192xf32> to vector<384x64xf32>
    %85 = vector.extract_strided_slice %83 {offsets = [24, 64], sizes = [384, 64], strides = [1, 1]} : vector<432x192xf32> to vector<384x64xf32>
    %86 = arith.addf %84, %85 : vector<384x64xf32>
    %87 = vector.extract_strided_slice %83 {offsets = [48, 128], sizes = [384, 64], strides = [1, 1]} : vector<432x192xf32> to vector<384x64xf32>
    %88 = arith.addf %86, %87 : vector<384x64xf32>
    %cst_57 = arith.constant 0.000000e+00 : f32
    %89 = vector.broadcast %cst_57 : f32 to vector<384x64xf32>
    %90 = arith.maximumf %88, %89 : vector<384x64xf32>
    %91 = arith.truncf %90 : vector<384x64xf32> to vector<384x64xbf16>
    %92 = arith.mulf %91, %15 : vector<384x64xbf16>
    %c32_58 = arith.constant 32 : index
    %c0_59 = arith.constant 0 : index
    %93 = vector.load %arg7[%c32_58, %c0_59] : memref<448x64xbf16, #tpu.memory_space<vmem>>, vector<384x64xbf16>
    tpu.vector_store %arg7[%c32_58, %c0_59], %92 {strides = array<i32>} : memref<448x64xbf16, #tpu.memory_space<vmem>>, vector<384x64xbf16>,
    %c0_60 = arith.constant 0 : index
    %c0_61 = arith.constant 0 : index
    %c0_62 = arith.constant 0 : index
    %94 = vector.load %arg4[%c0_60, %c0_61, %c0_62] : memref<3x192x4xbf16, #tpu.memory_space<vmem>>, vector<3x192x4xbf16>
    %c7_63 = arith.constant 7 : index
    %c0_64 = arith.constant 0 : index
    %95 = vector.load %arg7[%c7_63, %c0_64] : memref<448x64xbf16, #tpu.memory_space<vmem>>, vector<432x64xbf16>
    %c8_65 = arith.constant 8 : index
    %c0_66 = arith.constant 0 : index
    %96 = vector.load %arg7[%c8_65, %c0_66] : memref<448x64xbf16, #tpu.memory_space<vmem>>, vector<432x64xbf16>
    %c9_67 = arith.constant 9 : index
    %c0_68 = arith.constant 0 : index
    %97 = vector.load %arg7[%c9_67, %c0_68] : memref<448x64xbf16, #tpu.memory_space<vmem>>, vector<432x64xbf16>
    %98 = tpu.concatenate %95, %96, %97 in 1 : vector<432x64xbf16>, vector<432x64xbf16>, vector<432x64xbf16> -> vector<432x192xbf16>
    %99 = vector.extract_strided_slice %98 {offsets = [0, 0], sizes = [384, 192], strides = [1, 1]} : vector<432x192xbf16> to vector<384x192xbf16>
    %100 = vector.extract_strided_slice %94 {offsets = [0, 0, 0], sizes = [1, 192, 4], strides = [1, 1, 1]} : vector<3x192x4xbf16> to vector<1x192x4xbf16>
    %101 = vector.shape_cast %100 : vector<1x192x4xbf16> to vector<192x4xbf16>
    %cst_69 = arith.constant dense<0.000000e+00> : vector<384x4xf32>
    %102 = tpu.matmul %99, %101, %cst_69 {dimension_numbers = #tpu.dot_dimension_numbers<[1], [0], [0], [1], [0, 0, 1, 1], [], []>} : vector<384x192xbf16>, vector<192x4xbf16>, vector<384x4xf32> -> vector<384x4xf32>
    %103 = vector.extract_strided_slice %98 {offsets = [24, 0], sizes = [384, 192], strides = [1, 1]} : vector<432x192xbf16> to vector<384x192xbf16>
    %104 = vector.extract_strided_slice %94 {offsets = [1, 0, 0], sizes = [1, 192, 4], strides = [1, 1, 1]} : vector<3x192x4xbf16> to vector<1x192x4xbf16>
    %105 = vector.shape_cast %104 : vector<1x192x4xbf16> to vector<192x4xbf16>
    %cst_70 = arith.constant dense<0.000000e+00> : vector<384x4xf32>
    %106 = tpu.matmul %103, %105, %cst_70 {dimension_numbers = #tpu.dot_dimension_numbers<[1], [0], [0], [1], [0, 0, 1, 1], [], []>} : vector<384x192xbf16>, vector<192x4xbf16>, vector<384x4xf32> -> vector<384x4xf32>
    %107 = arith.addf %102, %106 : vector<384x4xf32>
    %108 = vector.extract_strided_slice %98 {offsets = [48, 0], sizes = [384, 192], strides = [1, 1]} : vector<432x192xbf16> to vector<384x192xbf16>
    %109 = vector.extract_strided_slice %94 {offsets = [2, 0, 0], sizes = [1, 192, 4], strides = [1, 1, 1]} : vector<3x192x4xbf16> to vector<1x192x4xbf16>
    %110 = vector.shape_cast %109 : vector<1x192x4xbf16> to vector<192x4xbf16>
    %cst_71 = arith.constant dense<0.000000e+00> : vector<384x4xf32>
    %111 = tpu.matmul %108, %110, %cst_71 {dimension_numbers = #tpu.dot_dimension_numbers<[1], [0], [0], [1], [0, 0, 1, 1], [], []>} : vector<384x192xbf16>, vector<192x4xbf16>, vector<384x4xf32> -> vector<384x4xf32>
    %112 = arith.addf %107, %111 : vector<384x4xf32>
    %c0_72 = arith.constant 0 : index
    %c32_73 = arith.constant 32 : index
    %c0_74 = arith.constant 0 : index
    %113 = vector.load %arg1[%c0_72, %c32_73, %c0_74] : memref<1x448x4xbf16, #tpu.memory_space<vmem>>, vector<1x384x4xbf16>
    %114 = vector.shape_cast %113 : vector<1x384x4xbf16> to vector<384x4xbf16>
    %115 = arith.extf %114 : vector<384x4xbf16> to vector<384x4xf32>
    %116 = arith.addf %112, %115 : vector<384x4xf32>
    %c0_75 = arith.constant 0 : index
    %c0_76 = arith.constant 0 : index
    %c0_77 = arith.constant 0 : index
    %117 = vector.load %arg5[%c0_75, %c0_76, %c0_77] : memref<1x384x4xf32, #tpu.memory_space<vmem>>, vector<1x384x4xf32>
    %118 = vector.shape_cast %117 : vector<1x384x4xf32> to vector<384x4xf32>
    %119 = vector.shape_cast %116 : vector<384x4xf32> to vector<1x384x4xf32>
    tpu.vector_store %arg5[%c0_75, %c0_76, %c0_77], %119 {strides = array<i32>} : memref<1x384x4xf32, #tpu.memory_space<vmem>>, vector<1x384x4xf32>,
    return
  }
  func.func @transform_0(%arg0: i32) -> (i32, i32, i32) {
    %c0_i32 = arith.constant 0 : i32
    %c0_i32_0 = arith.constant 0 : i32
    %c0_i32_1 = arith.constant 0 : i32
    return %arg0, %c0_i32, %c0_i32_0 : i32, i32, i32
  }
  func.func @transform_1(%arg0: i32) -> (i32, i32) {
    %c0_i32 = arith.constant 0 : i32
    %c0_i32_0 = arith.constant 0 : i32
    %c0_i32_1 = arith.constant 0 : i32
    return %c0_i32, %c0_i32_0 : i32, i32
  }
  func.func @transform_2(%arg0: i32) -> (i32, i32, i32) {
    %c0_i32 = arith.constant 0 : i32
    %c0_i32_0 = arith.constant 0 : i32
    %c0_i32_1 = arith.constant 0 : i32
    %c0_i32_2 = arith.constant 0 : i32
    return %c0_i32, %c0_i32_0, %c0_i32_1 : i32, i32, i32
  }
  func.func @transform_3(%arg0: i32) -> (i32, i32, i32) {
    %c0_i32 = arith.constant 0 : i32
    %c0_i32_0 = arith.constant 0 : i32
    %c0_i32_1 = arith.constant 0 : i32
    %c0_i32_2 = arith.constant 0 : i32
    return %c0_i32, %c0_i32_0, %c0_i32_1 : i32, i32, i32
  }
  func.func @transform_4(%arg0: i32) -> (i32, i32, i32) {
    %c0_i32 = arith.constant 0 : i32
    %c0_i32_0 = arith.constant 0 : i32
    %c0_i32_1 = arith.constant 0 : i32
    return %arg0, %c0_i32, %c0_i32_0 : i32, i32, i32
  }
}

</mosaic_0001>

<bundles_post_ra>
// kernel: squeeze.11
= control target key start
LH: loop header
LB: loop body
LE: loop exit
PB: predicated region body
PF: predicated region fallthrough
CT: control target
= control target key end

     0   :  { %vm50_vm0 = vcmask 523264   ;;  %s104_s0 = inlined_call_operand.vmem [shape: bf16[1,3,4,64], index: 0, kind: input, shape index: {}]   ;;  %s105_s1 = inlined_call_operand.vmem [shape: bf16[12,64], index: 1, kind: output, shape index: {}]  }
   0x1   :  { %v77_v0 = vld [vmem:[%s104_s0 + $0x2] sm:$0xf]   ;;  %v45_v1 = vld [vmem:[%s104_s0] sm:$0x3] }
   0x2   :  { %v17_v2 = vunpack.c.l.bf16 %v77_v0  ;;  %v46_v3 = vunpack.c.l.bf16 %v45_v1 }
   0x4   :  { %20 = vst [vmem:[#allocation1 + $0x8] ss:$8 sps:$4 sm:$0xff] %v17_v2   ;;  %48 = vst [vmem:[#allocation1] sm:$0xf] %v46_v3 }
   0xb   :  { %v49_v4 = vld [vmem:[#allocation1] sm:$0xf]   ;;  %v53_v5 = vld [vmem:[#allocation1 + $0x8] sm:$0xf]   ;;  %v58_v6 = vld [vmem:[#allocation1 + $0x10] sm:$0xf]  }
   0xc   :  { %51 = vst.msk [vmem:[#allocation0] sm:$0xf] %vm50_vm0, %v49_v4   ;;  %56 = vst.msk [vmem:[#allocation0 + $0x4] sm:$0xf] %vm50_vm0, %v53_v5  }
   0xd   :  { %61 = vst.msk [vmem:[#allocation0 + $0x8] sm:$0xf] %vm50_vm0, %v58_v6  }
  0x13   :  { %v66_v7 = vld [vmem:[#allocation0] sm:$0xff] }
  0x14   :  { %v71_v8 = vld [vmem:[#allocation0 + $0x8] sm:$0xff] }
  0x15   :  { %v83_v9 = vpack.c.bf16 %v71_v8, %v66_v7 }
  0x17   :  { %84 = vst [vmem:[%s105_s1] sm:$0xff] %v83_v9  }

// kernel: vdsr_forward.1
= control target key start
LH: loop header
LB: loop body
LE: loop exit
PB: predicated region body
PF: predicated region fallthrough
CT: control target
= control target key end

     0   :  { %s11372_s15 = smov 0   ;;  %s17372_s0 = inlined_call_operand.vmem [shape: bf16[2,448,4], index: 0, kind: input, shape index: {}]   ;;  %s17373_s1 = inlined_call_operand.vmem [shape: bf16[12,192], index: 1, kind: input, shape index: {}]   ;;  %s17374_s2 = inlined_call_operand.vmem [shape: bf16[3,192,192], index: 2, kind: input, shape index: {}]   ;;  %s17375_s3 = inlined_call_operand.vmem [shape: bf16[3,192,4], index: 3, kind: input, shape index: {}]   ;;  %s17376_s4 = inlined_call_operand.vmem [shape: f32[2,384,4], index: 4, kind: output, shape index: {}]  }
   0x1 LB: > { %s10586_s16 = sadd.s32 4294967295, %s11340_s15   ;;  %p10590_p0 = scmp.ge.s32.totalorder %s11340_s15, 1  ;;  %s11340_s15 = sphi %s11372_s15, %s14_s15  }
   0x2   : > { %p162_p1 = scmp.lt.s32.totalorder %s11340_s15, 3 }
   0x4   : > { %p163_p2 = pnand %p10590_p0, %p162_p1 }
   0x6   : > { %166 = sbr.rel (%p163_p2) target bundleno = 2836 (0xb14), region = 36 }
   0xd   : > { %p188_p3 = scmp.lt.s32.totalorder %s10586_s16, 1  ;;  %vm1190_vm0 = vcmask 1042432   ;;  %s11342_s21 = smov 8   ;;  %vm888_vm1 = vsmask.f32 3328  ;;  %vm1758_vm2 = vcmask 1045504  }
   0xe   : > { %s11343_s22 = smov 4   ;;  %vm1302_vm3 = vcmask 31744   ;;  %vm1387_vm4 = vcmask 64512   ;;  %vm1444_vm5 = vsmask.f32 4352  ;;  %vm1676_vm6 = vcmask 97280  }
   0xf   : > { %s18076_s16 = smov (!%p188_p3, %s10586_s16), 1  ;;  %vm656_vm7 = vcmask 523264   ;;  %s11345_s27 = smov 64   ;;  %vm2473_vm8 = vsmask.f32 7424  ;;  %vm2781_vm13 = vcmask 1046528  }
  0x10   : > { %s11112_s17 = smul.u32 224, %s18076_s16 }
  0x12   : > { %s11386_s20 = scalar_lea.vmem %s17372_s0, %s11112_s17 }
  0x13   : > { %v11389_v0 = vld [vmem:[%s11386_s20 + $0x4] sm:$0xf]  ;;  %v11392_v1 = vld [vmem:[%s11386_s20 + $0x8] sm:$0xf]  ;;  %v11395_v2 = vld [vmem:[%s11386_s20 + $0xc] sm:$0xf] }
  0x14   : > { %v10621_v3 = vcombine.low %v11389_v0, %v11392_v1  ;;  %v11400_v4 = vld [vmem:[%s11386_s20 + $0x10] sm:$0xf]  ;;  %v11403_v5 = vld [vmem:[%s11386_s20 + $0x14] sm:$0xf]  ;;  %v11406_v6 = vld [vmem:[%s11386_s20 + $0x18] sm:$0xf] }
  0x15   : > { %v10622_v8 = vcombine.low %v11395_v2, %v11400_v4  ;;  %v10623_v9 = vcombine.low %v11403_v5, %v11406_v6  ;;  %v11415_v10 = vld [vmem:[%s11386_s20 + $0x1c] sm:$0xf]  ;;  %v11418_v11 = vld [vmem:[%s11386_s20 + $0x20] sm:$0xf]  ;;  %v11425_v17 = vld [vmem:[%s11386_s20 + $0x24] sm:$0xf] }
  0x16   : > { %v890_v13 = vshrl.u32 %v10621_v3, 16  ;;  %v893_v14 = vshll.u32 %v10621_v3, 16  ;;  %v1191_v15 = vrot.slane %v10621_v3, 5  ;;  %v10624_v16 = vcombine.low %v11415_v10, %v11418_v11  ;;  %v11428_v22 = vld [vmem:[%s11386_s20 + $0x28] sm:$0xf] }
  0x17   : > { %v898_v18 = vshrl.u32 %v10622_v8, 16  ;;  %v901_v19 = vshll.u32 %v10622_v8, 16  ;;  %v1192_v20 = vrot.slane %v10622_v8, 5  ;;  %v907_v21 = vshrl.u32 %v10623_v9, 16  ;;  %v11432_v27 = vld [vmem:[%s11386_s20 + $0x2c] sm:$0xf] }
  0x18   : > { %v892_v23 = vrot.slane %v890_v13, 4  ;;  %v895_v24 = vrot.slane %v893_v14, 5  ;;  %1246 = vrot.lane.b32.xlu1 %v1191_v15, %s11342_s21  ;;  %v910_v25 = vshll.u32 %v10623_v9, 16  ;;  %v1194_v26 = vrot.slane %v10623_v9, 5  ;;  %v11436_v32 = vld [vmem:[%s11386_s20 + $0x30] sm:$0xf] }
  0x19   : > { %v900_v28 = vrot.slane %v898_v18, 4  ;;  %v903_v29 = vrot.slane %v901_v19, 5  ;;  %v1193_v30 = vsel %vm1190_vm0, %v1191_v15, %v1192_v20  ;;  %v909_v31 = vrot.slane %v907_v21, 4  ;;  %v11448_v43 = vld [vmem:[%s11386_s20 + $0x34] sm:$0xf] }
  0x1a   : > { %v896_v33 = vor.u32 %v895_v24, %v892_v23  ;;  %v912_v34 = vrot.slane %v910_v25, 5  ;;  %v916_v35 = vshrl.u32 %v10624_v16, 16  ;;  %v919_v37 = vshll.u32 %v10624_v16, 16  ;;  %v11451_v44 = vld [vmem:[%s11386_s20 + $0x38] sm:$0xf] }
  0x1b   : > { %v904_v36 = vor.u32 %v903_v29, %v900_v28  ;;  %v10625_v38 = vcombine.low %v11425_v17, %v11428_v22  ;;  %v1195_v40 = vsel %vm1190_vm0, %v1192_v20, %v1194_v26  ;;  %v1196_v41 = vrot.slane %v10624_v16, 5  ;;  %v11464_v55 = vld [vmem:[%s11386_s20 + $0x3c] sm:$0xf]  ;;  %v11468_v60 = vld [vmem:[%s11386_s20 + $0x40] sm:$0xf] }
  0x1c   : > { %1131 = vrot.lane.b32.xlu0 %v896_v33, %s11343_s22  ;;  %1248 = vrot.lane.b32.xlu1 %v1193_v30, %s11342_s21  ;;  %v913_v39 = vor.u32 %v912_v34, %v909_v31  ;;  %v11445_v42 = vcombine.low %v11432_v27, %v11436_v32  ;;  %v918_v46 = vrot.slane %v916_v35, 4  ;;  %v921_v47 = vrot.slane %v919_v37, 5  ;;  %v11471_v61 = vld [vmem:[%s11386_s20 + $0x44] sm:$0xf]  ;;  %v11476_v3 = vld [vmem:[%s11386_s20 + $0x48] sm:$0xf] }
  0x1d   : > { %v905_v45 = vsel %vm888_vm1, %v896_v33, %v904_v36  ;;  %v925_v48 = vshrl.u32 %v10625_v38, 16  ;;  %v928_v49 = vshll.u32 %v10625_v38, 16  ;;  %v11456_v50 = vcombine.low %v11448_v43, %v11451_v44  ;;  %v11485_v14 = vld [vmem:[%s11386_s20 + $0x4c] sm:$0xf]  ;;  %v11493_v21 = vld [vmem:[%s11386_s20 + $0x50] sm:$0xf] }
  0x1e   : > { %v914_v51 = vsel %vm888_vm1, %v904_v36, %v913_v39  ;;  %v1197_v52 = vsel %vm1190_vm0, %v1194_v26, %v1196_v41  ;;  %v1198_v53 = vrot.slane %v10625_v38, 5  ;;  %v934_v54 = vshrl.u32 %v11445_v42, 16  ;;  %v11505_v34 = vld [vmem:[%s11386_s20 + $0x54] sm:$0xf]  ;;  %v11508_v35 = vld [vmem:[%s11386_s20 + $0x58] sm:$0xf] }
  0x1f   : > { %v922_v56 = vor.u32 %v921_v47, %v918_v46  ;;  %v927_v57 = vrot.slane %v925_v48, 4  ;;  %v930_v58 = vrot.slane %v928_v49, 5  ;;  %v937_v59 = vshll.u32 %v11445_v42, 16  ;;  %v11513_v38 = vld [vmem:[%s11386_s20 + $0x5c] sm:$0xf] }
  0x20   : > { %1133 = vrot.lane.b32.xlu0 %v905_v45, %s11343_s22  ;;  %1250 = vrot.lane.b32.xlu1 %v1195_v40, %s11342_s21  ;;  %v943_v62 = vshrl.u32 %v11456_v50, 16  ;;  %v946_v63 = vshll.u32 %v11456_v50, 16  ;;  %v1199_v8 = vsel %vm1190_vm0, %v1196_v41, %v1198_v53  ;;  %v1200_v9 = vrot.slane %v11445_v42, 5  ;;  %v11519_v42 = vld [vmem:[%s11386_s20 + $0x64] sm:$0xf] }
  0x21   : > { %v10628_v13 = vcombine.low %v11464_v55, %v11468_v60  ;;  %v923_v15 = vsel %vm888_vm1, %v913_v39, %v922_v56  ;;  %v931_v16 = vor.u32 %v930_v58, %v927_v57  ;;  %v936_v18 = vrot.slane %v934_v54, 4  ;;  %v11516_v39 = vld [vmem:[%s11386_s20 + $0x60] sm:$0xf]  ;;  %v693_v45 = vld [vmem:[%s11386_s20 + $0x68] sm:$0xf] }
  0x22   : > { %v939_v19 = vrot.slane %v937_v59, 5  ;;  %v11490_v20 = vcombine.low %v11471_v61, %v11476_v3  ;;  %v945_v23 = vrot.slane %v943_v62, 4  ;;  %v948_v24 = vrot.slane %v946_v63, 5  ;;  %v11143_v46 = vld [vmem:[%s17373_s1 + $0x4] ss:$8 sps:$4 sm:$0x3f]  }
  0x23   : > { %v1201_v25 = vsel %vm1190_vm0, %v1198_v53, %v1200_v9  ;;  %v952_v26 = vshrl.u32 %v10628_v13, 16  ;;  %v955_v28 = vshll.u32 %v10628_v13, 16  ;;  %v932_v29 = vsel %vm888_vm1, %v922_v56, %v931_v16  ;;  %v11145_v47 = vld [vmem:[%s17373_s1] ss:$8 sps:$4 sm:$0x3f]   ;;  %10651 = vmatprep.subr.msk.bf16.mxu0 %vm1758_vm2, %v11143_v46  ;;  %11110 = vmatprep.subr.msk.bf16.mxu1 %vm1758_vm2, %v11143_v46 }
  0x24   : > { %1135 = vrot.lane.b32.xlu0 %v914_v51, %s11343_s22  ;;  %1252 = vrot.lane.b32.xlu1 %v1197_v52, %s11342_s21  ;;  %v940_v30 = vor.u32 %v939_v19, %v936_v18  ;;  %v1202_v31 = vrot.slane %v11456_v50, 5  ;;  %v11502_v33 = vcombine.low %v11485_v14, %v11493_v21  ;;  %v961_v36 = vshrl.u32 %v11490_v20, 16  ;;  %v11619_v46 = vld [vmem:[%s11386_s20 + $0x84] sm:$0xf]  ;;  %v11757_v12 = vld [vmem:[%s11386_s20 + $0xcc] sm:$0xf] }
  0x25   : > { %v964_v37 = vshll.u32 %v11490_v20, 16  ;;  %v949_v40 = vor.u32 %v948_v24, %v945_v23  ;;  %v1204_v41 = vrot.slane %v10628_v13, 5  ;;  %v954_v48 = vrot.slane %v952_v26, 4  ;;  %v11551_v13 = vld [vmem:[%s11386_s20 + $0x6c] sm:$0xf]  ;;  %17590 = vst [vmem:[#allocation15_spill] sm:$0xff] %v11757_v12 }
  0x26   : > { %v957_v49 = vrot.slane %v955_v28, 5  ;;  %v941_v50 = vsel %vm888_vm1, %v931_v16, %v940_v30  ;;  %v1203_v51 = vsel %vm1190_vm0, %v1200_v9, %v1202_v31  ;;  %v1206_v52 = vrot.slane %v11490_v20, 5  ;;  %v11760_v7 = vld [vmem:[%s11386_s20 + $0xd0] sm:$0xf] }
  0x27   : > { %v970_v53 = vshrl.u32 %v11502_v33, 16  ;;  %v963_v54 = vrot.slane %v961_v36, 4  ;;  %v966_v56 = vrot.slane %v964_v37, 5  ;;  %v11536_v57 = vcombine.low %v11505_v34, %v11508_v35  ;;  %v11572_v36 = vld [vmem:[%s11386_s20 + $0x78] sm:$0xf]  ;;  %17591 = vst [vmem:[#allocation16_spill] sm:$0xff] %v11760_v7 }
  0x28   : > { %1137 = vrot.lane.b32.xlu0 %v923_v15, %s11343_s22  ;;  %1254 = vrot.lane.b32.xlu1 %v1199_v8, %s11342_s21  ;;  %v950_v58 = vsel %vm888_vm1, %v940_v30, %v949_v40  ;;  %v1205_v59 = vsel %vm1190_vm0, %v1202_v31, %v1204_v41  ;;  %v11542_v62 = vcombine.low %v11513_v38, %v11516_v39  ;;  %v973_v8 = vshll.u32 %v11502_v33, 16  ;;  %v11554_v15 = vld [vmem:[%s11386_s20 + $0x70] sm:$0xf] }
  0x29   : > { %v958_v63 = vor.u32 %v957_v49, %v954_v48  ;;  %v11548_v9 = vcombine.low %v11519_v42, %v693_v45  ;;  %v1207_v16 = vsel %vm1190_vm0, %v1204_v41, %v1206_v52  ;;  %v972_v18 = vrot.slane %v970_v53, 4 }
  0x2a   : > { %v1208_v19 = vrot.slane %v11502_v33, 5  ;;  %v1760_v20 = vsel %vm1758_vm2, %v11145_v47, 0  ;;  %v967_v23 = vor.u32 %v966_v56, %v963_v54  ;;  %v979_v24 = vshrl.u32 %v11536_v57, 16  ;;  %v11569_v33 = vld [vmem:[%s11386_s20 + $0x74] sm:$0xf] }
  0x2b   : > { %1766 = vmatpush1.bf16.msra.mxu0 %v1760_v20  ;;  %11111 = vmatpush1.bf16.msra.mxu1 %v1760_v20  ;;  %v982_v26 = vshll.u32 %v11536_v57, 16  ;;  %v988_v28 = vshrl.u32 %v11542_v62, 16  ;;  %v959_v37 = vsel %vm888_vm1, %v949_v40, %v958_v63  ;;  %v991_v41 = vshll.u32 %v11542_v62, 16 }
  0x2c   : > { %1139 = vrot.lane.b32.xlu0 %v932_v29, %s11343_s22  ;;  %1256 = vrot.lane.b32.xlu1 %v1201_v25, %s11342_s21  ;;  %v17377_v29 = vmov 0   ;;  %v997_v45 = vshrl.u32 %v11548_v9, 16  ;;  %v975_v47 = vrot.slane %v973_v8, 5  ;;  %v1000_v48 = vshll.u32 %v11548_v9, 16 }
  0x2d   : > { %1797 = vmatprep.mubr.bf16.mxu0 %v17377_v29  ;;  %1941 = vmatprep.mubr.bf16.mxu1 %v17377_v29  ;;  %v11585_v49 = vcombine.low %v11551_v13, %v11554_v15  ;;  %v968_v40 = vsel %vm888_vm1, %v958_v63, %v967_v23  ;;  %v1210_v53 = vrot.slane %v11536_v57, 5  ;;  %v981_v54 = vrot.slane %v979_v24, 4 }
  0x2e   : > { %v984_v56 = vrot.slane %v982_v26, 5  ;;  %v993_v8 = vrot.slane %v991_v41, 5  ;;  %v999_v20 = vrot.slane %v997_v45, 4  ;;  %v976_v63 = vor.u32 %v975_v47, %v972_v18  ;;  %v11603_v26 = vld [vmem:[%s11386_s20 + $0x7c] sm:$0xf] }
  0x2f   : > { %v1002_v57 = vrot.slane %v1000_v48, 5  ;;  %v1006_v24 = vshrl.u32 %v11585_v49, 16 }
  0x30   : > { %1141 = vrot.lane.b32.xlu0 %v941_v50, %s11343_s22  ;;  %1258 = vrot.lane.b32.xlu1 %v1203_v51, %s11342_s21  ;;  %v1209_v51 = vsel %vm1190_vm0, %v1206_v52, %v1208_v19  ;;  %v1214_v50 = vrot.slane %v11548_v9, 5  ;;  %v11598_v52 = vcombine.low %v11569_v33, %v11572_v36  ;;  %v1211_v9 = vsel %vm1190_vm0, %v1208_v19, %v1210_v53 }
  0x31   : > { %v977_v41 = vsel %vm888_vm1, %v967_v23, %v976_v63  ;;  %v985_v45 = vor.u32 %v984_v56, %v981_v54  ;;  %v1008_v47 = vrot.slane %v1006_v24, 4  ;;  %v1003_v29 = vor.u32 %v1002_v57, %v999_v20 }
  0x32   : > { %v1015_v18 = vshrl.u32 %v11598_v52, 16  ;;  %v1218_v48 = vrot.slane %v11598_v52, 5 }
  0x33   : > { %v986_v54 = vsel %vm888_vm1, %v976_v63, %v985_v45 }
  0x34   : > { %1143 = vrot.lane.b32.xlu0 %v950_v58, %s11343_s22  ;;  %1260 = vrot.lane.b32.xlu1 %v1205_v59, %s11342_s21  ;;  %v990_v58 = vrot.slane %v988_v28, 4  ;;  %v1212_v59 = vrot.slane %v11542_v62, 5  ;;  %v1009_v62 = vshll.u32 %v11585_v49, 16  ;;  %v11607_v28 = vld [vmem:[%s11386_s20 + $0x80] sm:$0xf] }
  0x36   : > { %v1011_v19 = vrot.slane %v1009_v62, 5  ;;  %v994_v56 = vor.u32 %v993_v8, %v990_v58  ;;  %v1215_v63 = vsel %vm1190_vm0, %v1212_v59, %v1214_v50  ;;  %v11637_v58 = vld [vmem:[%s11386_s20 + $0x8c] sm:$0xf] }
  0x38   : > { %1145 = vrot.lane.b32.xlu0 %v959_v37, %s11343_s22  ;;  %1262 = vrot.lane.b32.xlu1 %v1207_v16, %s11342_s21  ;;  %v1216_v16 = vrot.slane %v11585_v49, 5  ;;  %v1018_v37 = vshll.u32 %v11598_v52, 16  ;;  %v10636_v49 = vcombine.low %v11603_v26, %v11607_v28  ;;  %v1213_v52 = vsel %vm1190_vm0, %v1210_v53, %v1212_v59  ;;  %v11640_v53 = vld [vmem:[%s11386_s20 + $0x90] sm:$0xf] }
  0x39   : > { %v995_v30 = vsel %vm888_vm1, %v985_v45, %v994_v56 }
  0x3a   : > { %v1020_v24 = vrot.slane %v1018_v37, 5  ;;  %v1024_v31 = vshrl.u32 %v10636_v49, 16  ;;  %v1217_v20 = vsel %vm1190_vm0, %v1214_v50, %v1216_v16 }
  0x3c   : > { %1147 = vrot.lane.b32.xlu0 %v968_v40, %s11343_s22  ;;  %1264 = vrot.lane.b32.xlu1 %v1209_v51, %s11342_s21  ;;  %v11622_v40 = vld [vmem:[%s11386_s20 + $0x88] sm:$0xf]  ;;  %v1017_v51 = vrot.slane %v1015_v18, 4  ;;  %v1026_v8 = vrot.slane %v1024_v31, 4 }
  0x3d   : > { %v10637_v23 = vcombine.low %v11619_v46, %v11622_v40 }
  0x3e   : > { %v1021_v25 = vor.u32 %v1020_v24, %v1017_v51 }
  0x3f   : > { %v1033_v18 = vshrl.u32 %v10637_v23, 16  ;;  %v1036_v37 = vshll.u32 %v10637_v23, 16 }
  0x40   : > { %1149 = vrot.lane.b32.xlu0 %v977_v41, %s11343_s22  ;;  %1266 = vrot.lane.b32.xlu1 %v1211_v9, %s11342_s21  ;;  %v1027_v41 = vshll.u32 %v10636_v49, 16  ;;  %v1220_v9 = vrot.slane %v10636_v49, 5  ;;  %v10638_v49 = vcombine.low %v11637_v58, %v11640_v53 }
  0x41   : > { %v1035_v59 = vrot.slane %v1033_v18, 4  ;;  %v1038_v45 = vrot.slane %v1036_v37, 5  ;;  %v11665_v37 = vld [vmem:[%s11386_s20 + $0x94] sm:$0xf] }
  0x42   : > { %v1029_v57 = vrot.slane %v1027_v41, 5  ;;  %v1221_v41 = vsel %vm1190_vm0, %v1218_v48, %v1220_v9  ;;  %v1224_v51 = vrot.slane %v10638_v49, 5 }
  0x44   : > { %1151 = vrot.lane.b32.xlu0 %v986_v54, %s11343_s22  ;;  %1268 = vrot.lane.b32.xlu1 %v1213_v52, %s11342_s21  ;;  %v1004_v54 = vsel %vm888_vm1, %v994_v56, %v1003_v29  ;;  %v1012_v52 = vor.u32 %v1011_v19, %v1008_v47  ;;  %v1219_v56 = vsel %vm1190_vm0, %v1216_v16, %v1218_v48  ;;  %v1045_v47 = vshll.u32 %v10638_v49, 16  ;;  %v11752_v16 = vld [vmem:[%s11386_s20 + $0xc8] sm:$0xf] }
  0x45   : > { %17589 = vst [vmem:[#allocation14_spill] sm:$0xff] %v11752_v16 }
  0x46   : > { %v1013_v62 = vsel %vm888_vm1, %v1003_v29, %v1012_v52  ;;  %v1022_v19 = vsel %vm888_vm1, %v1012_v52, %v1021_v25  ;;  %v1047_v29 = vrot.slane %v1045_v47, 5  ;;  %v11682_v47 = vld [vmem:[%s11386_s20 + $0x9c] sm:$0xf] }
  0x48   : > { %1153 = vrot.lane.b32.xlu0 %v995_v30, %s11343_s22  ;;  %1270 = vrot.lane.b32.xlu1 %v1215_v63, %s11342_s21  ;;  %v1222_v30 = vrot.slane %v10637_v23, 5  ;;  %v1042_v63 = vshrl.u32 %v10638_v49, 16  ;;  %v1030_v23 = vor.u32 %v1029_v57, %v1026_v8 }
  0x4a   : > { %v1044_v50 = vrot.slane %v1042_v63, 4  ;;  %v1031_v24 = vsel %vm888_vm1, %v1021_v25, %v1030_v23  ;;  %v1223_v18 = vsel %vm1190_vm0, %v1220_v9, %v1222_v30  ;;  %v1225_v9 = vsel %vm1190_vm0, %v1222_v30, %v1224_v51 }
  0x4c   : > { %1155 = vrot.lane.b32.xlu0 %v1004_v54, %s11343_s22  ;;  %1272 = vrot.lane.b32.xlu1 %v1217_v20, %s11342_s21  ;;  %v11668_v54 = vld [vmem:[%s11386_s20 + $0x98] sm:$0xf]  ;;  %v1048_v52 = vor.u32 %v1047_v29, %v1044_v50  ;;  %v11685_v50 = vld [vmem:[%s11386_s20 + $0xa0] sm:$0xf] }
  0x4d   : > { %v10639_v48 = vcombine.low %v11665_v37, %v11668_v54  ;;  %17579 = vst [vmem:[#allocation4_spill] sm:$0xff] %v11685_v50 }
  0x4f   : > { %v1051_v8 = vshrl.u32 %v10639_v48, 16  ;;  %v1054_v49 = vshll.u32 %v10639_v48, 16 }
  0x50   : > { %1157 = vrot.lane.b32.xlu0 %v1013_v62, %s11343_s22  ;;  %1274 = vrot.lane.b32.xlu1 %v1219_v56, %s11342_s21  ;;  %v1039_v62 = vor.u32 %v1038_v45, %v1035_v59  ;;  %v1226_v59 = vrot.slane %v10639_v48, 5 }
  0x51   : > { %v1053_v20 = vrot.slane %v1051_v8, 4  ;;  %v1056_v57 = vrot.slane %v1054_v49, 5  ;;  %v11697_v8 = vld [vmem:[%s11386_s20 + $0xa4] sm:$0xf]  ;;  %v11700_v49 = vld [vmem:[%s11386_s20 + $0xa8] sm:$0xf] }
  0x52   : > { %v1040_v25 = vsel %vm888_vm1, %v1030_v23, %v1039_v62  ;;  %v1049_v63 = vsel %vm888_vm1, %v1039_v62, %v1048_v52  ;;  %v1227_v30 = vsel %vm1190_vm0, %v1224_v51, %v1226_v59  ;;  %17580 = vst [vmem:[#allocation5_spill] sm:$0xff] %v11697_v8  ;;  %17581 = vst [vmem:[#allocation6_spill] sm:$0xff] %v11700_v49 }
  0x53   : > { %v1057_v56 = vor.u32 %v1056_v57, %v1053_v20 }
  0x54   : > { %1159 = vrot.lane.b32.xlu0 %v1022_v19, %s11343_s22  ;;  %1276 = vrot.lane.b32.xlu1 %v1221_v41, %s11342_s21  ;;  %v10640_v19 = vcombine.low %v11682_v47, %v11685_v50 }
  0x55   : > { %v1058_v29 = vsel %vm888_vm1, %v1048_v52, %v1057_v56  ;;  %v10641_v52 = vcombine.low %v11697_v8, %v11700_v49 }
  0x56   : > { %v1060_v23 = vshrl.u32 %v10640_v19, 16  ;;  %v1063_v41 = vshll.u32 %v10640_v19, 16  ;;  %v1228_v48 = vrot.slane %v10640_v19, 5 }
  0x57   : > { %v1069_v20 = vshrl.u32 %v10641_v52, 16  ;;  %v1072_v57 = vshll.u32 %v10641_v52, 16 }
  0x58   : > { %1161 = vrot.lane.b32.xlu0 %v1031_v24, %s11343_s22  ;;  %1278 = vrot.lane.b32.xlu1 %v1223_v18, %s11342_s21  ;;  %v1062_v24 = vrot.slane %v1060_v23, 4  ;;  %v1065_v62 = vrot.slane %v1063_v41, 5  ;;  %v1230_v23 = vrot.slane %v10641_v52, 5  ;;  %v11709_v41 = vld [vmem:[%s11386_s20 + $0xac] sm:$0xf] }
  0x59   : > { %17582 = vst [vmem:[#allocation7_spill] sm:$0xff] %v11709_v41 }
  0x5a   : > { %v1066_v18 = vor.u32 %v1065_v62, %v1062_v24 }
  0x5c   : > { %1163 = vrot.lane.b32.xlu0 %v1040_v25, %s11343_s22  ;;  %1280 = vrot.lane.b32.xlu1 %v1225_v9, %s11342_s21  ;;  %v1067_v25 = vsel %vm888_vm1, %v1057_v56, %v1066_v18  ;;  %v1229_v9 = vsel %vm1190_vm0, %v1226_v59, %v1228_v48  ;;  %v11712_v56 = vld [vmem:[%s11386_s20 + $0xb0] sm:$0xf] }
  0x5d   : > { %17583 = vst [vmem:[#allocation8_spill] sm:$0xff] %v11712_v56  ;;  %v10642_v24 = vcombine.low %v11709_v41, %v11712_v56  ;;  %v11780_v56 = vld [vmem:[%s11386_s20 + $0xd8] sm:$0xf]  ;;  %v11177_v41 = vld [vmem:[%s11386_s20 + $0xdc] ss:$0 sps:$4 sm:$0x11]  }
  0x5f   : > { %v1078_v62 = vshrl.u32 %v10642_v24, 16 }
  0x60   : > { %1165 = vrot.lane.b32.xlu0 %v1049_v63, %s11343_s22  ;;  %1282 = vrot.lane.b32.xlu1 %v1227_v30, %s11342_s21  ;;  %v1071_v63 = vrot.slane %v1069_v20, 4  ;;  %v1074_v30 = vrot.slane %v1072_v57, 5  ;;  %v1232_v57 = vrot.slane %v10642_v24, 5 }
  0x62   : > { %v1075_v19 = vor.u32 %v1074_v30, %v1071_v63  ;;  %v11721_v63 = vld [vmem:[%s11386_s20 + $0xb4] sm:$0xf]  ;;  %v11724_v30 = vld [vmem:[%s11386_s20 + $0xb8] sm:$0xf] }
  0x63   : > { %17584 = vst [vmem:[#allocation9_spill] sm:$0xff] %v11721_v63  ;;  %17585 = vst [vmem:[#allocation10_spill] sm:$0xff] %v11724_v30 }
  0x64   : > { %1167 = vrot.lane.b32.xlu0 %v1058_v29, %s11343_s22  ;;  %1284 = vrot.lane.b32.xlu1 %v1229_v9, %s11342_s21  ;;  %v1076_v59 = vsel %vm888_vm1, %v1066_v18, %v1075_v19  ;;  %v1231_v29 = vsel %vm1190_vm0, %v1228_v48, %v1230_v23  ;;  %v1080_v9 = vrot.slane %v1078_v62, 4  ;;  %v10643_v48 = vcombine.low %v11721_v63, %v11724_v30 }
  0x66   : > { %v1090_v62 = vshll.u32 %v10643_v48, 16 }
  0x68   : > { %1169 = vrot.lane.b32.xlu0 %v1067_v25, %s11343_s22  ;;  %1286 = vrot.lane.b32.xlu1 %v1231_v29, %s11342_s21  ;;  %v1081_v25 = vshll.u32 %v10642_v24, 16  ;;  %v1233_v29 = vsel %vm1190_vm0, %v1230_v23, %v1232_v57  ;;  %v1087_v24 = vshrl.u32 %v10643_v48, 16  ;;  %v11742_v23 = vld [vmem:[%s11386_s20 + $0xc0] sm:$0xf] }
  0x69   : > { %17587 = vst [vmem:[#allocation12_spill] sm:$0xff] %v11742_v23 }
  0x6a   : > { %v1083_v20 = vrot.slane %v1081_v25, 5  ;;  %v1234_v25 = vrot.slane %v10643_v48, 5 }
  0x6c   : > { %1171 = vrot.lane.b32.xlu0 %v1076_v59, %s11343_s22  ;;  %v1084_v52 = vor.u32 %v1083_v20, %v1080_v9  ;;  %1288 = vrot.lane.b32.xlu1 %v1233_v29, %s11342_s21  ;;  %v1089_v9 = vrot.slane %v1087_v24, 4  ;;  %v1092_v20 = vrot.slane %v1090_v62, 5  ;;  %v1235_v18 = vsel %vm1190_vm0, %v1232_v57, %v1234_v25 }
  0x6e   : > { %v1085_v59 = vsel %vm888_vm1, %v1075_v19, %v1084_v52  ;;  %v1093_v51 = vor.u32 %v1092_v20, %v1089_v9  ;;  %v11739_v19 = vld [vmem:[%s11386_s20 + $0xbc] sm:$0xf]  ;;  %v11749_v20 = vld [vmem:[%s11386_s20 + $0xc4] sm:$0xf] }
  0x6f   : > { %17586 = vst [vmem:[#allocation11_spill] sm:$0xff] %v11739_v19  ;;  %v10644_v48 = vcombine.low %v11739_v19, %v11742_v23  ;;  %17588 = vst [vmem:[#allocation13_spill] sm:$0xff] %v11749_v20  ;;  %v10645_v31 = vcombine.low %v11749_v20, %v11752_v16  ;;  %v10646_v16 = vcombine.low %v11757_v12, %v11760_v7  ;;  %v11777_v19 = vld [vmem:[%s11386_s20 + $0xd4] sm:$0xf] }
  0x70   : > { %1173 = vrot.lane.b32.xlu0 %v1085_v59, %s11343_s22  ;;  %1290 = vrot.lane.b32.xlu1 %v1235_v18, %s11342_s21  ;;  %v1094_v45 = vsel %vm888_vm1, %v1084_v52, %v1093_v51  ;;  %v667_v59 = vld [vmem:[%s11386_s20] sm:$0x8] }
  0x71   : > { %v1096_v57 = vshrl.u32 %v10644_v48, 16  ;;  %v1099_v29 = vshll.u32 %v10644_v48, 16  ;;  %v10593_v52 = vcombine.low %v667_v59, %v11389_v0  ;;  %v1236_v9 = vrot.slane %v10644_v48, 5 }
  0x72   : > { %v1105_v0 = vshrl.u32 %v10645_v31, 16  ;;  %v1238_v48 = vrot.slane %v10645_v31, 5  ;;  %v1117_v30 = vshll.u32 %v10646_v16, 16 }
  0x73   : > { %v1098_v18 = vrot.slane %v1096_v57, 4  ;;  %v1101_v62 = vrot.slane %v1099_v29, 5  ;;  %v1108_v57 = vshll.u32 %v10645_v31, 16 }
  0x74   : > { %1175 = vrot.lane.b32.xlu0 %v1094_v45, %s11343_s22  ;;  %v1119_v31 = vrot.slane %v1117_v30, 5  ;;  %v10647_v30 = vcombine.low %v11777_v19, %v11780_v56 }
  0x75   : > { %v1102_v45 = vor.u32 %v1101_v62, %v1098_v18  ;;  %v1237_v62 = vsel %vm1190_vm0, %v1234_v25, %v1236_v9  ;;  %v1240_v25 = vrot.slane %v10646_v16, 5 }
  0x76   : > { %1292 = vrot.lane.b32.xlu1 %v1237_v62, %s11342_s21  ;;  %v1239_v62 = vsel %vm1190_vm0, %v1236_v9, %v1238_v48 }
  0x77   : > { %v1103_v18 = vsel %vm888_vm1, %v1093_v51, %v1102_v45  ;;  %v1114_v51 = vshrl.u32 %v10646_v16, 16 }
  0x78   : > { %1177 = vrot.lane.b32.xlu0 %v1103_v18, %s11343_s22 }
  0x79   : > { %v1116_v63 = vrot.slane %v1114_v51, 4 }
  0x7a   : > { %1294 = vrot.lane.b32.xlu1 %v1239_v62, %s11342_s21  ;;  %v1244_v62 = vrot.slane %v11177_v41, 5 }
  0x7b   : > { %v1120_v8 = vor.u32 %v1119_v31, %v1116_v63  ;;  %v17593_v63 = vcombine.low %v11400_v4, %v11403_v5 }
  0x8a   : > { %v1247_v24 = vpop.permute.xlu1 %1246 }
  0x8e   : > { %v1132_v59 = vpop.permute.xlu0 %1131  ;;  %v1249_v29 = vpop.permute.xlu1 %1248 }
  0x8f   : > { %v1305_v23 = vsel %vm1302_vm3, %v10593_v52, %v1132_v59  ;;  %v1107_v52 = vrot.slane %v1105_v0, 4  ;;  %v1110_v59 = vrot.slane %v1108_v57, 5 }
  0x90   : > { %v1389_v20 = vsel %vm1387_vm4, %v1305_v23, %v1247_v24  ;;  %v17592_v23 = vcombine.low %v11392_v1, %v11395_v2 }
  0x91   : > { %v1445_v7 = vshrl.u32 %v1389_v20, 16  ;;  %v1448_v12 = vshll.u32 %v1389_v20, 16  ;;  %v1111_v49 = vor.u32 %v1110_v59, %v1107_v52  ;;  %v1241_v20 = vsel %vm1190_vm0, %v1238_v48, %v1240_v25 }
  0x92   : > { %v1134_v18 = vpop.permute.xlu0 %1133  ;;  %v1251_v16 = vpop.permute.xlu1 %1250  ;;  %v1123_v52 = vshrl.u32 %v10647_v30, 16  ;;  %v1126_v59 = vshll.u32 %v10647_v30, 16  ;;  %1296 = vrot.lane.b32.xlu1 %v1241_v20, %s11342_s21 }
  0x93   : > { %v1308_v24 = vsel %vm1302_vm3, %v17592_v23, %v1134_v18  ;;  %v1447_v57 = vrot.slane %v1445_v7, 3  ;;  %v1450_v9 = vrot.slane %v1448_v12, 4  ;;  %v1112_v1 = vsel %vm888_vm1, %v1102_v45, %v1111_v49 }
  0x94   : > { %v1391_v0 = vsel %vm1387_vm4, %v1308_v24, %v1249_v29  ;;  %1179 = vrot.lane.b32.xlu0 %v1112_v1, %s11343_s22  ;;  %v1242_v18 = vrot.slane %v10647_v30, 5  ;;  %v1121_v12 = vsel %vm888_vm1, %v1111_v49, %v1120_v8  ;;  %v1125_v31 = vrot.slane %v1123_v52, 4 }
  0x95   : > { %v1452_v51 = vshrl.u32 %v1391_v0, 16  ;;  %v1455_v50 = vshll.u32 %v1391_v0, 16  ;;  %v1128_v23 = vrot.slane %v1126_v59, 5  ;;  %v1451_v0 = vor.u32 %v1450_v9, %v1447_v57 }
  0x96   : > { %v1136_v2 = vpop.permute.xlu0 %1135  ;;  %v1243_v24 = vsel %vm1190_vm0, %v1240_v25, %v1242_v18  ;;  %v17594_v49 = vcombine.low %v11406_v6, %v11415_v10  ;;  %v1245_v9 = vsel %vm1190_vm0, %v1242_v18, %v1244_v62 }
  0x97   : > { %v1454_v48 = vrot.slane %v1452_v51, 3  ;;  %v1457_v7 = vrot.slane %v1455_v50, 4  ;;  %v1311_v29 = vsel %vm1302_vm3, %v17593_v63, %v1136_v2  ;;  %v1253_v50 = vpop.permute.xlu1 %1252  ;;  %v1129_v4 = vor.u32 %v1128_v23, %v1125_v31  ;;  %1298 = vrot.lane.b32.xlu1 %v1243_v24, %s11342_s21 }
  0x98   : > { %v1393_v45 = vsel %vm1387_vm4, %v1311_v29, %v1251_v16  ;;  %1181 = vrot.lane.b32.xlu0 %v1121_v12, %s11343_s22  ;;  %v17595_v63 = vmov 0   ;;  %v17596_v12 = vcombine.low %v11418_v11, %v11425_v17  ;;  %v17597_v11 = vcombine.low %v11428_v22, %v11432_v27 }
  0x99   : > { %v1458_v30 = vor.u32 %v1457_v7, %v1454_v48  ;;  %v1460_v41 = vshrl.u32 %v1393_v45, 16  ;;  %v1463_v51 = vshll.u32 %v1393_v45, 16  ;;  %v1130_v57 = vsel %vm888_vm1, %v1120_v8, %v1129_v4  ;;  %657 = vst.msk [vmem:[#allocation2] sm:$0xff] %vm656_vm7, %v17595_v63  ;;  %658 = vst.msk [vmem:[#allocation2 + $0x8] sm:$0xff] %vm656_vm7, %v17595_v63 }
  0x9a   : > { %v1138_v1 = vpop.permute.xlu0 %1137  ;;  %v17598_v22 = vcombine.low %v11436_v32, %v11448_v43  ;;  %659 = vst.msk [vmem:[#allocation2 + $0xd0] sm:$0xff] %vm656_vm7, %v17595_v63  ;;  %660 = vst.msk [vmem:[#allocation2 + $0xd8] sm:$0xff] %vm656_vm7, %v17595_v63 }
  0x9b   : > { %v1462_v5 = vrot.slane %v1460_v41, 3  ;;  %v1465_v2 = vrot.slane %v1463_v51, 4  ;;  %v1314_v16 = vsel %vm1302_vm3, %v17594_v49, %v1138_v1  ;;  %v1459_v20 = vsel %vm1444_vm5, %v1451_v0, %v1458_v30  ;;  %v1255_v7 = vpop.permute.xlu1 %1254  ;;  %1300 = vrot.lane.b32.xlu1 %v1245_v9, %s11342_s21  ;;  %661 = vst.msk [vmem:[#allocation3] sm:$0xff] %vm656_vm7, %v17595_v63  ;;  %662 = vst.msk [vmem:[#allocation3 + $0x8] sm:$0xff] %vm656_vm7, %v17595_v63 }
  0x9c   : > { %v1395_v25 = vsel %vm1387_vm4, %v1314_v16, %v1253_v50  ;;  %10652 = vmatmul.mubr.msk.bf16.vlgmr.msra.gmra.mrb[0].mxu0 %vm1676_vm6, %v1459_v20  ;;  %1183 = vrot.lane.b32.xlu0 %v1130_v57, %s11343_s22  ;;  %663 = vst.msk [vmem:[#allocation3 + $0xd0] sm:$0xff] %vm656_vm7, %v17595_v63  ;;  %664 = vst.msk [vmem:[#allocation3 + $0xd8] sm:$0xff] %vm656_vm7, %v17595_v63 }
  0x9d   : > { %v1466_v52 = vor.u32 %v1465_v2, %v1462_v5  ;;  %v1468_v59 = vshrl.u32 %v1395_v25, 16  ;;  %v1471_v48 = vshll.u32 %v1395_v25, 16  ;;  %1805 = vmatprep.mubr.bf16.mxu0 %v17595_v63 }
  0x9e   : > { %v1140_v6 = vpop.permute.xlu0 %1139 }
  0x9f   : > { %v1470_v10 = vrot.slane %v1468_v59, 3  ;;  %v1473_v29 = vrot.slane %v1471_v48, 4  ;;  %v1317_v45 = vsel %vm1302_vm3, %v17596_v12, %v1140_v6  ;;  %v1467_v8 = vsel %vm1444_vm5, %v1458_v30, %v1466_v52  ;;  %v1257_v24 = vpop.permute.xlu1 %1256 }
  0xa0   : > { %v1397_v18 = vsel %vm1387_vm4, %v1317_v45, %v1255_v7  ;;  %1185 = vrot.lane.b32.xlu0 %v1129_v4, %s11343_s22 }
  0xa1   : > { %v1474_v62 = vor.u32 %v1473_v29, %v1470_v10  ;;  %v1476_v31 = vshrl.u32 %v1397_v18, 16  ;;  %v1479_v23 = vshll.u32 %v1397_v18, 16  ;;  %v17599_v29 = vcombine.low %v11451_v44, %v11464_v55 }
  0xa2   : > { %v1142_v0 = vpop.permute.xlu0 %1141  ;;  %v17600_v44 = vcombine.low %v11468_v60, %v11471_v61 }
  0xa3   : > { %v1478_v41 = vrot.slane %v1476_v31, 3  ;;  %v1481_v51 = vrot.slane %v1479_v23, 4  ;;  %v1320_v17 = vsel %vm1302_vm3, %v17597_v11, %v1142_v0  ;;  %v1475_v30 = vsel %vm1444_vm5, %v1466_v52, %v1474_v62  ;;  %v1259_v49 = vpop.permute.xlu1 %1258 }
  0xa4   : > { %10653 = vmatmul.mubr.msk.bf16.gmra.mrb[4].mxu0 %vm1676_vm6, %v1467_v8  ;;  %v1399_v50 = vsel %vm1387_vm4, %v1320_v17, %v1257_v24 }
  0xa5   : > { %v1482_v1 = vor.u32 %v1481_v51, %v1478_v41  ;;  %v1484_v5 = vshrl.u32 %v1399_v50, 16  ;;  %v1487_v2 = vshll.u32 %v1399_v50, 16  ;;  %1813 = vmatprep.mubr.bf16.mxu0 %v17595_v63 }
  0xa6   : > { %v1144_v4 = vpop.permute.xlu0 %1143 }
  0xa7   : > { %v1486_v16 = vrot.slane %v1484_v5, 3  ;;  %v1489_v20 = vrot.slane %v1487_v2, 4  ;;  %v1323_v27 = vsel %vm1302_vm3, %v17598_v22, %v1144_v4  ;;  %v1483_v25 = vsel %vm1444_vm5, %v1474_v62, %v1482_v1  ;;  %v1261_v48 = vpop.permute.xlu1 %1260 }
  0xa8   : > { %v1401_v57 = vsel %vm1387_vm4, %v1323_v27, %v1259_v49  ;;  %v17601_v49 = vcombine.low %v11476_v3, %v11485_v14  ;;  %v17602_v3 = vcombine.low %v11493_v21, %v11505_v34 }
  0xa9   : > { %v1490_v9 = vor.u32 %v1489_v20, %v1486_v16  ;;  %v1492_v52 = vshrl.u32 %v1401_v57, 16  ;;  %v1495_v59 = vshll.u32 %v1401_v57, 16 }
  0xaa   : > { %v1146_v7 = vpop.permute.xlu0 %1145 }
  0xab   : > { %v1494_v6 = vrot.slane %v1492_v52, 3  ;;  %v1497_v10 = vrot.slane %v1495_v59, 4  ;;  %v1326_v12 = vsel %vm1302_vm3, %v17599_v29, %v1146_v7  ;;  %v1491_v32 = vsel %vm1444_vm5, %v1482_v1, %v1490_v9  ;;  %v1263_v62 = vpop.permute.xlu1 %1262 }
  0xac   : > { %10654 = vmatmul.mubr.msk.bf16.gmra.mrb[8].mxu0 %vm1676_vm6, %v1475_v30  ;;  %v1403_v43 = vsel %vm1387_vm4, %v1326_v12, %v1261_v48 }
  0xad   : > { %v1498_v45 = vor.u32 %v1497_v10, %v1494_v6  ;;  %1821 = vmatprep.mubr.bf16.mxu0 %v17595_v63  ;;  %v1500_v8 = vshrl.u32 %v1403_v43, 16  ;;  %v1503_v18 = vshll.u32 %v1403_v43, 16 }
  0xae   : > { %v1148_v31 = vpop.permute.xlu0 %1147 }
  0xaf   : > { %v1502_v23 = vrot.slane %v1500_v8, 3  ;;  %v1505_v24 = vrot.slane %v1503_v18, 4  ;;  %v1499_v0 = vsel %vm1444_vm5, %v1490_v9, %v1498_v45  ;;  %v1329_v55 = vsel %vm1302_vm3, %v17600_v44, %v1148_v31  ;;  %v1265_v30 = vpop.permute.xlu1 %1264 }
  0xb0   : > { %v1405_v41 = vsel %vm1387_vm4, %v1329_v55, %v1263_v62 }
  0xb1   : > { %v1506_v51 = vor.u32 %v1505_v24, %v1502_v23  ;;  %v1508_v11 = vshrl.u32 %v1405_v41, 16  ;;  %v1511_v17 = vshll.u32 %v1405_v41, 16  ;;  %v11328_v24 = vld [vmem:[%s11386_s20 + $0x68] sm:$0xf] }
  0xb2   : > { %v1150_v50 = vpop.permute.xlu0 %1149  ;;  %v10606_v44 = vcombine.low %v11328_v24, %v11551_v13 }
  0xb3   : > { %v1510_v1 = vrot.slane %v1508_v11, 3  ;;  %v1513_v5 = vrot.slane %v1511_v17, 4  ;;  %v11853_v2 = vsel %vm1444_vm5, %v1498_v45, %v1506_v51  ;;  %v1332_v4 = vsel %vm1302_vm3, %v17601_v49, %v1150_v50  ;;  %v1267_v22 = vpop.permute.xlu1 %1266 }
  0xb4   : > { %10655 = vmatmul.mubr.msk.bf16.gmra.mrb[12].mxu0 %vm1676_vm6, %v1483_v25  ;;  %v1407_v60 = vsel %vm1387_vm4, %v1332_v4, %v1265_v30  ;;  %v17603_v45 = vcombine.low %v11508_v35, %v11513_v38  ;;  %v17604_v38 = vcombine.low %v11516_v39, %v11519_v42 }
  0xb5   : > { %1831 = vmatprep.mubr.bf16.mxu0 %v17595_v63  ;;  %v1514_v61 = vor.u32 %v1513_v5, %v1510_v1  ;;  %v1516_v16 = vshrl.u32 %v1407_v60, 16  ;;  %v1519_v20 = vshll.u32 %v1407_v60, 16 }
  0xb6   : > { %v1152_v27 = vpop.permute.xlu0 %1151 }
  0xb7   : > { %v1518_v57 = vrot.slane %v1516_v16, 3  ;;  %v1521_v9 = vrot.slane %v1519_v20, 4  ;;  %v11863_v52 = vsel %vm1444_vm5, %v1506_v51, %v1514_v61  ;;  %v1335_v14 = vsel %vm1302_vm3, %v17602_v3, %v1152_v27  ;;  %v1269_v6 = vpop.permute.xlu1 %1268 }
  0xb8   : > { %v1409_v25 = vsel %vm1387_vm4, %v1335_v14, %v1267_v22  ;;  %v10608_v22 = vcombine.low %v11572_v36, %v11603_v26  ;;  %v10609_v36 = vcombine.low %v11607_v28, %v11619_v46 }
  0xb9   : > { %v1522_v59 = vor.u32 %v1521_v9, %v1518_v57  ;;  %v1524_v48 = vshrl.u32 %v1409_v25, 16  ;;  %v1527_v7 = vshll.u32 %v1409_v25, 16 }
  0xba   : > { %v1154_v10 = vpop.permute.xlu0 %1153 }
  0xbb   : > { %v1526_v29 = vrot.slane %v1524_v48, 3  ;;  %v1529_v12 = vrot.slane %v1527_v7, 4  ;;  %v11871_v43 = vsel %vm1444_vm5, %v1514_v61, %v1522_v59  ;;  %v1338_v21 = vsel %vm1302_vm3, %v17603_v45, %v1154_v10  ;;  %v1271_v31 = vpop.permute.xlu1 %1270 }
  0xbc   : > { %10656 = vmatmul.mubr.msk.bf16.gmra.mrb[16].mxu0 %vm1676_vm6, %v1491_v32  ;;  %v1411_v34 = vsel %vm1387_vm4, %v1338_v21, %v1269_v6 }
  0xbd   : > { %1841 = vmatprep.mubr.bf16.mxu0 %v17595_v63  ;;  %v1530_v8 = vor.u32 %v1529_v12, %v1526_v29  ;;  %v1532_v18 = vshrl.u32 %v1411_v34, 16  ;;  %v1535_v62 = vshll.u32 %v1411_v34, 16 }
  0xbe   : > { %v1156_v23 = vpop.permute.xlu0 %1155 }
  0xbf   : > { %v1534_v55 = vrot.slane %v1532_v18, 3  ;;  %v1537_v41 = vrot.slane %v1535_v62, 4  ;;  %v11883_v35 = vsel %vm1444_vm5, %v1522_v59, %v1530_v8  ;;  %v1341_v32 = vsel %vm1302_vm3, %v17604_v38, %v1156_v23  ;;  %v1273_v50 = vpop.permute.xlu1 %1272 }
  0xc0   : > { %v1413_v51 = vsel %vm1387_vm4, %v1341_v32, %v1271_v31  ;;  %v10610_v18 = vcombine.low %v11622_v40, %v11637_v58 }
  0xc1   : > { %v1538_v11 = vor.u32 %v1537_v41, %v1534_v55  ;;  %v1540_v17 = vshrl.u32 %v1413_v51, 16  ;;  %v1543_v30 = vshll.u32 %v1413_v51, 16  ;;  %v10611_v51 = vcombine.low %v11640_v53, %v11665_v37 }
  0xc2   : > { %v1158_v1 = vpop.permute.xlu0 %1157 }
  0xc3   : > { %v1542_v5 = vrot.slane %v1540_v17, 3  ;;  %v1545_v49 = vrot.slane %v1543_v30, 4  ;;  %v11891_v13 = vsel %vm1444_vm5, %v1530_v8, %v1538_v11  ;;  %v1344_v4 = vsel %vm1302_vm3, %v10606_v44, %v1158_v1  ;;  %v1275_v16 = vpop.permute.xlu1 %1274 }
  0xc4   : > { %10657 = vmatmul.mubr.msk.bf16.gmra.mrb[20].mxu0 %vm1676_vm6, %v1499_v0  ;;  %v1415_v39 = vsel %vm1387_vm4, %v1344_v4, %v1273_v50  ;;  %v17605_v0 = vcombine.low %v11554_v15, %v11569_v33 }
  0xc5   : > { %1851 = vmatprep.mubr.bf16.mxu0 %v17595_v63  ;;  %v1546_v42 = vor.u32 %v1545_v49, %v1542_v5  ;;  %v1548_v60 = vshrl.u32 %v1415_v39, 16  ;;  %v1551_v61 = vshll.u32 %v1415_v39, 16 }
  0xc6   : > { %v1160_v20 = vpop.permute.xlu0 %1159 }
  0xc7   : > { %v11900_v27 = vsel %vm1444_vm5, %v1538_v11, %v1546_v42  ;;  %v1550_v57 = vrot.slane %v1548_v60, 3  ;;  %v1553_v9 = vrot.slane %v1551_v61, 4  ;;  %v1347_v3 = vsel %vm1302_vm3, %v17605_v0, %v1160_v20  ;;  %v1277_v7 = vpop.permute.xlu1 %1276 }
  0xc8   : > { %v1417_v14 = vsel %vm1387_vm4, %v1347_v3, %v1275_v16  ;;  %v17606_v16 = vcombine.low %v11668_v54, %v11682_v47 }
  0xc9   : > { %v1554_v25 = vor.u32 %v1553_v9, %v1550_v57  ;;  %v1556_v59 = vshrl.u32 %v1417_v14, 16  ;;  %v1559_v48 = vshll.u32 %v1417_v14, 16 }
  0xca   : > { %v1162_v6 = vpop.permute.xlu0 %1161 }
  0xcb   : > { %v1558_v26 = vrot.slane %v1556_v59, 3  ;;  %v1561_v10 = vrot.slane %v1559_v48, 4  ;;  %v11910_v29 = vsel %vm1444_vm5, %v1546_v42, %v1554_v25  ;;  %v1350_v12 = vsel %vm1302_vm3, %v10608_v22, %v1162_v6  ;;  %v1279_v34 = vpop.permute.xlu1 %1278  ;;  %v17608_v6 = vld [vmem:[#allocation5_spill] sm:$0xff] }
  0xcc   : > { %10658 = vmatmul.mubr.msk.bf16.gmra.mrb[24].mxu0 %vm1676_vm6, %v11853_v2  ;;  %v1419_v15 = vsel %vm1387_vm4, %v1350_v12, %v1277_v7  ;;  %v17607_v7 = vld [vmem:[#allocation4_spill] sm:$0xff] }
  0xcd   : > { %1861 = vmatprep.mubr.bf16.mxu0 %v17595_v63  ;;  %v11917_v33 = vor.u32 %v1561_v10, %v1558_v26  ;;  %v1564_v45 = vshrl.u32 %v1419_v15, 16  ;;  %v1567_v21 = vshll.u32 %v1419_v15, 16 }
  0xce   : > { %v1164_v46 = vpop.permute.xlu0 %1163 }
  0xcf   : > { %v11921_v28 = vsel %vm1444_vm5, %v1554_v25, %v11917_v33  ;;  %v1353_v8 = vsel %vm1302_vm3, %v10609_v36, %v1164_v46  ;;  %v1566_v62 = vrot.slane %v1564_v45, 3  ;;  %v1569_v31 = vrot.slane %v1567_v21, 4  ;;  %v1281_v44 = vpop.permute.xlu1 %1280 }
  0xd0   : > { %v1421_v2 = vsel %vm1387_vm4, %v1353_v8, %v1279_v34  ;;  %v17609_v36 = vcombine.low %v17607_v7, %v17608_v6  ;;  %v17619_v6 = vld [vmem:[#allocation15_spill] sm:$0xff] }
  0xd1   : > { %v1572_v23 = vshrl.u32 %v1421_v2, 16  ;;  %v1575_v24 = vshll.u32 %v1421_v2, 16  ;;  %v11934_v58 = vor.u32 %v1569_v31, %v1566_v62  ;;  %v17610_v62 = vld [vmem:[#allocation6_spill] sm:$0xff]  ;;  %v17611_v31 = vld [vmem:[#allocation7_spill] sm:$0xff] }
  0xd2   : > { %v1166_v55 = vpop.permute.xlu0 %1165 }
  0xd3   : > { %v1574_v41 = vrot.slane %v1572_v23, 3  ;;  %v1577_v38 = vrot.slane %v1575_v24, 4  ;;  %v1356_v32 = vsel %vm1302_vm3, %v10610_v18, %v1166_v55  ;;  %v1283_v50 = vpop.permute.xlu1 %1282  ;;  %v17612_v23 = vcombine.low %v17610_v62, %v17611_v31 }
  0xd4   : > { %10659 = vmatmul.mubr.msk.bf16.gmra.mrb[28].mxu0 %vm1676_vm6, %v11863_v52  ;;  %v1423_v40 = vsel %vm1387_vm4, %v1356_v32, %v1281_v44 }
  0xd5   : > { %1871 = vmatprep.mubr.bf16.mxu0 %v17595_v63  ;;  %v1578_v11 = vor.u32 %v1577_v38, %v1574_v41  ;;  %v1580_v17 = vshrl.u32 %v1423_v40, 16  ;;  %v1583_v30 = vshll.u32 %v1423_v40, 16  ;;  %v17613_v40 = vld [vmem:[#allocation9_spill] sm:$0xff] }
  0xd6   : > { %v1168_v1 = vpop.permute.xlu0 %1167 }
  0xd7   : > { %v1582_v5 = vrot.slane %v1580_v17, 3  ;;  %v1585_v49 = vrot.slane %v1583_v30, 4  ;;  %v1579_v4 = vsel %vm1444_vm5, %v11934_v58, %v1578_v11  ;;  %v1359_v53 = vsel %vm1302_vm3, %v10611_v51, %v1168_v1  ;;  %v1285_v60 = vpop.permute.xlu1 %1284 }
  0xd8   : > { %10667 = vmatmul.mubr.msk.bf16.vlgmr.msra.gmra.mrb[0].mxu1 %vm1676_vm6, %v1579_v4  ;;  %v1425_v37 = vsel %vm1387_vm4, %v1359_v53, %v1283_v50 }
  0xd9   : > { %v1586_v52 = vor.u32 %v1585_v49, %v1582_v5  ;;  %1951 = vmatprep.mubr.bf16.mxu1 %v17595_v63  ;;  %v1588_v39 = vshrl.u32 %v1425_v37, 16  ;;  %v1591_v42 = vshll.u32 %v1425_v37, 16 }
  0xda   : > { %v1170_v61 = vpop.permute.xlu0 %1169 }
  0xdb   : > { %v1362_v20 = vsel %vm1302_vm3, %v17606_v16, %v1170_v61  ;;  %v1587_v22 = vsel %vm1444_vm5, %v1578_v11, %v1586_v52  ;;  %v1590_v9 = vrot.slane %v1588_v39, 3  ;;  %v1593_v0 = vrot.slane %v1591_v42, 4  ;;  %v17614_v11 = vld [vmem:[#allocation8_spill] sm:$0xff]  ;;  %v17615_v39 = vld [vmem:[#allocation11_spill] sm:$0xff]  ;;  %v17616_v42 = vld [vmem:[#allocation10_spill] sm:$0xff] }
  0xdc   : > { %10660 = vmatmul.mubr.msk.bf16.gmra.mrb[32].mxu0 %vm1676_vm6, %v11871_v43  ;;  %v1427_v57 = vsel %vm1387_vm4, %v1362_v20, %v1285_v60  ;;  %v1287_v43 = vpop.permute.xlu1 %1286  ;;  %v10615_v17 = vcombine.low %v17614_v11, %v17613_v40  ;;  %v10616_v60 = vcombine.low %v17616_v42, %v17615_v39  ;;  %v10620_v11 = vcombine.low %v11780_v56, %v11780_v56 }
  0xdd   : > { %1881 = vmatprep.mubr.bf16.mxu0 %v17595_v63  ;;  %v1596_v3 = vshrl.u32 %v1427_v57, 16  ;;  %v1599_v14 = vshll.u32 %v1427_v57, 16  ;;  %v1594_v54 = vor.u32 %v1593_v0, %v1590_v9  ;;  %v17617_v9 = vld [vmem:[#allocation13_spill] sm:$0xff]  ;;  %v17618_v0 = vld [vmem:[#allocation12_spill] sm:$0xff] }
  0xde   : > { %v1172_v48 = vpop.permute.xlu0 %1171 }
  0xdf   : > { %v1598_v25 = vrot.slane %v1596_v3, 3  ;;  %v1601_v59 = vrot.slane %v1599_v14, 4  ;;  %v1365_v26 = vsel %vm1302_vm3, %v17609_v36, %v1172_v48  ;;  %v1595_v21 = vsel %vm1444_vm5, %v1586_v52, %v1594_v54  ;;  %v17620_v36 = vld [vmem:[#allocation14_spill] sm:$0xff] }
  0xe0   : > { %10668 = vmatmul.mubr.msk.bf16.gmra.mrb[4].mxu1 %vm1676_vm6, %v1587_v22  ;;  %v1429_v10 = vsel %vm1387_vm4, %v1365_v26, %v1287_v43  ;;  %v1289_v2 = vpop.permute.xlu1 %1288  ;;  %v10617_v3 = vcombine.low %v17618_v0, %v17617_v9  ;;  %v10618_v26 = vcombine.low %v17620_v36, %v17619_v6 }
  0xe1   : > { %v1602_v47 = vor.u32 %v1601_v59, %v1598_v25  ;;  %1961 = vmatprep.mubr.bf16.mxu1 %v17595_v63  ;;  %v1604_v15 = vshrl.u32 %v1429_v10, 16  ;;  %v1607_v45 = vshll.u32 %v1429_v10, 16 }
  0xe2   : > { %v1174_v18 = vpop.permute.xlu0 %1173 }
  0xe3   : > { %v1603_v12 = vsel %vm1444_vm5, %v1594_v54, %v1602_v47  ;;  %v1606_v34 = vrot.slane %v1604_v15, 3  ;;  %v1609_v46 = vrot.slane %v1607_v45, 4 }
  0xe4   : > { %10661 = vmatmul.mubr.msk.bf16.gmra.mrb[36].mxu0 %vm1676_vm6, %v11883_v35  ;;  %v1368_v35 = vsel %vm1302_vm3, %v17612_v23, %v1174_v18 }
  0xe5   : > { %1891 = vmatprep.mubr.bf16.mxu0 %v17595_v63  ;;  %v1610_v8 = vor.u32 %v1609_v46, %v1606_v34  ;;  %v1431_v44 = vsel %vm1387_vm4, %v1368_v35, %v1289_v2  ;;  %v17621_v35 = vld [vmem:[#allocation16_spill] sm:$0xff] }
  0xe6   : > { %v1612_v55 = vshrl.u32 %v1431_v44, 16  ;;  %v1615_v41 = vshll.u32 %v1431_v44, 16  ;;  %v1176_v30 = vpop.permute.xlu0 %1175 }
  0xe7   : > { %v1611_v24 = vsel %vm1444_vm5, %v1602_v47, %v1610_v8  ;;  %v1371_v1 = vsel %vm1302_vm3, %v10615_v17, %v1176_v30 }
  0xe8   : > { %10669 = vmatmul.mubr.msk.bf16.gmra.mrb[8].mxu1 %vm1676_vm6, %v1595_v21  ;;  %v1614_v38 = vrot.slane %v1612_v55, 3  ;;  %v1617_v32 = vrot.slane %v1615_v41, 4 }
  0xe9   : > { %1971 = vmatprep.mubr.bf16.mxu1 %v17595_v63 }
  0xea   : > { %v1618_v51 = vor.u32 %v1617_v32, %v1614_v38  ;;  %v1178_v61 = vpop.permute.xlu0 %1177 }
  0xec   : > { %10662 = vmatmul.mubr.msk.bf16.gmra.mrb[40].mxu0 %vm1676_vm6, %v11891_v13  ;;  %v1619_v50 = vsel %vm1444_vm5, %v1610_v8, %v1618_v51  ;;  %v1291_v13 = vpop.permute.xlu1 %1290 }
  0xed   : > { %1901 = vmatprep.mubr.bf16.mxu0 %v17595_v63  ;;  %v1433_v5 = vsel %vm1387_vm4, %v1371_v1, %v1291_v13 }
  0xee   : > { %v1620_v49 = vshrl.u32 %v1433_v5, 16  ;;  %v1623_v4 = vshll.u32 %v1433_v5, 16 }
  0xf0   : > { %10670 = vmatmul.mubr.msk.bf16.gmra.mrb[12].mxu1 %vm1676_vm6, %v1603_v12  ;;  %v1622_v53 = vrot.slane %v1620_v49, 3  ;;  %v1625_v37 = vrot.slane %v1623_v4, 4  ;;  %v1293_v16 = vpop.permute.xlu1 %1292 }
  0xf1   : > { %1981 = vmatprep.mubr.bf16.mxu1 %v17595_v63 }
  0xf4   : > { %10663 = vmatmul.mubr.msk.bf16.gmra.mrb[44].mxu0 %vm1676_vm6, %v11900_v27  ;;  %v1626_v27 = vor.u32 %v1625_v37, %v1622_v53  ;;  %v1295_v54 = vpop.permute.xlu1 %1294 }
  0xf5   : > { %1911 = vmatprep.mubr.bf16.mxu0 %v17595_v63 }
  0xf6   : > { %v1627_v52 = vsel %vm1444_vm5, %v1618_v51, %v1626_v27 }
  0xf8   : > { %10671 = vmatmul.mubr.msk.bf16.gmra.mrb[16].mxu1 %vm1676_vm6, %v1611_v24  ;;  %v10619_v24 = vcombine.low %v17621_v35, %v11777_v19 }
  0xf9   : > { %1991 = vmatprep.mubr.bf16.mxu1 %v17595_v63 }
  0xfc   : > { %10664 = vmatmul.mubr.msk.bf16.gmra.mrb[48].mxu0 %vm1676_vm6, %v11910_v29  ;;  %v1571_v29 = vsel %vm1444_vm5, %v11917_v33, %v11934_v58 }
  0xfd   : > { %1921 = vmatprep.mubr.bf16.mxu0 %v17595_v63 }
 0x100   : > { %10672 = vmatmul.mubr.msk.bf16.gmra.mrb[20].mxu1 %vm1676_vm6, %v1619_v50 }
 0x101   : > { %2001 = vmatprep.mubr.bf16.mxu1 %v17595_v63 }
 0x104   : > { %10665 = vmatmul.mubr.msk.bf16.gmra.mrb[52].mxu0 %vm1676_vm6, %v11921_v28  ;;  %v1374_v28 = vsel %vm1302_vm3, %v10616_v60, %v1178_v61  ;;  %v1297_v34 = vpop.permute.xlu1 %1296 }
 0x105   : > { %1931 = vmatprep.mubr.bf16.mxu0 %v17595_v63  ;;  %v1435_v20 = vsel %vm1387_vm4, %v1374_v28, %v1293_v16 }
 0x106   : > { %v1628_v22 = vshrl.u32 %v1435_v20, 16  ;;  %v1631_v57 = vshll.u32 %v1435_v20, 16  ;;  %v1180_v14 = vpop.permute.xlu0 %1179 }
 0x107   : > { %v1377_v59 = vsel %vm1302_vm3, %v10617_v3, %v1180_v14 }
 0x108   : > { %10673 = vmatmul.mubr.msk.bf16.gmra.mrb[24].mxu1 %vm1676_vm6, %v1627_v52  ;;  %v1630_v33 = vrot.slane %v1628_v22, 3  ;;  %v1633_v58 = vrot.slane %v1631_v57, 4  ;;  %v1437_v47 = vsel %vm1387_vm4, %v1377_v59, %v1295_v54 }
 0x109   : > { %2011 = vmatprep.mubr.bf16.mxu1 %v17595_v63  ;;  %v1636_v43 = vshrl.u32 %v1437_v47, 16  ;;  %v1639_v7 = vshll.u32 %v1437_v47, 16  ;;  %v1299_v55 = vpop.permute.xlu1 %1298 }
 0x10a   : > { %v1634_v25 = vor.u32 %v1633_v58, %v1630_v33  ;;  %v1182_v10 = vpop.permute.xlu0 %1181 }
 0x10b   : > { %v1638_v12 = vrot.slane %v1636_v43, 3  ;;  %v1641_v15 = vrot.slane %v1639_v7, 4  ;;  %v1380_v21 = vsel %vm1302_vm3, %v10618_v26, %v1182_v10 }
 0x10c   : > { %10666 = vmatmul.mubr.msk.bf16.gmra.mrb[56].mxu0 %vm1676_vm6, %v1571_v29  ;;  %v1635_v48 = vsel %vm1444_vm5, %v1626_v27, %v1634_v25  ;;  %v1439_v46 = vsel %vm1387_vm4, %v1380_v21, %v1297_v34 }
 0x10d   : > { %v1642_v45 = vor.u32 %v1641_v15, %v1638_v12  ;;  %v1644_v18 = vshrl.u32 %v1439_v46, 16  ;;  %v1647_v2 = vshll.u32 %v1439_v46, 16  ;;  %v1301_v30 = vpop.permute.xlu1 %1300 }
 0x10e   : > { %v1184_v44 = vpop.permute.xlu0 %1183 }
 0x10f   : > { %v1643_v8 = vsel %vm1444_vm5, %v1634_v25, %v1642_v45  ;;  %v1646_v62 = vrot.slane %v1644_v18, 3  ;;  %v1649_v31 = vrot.slane %v1647_v2, 4  ;;  %v1383_v41 = vsel %vm1302_vm3, %v10619_v24, %v1184_v44  ;;  %v12149_v24 = vld [vmem:[#allocation2] sm:$0xf0] }
 0x110   : > { %10674 = vmatmul.mubr.msk.bf16.gmra.mrb[28].mxu1 %vm1676_vm6, %v1635_v48  ;;  %v1441_v32 = vsel %vm1387_vm4, %v1383_v41, %v1299_v55  ;;  %v11184_v55 = vld [vmem:[%s17374_s2] ss:$8 sps:$4 sm:$0xff]   ;;  %v11186_v41 = vld [vmem:[%s17374_s2 + $0x4] ss:$8 sps:$4 sm:$0xff]  }
 0x111   : > { %2021 = vmatprep.mubr.bf16.mxu1 %v17595_v63  ;;  %v1650_v23 = vor.u32 %v1649_v31, %v1646_v62  ;;  %v1652_v51 = vshrl.u32 %v1441_v32, 16  ;;  %v1655_v40 = vshll.u32 %v1441_v32, 16  ;;  %3596 = vmatprep.subr.bf16.mxu1 %v11186_v41  ;;  %v11190_v41 = vld [vmem:[%s17374_s2 + $0x20] ss:$8 sps:$4 sm:$0xff]  }
 0x112   : > { %v1186_v17 = vpop.permute.xlu0 %1185  ;;  %3597 = vmatpush1.bf16.msra.mxu1 %v11184_v55 }
 0x113   : > { %v1651_v38 = vsel %vm1444_vm5, %v1642_v45, %v1650_v23  ;;  %v1654_v19 = vrot.slane %v1652_v51, 3  ;;  %v1657_v50 = vrot.slane %v1655_v40, 4  ;;  %v1386_v1 = vsel %vm1302_vm3, %v10620_v11, %v1186_v17 }
 0x114   : > { %v1443_v13 = vsel %vm1387_vm4, %v1386_v1, %v1301_v30  ;;  %v2477_v51 = vshll.u32 %v12149_v24, 16  ;;  %v12172_v30 = vld [vmem:[#allocation2 + $0x8] sm:$0xff]  ;;  %v2475_v1 = vshrl.u32 %v12149_v24, 16 }
 0x115   : > { %v1658_v5 = vor.u32 %v1657_v50, %v1654_v19  ;;  %v1660_v49 = vshrl.u32 %v1443_v13, 16  ;;  %v1663_v4 = vshll.u32 %v1443_v13, 16 }
 0x116   : > { %v2479_v13 = vrot.slane %v2477_v51, 1  ;;  %v11192_v51 = vld [vmem:[%s17374_s2 + $0x24] ss:$8 sps:$4 sm:$0xff]  }
 0x117   : > { %v1662_v53 = vrot.slane %v1660_v49, 3  ;;  %v1665_v37 = vrot.slane %v1663_v4, 4  ;;  %v1659_v27 = vsel %vm1444_vm5, %v1650_v23, %v1658_v5  ;;  %v11187_v4 = vld [vmem:[%s17374_s2 + $0x10] ss:$8 sps:$4 sm:$0xff]  }
 0x118   : > { %10675 = vmatmul.mubr.msk.bf16.gmra.mrb[32].mxu1 %vm1676_vm6, %v1643_v8 }
 0x119   : > { %2031 = vmatprep.mubr.bf16.mxu1 %v17595_v63  ;;  %v1666_v56 = vor.u32 %v1665_v37, %v1662_v53  ;;  %v11189_v53 = vld [vmem:[%s17374_s2 + $0x14] ss:$8 sps:$4 sm:$0xff]  }
 0x11a   : > { %3598 = vmatprep.subr.bf16.mxu1 %v11189_v53  ;;  %v11193_v53 = vld [vmem:[%s17374_s2 + $0x30] ss:$8 sps:$4 sm:$0xff]  }
 0x11b   : > { %v1667_v52 = vsel %vm1444_vm5, %v1658_v5, %v1666_v56  ;;  %v2482_v5 = vshll.u32 %v12172_v30, 16  ;;  %3599 = vmatpush1.bf16.msra.mxu1 %v11187_v4 }
 0x11c   : > { %3600 = vmatprep.subr.bf16.mxu1 %v11192_v51  ;;  %v199_v51 = vlaneseq }
 0x11f   : > { %3601 = vmatpush1.bf16.msra.mxu1 %v11190_v41 }
 0x120   : > { %10676 = vmatmul.mubr.msk.bf16.gmra.mrb[36].mxu1 %vm1676_vm6, %v1651_v38 }
 0x121   : > { %2041 = vmatprep.mubr.bf16.mxu1 %v17595_v63 }
 0x128   : > { %10677 = vmatmul.mubr.msk.bf16.gmra.mrb[40].mxu1 %vm1676_vm6, %v1659_v27 }
 0x129   : > { %2050 = vmatprep.mubr.bf16.mxu1 %v17595_v63 }
 0x130   : > { %10678 = vmatmul.mubr.msk.bf16.gmra.mrb[44].mxu1 %vm1676_vm6, %v1667_v52 }
 0x16f   : > { %v12051_v29 = vpop.f32.mrb[0].mxu0 }
 0x170   : > { %v1801_v39 = vpop.f32.mrb[1].mxu0 }
 0x171   : > { %v12053_v42 = vpop.f32.mrb[2].mxu0  ;;  %v2480_v39 = vor.u32 %v2479_v13, %v2475_v1  ;;  %v11195_v13 = vld [vmem:[%s17374_s2 + $0x34] ss:$8 sps:$4 sm:$0xff]  }
 0x172   : > { %v1804_v60 = vpop.f32.mrb[3].mxu0  ;;  %3602 = vmatprep.subr.bf16.mxu1 %v11195_v13  ;;  %v11196_v13 = vld [vmem:[%s17374_s2 + $0x40] ss:$8 sps:$4 sm:$0xff]  }
 0x173   : > { %v12198_v60 = vrot.slane %v2482_v5, 1  ;;  %3603 = vmatpush1.bf16.msra.mxu1 %v11193_v53 }
 0x177   : > { %v12055_v61 = vpop.f32.mrb[4].mxu0 }
 0x178   : > { %v1809_v28 = vpop.f32.mrb[5].mxu0 }
 0x179   : > { %v12057_v16 = vpop.f32.mrb[6].mxu0 }
 0x17a   : > { %2107 = vrot.lane.b32.xlu0 %v12057_v16, %s11345_s27  ;;  %v1812_v20 = vpop.f32.mrb[7].mxu0 }
 0x17f   : > { %v12061_v22 = vpop.f32.mrb[8].mxu0 }
 0x180   : > { %2109 = vrot.lane.b32.xlu1 %v12061_v22, %s11345_s27  ;;  %v1817_v57 = vpop.f32.mrb[9].mxu0 }
 0x181   : > { %v12065_v9 = vpop.f32.mrb[10].mxu0 }
 0x182   : > { %2111 = vrot.lane.b32.xlu0 %v12065_v9, %s11345_s27  ;;  %v1820_v0 = vpop.f32.mrb[11].mxu0 }
 0x183   : > { %v2485_v0 = vsel %vm2473_vm8, %v2480_v39, %v12198_v60 }
 0x187   : > { %v12069_v3 = vpop.f32.mrb[12].mxu0 }
 0x188   : > { %2113 = vrot.lane.b32.xlu1 %v12069_v3, %s11345_s27  ;;  %v12073_v14 = vpop.f32.mrb[13].mxu0 }
 0x189   : > { %v12075_v33 = vpop.f32.mrb[14].mxu0 }
 0x18a   : > { %2115 = vrot.lane.b32.xlu0 %v12075_v33, %s11345_s27  ;;  %v12079_v58 = vpop.f32.mrb[15].mxu0 }
 0x18f   : > { %v12081_v25 = vpop.f32.mrb[16].mxu0 }
 0x190   : > { %2117 = vrot.lane.b32.xlu1 %v12081_v25, %s11345_s27  ;;  %v12085_v59 = vpop.f32.mrb[17].mxu0 }
 0x191   : > { %v12087_v54 = vpop.f32.mrb[18].mxu0 }
 0x192   : > { %2119 = vrot.lane.b32.xlu0 %v12087_v54, %s11345_s27  ;;  %v12091_v47 = vpop.f32.mrb[19].mxu0 }
 0x197   : > { %v12093_v48 = vpop.f32.mrb[20].mxu0 }
 0x198   : > { %2121 = vrot.lane.b32.xlu1 %v12093_v48, %s11345_s27  ;;  %v12097_v43 = vpop.f32.mrb[21].mxu0 }
 0x199   : > { %v12099_v7 = vpop.f32.mrb[22].mxu0 }
 0x19a   : > { %2123 = vrot.lane.b32.xlu0 %v12099_v7, %s11345_s27  ;;  %v12103_v6 = vpop.f32.mrb[23].mxu0 }
 0x19f   : > { %v12105_v36 = vpop.f32.mrb[24].mxu0 }
 0x1a0   : > { %17622 = vst [vmem:[#allocation4_spill] sm:$0xff] %v12105_v36  ;;  %2125 = vrot.lane.b32.xlu1 %v12105_v36, %s11345_s27  ;;  %v12109_v26 = vpop.f32.mrb[25].mxu0 }
 0x1a1   : > { %v12111_v10 = vpop.f32.mrb[26].mxu0 }
 0x1a2   : > { %17623 = vst [vmem:[#allocation5_spill] sm:$0xff] %v12111_v10  ;;  %2127 = vrot.lane.b32.xlu0 %v12111_v10, %s11345_s27  ;;  %v12115_v12 = vpop.f32.mrb[27].mxu0 }
 0x1a7   : > { %v12117_v15 = vpop.f32.mrb[28].mxu0 }
 0x1a8   : > { %17624 = vst [vmem:[#allocation6_spill] sm:$0xff] %v12117_v15  ;;  %2129 = vrot.lane.b32.xlu1 %v12117_v15, %s11345_s27  ;;  %v12121_v45 = vpop.f32.mrb[29].mxu0 }
 0x1a9   : > { %v12123_v21 = vpop.f32.mrb[30].mxu0 }
 0x1aa   : > { %17625 = vst [vmem:[#allocation7_spill] sm:$0xff] %v12123_v21  ;;  %2131 = vrot.lane.b32.xlu0 %v12123_v21, %s11345_s27  ;;  %v12127_v34 = vpop.f32.mrb[31].mxu0 }
 0x1ab   : > { %v12129_v46 = vpop.f32.mrb[0].mxu1 }
 0x1ac   : > { %17626 = vst [vmem:[#allocation9_spill] sm:$0xff] %v12129_v46  ;;  %v12131_v8 = vpop.f32.mrb[1].mxu1 }
 0x1ad   : > { %17627 = vst [vmem:[#allocation8_spill] sm:$0xff] %v12131_v8  ;;  %v12133_v18 = vpop.f32.mrb[2].mxu1 }
 0x1ae   : > { %17628 = vst [vmem:[#allocation11_spill] sm:$0xff] %v12133_v18  ;;  %v12135_v2 = vpop.f32.mrb[3].mxu1 }
 0x1af   : > { %17629 = vst [vmem:[#allocation10_spill] sm:$0xff] %v12135_v2  ;;  %v12137_v62 = vpop.f32.mrb[32].mxu0 }
 0x1b0   : > { %17630 = vst [vmem:[#allocation13_spill] sm:$0xff] %v12137_v62  ;;  %2133 = vrot.lane.b32.xlu1 %v12137_v62, %s11345_s27  ;;  %v12141_v31 = vpop.f32.mrb[33].mxu0 }
 0x1b1   : > { %v12143_v23 = vpop.f32.mrb[34].mxu0 }
 0x1b2   : > { %17631 = vst [vmem:[#allocation12_spill] sm:$0xff] %v12143_v23  ;;  %2135 = vrot.lane.b32.xlu0 %v12143_v23, %s11345_s27  ;;  %v12147_v35 = vpop.f32.mrb[35].mxu0 }
 0x1b3   : > { %v12151_v44 = vpop.f32.mrb[4].mxu1 }
 0x1b4   : > { %17632 = vst [vmem:[#allocation15_spill] sm:$0xff] %v12151_v44  ;;  %v12159_v38 = vpop.f32.mrb[5].mxu1 }
 0x1b5   : > { %17633 = vst [vmem:[#allocation14_spill] sm:$0xff] %v12159_v38  ;;  %v12161_v32 = vpop.f32.mrb[6].mxu1 }
 0x1b6   : > { %17634 = vst [vmem:[#allocation16_spill] sm:$0xff] %v12161_v32  ;;  %v12164_v40 = vpop.f32.mrb[7].mxu1 }
 0x1b7   : > { %17635 = vst [vmem:[#allocation17_spill] sm:$0xff] %v12164_v40  ;;  %v12166_v11 = vpop.f32.mrb[36].mxu0 }
 0x1b8   : > { %17636 = vst [vmem:[#allocation18_spill] sm:$0xff] %v12166_v11  ;;  %2137 = vrot.lane.b32.xlu1 %v12166_v11, %s11345_s27  ;;  %v12170_v17 = vpop.f32.mrb[37].mxu0  ;;  %v11210_v11 = vld [vmem:[%s17374_s2 + $0x84] ss:$8 sps:$4 sm:$0xff]  }
 0x1b9   : > { %17637 = vst [vmem:[#allocation19_spill] sm:$0xff] %v12170_v17  ;;  %v12174_v19 = vpop.f32.mrb[38].mxu0 }
 0x1ba   : > { %17638 = vst [vmem:[#allocation20_spill] sm:$0xff] %v12174_v19  ;;  %2139 = vrot.lane.b32.xlu0 %v12174_v19, %s11345_s27  ;;  %v12178_v50 = vpop.f32.mrb[39].mxu0 }
 0x1bb   : > { %17639 = vst [vmem:[#allocation21_spill] sm:$0xff] %v12178_v50  ;;  %v12182_v49 = vpop.f32.mrb[8].mxu1 }
 0x1bc   : > { %17640 = vst [vmem:[#allocation22_spill] sm:$0xff] %v12182_v49  ;;  %v12190_v37 = vpop.f32.mrb[9].mxu1 }
 0x1bd   : > { %17641 = vst [vmem:[#allocation23_spill] sm:$0xff] %v12190_v37  ;;  %v12192_v27 = vpop.f32.mrb[10].mxu1  ;;  %v12255_v37 = vshrl.u32 %v199_v51, 7 }
 0x1be   : > { %17642 = vst [vmem:[#allocation24_spill] sm:$0xff] %v12192_v27  ;;  %v12194_v56 = vpop.f32.mrb[11].mxu1 }
 0x1bf   : > { %17643 = vst [vmem:[#allocation25_spill] sm:$0xff] %v12194_v56  ;;  %v12196_v52 = vpop.f32.mrb[40].mxu0  ;;  %v11198_v56 = vld [vmem:[%s17374_s2 + $0x44] ss:$8 sps:$4 sm:$0xff]   ;;  %v12334_v49 = vadd.s32 32, %v12255_v37  ;;  %v12342_v23 = vadd.s32 48, %v12255_v37 }
 0x1c0   : > { %17644 = vst [vmem:[#allocation26_spill] sm:$0xff] %v12196_v52  ;;  %2141 = vrot.lane.b32.xlu1 %v12196_v52, %s11345_s27  ;;  %v12202_v28 = vpop.f32.mrb[41].mxu0  ;;  %3604 = vmatprep.subr.bf16.mxu1 %v11198_v56  ;;  %v11199_v56 = vld [vmem:[%s17374_s2 + $0x50] ss:$8 sps:$4 sm:$0xff]   ;;  %v12377_v50 = vadd.s32 64, %v12255_v37 }
 0x1c1   : > { %17645 = vst [vmem:[#allocation27_spill] sm:$0xff] %v12202_v28  ;;  %v12204_v20 = vpop.f32.mrb[42].mxu0  ;;  %3605 = vmatpush1.bf16.msra.mxu1 %v11196_v13  ;;  %v11201_v13 = vld [vmem:[%s17374_s2 + $0x54] ss:$8 sps:$4 sm:$0xff]   ;;  %v17417_v44 = vcvt.s32.f32 %v12334_v49  ;;  %v17419_v18 = vcvt.s32.f32 %v12342_v23 }
 0x1c2   : > { %17646 = vst [vmem:[#allocation28_spill] sm:$0xff] %v12204_v20  ;;  %2143 = vrot.lane.b32.xlu0 %v12204_v20, %s11345_s27  ;;  %v12208_v57 = vpop.f32.mrb[43].mxu0  ;;  %3606 = vmatprep.subr.bf16.mxu1 %v11201_v13  ;;  %v11202_v20 = vld [vmem:[%s17374_s2 + $0x60] ss:$8 sps:$4 sm:$0xff]  }
 0x1c3   : > { %17647 = vst [vmem:[#allocation29_spill] sm:$0xff] %v12208_v57  ;;  %v12212_v55 = vpop.f32.mrb[12].mxu1  ;;  %v300_v28 = vadd.f32 0.5, %v17417_v44  ;;  %v302_v15 = vadd.f32 0.5, %v17419_v18 }
 0x1c4   : > { %17648 = vst [vmem:[#allocation30_spill] sm:$0xff] %v12212_v55  ;;  %v12220_v1 = vpop.f32.mrb[13].mxu1 }
 0x1c5   : > { %17649 = vst [vmem:[#allocation31_spill] sm:$0xff] %v12220_v1  ;;  %v12225_v5 = vpop.f32.mrb[14].mxu1  ;;  %3607 = vmatpush1.bf16.msra.mxu1 %v11199_v56  ;;  %v11207_v56 = vld [vmem:[%s17374_s2 + $0x74] ss:$8 sps:$4 sm:$0xff]   ;;  %v348_v46 = vmul.f32 0.041666668, %v300_v28 }
 0x1c6   : > { %17650 = vst [vmem:[#allocation32_spill] sm:$0xff] %v12225_v5  ;;  %2697 = vrot.lane.b32.xlu0 %v2485_v0, %s11345_s27  ;;  %v12228_v4 = vpop.f32.mrb[15].mxu1  ;;  %v350_v10 = vmul.f32 0.041666668, %v302_v15 }
 0x1c7   : > { %17651 = vst [vmem:[#allocation33_spill] sm:$0xff] %v12228_v4  ;;  %v12233_v39 = vpop.f32.mrb[44].mxu0 }
 0x1c8   : > { %17652 = vst [vmem:[#allocation34_spill] sm:$0xff] %v12233_v39  ;;  %2145 = vrot.lane.b32.xlu1 %v12233_v39, %s11345_s27  ;;  %v12237_v63 = vpop.f32.mrb[45].mxu0 }
 0x1c9   : > { %17653 = vst [vmem:[#allocation35_spill] sm:$0xff] %v12237_v63  ;;  %v12239_v1 = vpop.f32.mrb[46].mxu0 }
 0x1ca   : > { %17654 = vst [vmem:[#allocation36_spill] sm:$0xff] %v12239_v1  ;;  %2147 = vrot.lane.b32.xlu0 %v12239_v1, %s11345_s27  ;;  %v12243_v0 = vpop.f32.mrb[47].mxu0 }
 0x1cb   : > { %17655 = vst [vmem:[#allocation37_spill] sm:$0xff] %v12243_v0  ;;  %v12245_v41 = vpop.f32.mrb[16].mxu1 }
 0x1cc   : > { %17656 = vst [vmem:[#allocation38_spill] sm:$0xff] %v12245_v41  ;;  %v12247_v4 = vpop.f32.mrb[17].mxu1  ;;  %v12287_v41 = vadd.s32 16, %v12255_v37 }
 0x1cd   : > { %17657 = vst [vmem:[#allocation39_spill] sm:$0xff] %v12247_v4  ;;  %v12257_v40 = vpop.f32.mrb[18].mxu1  ;;  %v12266_v4 = vadd.s32 8, %v12255_v37 }
 0x1ce   : > { %17658 = vst [vmem:[#allocation40_spill] sm:$0xff] %v12257_v40  ;;  %v12259_v38 = vpop.f32.mrb[19].mxu1 }
 0x1cf   : > { %17659 = vst [vmem:[#allocation41_spill] sm:$0xff] %v12259_v38  ;;  %v12261_v53 = vpop.f32.mrb[48].mxu0  ;;  %v11204_v38 = vld [vmem:[%s17374_s2 + $0x64] ss:$8 sps:$4 sm:$0xff]   ;;  %v17668_v55 = vcvt.s32.f32 %v12266_v4 }
 0x1d0   : > { %v12263_v2 = vpop.f32.mrb[49].mxu0  ;;  %3608 = vmatprep.subr.bf16.mxu1 %v11204_v38  ;;  %v17673_v38 = vcvt.s32.f32 %v12287_v41 }
 0x1d1   : > { %17660 = vst [vmem:[#allocation42_spill] sm:$0xff] %v12263_v2  ;;  %v12268_v8 = vpop.f32.mrb[50].mxu0  ;;  %3609 = vmatpush1.bf16.msra.mxu1 %v11202_v20 }
 0x1d2   : > { %v12270_v1 = vpop.f32.mrb[51].mxu0  ;;  %3610 = vmatprep.subr.bf16.mxu1 %v11207_v56 }
 0x1d3   : > { %17661 = vst [vmem:[#allocation43_spill] sm:$0xff] %v12270_v1  ;;  %v12272_v39 = vpop.f32.mrb[20].mxu1 }
 0x1d4   : > { %17662 = vst [vmem:[#allocation44_spill] sm:$0xff] %v12272_v39  ;;  %v12274_v51 = vpop.f32.mrb[21].mxu1  ;;  %v12290_v39 = vadd.s32 24, %v12255_v37 }
 0x1d5   : > { %17663 = vst [vmem:[#allocation45_spill] sm:$0xff] %v12274_v51  ;;  %v12284_v40 = vpop.f32.mrb[22].mxu1 }
 0x1d6   : > { %17664 = vst [vmem:[#allocation46_spill] sm:$0xff] %v12284_v40  ;;  %v12292_v51 = vpop.f32.mrb[23].mxu1  ;;  %v17667_v40 = vcvt.s32.f32 %v12255_v37  ;;  %v17674_v20 = vcvt.s32.f32 %v12290_v39 }
 0x1d7   : > { %17665 = vst [vmem:[#allocation47_spill] sm:$0xff] %v12292_v51  ;;  %v12294_v5 = vpop.f32.mrb[52].mxu0  ;;  %v297_v51 = vadd.f32 0.5, %v17668_v55 }
 0x1d8   : > { %v12296_v52 = vpop.f32.mrb[53].mxu0  ;;  %v296_v1 = vadd.f32 0.5, %v17667_v40  ;;  %v11205_v40 = vld [vmem:[%s17374_s2 + $0x70] ss:$8 sps:$4 sm:$0xff]  }
 0x1d9   : > { %17666 = vst [vmem:[#allocation48_spill] sm:$0xff] %v12296_v52  ;;  %v12308_v13 = vpop.f32.mrb[54].mxu0  ;;  %v345_v0 = vmul.f32 0.041666668, %v297_v51  ;;  %3611 = vmatpush1.bf16.msra.mxu1 %v11205_v40 }
 0x1da   : > { %v12315_v27 = vpop.f32.mrb[55].mxu0  ;;  %v344_v52 = vmul.f32 0.041666668, %v296_v1  ;;  %v12345_v1 = vadd.s32 56, %v12255_v37  ;;  %3612 = vmatprep.subr.bf16.mxu1 %v11210_v11 }
 0x1db   : > { %17669 = vst [vmem:[#allocation49_spill] sm:$0xff] %v12315_v27  ;;  %v12317_v2 = vpop.f32.mrb[24].mxu1  ;;  %v298_v27 = vadd.f32 0.5, %v17673_v38  ;;  %v11208_v38 = vld [vmem:[%s17374_s2 + $0x80] ss:$8 sps:$4 sm:$0xff]   ;;  %v393_v32 = vfloor.f32 %v345_v0 }
 0x1dc   : > { %17670 = vst [vmem:[#allocation50_spill] sm:$0xff] %v12317_v2  ;;  %v12322_v55 = vpop.f32.mrb[25].mxu1  ;;  %v299_v2 = vadd.f32 0.5, %v17674_v20  ;;  %v17422_v11 = vcvt.s32.f32 %v12345_v1 }
 0x1dd   : > { %17671 = vst [vmem:[#allocation51_spill] sm:$0xff] %v12322_v55  ;;  %v12327_v19 = vpop.f32.mrb[26].mxu1  ;;  %v12337_v55 = vadd.s32 40, %v12255_v37  ;;  %v346_v62 = vmul.f32 0.041666668, %v298_v27  ;;  %3613 = vmatpush1.bf16.msra.mxu1 %v11208_v38 }
 0x1de   : > { %17672 = vst [vmem:[#allocation52_spill] sm:$0xff] %v12327_v19  ;;  %v12339_v56 = vpop.f32.mrb[27].mxu1  ;;  %v392_v19 = vfloor.f32 %v344_v52  ;;  %v347_v57 = vmul.f32 0.041666668, %v299_v2  ;;  %v11211_v52 = vld [vmem:[%s17374_s2 + $0x90] ss:$8 sps:$4 sm:$0xff]  }
 0x1df   : > { %17675 = vst [vmem:[#allocation53_spill] sm:$0xff] %v12339_v56  ;;  %v12347_v51 = vpop.f32.mrb[56].mxu0  ;;  %v11213_v56 = vld [vmem:[%s17374_s2 + $0x94] ss:$8 sps:$4 sm:$0xff]   ;;  %v17416_v40 = vcvt.s32.f32 %v12337_v55  ;;  %v394_v27 = vfloor.f32 %v346_v62  ;;  %v303_v38 = vadd.f32 0.5, %v17422_v11  ;;  %v17679_v62 = vcvt.s32.f32 %v12255_v37 }
 0x1e0   : > { %v12352_v20 = vpop.f32.mrb[57].mxu0  ;;  %3614 = vmatprep.subr.bf16.mxu1 %v11213_v56  ;;  %v440_v0 = vmul.f32 24.0, %v392_v19  ;;  %v395_v2 = vfloor.f32 %v347_v57  ;;  %v17680_v57 = vcvt.s32.f32 %v12266_v4  ;;  %v17682_v4 = vcvt.s32.f32 %v12290_v39 }
 0x1e1   : > { %17676 = vst [vmem:[#allocation54_spill] sm:$0xff] %v12352_v20  ;;  %v12357_v63 = vpop.f32.mrb[58].mxu0  ;;  %v441_v20 = vmul.f32 24.0, %v393_v32  ;;  %3615 = vmatpush1.bf16.msra.mxu1 %v11211_v52  ;;  %v12380_v32 = vadd.s32 72, %v12255_v37  ;;  %v17425_v52 = vcvt.s32.f32 %v12377_v50  ;;  %v2783_v39 = vrot.slane %v12172_v30, 1 }
 0x1e2   : > { %17677 = vst [vmem:[#allocation55_spill] sm:$0xff] %v12357_v63  ;;  %v12361_v21 = vpop.f32.mrb[59].mxu0  ;;  %v488_v19 = vsub.f32 %v17679_v62, %v440_v0  ;;  %v443_v44 = vmul.f32 24.0, %v395_v2  ;;  %v351_v63 = vmul.f32 0.041666668, %v303_v38  ;;  %v17681_v0 = vcvt.s32.f32 %v12287_v41 }
 0x1e3   : > { %17678 = vst [vmem:[#allocation56_spill] sm:$0xff] %v12361_v21  ;;  %v301_v21 = vadd.f32 0.5, %v17416_v40  ;;  %v489_v56 = vsub.f32 %v17680_v57, %v441_v20  ;;  %v442_v40 = vmul.f32 24.0, %v394_v27  ;;  %v17424_v17 = vcvt.s32.f32 %v12380_v32 }
 0x1e4   : > { %vm536_vm9 = vcmp.lt.f32.partialorder %v488_v19, 15.5  ;;  %v491_v20 = vsub.f32 %v17682_v4, %v443_v44  ;;  %v396_v27 = vfloor.f32 %v348_v46  ;;  %v399_v2 = vfloor.f32 %v351_v63 }
 0x1e5   : > { %v349_v18 = vmul.f32 0.041666668, %v301_v21  ;;  %vm537_vm10 = vcmp.lt.f32.partialorder %v489_v56, 15.5  ;;  %v490_v62 = vsub.f32 %v17681_v0, %v442_v40  ;;  %v398_v21 = vfloor.f32 %v350_v10 }
 0x1e6   : > { %v304_v38 = vadd.f32 0.5, %v17425_v52  ;;  %v2782_v41 = vrot.slane %v12149_v24, 1  ;;  %v17431_v44 = vmov 0.0   ;;  %vm539_vm12 = vcmp.lt.f32.partialorder %v491_v20, 15.5 }
 0x1e7   : > { %v397_v28 = vfloor.f32 %v349_v18  ;;  %v584_v46 = vsel %vm536_vm9, 1.0, %v17431_v44  ;;  %vm538_vm11 = vcmp.lt.f32.partialorder %v490_v62, 15.5  ;;  %v444_v63 = vmul.f32 24.0, %v396_v27 }
 0x1e8   : > { %v446_v40 = vmul.f32 24.0, %v398_v21  ;;  %v447_v19 = vmul.f32 24.0, %v399_v2  ;;  %v352_v56 = vmul.f32 0.041666668, %v304_v38  ;;  %v12407_v0 = vadd.s32 88, %v12255_v37 }
 0x1e9   : > { %v445_v10 = vmul.f32 24.0, %v397_v28  ;;  %v587_v28 = vsel %vm539_vm12, 1.0, %v17431_v44  ;;  %v17684_v21 = vcvt.s32.f32 %v12334_v49  ;;  %v17685_v38 = vcvt.s32.f32 %v12337_v55 }
 0x1ea   : > { %v259_v49 = vcvt.s32.f32 %v12407_v0 }
 0x1eb   : > { %v492_v2 = vsub.f32 %v17684_v21, %v444_v63 }
 0x1ec   : > { %v2108_v11 = vpop.permute.xlu0 %2107 }
 0x1ed   : > { %v2251_v36 = vadd.f32 %v2108_v11, %v12051_v29  ;;  %v305_v29 = vadd.f32 0.5, %v17424_v17  ;;  %v12399_v11 = vadd.s32 80, %v12255_v37  ;;  %vm540_vm14 = vcmp.lt.f32.partialorder %v492_v2, 15.5 }
 0x1ee   : > { %v588_v21 = vsel %vm540_vm14, 1.0, %v17431_v44 }
 0x1ef   : > { %v2299_v15 = vadd.f32 %v2251_v36, %v12073_v14  ;;  %v585_v14 = vsel %vm537_vm10, 1.0, %v17431_v44  ;;  %v353_v24 = vmul.f32 0.041666668, %v305_v29  ;;  %v258_v4 = vcvt.s32.f32 %v12399_v11 }
 0x1f0   : > { %v12410_v17 = vpack.c.bf16 %v585_v14, %v584_v46  ;;  %v493_v29 = vsub.f32 %v17685_v38, %v445_v10  ;;  %v2784_v46 = vsel %vm2781_vm13, %v2782_v41, %v2783_v39  ;;  %v11214_v41 = vld [vmem:[%s17374_s2 + $0xa0] ss:$8 sps:$4 sm:$0xff]   ;;  %v11219_v38 = vld [vmem:[%s17374_s2 + $0xb4] ss:$8 sps:$4 sm:$0xff]  }
 0x1f1   : > { %v306_v55 = vadd.f32 0.5, %v258_v4 }
 0x1f2   : > { %v2110_v36 = vpop.permute.xlu1 %2109  ;;  %17683 = vst [vmem:[#allocation57_spill] sm:$0xff] %v12410_v17  ;;  %vm541_vm15 = vcmp.lt.f32.partialorder %v493_v29, 15.5 }
 0x1f3   : > { %v2252_v18 = vadd.f32 %v2110_v36, %v12053_v42  ;;  %v586_v42 = vsel %vm538_vm11, 1.0, %v17431_v44  ;;  %v17687_v36 = vcvt.s32.f32 %v12345_v1  ;;  %v2913_v1 = vshll.u32 %v2784_v46, 16 }
 0x1f4   : > { %v2112_v57 = vpop.permute.xlu0 %2111  ;;  %v589_v29 = vsel %vm541_vm15, 1.0, %v17431_v44 }
 0x1f5   : > { %v2300_v52 = vadd.f32 %v2252_v18, %v12079_v58  ;;  %v2253_v27 = vadd.f32 %v2112_v57, %v12055_v61  ;;  %v17686_v61 = vcvt.s32.f32 %v12342_v23  ;;  %v495_v20 = vsub.f32 %v17687_v36, %v447_v19 }
 0x1f6   : > { %v400_v18 = vfloor.f32 %v352_v56  ;;  %v401_v57 = vfloor.f32 %v353_v24  ;;  %v307_v24 = vadd.f32 0.5, %v259_v49 }
 0x1f7   : > { %v2347_v14 = vpack.c.bf16 %v2300_v52, %v2299_v15  ;;  %v2301_v58 = vadd.f32 %v2253_v27, %v12085_v59  ;;  %v494_v62 = vsub.f32 %v17686_v61, %v446_v40  ;;  %v11216_v52 = vld [vmem:[%s17374_s2 + $0xa4] ss:$8 sps:$4 sm:$0xff]   ;;  %v12437_v59 = vpack.c.bf16 %v587_v28, %v586_v42 }
 0x1f8   : > { %v2910_v15 = vshrl.u32 %v2784_v46, 16  ;;  %vm543_vm1 = vcmp.lt.f32.partialorder %v495_v20, 15.5  ;;  %3616 = vmatprep.subr.bf16.mxu1 %v11216_v52  ;;  %v448_v19 = vmul.f32 24.0, %v400_v18  ;;  %v449_v56 = vmul.f32 24.0, %v401_v57 }
 0x1f9   : > { %v2371_v63 = vmul.bf16 %v2347_v14, %v12410_v17  ;;  %17688 = vst [vmem:[#allocation58_spill] sm:$0xff] %v12437_v59  ;;  %vm542_vm0 = vcmp.lt.f32.partialorder %v494_v62, 15.5  ;;  %v354_v27 = vmul.f32 0.041666668, %v306_v55  ;;  %3617 = vmatpush1.bf16.msra.mxu1 %v11214_v41  ;;  %v12457_v14 = vrot.slane %v2913_v1, 4 }
 0x1fa   : > { %v2114_v23 = vpop.permute.xlu1 %2113  ;;  %v12455_v46 = vrot.slane %v2910_v15, 3  ;;  %v12460_v61 = vadd.s32 96, %v12255_v37  ;;  %v590_v36 = vsel %vm542_vm0, 1.0, %v17431_v44  ;;  %v591_v18 = vsel %vm543_vm1, 1.0, %v17431_v44  ;;  %3618 = vmatprep.subr.bf16.mxu1 %v11219_v38 }
 0x1fb   : > { %2395 = vst.msk [vmem:[#allocation2 + $0x10] sm:$0xff] %vm656_vm7, %v2371_v63  ;;  %v2254_v10 = vadd.f32 %v2114_v23, %v12057_v16  ;;  %v2486_v16 = vshrl.u32 %v12172_v30, 16  ;;  %v17689_v57 = vcvt.s32.f32 %v12377_v50  ;;  %v17690_v63 = vcvt.s32.f32 %v12380_v32 }
 0x1fc   : > { %v2116_v40 = vpop.permute.xlu0 %2115  ;;  %v355_v23 = vmul.f32 0.041666668, %v307_v24  ;;  %v402_v15 = vfloor.f32 %v354_v27  ;;  %v12476_v1 = vpack.c.bf16 %v589_v29, %v588_v21  ;;  %v2916_v20 = vor.u32 %v12457_v14, %v12455_v46 }
 0x1fd   : > { %v2302_v42 = vadd.f32 %v2254_v10, %v12091_v47  ;;  %v2255_v28 = vadd.f32 %v2116_v40, %v12061_v22  ;;  %v11217_v22 = vld [vmem:[%s17374_s2 + $0xb0] ss:$8 sps:$4 sm:$0xff]   ;;  %v496_v55 = vsub.f32 %v17689_v57, %v448_v19  ;;  %v497_v52 = vsub.f32 %v17690_v63, %v449_v56 }
 0x1fe   : > { %3619 = vmatpush1.bf16.msra.mxu1 %v11217_v22  ;;  %17691 = vst [vmem:[#allocation59_spill] sm:$0xff] %v12476_v1  ;;  %v12483_v50 = vadd.s32 104, %v12255_v37  ;;  %v260_v32 = vcvt.s32.f32 %v12460_v61  ;;  %v403_v24 = vfloor.f32 %v355_v23  ;;  %v450_v27 = vmul.f32 24.0, %v402_v15 }
 0x1ff   : > { %v2348_v47 = vpack.c.bf16 %v2302_v42, %v2301_v58  ;;  %v2303_v2 = vadd.f32 %v2255_v28, %v12097_v43  ;;  %v2488_v43 = vor.u32 %v2486_v16, %v12198_v60  ;;  %v12489_v60 = vpack.c.bf16 %v591_v18, %v590_v36 }
 0x200   : > { %vm544_vm2 = vcmp.lt.f32.partialorder %v496_v55, 15.5  ;;  %vm545_vm4 = vcmp.lt.f32.partialorder %v497_v52, 15.5  ;;  %v261_v29 = vcvt.s32.f32 %v12483_v50  ;;  %v308_v46 = vadd.f32 0.5, %v260_v32 }
 0x201   : > { %v2372_v58 = vmul.bf16 %v2348_v47, %v12437_v59  ;;  %17692 = vst [vmem:[#allocation60_spill] sm:$0xff] %v12489_v60  ;;  %v12507_v36 = vadd.s32 120, %v12255_v37  ;;  %v12516_v57 = vsub.f32 %v258_v4, %v450_v27 }
 0x202   : > { %v2118_v62 = vpop.permute.xlu1 %2117  ;;  %v12478_v41 = vld [vmem:[#allocation2 + $0x10] sm:$0xff] }
 0x203   : > { %2396 = vst.msk [vmem:[#allocation2 + $0x18] sm:$0xff] %vm656_vm7, %v2372_v58  ;;  %v2256_v10 = vadd.f32 %v2118_v62, %v12065_v9  ;;  %v2490_v40 = vshll.u32 %v12478_v41, 16  ;;  %v2785_v19 = vrot.slane %v12478_v41, 1  ;;  %v2494_v58 = vshrl.u32 %v12478_v41, 16 }
 0x204   : > { %v2120_v56 = vpop.permute.xlu0 %2119  ;;  %v356_v62 = vmul.f32 0.041666668, %v308_v46  ;;  %v263_v27 = vcvt.s32.f32 %v12507_v36  ;;  %vm546_vm6 = vcmp.lt.f32.partialorder %v12516_v57, 15.5 }
 0x205   : > { %v2304_v42 = vadd.f32 %v2256_v10, %v12103_v6  ;;  %v2257_v28 = vadd.f32 %v2120_v56, %v12069_v3  ;;  %v2492_v21 = vrot.slane %v2490_v40, 1  ;;  %v2786_v9 = vsel %vm2781_vm13, %v2783_v39, %v2785_v19 }
 0x206   : > { %v2918_v16 = vshrl.u32 %v2786_v9, 16  ;;  %v2921_v38 = vshll.u32 %v2786_v9, 16  ;;  %v12503_v6 = vadd.s32 112, %v12255_v37  ;;  %v451_v39 = vmul.f32 24.0, %v403_v24 }
 0x207   : > { %v2349_v14 = vpack.c.bf16 %v2304_v42, %v2303_v2  ;;  %v2305_v22 = vadd.f32 %v2257_v28, %v12109_v26  ;;  %v2493_v47 = vsel %vm2473_vm8, %v2488_v43, %v2492_v21  ;;  %v592_v2 = vsel %vm544_vm2, 1.0, %v17431_v44  ;;  %v12534_v42 = vpop.f32.mrb[28].mxu1 }
 0x208   : > { %2699 = vrot.lane.b32.xlu1 %v2493_v47, %s11345_s27  ;;  %v2920_v3 = vrot.slane %v2918_v16, 3  ;;  %v2923_v30 = vrot.slane %v2921_v38, 4  ;;  %v593_v26 = vsel %vm545_vm4, 1.0, %v17431_v44  ;;  %v309_v43 = vadd.f32 0.5, %v261_v29 }
 0x209   : > { %v2373_v18 = vmul.bf16 %v2349_v14, %v12476_v1  ;;  %v262_v11 = vcvt.s32.f32 %v12503_v6  ;;  %v2496_v56 = vor.u32 %v2494_v58, %v2492_v21  ;;  %v499_v24 = vsub.f32 %v259_v49, %v451_v39 }
 0x20a   : > { %v2122_v63 = vpop.permute.xlu1 %2121  ;;  %v2924_v23 = vor.u32 %v2923_v30, %v2920_v3  ;;  %v12518_v15 = vld [vmem:[#allocation2 + $0x18] sm:$0xff]  ;;  %v357_v21 = vmul.f32 0.041666668, %v309_v43  ;;  %v404_v0 = vfloor.f32 %v356_v62  ;;  %v12558_v30 = vadd.s32 128, %v12255_v37 }
 0x20b   : > { %2397 = vst.msk [vmem:[#allocation2 + $0x20] sm:$0xff] %vm656_vm7, %v2373_v18  ;;  %v2258_v55 = vadd.f32 %v2122_v63, %v12075_v33  ;;  %v2498_v52 = vshll.u32 %v12518_v15, 16  ;;  %v17426_v4 = vrot.slane %v12518_v15, 1  ;;  %v310_v47 = vadd.f32 0.5, %v262_v11 }
 0x20c   : > { %v2124_v10 = vpop.permute.xlu0 %2123  ;;  %2149 = vrot.lane.b32.xlu1 %v12261_v53, %s11345_s27  ;;  %v2925_v40 = vsel %vm1444_vm5, %v2916_v20, %v2924_v23  ;;  %v12542_v20 = vpop.f32.mrb[29].mxu1  ;;  %v12561_v18 = vpack.c.bf16 %v593_v26, %v592_v2  ;;  %vm547_vm9 = vcmp.lt.f32.partialorder %v499_v24, 15.5  ;;  %v405_v43 = vfloor.f32 %v357_v21 }
 0x20d   : > { %v2306_v33 = vadd.f32 %v2258_v55, %v12115_v12  ;;  %v2259_v28 = vadd.f32 %v2124_v10, %v12081_v25  ;;  %10703 = vmatprep.mubr.msk.bf16.mxu1 %vm656_vm7, %v2925_v40  ;;  %v2500_v9 = vrot.slane %v2498_v52, 1  ;;  %v2788_v16 = vsel %vm2781_vm13, %v2785_v19, %v17426_v4  ;;  %17693 = vst [vmem:[#allocation61_spill] sm:$0xff] %v12542_v20  ;;  %v12544_v46 = vpop.f32.mrb[30].mxu1  ;;  %v17702_v4 = vld [vmem:[#allocation19_spill] sm:$0xff] }
 0x20e   : > { %v2935_v49 = vshrl.u32 %v2788_v16, 16  ;;  %v2938_v38 = vshll.u32 %v2788_v16, 16  ;;  %v12550_v3 = vpop.f32.mrb[31].mxu1  ;;  %v311_v19 = vadd.f32 0.5, %v263_v27  ;;  %17695 = vst [vmem:[#allocation63_spill] sm:$0xff] %v12561_v18  ;;  %v12567_v62 = vadd.s32 136, %v12255_v37 }
 0x20f   : > { %v2350_v14 = vpack.c.bf16 %v2306_v33, %v2305_v22  ;;  %v2307_v12 = vadd.f32 %v2259_v28, %v12121_v45  ;;  %v2501_v25 = vsel %vm2473_vm8, %v2496_v56, %v2500_v9  ;;  %17694 = vst [vmem:[#allocation62_spill] sm:$0xff] %v12550_v3  ;;  %v2502_v10 = vshrl.u32 %v12518_v15, 16  ;;  %v12582_v21 = vpop.f32.mrb[32].mxu1 }
 0x210   : > { %2701 = vrot.lane.b32.xlu0 %v2501_v25, %s11345_s27  ;;  %2151 = vrot.lane.b32.xlu1 %v12268_v8, %s11345_s27  ;;  %v2937_v22 = vrot.slane %v2935_v49, 3  ;;  %v2940_v45 = vrot.slane %v2938_v38, 4  ;;  %v452_v26 = vmul.f32 24.0, %v404_v0  ;;  %v358_v56 = vmul.f32 0.041666668, %v310_v47 }
 0x211   : > { %v2374_v39 = vmul.bf16 %v2350_v14, %v12489_v60  ;;  %v359_v33 = vmul.f32 0.041666668, %v311_v19  ;;  %v17430_v28 = vcvt.s32.f32 %v12558_v30  ;;  %v2504_v38 = vor.u32 %v2502_v10, %v2500_v9 }
 0x212   : > { %v2126_v63 = vpop.permute.xlu1 %2125  ;;  %v12564_v58 = vld [vmem:[#allocation2 + $0x20] sm:$0xff]  ;;  %v12569_v55 = vor.u32 %v2940_v45, %v2937_v22  ;;  %v594_v14 = vsel %vm546_vm6, 1.0, %v17431_v44  ;;  %v453_v25 = vmul.f32 24.0, %v405_v43  ;;  %v17427_v47 = vcvt.s32.f32 %v12567_v62 }
 0x213   : > { %2398 = vst.msk [vmem:[#allocation2 + $0x28] sm:$0xff] %vm656_vm7, %v2374_v39  ;;  %v2260_v52 = vadd.f32 %v2126_v63, %v12087_v54  ;;  %v2506_v2 = vshll.u32 %v12564_v58, 16  ;;  %v595_v45 = vsel %vm547_vm9, 1.0, %v17431_v44  ;;  %v406_v57 = vfloor.f32 %v358_v56 }
 0x214   : > { %v2128_v40 = vpop.permute.xlu0 %2127  ;;  %2153 = vrot.lane.b32.xlu0 %v12294_v5, %s11345_s27  ;;  %v12580_v16 = vsel %vm1444_vm5, %v2924_v23, %v12569_v55  ;;  %v407_v9 = vfloor.f32 %v359_v33  ;;  %v313_v61 = vadd.f32 0.5, %v17427_v47  ;;  %v12618_v10 = vadd.s32 152, %v12255_v37 }
 0x215   : > { %v2308_v54 = vadd.f32 %v2260_v52, %v12127_v34  ;;  %v2261_v49 = vadd.f32 %v2128_v40, %v12093_v48  ;;  %v2508_v0 = vrot.slane %v2506_v2, 1  ;;  %v12594_v34 = vpop.f32.mrb[33].mxu1  ;;  %v500_v48 = vsub.f32 %v260_v32, %v452_v26 }
 0x216   : > { %17696 = vst [vmem:[#allocation64_spill] sm:$0xff] %v12594_v34  ;;  %v501_v52 = vsub.f32 %v261_v29, %v453_v25  ;;  %v12615_v32 = vadd.s32 144, %v12255_v37  ;;  %v12621_v2 = vpack.c.bf16 %v595_v45, %v594_v14  ;;  %v2510_v40 = vshrl.u32 %v12564_v58, 16 }
 0x217   : > { %v2351_v19 = vpack.c.bf16 %v2308_v54, %v2307_v12  ;;  %v2309_v22 = vadd.f32 %v2261_v49, %v12141_v31  ;;  %v2509_v23 = vsel %vm2473_vm8, %v2504_v38, %v2508_v0  ;;  %v312_v31 = vadd.f32 0.5, %v17430_v28  ;;  %v12603_v12 = vpop.f32.mrb[34].mxu1  ;;  %v17700_v38 = vld [vmem:[#allocation4_spill] sm:$0xff] }
 0x218   : > { %2703 = vrot.lane.b32.xlu1 %v2509_v23, %s11345_s27  ;;  %2155 = vrot.lane.b32.xlu0 %v12308_v13, %s11345_s27  ;;  %17697 = vst [vmem:[#allocation65_spill] sm:$0xff] %v12603_v12  ;;  %v12606_v39 = vpop.f32.mrb[35].mxu1  ;;  %17699 = vst [vmem:[#allocation67_spill] sm:$0xff] %v12621_v2  ;;  %vm548_vm10 = vcmp.lt.f32.partialorder %v500_v48, 15.5  ;;  %v454_v56 = vmul.f32 24.0, %v406_v57  ;;  %v455_v33 = vmul.f32 24.0, %v407_v9  ;;  %v2512_v14 = vor.u32 %v2510_v40, %v2508_v0 }
 0x219   : > { %v2375_v24 = vmul.bf16 %v2351_v19, %v12561_v18  ;;  %17698 = vst [vmem:[#allocation66_spill] sm:$0xff] %v12606_v39  ;;  %v360_v54 = vmul.f32 0.041666668, %v312_v31  ;;  %vm549_vm11 = vcmp.lt.f32.partialorder %v501_v52, 15.5  ;;  %v17429_v23 = vcvt.s32.f32 %v12615_v32 }
 0x21a   : > { %v2130_v63 = vpop.permute.xlu1 %2129  ;;  %v12608_v43 = vld [vmem:[#allocation2 + $0x28] sm:$0xff]  ;;  %v17428_v45 = vcvt.s32.f32 %v12618_v10  ;;  %v502_v0 = vsub.f32 %v262_v11, %v454_v56  ;;  %v503_v31 = vsub.f32 %v263_v27, %v455_v33  ;;  %v597_v40 = vsel %vm549_vm11, 1.0, %v17431_v44 }
 0x21b   : > { %2399 = vst.msk [vmem:[#allocation2 + $0x30] sm:$0xff] %vm656_vm7, %v2375_v24  ;;  %v2262_v26 = vadd.f32 %v2130_v63, %v12099_v7  ;;  %v2514_v50 = vshll.u32 %v12608_v43, 16  ;;  %v361_v7 = vmul.f32 0.041666668, %v313_v61  ;;  %v12632_v24 = vpop.f32.mrb[36].mxu1  ;;  %v408_v61 = vfloor.f32 %v360_v54  ;;  %v17707_v27 = vld [vmem:[#allocation5_spill] sm:$0xff] }
 0x21c   : > { %v2132_v29 = vpop.permute.xlu0 %2131  ;;  %2157 = vrot.lane.b32.xlu1 %v12347_v51, %s11345_s27  ;;  %17701 = vst [vmem:[#allocation4_spill] sm:$0xff] %v12632_v24  ;;  %v12636_v9 = vpop.f32.mrb[37].mxu1  ;;  %v314_v36 = vadd.f32 0.5, %v17429_v23  ;;  %v315_v11 = vadd.f32 0.5, %v17428_v45  ;;  %v2518_v56 = vshrl.u32 %v12608_v43, 16  ;;  %vm550_vm12 = vcmp.lt.f32.partialorder %v502_v0, 15.5 }
 0x21d   : > { %v2310_v49 = vadd.f32 %v2262_v26, %v12147_v35  ;;  %v2263_v25 = vadd.f32 %v2132_v29, %v17700_v38  ;;  %v2516_v19 = vrot.slane %v2514_v50, 1  ;;  %17703 = vst [vmem:[#allocation19_spill] sm:$0xff] %v12636_v9  ;;  %v17704_v35 = vld [vmem:[#allocation55_spill] sm:$0xff]  ;;  %v12645_v26 = vpop.f32.mrb[38].mxu1  ;;  %v409_v6 = vfloor.f32 %v361_v7  ;;  %v17709_v38 = vld [vmem:[#allocation9_spill] sm:$0xff] }
 0x21e   : > { %17705 = vst [vmem:[#allocation55_spill] sm:$0xff] %v12645_v26  ;;  %v12652_v50 = vpop.f32.mrb[39].mxu1  ;;  %vm551_vm14 = vcmp.lt.f32.partialorder %v503_v31, 15.5  ;;  %v363_v23 = vmul.f32 0.041666668, %v315_v11  ;;  %v17720_v0 = vld [vmem:[#allocation7_spill] sm:$0xff] }
 0x21f   : > { %v2352_v63 = vpack.c.bf16 %v2310_v49, %v2309_v22  ;;  %v2311_v47 = vadd.f32 %v2263_v25, %v17702_v4  ;;  %v2517_v57 = vsel %vm2473_vm8, %v2512_v14, %v2516_v19  ;;  %v596_v22 = vsel %vm548_vm10, 1.0, %v17431_v44  ;;  %17706 = vst [vmem:[#allocation68_spill] sm:$0xff] %v12652_v50  ;;  %v17710_v14 = vld [vmem:[#allocation21_spill] sm:$0xff]  ;;  %v12670_v28 = vpop.f32.mrb[40].mxu1  ;;  %v17750_v50 = vld [vmem:[#allocation52_spill] sm:$0xff] }
 0x220   : > { %2705 = vrot.lane.b32.xlu0 %v2517_v57, %s11345_s27  ;;  %2159 = vrot.lane.b32.xlu1 %v17704_v35, %s11345_s27  ;;  %v12664_v33 = vpack.c.bf16 %v597_v40, %v596_v22  ;;  %v456_v25 = vmul.f32 24.0, %v408_v61  ;;  %17712 = vst [vmem:[#allocation21_spill] sm:$0xff] %v12670_v28  ;;  %v17713_v40 = vld [vmem:[#allocation27_spill] sm:$0xff]  ;;  %v12674_v18 = vpop.f32.mrb[41].mxu1 }
 0x221   : > { %v2376_v4 = vmul.bf16 %v2352_v63, %v12621_v2  ;;  %v17711_v63 = vld [vmem:[#allocation6_spill] sm:$0xff]  ;;  %v17715_v61 = vld [vmem:[#allocation11_spill] sm:$0xff] }
 0x222   : > { %v2134_v29 = vpop.permute.xlu1 %2133  ;;  %v12654_v49 = vld [vmem:[#allocation2 + $0x30] sm:$0xff]  ;;  %17708 = vst [vmem:[#allocation5_spill] sm:$0xff] %v12664_v33  ;;  %17714 = vst [vmem:[#allocation6_spill] sm:$0xff] %v12674_v18 }
 0x223   : > { %2400 = vst.msk [vmem:[#allocation2 + $0x38] sm:$0xff] %vm656_vm7, %v2376_v4  ;;  %v2264_v48 = vadd.f32 %v2134_v29, %v17707_v27  ;;  %v2522_v52 = vshll.u32 %v12654_v49, 16  ;;  %v2520_v4 = vor.u32 %v2518_v56, %v2516_v19  ;;  %v457_v29 = vmul.f32 24.0, %v409_v6 }
 0x224   : > { %v2136_v54 = vpop.permute.xlu0 %2135  ;;  %2161 = vrot.lane.b32.xlu0 %v17709_v38, %s11345_s27  ;;  %v362_v27 = vmul.f32 0.041666668, %v314_v36  ;;  %v17716_v6 = vmov 0.0   ;;  %v2526_v31 = vshrl.u32 %v12654_v49, 16 }
 0x225   : > { %v2312_v7 = vadd.f32 %v2264_v48, %v17710_v14  ;;  %v2265_v57 = vadd.f32 %v2136_v54, %v17711_v63  ;;  %v2524_v45 = vrot.slane %v2522_v52, 1  ;;  %v2047_v48 = vpop.f32.mrb[42].mxu1  ;;  %v598_v36 = vsel %vm550_vm12, 1.0, %v17716_v6 }
 0x226   : > { %v12684_v11 = vpop.f32.mrb[43].mxu1  ;;  %v17718_v54 = vcvt.s32.f32 %v12558_v30  ;;  %v410_v63 = vfloor.f32 %v362_v27 }
 0x227   : > { %v2353_v22 = vpack.c.bf16 %v2312_v7, %v2311_v47  ;;  %v2313_v44 = vadd.f32 %v2265_v57, %v17713_v40  ;;  %v2525_v2 = vsel %vm2473_vm8, %v2520_v4, %v2524_v45  ;;  %v599_v47 = vsel %vm551_vm14, 1.0, %v17716_v6  ;;  %17717 = vst [vmem:[#allocation27_spill] sm:$0xff] %v12684_v11  ;;  %v2052_v30 = vpop.f32.mrb[44].mxu1 }
 0x228   : > { %2163 = vrot.lane.b32.xlu0 %v17715_v61, %s11345_s27  ;;  %2707 = vrot.lane.b32.xlu1 %v2525_v2, %s11345_s27  ;;  %v504_v14 = vsub.f32 %v17718_v54, %v456_v25  ;;  %v17719_v7 = vcvt.s32.f32 %v12567_v62  ;;  %v411_v57 = vfloor.f32 %v363_v23  ;;  %v12696_v40 = vpack.c.bf16 %v599_v47, %v598_v36  ;;  %v17723_v25 = vld [vmem:[#allocation29_spill] sm:$0xff]  ;;  %v17726_v47 = vld [vmem:[#allocation16_spill] sm:$0xff]  ;;  %v12707_v30 = vpop.f32.mrb[45].mxu1 }
 0x229   : > { %v2377_v19 = vmul.bf16 %v2353_v22, %v12664_v33  ;;  %v17722_v33 = vld [vmem:[#allocation15_spill] sm:$0xff]  ;;  %v2528_v23 = vor.u32 %v2526_v31, %v2524_v45  ;;  %17727 = vst [vmem:[#allocation29_spill] sm:$0xff] %v12707_v30 }
 0x22a   : > { %v2138_v56 = vpop.permute.xlu1 %2137  ;;  %v12686_v52 = vld [vmem:[#allocation2 + $0x38] sm:$0xff]  ;;  %v505_v2 = vsub.f32 %v17719_v7, %v457_v29  ;;  %17721 = vst [vmem:[#allocation7_spill] sm:$0xff] %v12696_v40  ;;  %v17724_v29 = vld [vmem:[#allocation13_spill] sm:$0xff]  ;;  %vm552_vm15 = vcmp.lt.f32.partialorder %v504_v14, 15.5 }
 0x22b   : > { %2401 = vst.msk [vmem:[#allocation2 + $0x40] sm:$0xff] %vm656_vm7, %v2377_v19  ;;  %v2266_v4 = vadd.f32 %v2138_v56, %v17720_v0  ;;  %v2530_v22 = vshll.u32 %v12686_v52, 16  ;;  %v458_v19 = vmul.f32 24.0, %v410_v63  ;;  %v459_v56 = vmul.f32 24.0, %v411_v57  ;;  %v17725_v0 = vld [vmem:[#allocation35_spill] sm:$0xff] }
 0x22c   : > { %v2140_v48 = vpop.permute.xlu0 %2139  ;;  %2165 = vrot.lane.b32.xlu1 %v17722_v33, %s11345_s27  ;;  %vm553_vm0 = vcmp.lt.f32.partialorder %v505_v2, 15.5  ;;  %v600_v45 = vsel %vm552_vm15, 1.0, %v17716_v6  ;;  %v2055_v2 = vpop.f32.mrb[46].mxu1  ;;  %v17728_v57 = vcvt.s32.f32 %v12615_v32 }
 0x22d   : > { %v2314_v62 = vadd.f32 %v2266_v4, %v17723_v25  ;;  %v2267_v27 = vadd.f32 %v2140_v48, %v17724_v29  ;;  %v2532_v54 = vrot.slane %v2530_v22, 1  ;;  %v601_v14 = vsel %vm553_vm0, 1.0, %v17716_v6  ;;  %v17730_v25 = vld [vmem:[#allocation12_spill] sm:$0xff] }
 0x22e   : > { %v506_v31 = vsub.f32 %v17728_v57, %v458_v19  ;;  %v17729_v22 = vcvt.s32.f32 %v12618_v10  ;;  %v2534_v29 = vshrl.u32 %v12686_v52, 16  ;;  %v17734_v19 = vld [vmem:[#allocation18_spill] sm:$0xff]  ;;  %v12728_v57 = vpop.f32.mrb[47].mxu1 }
 0x22f   : > { %v2354_v7 = vpack.c.bf16 %v2314_v62, %v2313_v44  ;;  %v2315_v60 = vadd.f32 %v2267_v27, %v17725_v0  ;;  %v2533_v36 = vsel %vm2473_vm8, %v2528_v23, %v2532_v54  ;;  %v12722_v23 = vpack.c.bf16 %v601_v14, %v600_v45  ;;  %v17732_v0 = vld [vmem:[#allocation22_spill] sm:$0xff]  ;;  %17735 = vst [vmem:[#allocation35_spill] sm:$0xff] %v12728_v57 }
 0x230   : > { %2709 = vrot.lane.b32.xlu0 %v2533_v36, %s11345_s27  ;;  %2167 = vrot.lane.b32.xlu1 %v17726_v47, %s11345_s27  ;;  %v507_v48 = vsub.f32 %v17729_v22, %v459_v56  ;;  %v17733_v36 = vld [vmem:[#allocation37_spill] sm:$0xff]  ;;  %v2536_v10 = vor.u32 %v2534_v29, %v2532_v54  ;;  %vm554_vm1 = vcmp.lt.f32.partialorder %v506_v31, 15.5  ;;  %v223_v57 = vadd.s32 184, %v12255_v37 }
 0x231   : > { %v2378_v4 = vmul.bf16 %v2354_v7, %v12696_v40  ;;  %17731 = vst [vmem:[#allocation13_spill] sm:$0xff] %v12722_v23  ;;  %v602_v54 = vsel %vm554_vm1, 1.0, %v17716_v6  ;;  %v2793_v47 = vrot.slane %v12654_v49, 1 }
 0x232   : > { %v2142_v63 = vpop.permute.xlu1 %2141  ;;  %v12712_v44 = vld [vmem:[#allocation2 + $0x40] sm:$0xff]  ;;  %vm555_vm2 = vcmp.lt.f32.partialorder %v507_v48, 15.5 }
 0x233   : > { %2402 = vst.msk [vmem:[#allocation2 + $0x48] sm:$0xff] %vm656_vm7, %v2378_v4  ;;  %v2268_v62 = vadd.f32 %v2142_v63, %v17730_v25  ;;  %v2538_v27 = vshll.u32 %v12712_v44, 16  ;;  %v17736_v63 = vld [vmem:[#allocation42_spill] sm:$0xff]  ;;  %v17737_v25 = vld [vmem:[#allocation24_spill] sm:$0xff]  ;;  %v603_v29 = vsel %vm555_vm2, 1.0, %v17716_v6 }
 0x234   : > { %v2144_v7 = vpop.permute.xlu0 %2143  ;;  %2169 = vrot.lane.b32.xlu0 %v17732_v0, %s11345_s27 }
 0x235   : > { %v2316_v32 = vadd.f32 %v2268_v62, %v17733_v36  ;;  %v2269_v2 = vadd.f32 %v2144_v7, %v17734_v19  ;;  %v2540_v56 = vrot.slane %v2538_v27, 1  ;;  %v2542_v7 = vshrl.u32 %v12712_v44, 16 }
 0x237   : > { %v2355_v4 = vpack.c.bf16 %v2316_v32, %v2315_v60  ;;  %v2317_v22 = vadd.f32 %v2269_v2, %v17736_v63  ;;  %v2541_v45 = vsel %vm2473_vm8, %v2536_v10, %v2540_v56  ;;  %v17738_v60 = vld [vmem:[#allocation20_spill] sm:$0xff]  ;;  %v12746_v32 = vpack.c.bf16 %v603_v29, %v602_v54  ;;  %v17740_v2 = vld [vmem:[#allocation30_spill] sm:$0xff]  ;;  %v17741_v10 = vld [vmem:[#allocation43_spill] sm:$0xff] }
 0x238   : > { %v12732_v14 = vpop.permute.xlu0 %2697  ;;  %2171 = vrot.lane.b32.xlu0 %v17737_v25, %s11345_s27  ;;  %2711 = vrot.lane.b32.xlu1 %v2541_v45, %s11345_s27  ;;  %v17742_v63 = vld [vmem:[#allocation26_spill] sm:$0xff]  ;;  %v17744_v54 = vld [vmem:[#allocation32_spill] sm:$0xff] }
 0x239   : > { %v2379_v62 = vmul.bf16 %v2355_v4, %v12722_v23  ;;  %17739 = vst [vmem:[#allocation12_spill] sm:$0xff] %v12746_v32  ;;  %v2544_v23 = vor.u32 %v2542_v7, %v2540_v56 }
 0x23a   : > { %v2146_v31 = vpop.permute.xlu1 %2145  ;;  %v12740_v48 = vld [vmem:[#allocation2 + $0x48] sm:$0xff] }
 0x23b   : > { %2403 = vst.msk [vmem:[#allocation2 + $0x50] sm:$0xff] %vm656_vm7, %v2379_v62  ;;  %v2270_v27 = vadd.f32 %v2146_v31, %v17738_v60  ;;  %v2546_v36 = vshll.u32 %v12740_v48, 16  ;;  %v17743_v62 = vld [vmem:[#allocation48_spill] sm:$0xff]  ;;  %v2550_v56 = vshrl.u32 %v12740_v48, 16 }
 0x23c   : > { %v2148_v19 = vpop.permute.xlu0 %2147  ;;  %2173 = vrot.lane.b32.xlu1 %v17740_v2, %s11345_s27 }
 0x23d   : > { %v2318_v4 = vadd.f32 %v2270_v27, %v17741_v10  ;;  %v2271_v45 = vadd.f32 %v2148_v19, %v17742_v63  ;;  %v2548_v40 = vrot.slane %v2546_v36, 1  ;;  %v17745_v27 = vld [vmem:[#allocation38_spill] sm:$0xff]  ;;  %v17746_v19 = vld [vmem:[#allocation40_spill] sm:$0xff]  ;;  %v221_v10 = vadd.s32 168, %v12255_v37 }
 0x23f   : > { %v2356_v1 = vpack.c.bf16 %v2318_v4, %v2317_v22  ;;  %v12753_v59 = vadd.f32 %v2271_v45, %v17743_v62  ;;  %v2549_v31 = vsel %vm2473_vm8, %v2544_v23, %v2548_v40  ;;  %v2552_v7 = vor.u32 %v2550_v56, %v2548_v40  ;;  %v17747_v40 = vld [vmem:[#allocation44_spill] sm:$0xff] }
 0x240   : > { %2713 = vrot.lane.b32.xlu0 %v2549_v31, %s11345_s27  ;;  %2175 = vrot.lane.b32.xlu1 %v17744_v54, %s11345_s27  ;;  %v269_v31 = vcvt.s32.f32 %v221_v10  ;;  %v17749_v10 = vld [vmem:[#allocation50_spill] sm:$0xff] }
 0x241   : > { %v2380_v29 = vmul.bf16 %v2356_v1, %v12746_v32  ;;  %v220_v1 = vadd.s32 160, %v12255_v37 }
 0x242   : > { %v12760_v60 = vld [vmem:[#allocation2 + $0x50] sm:$0xff]  ;;  %v317_v17 = vadd.f32 0.5, %v269_v31 }
 0x243   : > { %2404 = vst.msk [vmem:[#allocation2 + $0x58] sm:$0xff] %vm656_vm7, %v2380_v29  ;;  %v2554_v22 = vshll.u32 %v12760_v60, 16  ;;  %v2558_v63 = vshrl.u32 %v12760_v60, 16  ;;  %v268_v62 = vcvt.s32.f32 %v220_v1  ;;  %v12789_v1 = vadd.s32 192, %v12255_v37 }
 0x244   : > { %2177 = vrot.lane.b32.xlu0 %v17745_v27, %s11345_s27 }
 0x245   : > { %v2556_v23 = vrot.slane %v2554_v22, 1  ;;  %v222_v22 = vadd.s32 176, %v12255_v37  ;;  %v316_v32 = vadd.f32 0.5, %v268_v62  ;;  %v272_v11 = vcvt.s32.f32 %v12789_v1 }
 0x247   : > { %v2557_v36 = vsel %vm2473_vm8, %v2552_v7, %v2556_v23  ;;  %v2560_v29 = vor.u32 %v2558_v63, %v2556_v23  ;;  %v270_v30 = vcvt.s32.f32 %v222_v22  ;;  %v12792_v23 = vadd.s32 200, %v12255_v37 }
 0x248   : > { %2179 = vrot.lane.b32.xlu0 %v17746_v19, %s11345_s27  ;;  %2715 = vrot.lane.b32.xlu1 %v2557_v36, %s11345_s27  ;;  %v17748_v36 = vld [vmem:[#allocation46_spill] sm:$0xff]  ;;  %v364_v63 = vmul.f32 0.041666668, %v316_v32 }
 0x249   : > { %v273_v18 = vcvt.s32.f32 %v12792_v23 }
 0x24a   : > { %v12773_v4 = vld [vmem:[#allocation2 + $0x58] sm:$0xff]  ;;  %v412_v22 = vfloor.f32 %v364_v63  ;;  %v2789_v63 = vrot.slane %v12564_v58, 1 }
 0x24b   : > { %v2562_v45 = vshll.u32 %v12773_v4, 16 }
 0x24c   : > { %2181 = vrot.lane.b32.xlu1 %v17747_v40, %s11345_s27  ;;  %v320_v40 = vadd.f32 0.5, %v272_v11 }
 0x24d   : > { %v12779_v56 = vrot.slane %v2562_v45, 1  ;;  %v365_v45 = vmul.f32 0.041666668, %v317_v17  ;;  %v12804_v17 = vadd.s32 216, %v12255_v37 }
 0x24e   : > { %v368_v19 = vmul.f32 0.041666668, %v320_v40 }
 0x24f   : > { %v2565_v7 = vsel %vm2473_vm8, %v2560_v29, %v12779_v56  ;;  %v271_v29 = vcvt.s32.f32 %v223_v57  ;;  %v413_v9 = vfloor.f32 %v365_v45  ;;  %v460_v57 = vmul.f32 24.0, %v412_v22 }
 0x250   : > { %2717 = vrot.lane.b32.xlu0 %v2565_v7, %s11345_s27  ;;  %2183 = vrot.lane.b32.xlu1 %v17748_v36, %s11345_s27  ;;  %v318_v7 = vadd.f32 0.5, %v270_v30  ;;  %v12801_v36 = vadd.s32 208, %v12255_v37  ;;  %v17454_v45 = vcvt.s32.f32 %v12804_v17 }
 0x251   : > { %v319_v39 = vadd.f32 0.5, %v271_v29  ;;  %v461_v32 = vmul.f32 24.0, %v413_v9  ;;  %v508_v20 = vsub.f32 %v268_v62, %v460_v57  ;;  %v12826_v57 = vadd.s32 248, %v12255_v37 }
 0x252   : > { %v366_v34 = vmul.f32 0.041666668, %v318_v7  ;;  %v17453_v23 = vcvt.s32.f32 %v12801_v36  ;;  %v12810_v7 = vadd.s32 224, %v12255_v37  ;;  %v323_v62 = vadd.f32 0.5, %v17454_v45 }
 0x253   : > { %v367_v1 = vmul.f32 0.041666668, %v319_v39  ;;  %v509_v27 = vsub.f32 %v269_v31, %v461_v32  ;;  %v12815_v39 = vadd.s32 232, %v12255_v37  ;;  %v12823_v31 = vadd.s32 240, %v12255_v37 }
 0x254   : > { %2185 = vrot.lane.b32.xlu0 %v17749_v10, %s11345_s27  ;;  %v321_v10 = vadd.f32 0.5, %v273_v18  ;;  %v414_v3 = vfloor.f32 %v366_v34  ;;  %v322_v22 = vadd.f32 0.5, %v17453_v23  ;;  %v416_v34 = vfloor.f32 %v368_v19 }
 0x255   : > { %v415_v54 = vfloor.f32 %v367_v1  ;;  %vm556_vm4 = vcmp.lt.f32.partialorder %v508_v20, 15.5  ;;  %vm557_vm6 = vcmp.lt.f32.partialorder %v509_v27, 15.5  ;;  %v371_v0 = vmul.f32 0.041666668, %v323_v62 }
 0x256   : > { %v462_v9 = vmul.f32 24.0, %v414_v3  ;;  %v370_v19 = vmul.f32 0.041666668, %v322_v22  ;;  %v464_v25 = vmul.f32 24.0, %v416_v34  ;;  %v604_v20 = vsel %vm556_vm4, 1.0, %v17716_v6 }
 0x257   : > { %v463_v3 = vmul.f32 24.0, %v415_v54  ;;  %v605_v27 = vsel %vm557_vm6, 1.0, %v17716_v6  ;;  %v17752_v54 = vcvt.s32.f32 %v12810_v7  ;;  %v419_v33 = vfloor.f32 %v371_v0 }
 0x258   : > { %2187 = vrot.lane.b32.xlu0 %v17750_v50, %s11345_s27  ;;  %v369_v50 = vmul.f32 0.041666668, %v321_v10  ;;  %v17751_v10 = vrot.slane %v12518_v15, 1  ;;  %v512_v62 = vsub.f32 %v272_v11, %v464_v25  ;;  %v17754_v24 = vcvt.s32.f32 %v12823_v31 }
 0x259   : > { %v324_v26 = vadd.f32 0.5, %v17752_v54  ;;  %v511_v22 = vsub.f32 %v271_v29, %v463_v3  ;;  %v17755_v61 = vcvt.s32.f32 %v12826_v57  ;;  %v12845_v12 = vpack.c.bf16 %v605_v27, %v604_v20 }
 0x25a   : > { %v417_v40 = vfloor.f32 %v369_v50  ;;  %v2790_v2 = vsel %vm2781_vm13, %v17751_v10, %v2789_v63  ;;  %v2791_v50 = vrot.slane %v12608_v43, 1  ;;  %v510_v10 = vsub.f32 %v270_v30, %v462_v9 }
 0x25b   : > { %v2952_v23 = vshrl.u32 %v2790_v2, 16  ;;  %v2955_v32 = vshll.u32 %v2790_v2, 16  ;;  %v418_v30 = vfloor.f32 %v370_v19  ;;  %v17753_v9 = vcvt.s32.f32 %v12815_v39  ;;  %17756 = vst [vmem:[#allocation37_spill] sm:$0xff] %v12845_v12 }
 0x25c   : > { %v465_v45 = vmul.f32 24.0, %v417_v40  ;;  %v2792_v1 = vsel %vm2781_vm13, %v2789_v63, %v2791_v50  ;;  %vm558_vm9 = vcmp.lt.f32.partialorder %v510_v10, 15.5  ;;  %v326_v2 = vadd.f32 0.5, %v17754_v24 }
 0x25d   : > { %v325_v34 = vadd.f32 0.5, %v17753_v9  ;;  %v2954_v40 = vrot.slane %v2952_v23, 3  ;;  %v327_v54 = vadd.f32 0.5, %v17755_v61  ;;  %v2957_v29 = vrot.slane %v2955_v32, 4  ;;  %v2443_v61 = vld [vmem:[#allocation2] sm:$0xf8] }
 0x25e   : > { %v513_v28 = vsub.f32 %v273_v18, %v465_v45  ;;  %v2969_v3 = vshrl.u32 %v2792_v1, 16  ;;  %v2972_v63 = vshll.u32 %v2792_v1, 16  ;;  %v372_v19 = vmul.f32 0.041666668, %v324_v26 }
 0x25f   : > { %v466_v9 = vmul.f32 24.0, %v418_v30  ;;  %v373_v38 = vmul.f32 0.041666668, %v325_v34  ;;  %vm559_vm10 = vcmp.lt.f32.partialorder %v511_v22, 15.5  ;;  %v606_v11 = vsel %vm558_vm9, 1.0, %v17716_v6 }
 0x260   : > { %vm560_vm11 = vcmp.lt.f32.partialorder %v512_v62, 15.5  ;;  %v2794_v18 = vsel %vm2781_vm13, %v2791_v50, %v2793_v47  ;;  %vm561_vm12 = vcmp.lt.f32.partialorder %v513_v28, 15.5  ;;  %v467_v24 = vmul.f32 24.0, %v419_v33 }
 0x261   : > { %v374_v0 = vmul.f32 0.041666668, %v326_v2  ;;  %v375_v25 = vmul.f32 0.041666668, %v327_v54  ;;  %v2958_v23 = vor.u32 %v2957_v29, %v2954_v40  ;;  %v2971_v45 = vrot.slane %v2969_v3, 3 }
 0x262   : > { %v2974_v32 = vrot.slane %v2972_v63, 4  ;;  %v420_v26 = vfloor.f32 %v372_v19  ;;  %v607_v1 = vsel %vm559_vm10, 1.0, %v17716_v6  ;;  %v17757_v20 = vcvt.s32.f32 %v12801_v36 }
 0x263   : > { %v2986_v22 = vshrl.u32 %v2794_v18, 16  ;;  %v421_v10 = vfloor.f32 %v373_v38  ;;  %v608_v30 = vsel %vm560_vm11, 1.0, %v17716_v6  ;;  %v609_v50 = vsel %vm561_vm12, 1.0, %v17716_v6 }
 0x264   : > { %v514_v27 = vsub.f32 %v17757_v20, %v466_v9  ;;  %v2989_v28 = vshll.u32 %v2794_v18, 16  ;;  %v2795_v33 = vrot.slane %v12686_v52, 1  ;;  %v2839_v34 = vsel %vm656_vm7, %v2443_v61, %v12732_v14 }
 0x265   : > { %v17758_v40 = vcvt.s32.f32 %v12804_v17  ;;  %v422_v2 = vfloor.f32 %v374_v0  ;;  %v423_v54 = vfloor.f32 %v375_v25  ;;  %v12860_v29 = vpack.c.bf16 %v607_v1, %v606_v11 }
 0x266   : > { %v12864_v38 = vsel %vm1444_vm5, %v12569_v55, %v2958_v23  ;;  %v12866_v36 = vor.u32 %v2974_v32, %v2971_v45  ;;  %v468_v3 = vmul.f32 24.0, %v420_v26  ;;  %v12868_v63 = vpack.c.bf16 %v609_v50, %v608_v30 }
 0x267   : > { %v515_v62 = vsub.f32 %v17758_v40, %v467_v24  ;;  %17759 = vst [vmem:[#allocation18_spill] sm:$0xff] %v12860_v29  ;;  %vm562_vm14 = vcmp.lt.f32.partialorder %v514_v27, 15.5  ;;  %v2988_v19 = vrot.slane %v2986_v22, 3  ;;  %v469_v9 = vmul.f32 24.0, %v421_v10 }
 0x268   : > { %17760 = vst [vmem:[#allocation42_spill] sm:$0xff] %v12868_v63  ;;  %v2894_v14 = vshrl.u32 %v2839_v34, 16  ;;  %v2897_v18 = vshll.u32 %v2839_v34, 16  ;;  %v2991_v17 = vrot.slane %v2989_v28, 4  ;;  %v2796_v24 = vsel %vm2781_vm13, %v2793_v47, %v2795_v33 }
 0x269   : > { %vm563_vm15 = vcmp.lt.f32.partialorder %v515_v62, 15.5  ;;  %v470_v11 = vmul.f32 24.0, %v422_v2  ;;  %v471_v0 = vmul.f32 24.0, %v423_v54  ;;  %v2797_v25 = vrot.slane %v12712_v44, 1 }
 0x26a   : > { %v12874_v55 = vsel %vm1444_vm5, %v2958_v23, %v12866_v36  ;;  %v12877_v61 = vsel %vm562_vm14, 1.0, %v17716_v6  ;;  %v17761_v45 = vcvt.s32.f32 %v12810_v7  ;;  %v12882_v26 = vadd.s32 256, %v12255_v37  ;;  %v11329_v7 = vld [vmem:[#allocation2 + $0x8] sm:$0xff] }
 0x26b   : > { %v17762_v47 = vcvt.s32.f32 %v12815_v39  ;;  %v3003_v20 = vshrl.u32 %v2796_v24, 16  ;;  %v3006_v27 = vshll.u32 %v2796_v24, 16  ;;  %v12887_v22 = vadd.s32 264, %v12255_v37 }
 0x26c   : > { %v516_v32 = vsub.f32 %v17761_v45, %v468_v3  ;;  %v2896_v10 = vrot.slane %v2894_v14, 3  ;;  %v2899_v23 = vrot.slane %v2897_v18, 4  ;;  %v611_v50 = vsel %vm563_vm15, 1.0, %v17716_v6 }
 0x26d   : > { %v517_v1 = vsub.f32 %v17762_v47, %v469_v9  ;;  %v12890_v28 = vor.u32 %v2991_v17, %v2988_v19  ;;  %v17763_v40 = vcvt.s32.f32 %v12823_v31  ;;  %v17764_v39 = vcvt.s32.f32 %v12826_v57 }
 0x26e   : > { %v2798_v54 = vsel %vm2781_vm13, %v2795_v33, %v2797_v25  ;;  %vm564_vm0 = vcmp.lt.f32.partialorder %v516_v32, 15.5  ;;  %v280_v14 = vcvt.s32.f32 %v12882_v26  ;;  %v3005_v18 = vrot.slane %v3003_v20, 3 }
 0x26f   : > { %v518_v62 = vsub.f32 %v17763_v40, %v470_v11  ;;  %v519_v2 = vsub.f32 %v17764_v39, %v471_v0  ;;  %vm565_vm1 = vcmp.lt.f32.partialorder %v517_v1, 15.5  ;;  %v3008_v19 = vrot.slane %v3006_v27, 4  ;;  %v17766_v27 = vld [vmem:[#allocation49_spill] sm:$0xff] }
 0x270   : > { %v17456_v17 = vcvt.s32.f32 %v12887_v22  ;;  %v2900_v24 = vor.u32 %v2899_v23, %v2896_v10  ;;  %v3020_v11 = vshrl.u32 %v2798_v54, 16  ;;  %v2799_v33 = vrot.slane %v12740_v48, 1 }
 0x271   : > { %vm566_vm2 = vcmp.lt.f32.partialorder %v518_v62, 15.5  ;;  %vm567_vm4 = vcmp.lt.f32.partialorder %v519_v2, 15.5  ;;  %v328_v20 = vadd.f32 0.5, %v280_v14  ;;  %v613_v23 = vsel %vm565_vm1, 1.0, %v17716_v6 }
 0x272   : > { %v12909_v40 = vor.u32 %v3008_v19, %v3005_v18  ;;  %v329_v62 = vadd.f32 0.5, %v17456_v17  ;;  %v614_v32 = vsel %vm566_vm2, 1.0, %v17716_v6  ;;  %v2800_v19 = vsel %vm2781_vm13, %v2797_v25, %v2799_v33 }
 0x273   : > { %v12931_v25 = vadd.s32 280, %v12255_v37 }
 0x27a   : > { %v2700_v30 = vpop.permute.xlu1 %2699 }
 0x27b   : > { %v2841_v34 = vsel %vm656_vm7, %v11329_v7, %v2700_v30  ;;  %v17765_v30 = vld [vmem:[#allocation28_spill] sm:$0xff]  ;;  %v612_v7 = vsel %vm564_vm0, 1.0, %v17716_v6 }
 0x27c   : > { %v2901_v3 = vshrl.u32 %v2841_v34, 16  ;;  %v2904_v9 = vshll.u32 %v2841_v34, 16  ;;  %v3023_v34 = vshll.u32 %v2798_v54, 16  ;;  %v615_v54 = vsel %vm567_vm4, 1.0, %v17716_v6 }
 0x27e   : > { %v2903_v45 = vrot.slane %v2901_v3, 3  ;;  %v2906_v47 = vrot.slane %v2904_v9, 4  ;;  %v2150_v31 = vpop.permute.xlu1 %2149  ;;  %v3022_v9 = vrot.slane %v3020_v11, 3 }
 0x27f   : > { %v2272_v57 = vadd.f32 %v2150_v31, %v17765_v30 }
 0x280   : > { %v2907_v0 = vor.u32 %v2906_v47, %v2903_v45  ;;  %v17767_v47 = vld [vmem:[#allocation34_spill] sm:$0xff] }
 0x281   : > { %v2320_v10 = vadd.f32 %v2272_v57, %v17766_v27  ;;  %v376_v57 = vmul.f32 0.041666668, %v328_v20  ;;  %v12936_v20 = vpack.c.bf16 %v611_v50, %v12877_v61 }
 0x282   : > { %v2702_v39 = vpop.permute.xlu0 %2701  ;;  %v2152_v2 = vpop.permute.xlu1 %2151  ;;  %v2908_v3 = vsel %vm1444_vm5, %v2900_v24, %v2907_v0  ;;  %v3025_v24 = vrot.slane %v3023_v34, 4 }
 0x283   : > { %v2357_v45 = vpack.c.bf16 %v2320_v10, %v12753_v59  ;;  %v2843_v1 = vsel %vm656_vm7, %v12478_v41, %v2702_v39  ;;  %v2273_v18 = vadd.f32 %v2152_v2, %v17767_v47  ;;  %3629 = vmatmul.mubr.bf16.vlgmr.msra.gmra.mrb[48].mxu1 %v2908_v3  ;;  %v17768_v59 = vld [vmem:[#allocation54_spill] sm:$0xff]  ;;  %v377_v10 = vmul.f32 0.041666668, %v329_v62  ;;  %17770 = vst [vmem:[#allocation20_spill] sm:$0xff] %v12936_v20 }
 0x284   : > { %v2926_v31 = vshrl.u32 %v2843_v1, 16  ;;  %v2929_v30 = vshll.u32 %v2843_v1, 16  ;;  %10704 = vmatprep.mubr.msk.bf16.mxu1 %vm656_vm7, %v12580_v16  ;;  %v12928_v41 = vadd.s32 272, %v12255_v37  ;;  %v3037_v47 = vshrl.u32 %v2800_v19, 16  ;;  %v17769_v16 = vld [vmem:[#allocation36_spill] sm:$0xff] }
 0x285   : > { %v2381_v11 = vmul.bf16 %v2357_v45, %v12845_v12  ;;  %v2321_v27 = vadd.f32 %v2273_v18, %v17768_v59  ;;  %v12941_v62 = vsel %vm1444_vm5, %v12866_v36, %v12890_v28  ;;  %v3040_v45 = vshll.u32 %v2800_v19, 16 }
 0x286   : > { %v2928_v39 = vrot.slane %v2926_v31, 3  ;;  %v2931_v2 = vrot.slane %v2929_v30, 4  ;;  %v2154_v3 = vpop.permute.xlu0 %2153  ;;  %v12943_v18 = vpack.c.bf16 %v613_v23, %v612_v7  ;;  %v12948_v31 = vsel %vm1444_vm5, %v12890_v28, %v12909_v40 }
 0x287   : > { %2405 = vst.msk [vmem:[#allocation2 + $0x60] sm:$0xff] %vm656_vm7, %v2381_v11  ;;  %v2274_v34 = vadd.f32 %v2154_v3, %v17769_v16  ;;  %v424_v30 = vfloor.f32 %v376_v57  ;;  %v17772_v11 = vld [vmem:[#allocation56_spill] sm:$0xff]  ;;  %v12951_v3 = vpack.c.bf16 %v615_v54, %v614_v32  ;;  %v3026_v61 = vor.u32 %v3025_v24, %v3022_v9 }
 0x288   : > { %v2932_v1 = vor.u32 %v2931_v2, %v2928_v39  ;;  %17771 = vst [vmem:[#allocation43_spill] sm:$0xff] %v12943_v18  ;;  %v425_v50 = vfloor.f32 %v377_v10  ;;  %v3039_v19 = vrot.slane %v3037_v47, 3  ;;  %v282_v7 = vcvt.s32.f32 %v12928_v41  ;;  %v17774_v2 = vld [vmem:[#allocation8_spill] sm:$0xff] }
 0x289   : > { %v2322_v59 = vadd.f32 %v2274_v34, %v17772_v11  ;;  %17773 = vst [vmem:[#allocation26_spill] sm:$0xff] %v12951_v3  ;;  %v283_v23 = vcvt.s32.f32 %v12931_v25  ;;  %v3042_v32 = vrot.slane %v3040_v45, 4  ;;  %v472_v24 = vmul.f32 24.0, %v424_v30  ;;  %v17789_v25 = vld [vmem:[#allocation55_spill] sm:$0xff] }
 0x28a   : > { %v2704_v16 = vpop.permute.xlu1 %2703  ;;  %v2156_v17 = vpop.permute.xlu0 %2155  ;;  %v2933_v36 = vsel %vm1444_vm5, %v2907_v0, %v2932_v1  ;;  %v17458_v0 = vrot.slane %v12760_v60, 1  ;;  %v12965_v34 = vadd.s32 288, %v12255_v37  ;;  %v330_v11 = vadd.f32 0.5, %v282_v7 }
 0x28b   : > { %v2358_v39 = vpack.c.bf16 %v2322_v59, %v2321_v27  ;;  %v2845_v28 = vsel %vm656_vm7, %v12518_v15, %v2704_v16  ;;  %v2275_v57 = vadd.f32 %v2156_v17, %v12261_v53  ;;  %3637 = vmatmul.mubr.bf16.gmra.mrb[52].mxu1 %v2933_v36  ;;  %v473_v27 = vmul.f32 24.0, %v425_v50 }
 0x28c   : > { %v2943_v54 = vshrl.u32 %v2845_v28, 16  ;;  %v2946_v9 = vshll.u32 %v2845_v28, 16  ;;  %10705 = vmatprep.mubr.msk.bf16.mxu1 %vm656_vm7, %v12864_v38  ;;  %v331_v38 = vadd.f32 0.5, %v283_v23  ;;  %v2566_v59 = vshrl.u32 %v12773_v4, 16 }
 0x28d   : > { %v2382_v10 = vmul.bf16 %v2358_v39, %v12860_v29  ;;  %v2323_v47 = vadd.f32 %v2275_v57, %v17774_v2  ;;  %v12979_v16 = vsel %vm1444_vm5, %v12909_v40, %v3026_v61  ;;  %v520_v39 = vsub.f32 %v280_v14, %v472_v24  ;;  %v17775_v57 = vld [vmem:[#allocation10_spill] sm:$0xff] }
 0x28e   : > { %v2945_v15 = vrot.slane %v2943_v54, 3  ;;  %v2948_v53 = vrot.slane %v2946_v9, 4  ;;  %v2158_v17 = vpop.permute.xlu1 %2157  ;;  %v12967_v45 = vld [vmem:[#allocation2 + $0x60] sm:$0xff]  ;;  %v12983_v28 = vor.u32 %v3042_v32, %v3039_v19  ;;  %v2568_v9 = vor.u32 %v2566_v59, %v12779_v56 }
 0x28f   : > { %2406 = vst.msk [vmem:[#allocation2 + $0x68] sm:$0xff] %vm656_vm7, %v2382_v10  ;;  %v2276_v30 = vadd.f32 %v2158_v17, %v12268_v8  ;;  %v2570_v50 = vshll.u32 %v12967_v45, 16  ;;  %v12990_v8 = vsel %vm2781_vm13, %v2799_v33, %v17458_v0  ;;  %v17776_v40 = vcvt.s32.f32 %v12887_v22 }
 0x290   : > { %v2949_v36 = vor.u32 %v2948_v53, %v2945_v15  ;;  %v12997_v19 = vmul.f32 0.041666668, %v330_v11  ;;  %v12999_v32 = vmul.f32 0.041666668, %v331_v38  ;;  %v2805_v24 = vrot.slane %v12967_v45, 1  ;;  %v17777_v11 = vld [vmem:[#allocation14_spill] sm:$0xff] }
 0x291   : > { %v2324_v54 = vadd.f32 %v2276_v30, %v17775_v57  ;;  %v2572_v10 = vrot.slane %v2570_v50, 1  ;;  %v521_v2 = vsub.f32 %v17776_v40, %v473_v27  ;;  %v3054_v38 = vshrl.u32 %v12990_v8, 16 }
 0x292   : > { %v2706_v15 = vpop.permute.xlu0 %2705  ;;  %v2160_v26 = vpop.permute.xlu1 %2159  ;;  %v2950_v14 = vsel %vm1444_vm5, %v2932_v1, %v2949_v36  ;;  %v13011_v1 = vsel %vm1444_vm5, %v3026_v61, %v12983_v28  ;;  %v3057_v30 = vshll.u32 %v12990_v8, 16  ;;  %v2574_v40 = vshrl.u32 %v12967_v45, 16  ;;  %v17788_v8 = vld [vmem:[#allocation15_spill] sm:$0xff] }
 0x293   : > { %v2359_v33 = vpack.c.bf16 %v2324_v54, %v2323_v47  ;;  %v2847_v53 = vsel %vm656_vm7, %v12564_v58, %v2706_v15  ;;  %v2277_v56 = vadd.f32 %v2160_v26, %v12294_v5  ;;  %3645 = vmatmul.mubr.bf16.gmra.mrb[56].mxu1 %v2950_v14  ;;  %v2573_v22 = vsel %vm2473_vm8, %v2568_v9, %v2572_v10 }
 0x294   : > { %v2960_v27 = vshrl.u32 %v2847_v53, 16  ;;  %v2963_v17 = vshll.u32 %v2847_v53, 16  ;;  %10706 = vmatprep.mubr.msk.bf16.mxu1 %vm656_vm7, %v12874_v55  ;;  %2719 = vrot.lane.b32.xlu1 %v2573_v22, %s11345_s27  ;;  %v17461_v47 = vrot.slane %v12773_v4, 1  ;;  %v13021_v54 = vadd.s32 296, %v12255_v37  ;;  %v17778_v53 = vld [vmem:[#allocation17_spill] sm:$0xff] }
 0x295   : > { %v2383_v58 = vmul.bf16 %v2359_v33, %v12868_v63  ;;  %v2325_v5 = vadd.f32 %v2277_v56, %v17777_v11  ;;  %vm568_vm6 = vcmp.lt.f32.partialorder %v520_v39, 15.5  ;;  %vm569_vm9 = vcmp.lt.f32.partialorder %v521_v2, 15.5 }
 0x296   : > { %v2962_v59 = vrot.slane %v2960_v27, 3  ;;  %v2965_v50 = vrot.slane %v2963_v17, 4  ;;  %v2162_v57 = vpop.permute.xlu0 %2161  ;;  %v13018_v55 = vld [vmem:[#allocation2 + $0x68] sm:$0xff]  ;;  %v2806_v61 = vsel %vm2781_vm13, %v17461_v47, %v2805_v24  ;;  %v426_v14 = vfloor.f32 %v12997_v19 }
 0x297   : > { %2407 = vst.msk [vmem:[#allocation2 + $0x70] sm:$0xff] %vm656_vm7, %v2383_v58  ;;  %v2278_v9 = vadd.f32 %v2162_v57, %v12308_v13  ;;  %v2578_v15 = vshll.u32 %v13018_v55, 16  ;;  %v17457_v33 = vrot.slane %v13018_v55, 1  ;;  %v2576_v22 = vor.u32 %v2574_v40, %v2572_v10 }
 0x298   : > { %v2966_v26 = vor.u32 %v2965_v50, %v2962_v59  ;;  %2189 = vrot.lane.b32.xlu1 %v12534_v42, %s11345_s27  ;;  %v3088_v17 = vshrl.u32 %v2806_v61, 16  ;;  %v616_v39 = vsel %vm568_vm6, 1.0, %v17716_v6  ;;  %v3091_v59 = vshll.u32 %v2806_v61, 16 }
 0x299   : > { %v2326_v56 = vadd.f32 %v2278_v9, %v17778_v53  ;;  %v2580_v27 = vrot.slane %v2578_v15, 1  ;;  %v2808_v50 = vsel %vm2781_vm13, %v2805_v24, %v17457_v33 }
 0x29a   : > { %v2164_v13 = vpop.permute.xlu0 %2163  ;;  %v2708_v58 = vpop.permute.xlu1 %2707  ;;  %v2967_v11 = vsel %vm1444_vm5, %v2949_v36, %v2966_v26  ;;  %v617_v36 = vsel %vm569_vm9, 1.0, %v17716_v6  ;;  %v3105_v24 = vshrl.u32 %v2808_v50, 16  ;;  %v3108_v53 = vshll.u32 %v2808_v50, 16 }
 0x29b   : > { %v2360_v57 = vpack.c.bf16 %v2326_v56, %v2325_v5  ;;  %v2279_v19 = vadd.f32 %v2164_v13, %v12347_v51  ;;  %v2849_v9 = vsel %vm656_vm7, %v12608_v43, %v2708_v58  ;;  %3653 = vmatmul.mubr.bf16.gmra.mrb[60].mxu1 %v2967_v11  ;;  %v2581_v10 = vsel %vm2473_vm8, %v2576_v22, %v2580_v27  ;;  %v17779_v5 = vld [vmem:[#allocation23_spill] sm:$0xff] }
 0x29c   : > { %v2977_v40 = vshrl.u32 %v2849_v9, 16  ;;  %v2980_v15 = vshll.u32 %v2849_v9, 16  ;;  %10707 = vmatprep.mubr.msk.bf16.mxu1 %vm656_vm7, %v12941_v62  ;;  %2191 = vrot.lane.b32.xlu1 %v12544_v46, %s11345_s27  ;;  %v3090_v43 = vrot.slane %v3088_v17, 3  ;;  %v3093_v62 = vrot.slane %v3091_v59, 4 }
 0x29d   : > { %v2384_v51 = vmul.bf16 %v2360_v57, %v12936_v20  ;;  %v2327_v61 = vadd.f32 %v2279_v19, %v17779_v5  ;;  %2721 = vrot.lane.b32.xlu0 %v2581_v10, %s11345_s27  ;;  %v3107_v11 = vrot.slane %v3105_v24, 3  ;;  %v2582_v9 = vshrl.u32 %v13018_v55, 16 }
 0x29e   : > { %v2979_v56 = vrot.slane %v2977_v40, 3  ;;  %v2982_v22 = vrot.slane %v2980_v15, 4  ;;  %v2166_v13 = vpop.permute.xlu1 %2165  ;;  %v13053_v58 = vld [vmem:[#allocation2 + $0x70] sm:$0xff]  ;;  %v3110_v19 = vrot.slane %v3108_v53, 4  ;;  %v427_v17 = vfloor.f32 %v12999_v32  ;;  %v17780_v40 = vld [vmem:[#allocation25_spill] sm:$0xff] }
 0x29f   : > { %2408 = vst.msk [vmem:[#allocation2 + $0x78] sm:$0xff] %vm656_vm7, %v2384_v51  ;;  %v2280_v2 = vadd.f32 %v2166_v13, %v17704_v35  ;;  %v2586_v57 = vshll.u32 %v13053_v58, 16  ;;  %v17460_v50 = vcvt.s32.f32 %v12965_v34  ;;  %v17459_v10 = vcvt.s32.f32 %v13021_v54 }
 0x2a0   : > { %v2983_v5 = vor.u32 %v2982_v22, %v2979_v56  ;;  %v2584_v59 = vor.u32 %v2582_v9, %v2580_v27  ;;  %v13065_v35 = vor.u32 %v3110_v19, %v3107_v11  ;;  %v13068_v56 = vpack.c.bf16 %v617_v36, %v616_v39  ;;  %v17783_v39 = vld [vmem:[#allocation31_spill] sm:$0xff] }
 0x2a1   : > { %v2328_v15 = vadd.f32 %v2280_v2, %v17780_v40  ;;  %2193 = vrot.lane.b32.xlu0 %v12582_v21, %s11345_s27  ;;  %v2588_v24 = vrot.slane %v2586_v57, 1  ;;  %v474_v32 = vmul.f32 24.0, %v426_v14  ;;  %v13070_v22 = vor.u32 %v3093_v62, %v3090_v43  ;;  %v17782_v40 = vld [vmem:[#allocation9_spill] sm:$0xff] }
 0x2a2   : > { %v2710_v51 = vpop.permute.xlu0 %2709  ;;  %v2168_v13 = vpop.permute.xlu1 %2167  ;;  %v2984_v53 = vsel %vm1444_vm5, %v2966_v26, %v2983_v5  ;;  %17781 = vst [vmem:[#allocation48_spill] sm:$0xff] %v13068_v56  ;;  %v332_v26 = vadd.f32 0.5, %v17460_v50  ;;  %v475_v43 = vmul.f32 24.0, %v427_v17  ;;  %v2590_v17 = vshrl.u32 %v13053_v58, 16 }
 0x2a3   : > { %v2361_v33 = vpack.c.bf16 %v2328_v15, %v2327_v61  ;;  %v2851_v2 = vsel %vm656_vm7, %v12654_v49, %v2710_v51  ;;  %v2281_v0 = vadd.f32 %v2168_v13, %v17782_v40  ;;  %3663 = vmatmul.mubr.bf16.gmra.mrb[64].mxu1 %v2984_v53  ;;  %v2589_v27 = vsel %vm2473_vm8, %v2584_v59, %v2588_v24  ;;  %v17784_v61 = vld [vmem:[#allocation65_spill] sm:$0xff]  ;;  %v17786_v40 = vld [vmem:[#allocation4_spill] sm:$0xff] }
 0x2a4   : > { %v2994_v11 = vshrl.u32 %v2851_v2, 16  ;;  %v2997_v9 = vshll.u32 %v2851_v2, 16  ;;  %10708 = vmatprep.mubr.msk.bf16.mxu1 %vm656_vm7, %v12948_v31  ;;  %2723 = vrot.lane.b32.xlu1 %v2589_v27, %s11345_s27  ;;  %v13084_v14 = vsel %vm1444_vm5, %v13070_v22, %v13065_v35  ;;  %v333_v31 = vadd.f32 0.5, %v17459_v10 }
 0x2a5   : > { %v2385_v49 = vmul.bf16 %v2361_v33, %v12943_v18  ;;  %v2329_v36 = vadd.f32 %v2281_v0, %v17783_v39  ;;  %2195 = vrot.lane.b32.xlu0 %v17784_v61, %s11345_s27  ;;  %v13095_v59 = vadd.s32 304, %v12255_v37  ;;  %v13098_v51 = vadd.s32 312, %v12255_v37  ;;  %v17785_v0 = vld [vmem:[#allocation11_spill] sm:$0xff] }
 0x2a6   : > { %v2996_v62 = vrot.slane %v2994_v11, 3  ;;  %v2999_v57 = vrot.slane %v2997_v9, 4  ;;  %v2170_v19 = vpop.permute.xlu0 %2169  ;;  %v13092_v15 = vld [vmem:[#allocation2 + $0x78] sm:$0xff]  ;;  %v3056_v53 = vrot.slane %v3054_v38, 3  ;;  %v522_v27 = vsub.f32 %v282_v7, %v474_v32 }
 0x2a7   : > { %2409 = vst.msk [vmem:[#allocation2 + $0x80] sm:$0xff] %vm656_vm7, %v2385_v49  ;;  %v2282_v33 = vadd.f32 %v2170_v19, %v17785_v0  ;;  %v2594_v13 = vshll.u32 %v13092_v15, 16  ;;  %v3059_v11 = vrot.slane %v3057_v30, 4  ;;  %v380_v9 = vmul.f32 0.041666668, %v332_v26  ;;  %v17787_v49 = vld [vmem:[#allocation33_spill] sm:$0xff] }
 0x2a8   : > { %v3000_v2 = vor.u32 %v2999_v57, %v2996_v62  ;;  %2197 = vrot.lane.b32.xlu1 %v17786_v40, %s11345_s27  ;;  %v2592_v19 = vor.u32 %v2590_v17, %v2588_v24  ;;  %v381_v10 = vmul.f32 0.041666668, %v333_v31  ;;  %v523_v62 = vsub.f32 %v283_v23, %v475_v43  ;;  %v17791_v40 = vld [vmem:[#allocation16_spill] sm:$0xff] }
 0x2a9   : > { %v2330_v39 = vadd.f32 %v2282_v33, %v17787_v49  ;;  %v2596_v0 = vrot.slane %v2594_v13, 1  ;;  %v286_v57 = vcvt.s32.f32 %v13095_v59  ;;  %v287_v41 = vcvt.s32.f32 %v13098_v51 }
 0x2aa   : > { %v2172_v50 = vpop.permute.xlu0 %2171  ;;  %v2712_v47 = vpop.permute.xlu1 %2711  ;;  %v3001_v38 = vsel %vm1444_vm5, %v2983_v5, %v3000_v2  ;;  %v13126_v23 = vor.u32 %v3059_v11, %v3056_v53  ;;  %v428_v5 = vfloor.f32 %v380_v9  ;;  %vm570_vm10 = vcmp.lt.f32.partialorder %v522_v27, 15.5 }
 0x2ab   : > { %v2362_v7 = vpack.c.bf16 %v2330_v39, %v2329_v36  ;;  %v2283_v30 = vadd.f32 %v2172_v50, %v17788_v8  ;;  %v2853_v32 = vsel %vm656_vm7, %v12686_v52, %v2712_v47  ;;  %3673 = vmatmul.mubr.bf16.gmra.mrb[68].mxu1 %v3001_v38  ;;  %v2597_v24 = vsel %vm2473_vm8, %v2592_v19, %v2596_v0  ;;  %v17790_v50 = vld [vmem:[#allocation39_spill] sm:$0xff]  ;;  %v17794_v8 = vld [vmem:[#allocation41_spill] sm:$0xff] }
 0x2ac   : > { %v3011_v26 = vshrl.u32 %v2853_v32, 16  ;;  %v3014_v31 = vshll.u32 %v2853_v32, 16  ;;  %10709 = vmatprep.mubr.msk.bf16.mxu1 %vm656_vm7, %v12979_v16  ;;  %2199 = vrot.lane.b32.xlu1 %v17789_v25, %s11345_s27  ;;  %v429_v52 = vfloor.f32 %v381_v10  ;;  %v334_v16 = vadd.f32 0.5, %v286_v57  ;;  %v17795_v32 = vld [vmem:[#allocation21_spill] sm:$0xff] }
 0x2ad   : > { %v2386_v36 = vmul.bf16 %v2362_v7, %v12951_v3  ;;  %v2331_v43 = vadd.f32 %v2283_v30, %v17790_v50  ;;  %2725 = vrot.lane.b32.xlu0 %v2597_v24, %s11345_s27  ;;  %v335_v53 = vadd.f32 0.5, %v287_v41  ;;  %v2598_v9 = vshrl.u32 %v13092_v15, 16 }
 0x2ae   : > { %v3013_v47 = vrot.slane %v3011_v26, 3  ;;  %v3016_v33 = vrot.slane %v3014_v31, 4  ;;  %v2174_v17 = vpop.permute.xlu1 %2173  ;;  %v13131_v13 = vld [vmem:[#allocation2 + $0x80] sm:$0xff]  ;;  %vm571_vm11 = vcmp.lt.f32.partialorder %v523_v62, 15.5  ;;  %v618_v49 = vsel %vm570_vm10, 1.0, %v17716_v6 }
 0x2af   : > { %2410 = vst.msk [vmem:[#allocation2 + $0x88] sm:$0xff] %vm656_vm7, %v2386_v36  ;;  %v2284_v11 = vadd.f32 %v2174_v17, %v17791_v40  ;;  %v2602_v27 = vshll.u32 %v13131_v13, 16  ;;  %v476_v39 = vmul.f32 24.0, %v428_v5  ;;  %v17792_v19 = vrot.slane %v12773_v4, 1 }
 0x2b0   : > { %v3017_v10 = vor.u32 %v3016_v33, %v3013_v47  ;;  %v17793_v38 = vrot.slane %v12760_v60, 1  ;;  %v2600_v24 = vor.u32 %v2598_v9, %v2596_v0  ;;  %v477_v31 = vmul.f32 24.0, %v429_v52  ;;  %v17796_v33 = vld [vmem:[#allocation22_spill] sm:$0xff] }
 0x2b1   : > { %v2332_v30 = vadd.f32 %v2284_v11, %v17794_v8  ;;  %2201 = vrot.lane.b32.xlu0 %v17795_v32, %s11345_s27  ;;  %v2604_v26 = vrot.slane %v2602_v27, 1  ;;  %v619_v5 = vsel %vm571_vm11, 1.0, %v17716_v6  ;;  %v382_v50 = vmul.f32 0.041666668, %v334_v16 }
 0x2b2   : > { %v2804_v7 = vsel %vm2781_vm13, %v17793_v38, %v17792_v19  ;;  %v2714_v25 = vpop.permute.xlu0 %2713  ;;  %v2176_v62 = vpop.permute.xlu1 %2175  ;;  %v3018_v36 = vsel %vm1444_vm5, %v3000_v2, %v3017_v10  ;;  %v383_v4 = vmul.f32 0.041666668, %v335_v53  ;;  %v17799_v27 = vcvt.s32.f32 %v13021_v54 }
 0x2b3   : > { %v2363_v47 = vpack.c.bf16 %v2332_v30, %v2331_v43  ;;  %v2855_v60 = vsel %vm656_vm7, %v12712_v44, %v2714_v25  ;;  %v2285_v17 = vadd.f32 %v2176_v62, %v17796_v33  ;;  %3683 = vmatmul.mubr.bf16.gmra.mrb[72].mxu1 %v3018_v36  ;;  %v2605_v40 = vsel %vm2473_vm8, %v2600_v24, %v2604_v26  ;;  %v17797_v43 = vld [vmem:[#allocation45_spill] sm:$0xff] }
 0x2b4   : > { %v3028_v0 = vshrl.u32 %v2855_v60, 16  ;;  %v3031_v11 = vshll.u32 %v2855_v60, 16  ;;  %10710 = vmatprep.mubr.msk.bf16.mxu1 %vm656_vm7, %v13011_v1  ;;  %2727 = vrot.lane.b32.xlu1 %v2605_v40, %s11345_s27  ;;  %v3071_v2 = vshrl.u32 %v2804_v7, 16  ;;  %v3074_v52 = vshll.u32 %v2804_v7, 16  ;;  %v17800_v7 = vld [vmem:[#allocation24_spill] sm:$0xff]  ;;  %v17802_v60 = vld [vmem:[#allocation47_spill] sm:$0xff] }
 0x2b5   : > { %v2387_v16 = vmul.bf16 %v2363_v47, %v13068_v56  ;;  %v2333_v53 = vadd.f32 %v2285_v17, %v17797_v43  ;;  %v17798_v44 = vcvt.s32.f32 %v12965_v34  ;;  %v525_v19 = vsub.f32 %v17799_v27, %v477_v31  ;;  %v17803_v43 = vld [vmem:[#allocation30_spill] sm:$0xff]  ;;  %v17804_v27 = vld [vmem:[#allocation51_spill] sm:$0xff] }
 0x2b6   : > { %v3030_v38 = vrot.slane %v3028_v0, 3  ;;  %v3033_v8 = vrot.slane %v3031_v11, 4  ;;  %v2178_v30 = vpop.permute.xlu0 %2177  ;;  %v13165_v32 = vld [vmem:[#allocation2 + $0x88] sm:$0xff]  ;;  %v430_v1 = vfloor.f32 %v382_v50  ;;  %v431_v24 = vfloor.f32 %v383_v4  ;;  %v2472_v56 = vld [vmem:[#allocation2 + $0xd8] sm:$0x1f] }
 0x2b7   : > { %v524_v9 = vsub.f32 %v17798_v44, %v476_v39  ;;  %2411 = vst.msk [vmem:[#allocation2 + $0x90] sm:$0xff] %vm656_vm7, %v2387_v16  ;;  %v2286_v25 = vadd.f32 %v2178_v30, %v17800_v7  ;;  %v3061_v62 = vsel %vm1444_vm5, %v12983_v28, %v13126_v23  ;;  %v2606_v34 = vshrl.u32 %v13131_v13, 16 }
 0x2b8   : > { %v2610_v54 = vshll.u32 %v13165_v32, 16  ;;  %v3034_v39 = vor.u32 %v3033_v8, %v3030_v38  ;;  %v13174_v31 = vpack.c.bf16 %v619_v5, %v618_v49  ;;  %v3073_v36 = vrot.slane %v3071_v2, 3 }
 0x2b9   : > { %v3076_v47 = vrot.slane %v3074_v52, 4  ;;  %v2334_v50 = vadd.f32 %v2286_v25, %v17802_v60  ;;  %v2608_v4 = vor.u32 %v2606_v34, %v2604_v26  ;;  %vm572_vm12 = vcmp.lt.f32.partialorder %v524_v9, 15.5 }
 0x2ba   : > { %17801 = vst [vmem:[#allocation28_spill] sm:$0xff] %v13174_v31  ;;  %v2612_v33 = vrot.slane %v2610_v54, 1  ;;  %v2180_v17 = vpop.permute.xlu0 %2179  ;;  %v2716_v40 = vpop.permute.xlu1 %2715  ;;  %v3035_v0 = vsel %vm1444_vm5, %v3017_v10, %v3034_v39  ;;  %vm573_vm14 = vcmp.lt.f32.partialorder %v525_v19, 15.5  ;;  %v478_v28 = vmul.f32 24.0, %v430_v1 }
 0x2bb   : > { %v479_v11 = vmul.f32 24.0, %v431_v24  ;;  %v2364_v16 = vpack.c.bf16 %v2334_v50, %v2333_v53  ;;  %v2287_v44 = vadd.f32 %v2180_v17, %v17803_v43  ;;  %v2857_v49 = vsel %vm656_vm7, %v12740_v48, %v2716_v40  ;;  %3693 = vmatmul.mubr.bf16.gmra.mrb[76].mxu1 %v3035_v0  ;;  %v11330_v40 = vld [vmem:[#allocation2 + $0x50] sm:$0xff] }
 0x2bc   : > { %v2613_v5 = vsel %vm2473_vm8, %v2608_v4, %v2612_v33  ;;  %v3045_v2 = vshrl.u32 %v2857_v49, 16  ;;  %v3048_v26 = vshll.u32 %v2857_v49, 16  ;;  %10711 = vmatprep.mubr.msk.bf16.mxu1 %vm656_vm7, %v3061_v62  ;;  %v3077_v52 = vor.u32 %v3076_v47, %v3073_v36  ;;  %v17805_v62 = vld [vmem:[#allocation32_spill] sm:$0xff]  ;;  %v17807_v47 = vld [vmem:[#allocation53_spill] sm:$0xff] }
 0x2bd   : > { %2729 = vrot.lane.b32.xlu0 %v2613_v5, %s11345_s27  ;;  %v2388_v10 = vmul.bf16 %v2364_v16, %v13174_v31  ;;  %v2335_v38 = vadd.f32 %v2287_v44, %v17804_v27  ;;  %v620_v53 = vsel %vm572_vm12, 1.0, %v17716_v6  ;;  %v621_v48 = vsel %vm573_vm14, 1.0, %v17716_v6 }
 0x2be   : > { %v3047_v8 = vrot.slane %v3045_v2, 3  ;;  %v3050_v30 = vrot.slane %v3048_v26, 4  ;;  %v2182_v1 = vpop.permute.xlu1 %2181  ;;  %v13190_v24 = vld [vmem:[#allocation2 + $0x90] sm:$0xff]  ;;  %v526_v7 = vsub.f32 %v286_v57, %v478_v28  ;;  %v527_v25 = vsub.f32 %v287_v41, %v479_v11 }
 0x2bf   : > { %2412 = vst.msk [vmem:[#allocation2 + $0x98] sm:$0xff] %vm656_vm7, %v2388_v10  ;;  %v2288_v34 = vadd.f32 %v2182_v1, %v17805_v62  ;;  %v2614_v9 = vshrl.u32 %v13165_v32, 16  ;;  %v2618_v19 = vshll.u32 %v13190_v24, 16  ;;  %v13200_v36 = vpack.c.bf16 %v621_v48, %v620_v53  ;;  %v17808_v28 = vld [vmem:[#allocation38_spill] sm:$0xff] }
 0x2c0   : > { %v3051_v54 = vor.u32 %v3050_v30, %v3047_v8  ;;  %v3078_v41 = vsel %vm1444_vm5, %v13126_v23, %v3077_v52  ;;  %vm574_vm15 = vcmp.lt.f32.partialorder %v526_v7, 15.5  ;;  %vm575_vm0 = vcmp.lt.f32.partialorder %v527_v25, 15.5  ;;  %v17809_v23 = vld [vmem:[#allocation61_spill] sm:$0xff]  ;;  %v17812_v7 = vld [vmem:[#allocation62_spill] sm:$0xff] }
 0x2c1   : > { %17806 = vst [vmem:[#allocation49_spill] sm:$0xff] %v13200_v36  ;;  %v2336_v60 = vadd.f32 %v2288_v34, %v17807_v47  ;;  %v2616_v50 = vor.u32 %v2614_v9, %v2612_v33  ;;  %v2620_v4 = vrot.slane %v2618_v19, 1  ;;  %v622_v2 = vsel %vm574_vm15, 1.0, %v17716_v6 }
 0x2c2   : > { %v2718_v59 = vpop.permute.xlu0 %2717  ;;  %v2184_v57 = vpop.permute.xlu1 %2183  ;;  %v3052_v51 = vsel %vm1444_vm5, %v3034_v39, %v3051_v54  ;;  %v623_v26 = vsel %vm575_vm0, 1.0, %v17716_v6  ;;  %v2622_v48 = vshrl.u32 %v13190_v24, 16  ;;  %vm8575_vm14 = vsmask.f32 256 }
 0x2c3   : > { %v2365_v17 = vpack.c.bf16 %v2336_v60, %v2335_v38  ;;  %v2859_v0 = vsel %vm656_vm7, %v11330_v40, %v2718_v59  ;;  %v2289_v11 = vadd.f32 %v2184_v57, %v17808_v28  ;;  %3703 = vmatmul.mubr.bf16.gmra.mrb[80].mxu1 %v3052_v51  ;;  %v2621_v16 = vsel %vm2473_vm8, %v2616_v50, %v2620_v4  ;;  %v17810_v38 = vld [vmem:[#allocation40_spill] sm:$0xff] }
 0x2c4   : > { %v3062_v33 = vshrl.u32 %v2859_v0, 16  ;;  %v3065_v43 = vshll.u32 %v2859_v0, 16  ;;  %10712 = vmatprep.mubr.msk.bf16.mxu1 %vm656_vm7, %v3078_v41  ;;  %2731 = vrot.lane.b32.xlu1 %v2621_v16, %s11345_s27  ;;  %v13225_v1 = vpack.c.bf16 %v623_v26, %v622_v2  ;;  %v2624_v34 = vor.u32 %v2622_v48, %v2620_v4  ;;  %v17813_v60 = vld [vmem:[#allocation44_spill] sm:$0xff] }
 0x2c5   : > { %v2389_v39 = vmul.bf16 %v2365_v17, %v13200_v36  ;;  %v2337_v44 = vadd.f32 %v2289_v11, %v17809_v23  ;;  %v3095_v59 = vsel %vm1444_vm5, %v3077_v52, %v13070_v22  ;;  %v17814_v51 = vld [vmem:[#allocation64_spill] sm:$0xff]  ;;  %v240_v23 = vadd.s32 320, %v12255_v37 }
 0x2c6   : > { %v3064_v49 = vrot.slane %v3062_v33, 3  ;;  %v3067_v5 = vrot.slane %v3065_v43, 4  ;;  %v2186_v10 = vpop.permute.xlu0 %2185  ;;  %v13217_v27 = vld [vmem:[#allocation2 + $0x98] sm:$0xff]  ;;  %17811 = vst [vmem:[#allocation34_spill] sm:$0xff] %v13225_v1  ;;  %v242_v2 = vadd.s32 336, %v12255_v37  ;;  %v243_v26 = vadd.s32 344, %v12255_v37 }
 0x2c7   : > { %2413 = vst.msk [vmem:[#allocation2 + $0xa0] sm:$0xff] %vm656_vm7, %v2389_v39  ;;  %v2290_v53 = vadd.f32 %v2186_v10, %v17810_v38  ;;  %v2626_v8 = vshll.u32 %v13217_v27, 16 }
 0x2c8   : > { %v13223_v30 = vor.u32 %v3067_v5, %v3064_v49  ;;  %v288_v49 = vcvt.s32.f32 %v240_v23  ;;  %v291_v48 = vcvt.s32.f32 %v243_v26  ;;  %v17815_v23 = vrot.slane %v13018_v55, 1 }
 0x2c9   : > { %v2338_v62 = vadd.f32 %v2290_v53, %v17812_v7  ;;  %v2628_v25 = vrot.slane %v2626_v8, 1  ;;  %v290_v53 = vcvt.s32.f32 %v242_v2 }
 0x2ca   : > { %v2188_v9 = vpop.permute.xlu0 %2187  ;;  %v3069_v19 = vsel %vm1444_vm5, %v3051_v54, %v13223_v30  ;;  %v2630_v54 = vshrl.u32 %v13217_v27, 16  ;;  %v336_v10 = vadd.f32 0.5, %v288_v49 }
 0x2cb   : > { %v2366_v47 = vpack.c.bf16 %v2338_v62, %v2337_v44  ;;  %v2291_v50 = vadd.f32 %v2188_v9, %v17813_v60  ;;  %3713 = vmatmul.mubr.bf16.gmra.mrb[84].mxu1 %v3069_v19  ;;  %v2629_v57 = vsel %vm2473_vm8, %v2624_v34, %v2628_v25  ;;  %v241_v44 = vadd.s32 328, %v12255_v37 }
 0x2cc   : > { %10713 = vmatprep.mubr.msk.bf16.mxu1 %vm656_vm7, %v3095_v59  ;;  %2733 = vrot.lane.b32.xlu0 %v2629_v57, %s11345_s27  ;;  %v2632_v22 = vor.u32 %v2630_v54, %v2628_v25  ;;  %v384_v8 = vmul.f32 0.041666668, %v336_v10  ;;  %v338_v62 = vadd.f32 0.5, %v290_v53  ;;  %v339_v34 = vadd.f32 0.5, %v291_v48 }
 0x2cd   : > { %v2390_v4 = vmul.bf16 %v2366_v47, %v13225_v1  ;;  %v13238_v41 = vadd.f32 %v2291_v50, %v17814_v51  ;;  %v289_v5 = vcvt.s32.f32 %v241_v44  ;;  %v13261_v60 = vadd.s32 352, %v12255_v37 }
 0x2ce   : > { %v13240_v17 = vld [vmem:[#allocation2 + $0xa0] sm:$0xff]  ;;  %v432_v25 = vfloor.f32 %v384_v8  ;;  %v386_v19 = vmul.f32 0.041666668, %v338_v62  ;;  %v387_v47 = vmul.f32 0.041666668, %v339_v34  ;;  %v13264_v50 = vadd.s32 360, %v12255_v37 }
 0x2cf   : > { %2414 = vst.msk [vmem:[#allocation2 + $0xa8] sm:$0xff] %vm656_vm7, %v2390_v4  ;;  %v2634_v40 = vshll.u32 %v13240_v17, 16  ;;  %v2638_v11 = vshrl.u32 %v13240_v17, 16  ;;  %v337_v38 = vadd.f32 0.5, %v289_v5  ;;  %v2809_v54 = vrot.slane %v13053_v58, 1 }
 0x2d0   : > { %v480_v59 = vmul.f32 24.0, %v432_v25  ;;  %v434_v4 = vfloor.f32 %v386_v19  ;;  %v435_v51 = vfloor.f32 %v387_v47 }
 0x2d1   : > { %v2636_v52 = vrot.slane %v2634_v40, 1  ;;  %v385_v7 = vmul.f32 0.041666668, %v337_v38  ;;  %v17464_v40 = vcvt.s32.f32 %v13261_v60  ;;  %v2810_v44 = vsel %vm2781_vm13, %v17815_v23, %v2809_v54 }
 0x2d2   : > { %v3122_v38 = vshrl.u32 %v2810_v44, 16  ;;  %v3125_v8 = vshll.u32 %v2810_v44, 16 }
 0x2d3   : > { %v2637_v0 = vsel %vm2473_vm8, %v2632_v22, %v2636_v52  ;;  %v2640_v33 = vor.u32 %v2638_v11, %v2636_v52  ;;  %v433_v9 = vfloor.f32 %v385_v7  ;;  %v17463_v22 = vcvt.s32.f32 %v13264_v50 }
 0x2d4   : > { %2735 = vrot.lane.b32.xlu1 %v2637_v0, %s11345_s27  ;;  %v13270_v52 = vadd.s32 368, %v12255_v37  ;;  %v528_v0 = vsub.f32 %v288_v49, %v480_v59  ;;  %v340_v2 = vadd.f32 0.5, %v17464_v40  ;;  %v2811_v7 = vrot.slane %v13092_v15, 1 }
 0x2d5   : > { %v481_v57 = vmul.f32 24.0, %v433_v9  ;;  %v341_v26 = vadd.f32 0.5, %v17463_v22  ;;  %v11331_v9 = vld [vmem:[#allocation2 + $0x58] sm:$0xff] }
 0x2d6   : > { %v13247_v28 = vld [vmem:[#allocation2 + $0xa8] sm:$0xff]  ;;  %v17462_v10 = vcvt.s32.f32 %v13270_v52  ;;  %vm576_vm1 = vcmp.lt.f32.partialorder %v528_v0, 15.5  ;;  %v388_v34 = vmul.f32 0.041666668, %v340_v2  ;;  %v3127_v0 = vrot.slane %v3125_v8, 4 }
 0x2d7   : > { %v2642_v16 = vshll.u32 %v13247_v28, 16  ;;  %v529_v11 = vsub.f32 %v289_v5, %v481_v57  ;;  %v389_v25 = vmul.f32 0.041666668, %v341_v26  ;;  %v624_v47 = vsel %vm576_vm1, 1.0, %v17716_v6  ;;  %v17816_v26 = vld [vmem:[#allocation46_spill] sm:$0xff] }
 0x2d8   : > { %v436_v44 = vfloor.f32 %v388_v34 }
 0x2d9   : > { %v13251_v43 = vrot.slane %v2642_v16, 1  ;;  %v482_v16 = vmul.f32 24.0, %v434_v4  ;;  %vm577_vm2 = vcmp.lt.f32.partialorder %v529_v11, 15.5  ;;  %v2812_v11 = vsel %vm2781_vm13, %v2809_v54, %v2811_v7 }
 0x2da   : > { %v625_v59 = vsel %vm577_vm2, 1.0, %v17716_v6  ;;  %v437_v2 = vfloor.f32 %v389_v25  ;;  %v3139_v22 = vshrl.u32 %v2812_v11, 16  ;;  %v3142_v40 = vshll.u32 %v2812_v11, 16 }
 0x2db   : > { %v2645_v39 = vsel %vm2473_vm8, %v2640_v33, %v13251_v43  ;;  %v13273_v33 = vadd.s32 376, %v12255_v37  ;;  %v530_v49 = vsub.f32 %v290_v53, %v482_v16  ;;  %v342_v53 = vadd.f32 0.5, %v17462_v10 }
 0x2dc   : > { %2737 = vrot.lane.b32.xlu0 %v2645_v39, %s11345_s27  ;;  %v483_v39 = vmul.f32 24.0, %v435_v51  ;;  %v3124_v51 = vrot.slane %v3122_v38, 3  ;;  %v2813_v10 = vrot.slane %v13131_v13, 1  ;;  %v17818_v38 = vld [vmem:[#allocation66_spill] sm:$0xff] }
 0x2dd   : > { %v17467_v5 = vcvt.s32.f32 %v13273_v33  ;;  %vm578_vm4 = vcmp.lt.f32.partialorder %v530_v49, 15.5 }
 0x2de   : > { %v531_v37 = vsub.f32 %v291_v48, %v483_v39  ;;  %v626_v54 = vsel %vm578_vm4, 1.0, %v17716_v6  ;;  %v2814_v49 = vsel %vm2781_vm13, %v2811_v7, %v2813_v10  ;;  %v17822_v7 = vcvt.s32.f32 %v13264_v50 }
 0x2df   : > { %v343_v48 = vadd.f32 0.5, %v17467_v5  ;;  %v13295_v5 = vpack.c.bf16 %v625_v59, %v624_v47  ;;  %v17819_v47 = vld [vmem:[#allocation50_spill] sm:$0xff] }
 0x2e0   : > { %vm579_vm6 = vcmp.lt.f32.partialorder %v531_v37, 15.5 }
 0x2e1   : > { %v391_v1 = vmul.f32 0.041666668, %v343_v48  ;;  %17817 = vst [vmem:[#allocation54_spill] sm:$0xff] %v13295_v5  ;;  %v627_v34 = vsel %vm579_vm6, 1.0, %v17716_v6 }
 0x306   : > { %v2720_v62 = vpop.permute.xlu1 %2719 }
 0x307   : > { %v2861_v19 = vsel %vm656_vm7, %v11331_v9, %v2720_v62  ;;  %v390_v9 = vmul.f32 0.041666668, %v342_v53 }
 0x308   : > { %v3079_v57 = vshrl.u32 %v2861_v19, 16  ;;  %v3082_v4 = vshll.u32 %v2861_v19, 16 }
 0x30a   : > { %v3081_v16 = vrot.slane %v3079_v57, 3  ;;  %v3084_v39 = vrot.slane %v3082_v4, 4  ;;  %v2190_v23 = vpop.permute.xlu1 %2189  ;;  %v13304_v57 = vor.u32 %v3127_v0, %v3124_v51  ;;  %v484_v4 = vmul.f32 24.0, %v436_v44 }
 0x30b   : > { %v2292_v62 = vadd.f32 %v2190_v23, %v17816_v26  ;;  %v3144_v51 = vrot.slane %v3142_v40, 4  ;;  %v439_v0 = vfloor.f32 %v391_v1  ;;  %v17820_v23 = vld [vmem:[#allocation19_spill] sm:$0xff]  ;;  %v3159_v1 = vshll.u32 %v2814_v49, 16 }
 0x30c   : > { %v3085_v19 = vor.u32 %v3084_v39, %v3081_v16  ;;  %v485_v16 = vmul.f32 24.0, %v437_v2  ;;  %v438_v39 = vfloor.f32 %v390_v9 }
 0x30d   : > { %v2340_v8 = vadd.f32 %v2292_v62, %v17818_v38  ;;  %v17821_v62 = vcvt.s32.f32 %v13261_v60  ;;  %v3129_v60 = vsel %vm1444_vm5, %v13065_v35, %v13304_v57  ;;  %v487_v50 = vmul.f32 24.0, %v439_v0 }
 0x30e   : > { %v2192_v25 = vpop.permute.xlu1 %2191  ;;  %v3086_v53 = vsel %vm1444_vm5, %v13223_v30, %v3085_v19  ;;  %v3141_v30 = vrot.slane %v3139_v22, 3  ;;  %v533_v38 = vsub.f32 %v17822_v7, %v485_v16  ;;  %v486_v40 = vmul.f32 24.0, %v438_v39  ;;  %v17828_v7 = vld [vmem:[#allocation6_spill] sm:$0xff] }
 0x30f   : > { %v2367_v48 = vpack.c.bf16 %v2340_v8, %v13238_v41  ;;  %v2293_v59 = vadd.f32 %v2192_v25, %v17819_v47  ;;  %v2722_v11 = vpop.permute.xlu0 %2721  ;;  %3723 = vmatmul.mubr.bf16.gmra.mrb[88].mxu1 %v3086_v53  ;;  %v532_v9 = vsub.f32 %v17821_v62, %v484_v4  ;;  %v3156_v8 = vshrl.u32 %v2814_v49, 16  ;;  %v17824_v53 = vld [vmem:[#allocation52_spill] sm:$0xff] }
 0x310   : > { %v2863_v37 = vsel %vm656_vm7, %v12967_v45, %v2722_v11  ;;  %10714 = vmatprep.mubr.msk.bf16.mxu1 %vm656_vm7, %v13084_v14  ;;  %v13322_v25 = vpack.c.bf16 %v627_v34, %v626_v54  ;;  %v13328_v47 = vor.u32 %v3144_v51, %v3141_v30  ;;  %v2815_v16 = vrot.slane %v13165_v32, 1 }
 0x311   : > { %v2391_v41 = vmul.bf16 %v2367_v48, %v13295_v5  ;;  %v2341_v44 = vadd.f32 %v2293_v59, %v17820_v23  ;;  %v3096_v2 = vshrl.u32 %v2863_v37, 16  ;;  %v3099_v26 = vshll.u32 %v2863_v37, 16  ;;  %v17825_v59 = vld [vmem:[#allocation68_spill] sm:$0xff] }
 0x312   : > { %17823 = vst [vmem:[#allocation36_spill] sm:$0xff] %v13322_v25  ;;  %vm580_vm9 = vcmp.lt.f32.partialorder %v532_v9, 15.5  ;;  %vm581_vm10 = vcmp.lt.f32.partialorder %v533_v38, 15.5  ;;  %v3158_v39 = vrot.slane %v3156_v8, 3  ;;  %v17826_v35 = vcvt.s32.f32 %v13270_v52 }
 0x313   : > { %2415 = vst.msk [vmem:[#allocation2 + $0xb0] sm:$0xff] %vm656_vm7, %v2391_v41  ;;  %v3098_v45 = vrot.slane %v3096_v2, 3  ;;  %v3101_v14 = vrot.slane %v3099_v26, 4  ;;  %v2194_v22 = vpop.permute.xlu0 %2193  ;;  %v3161_v30 = vrot.slane %v3159_v1, 4  ;;  %v628_v26 = vsel %vm580_vm9, 1.0, %v17716_v6 }
 0x314   : > { %v2294_v48 = vadd.f32 %v2194_v22, %v17824_v53  ;;  %v534_v41 = vsub.f32 %v17826_v35, %v486_v40  ;;  %v629_v62 = vsel %vm581_vm10, 1.0, %v17716_v6  ;;  %v2816_v52 = vsel %vm2781_vm13, %v2813_v10, %v2815_v16 }
 0x315   : > { %v3102_v4 = vor.u32 %v3101_v14, %v3098_v45  ;;  %v13356_v10 = vpack.c.bf16 %v629_v62, %v628_v26  ;;  %v3146_v1 = vsel %vm1444_vm5, %v13304_v57, %v13328_v47  ;;  %v13361_v53 = vor.u32 %v3161_v30, %v3158_v39 }
 0x316   : > { %v2342_v11 = vadd.f32 %v2294_v48, %v17825_v59  ;;  %v2724_v37 = vpop.permute.xlu1 %2723  ;;  %vm582_vm11 = vcmp.lt.f32.partialorder %v534_v41, 15.5  ;;  %v17830_v48 = vld [vmem:[#allocation27_spill] sm:$0xff]  ;;  %v3176_v41 = vshll.u32 %v2816_v52, 16  ;;  %v2817_v30 = vrot.slane %v13190_v24, 1 }
 0x317   : > { %v2865_v54 = vsel %vm656_vm7, %v13018_v55, %v2724_v37  ;;  %v2196_v34 = vpop.permute.xlu0 %2195  ;;  %v3103_v49 = vsel %vm1444_vm5, %v3085_v19, %v3102_v4  ;;  %v17827_v55 = vcvt.s32.f32 %v13273_v33  ;;  %v2646_v33 = vshrl.u32 %v13247_v28, 16  ;;  %17829 = vst [vmem:[#allocation56_spill] sm:$0xff] %v13356_v10 }
 0x318   : > { %v2368_v51 = vpack.c.bf16 %v2342_v11, %v2341_v44  ;;  %v3113_v0 = vshrl.u32 %v2865_v54, 16  ;;  %v3116_v23 = vshll.u32 %v2865_v54, 16  ;;  %v2295_v2 = vadd.f32 %v2196_v34, %v12534_v42  ;;  %3733 = vmatmul.mubr.bf16.gmra.mrb[92].mxu1 %v3103_v49 }
 0x319   : > { %10715 = vmatprep.mubr.msk.bf16.mxu1 %vm656_vm7, %v3129_v60  ;;  %v535_v9 = vsub.f32 %v17827_v55, %v487_v50  ;;  %v630_v37 = vsel %vm582_vm11, 1.0, %v17716_v6  ;;  %v3173_v54 = vshrl.u32 %v2816_v52, 16 }
 0x31a   : > { %v2392_v19 = vmul.bf16 %v2368_v51, %v13322_v25  ;;  %v3115_v44 = vrot.slane %v3113_v0, 3  ;;  %v3118_v42 = vrot.slane %v3116_v23, 4  ;;  %v2343_v38 = vadd.f32 %v2295_v2, %v17828_v7  ;;  %v2198_v8 = vpop.permute.xlu1 %2197  ;;  %v13350_v45 = vld [vmem:[#allocation2 + $0xb0] sm:$0xff]  ;;  %v17831_v23 = vld [vmem:[#allocation29_spill] sm:$0xff] }
 0x31b   : > { %v2296_v14 = vadd.f32 %v2198_v8, %v12544_v46  ;;  %v2650_v22 = vshll.u32 %v13350_v45, 16  ;;  %v2648_v46 = vor.u32 %v2646_v33, %v13251_v43  ;;  %vm583_vm12 = vcmp.lt.f32.partialorder %v535_v9, 15.5 }
 0x31c   : > { %2416 = vst.msk [vmem:[#allocation2 + $0xb8] sm:$0xff] %vm656_vm7, %v2392_v19  ;;  %v3119_v40 = vor.u32 %v3118_v42, %v3115_v44  ;;  %v2825_v34 = vrot.slane %v13350_v45, 1  ;;  %v2823_v51 = vrot.slane %v13247_v28, 1  ;;  %v3175_v62 = vrot.slane %v3173_v54, 3 }
 0x31d   : > { %v2344_v60 = vadd.f32 %v2296_v14, %v17830_v48  ;;  %v2652_v50 = vrot.slane %v2650_v22, 1  ;;  %v3178_v42 = vrot.slane %v3176_v41, 4  ;;  %v2818_v8 = vsel %vm2781_vm13, %v2815_v16, %v2817_v30  ;;  %v17833_v48 = vld [vmem:[#allocation35_spill] sm:$0xff] }
 0x31e   : > { %v2200_v59 = vpop.permute.xlu1 %2199  ;;  %v3120_v11 = vsel %vm1444_vm5, %v3102_v4, %v3119_v40  ;;  %v631_v4 = vsel %vm583_vm12, 1.0, %v17716_v6  ;;  %v2826_v6 = vsel %vm2781_vm13, %v2823_v51, %v2825_v34 }
 0x31f   : > { %v2369_v49 = vpack.c.bf16 %v2344_v60, %v2343_v38  ;;  %v2297_v35 = vadd.f32 %v2200_v59, %v12582_v21  ;;  %v2726_v57 = vpop.permute.xlu0 %2725  ;;  %v2653_v39 = vsel %vm2473_vm8, %v2648_v46, %v2652_v50  ;;  %v13386_v52 = vpack.c.bf16 %v631_v4, %v630_v37 }
 0x320   : > { %v2867_v43 = vsel %vm656_vm7, %v13053_v58, %v2726_v57  ;;  %3743 = vmatmul.mubr.bf16.gmra.mrb[96].mxu1 %v3120_v11  ;;  %2739 = vrot.lane.b32.xlu1 %v2653_v39, %s11345_s27  ;;  %v3163_v58 = vsel %vm1444_vm5, %v13328_v47, %v13361_v53  ;;  %v2654_v38 = vshrl.u32 %v13350_v45, 16  ;;  %v3258_v33 = vshrl.u32 %v2826_v6, 16 }
 0x321   : > { %v2393_v0 = vmul.bf16 %v2369_v49, %v13356_v10  ;;  %v2345_v21 = vadd.f32 %v2297_v35, %v17831_v23  ;;  %v3130_v2 = vshrl.u32 %v2867_v43, 16  ;;  %v3133_v26 = vshll.u32 %v2867_v43, 16  ;;  %10716 = vmatprep.mubr.msk.bf16.mxu1 %vm656_vm7, %v3146_v1  ;;  %17832 = vst [vmem:[#allocation8_spill] sm:$0xff] %v13386_v52 }
 0x322   : > { %v3261_v22 = vshll.u32 %v2826_v6, 16  ;;  %v2656_v59 = vor.u32 %v2654_v38, %v2652_v50  ;;  %v2819_v11 = vrot.slane %v13217_v27, 1  ;;  %v3190_v49 = vshrl.u32 %v2818_v8, 16  ;;  %v13415_v6 = vld [vmem:[#allocation2 + $0xd0] sm:$0xff] }
 0x323   : > { %2417 = vst.msk [vmem:[#allocation2 + $0xc0] sm:$0xff] %vm656_vm7, %v2393_v0  ;;  %v3132_v55 = vrot.slane %v3130_v2, 3  ;;  %v3135_v9 = vrot.slane %v3133_v26, 4  ;;  %v2202_v19 = vpop.permute.xlu0 %2201  ;;  %v13388_v44 = vld [vmem:[#allocation2 + $0xb8] sm:$0xff]  ;;  %v3260_v50 = vrot.slane %v3258_v33, 3 }
 0x324   : > { %v2298_v7 = vadd.f32 %v2202_v19, %v17784_v61  ;;  %v2658_v47 = vshll.u32 %v13388_v44, 16  ;;  %v2827_v1 = vrot.slane %v13388_v44, 1  ;;  %v3263_v43 = vrot.slane %v3261_v22, 4 }
 0x325   : > { %v3136_v14 = vor.u32 %v3135_v9, %v3132_v55  ;;  %v3179_v19 = vor.u32 %v3178_v42, %v3175_v62  ;;  %v2820_v62 = vsel %vm2781_vm13, %v2817_v30, %v2819_v11 }
 0x326   : > { %v2346_v60 = vadd.f32 %v2298_v7, %v17833_v48  ;;  %v2728_v46 = vpop.permute.xlu1 %2727  ;;  %v2660_v61 = vrot.slane %v2658_v47, 1  ;;  %v2828_v16 = vsel %vm2781_vm13, %v2825_v34, %v2827_v1  ;;  %v3193_v34 = vshll.u32 %v2818_v8, 16 }
 0x327   : > { %v2869_v37 = vsel %vm656_vm7, %v13092_v15, %v2728_v46  ;;  %v3137_v54 = vsel %vm1444_vm5, %v3119_v40, %v3136_v14  ;;  %v3275_v15 = vshrl.u32 %v2828_v16, 16  ;;  %v3278_v4 = vshll.u32 %v2828_v16, 16  ;;  %v13424_v46 = vld [vmem:[#allocation2 + $0xd8] sm:$0xf] }
 0x328   : > { %v2370_v35 = vpack.c.bf16 %v2346_v60, %v2345_v21  ;;  %v3147_v57 = vshrl.u32 %v2869_v37, 16  ;;  %v3150_v39 = vshll.u32 %v2869_v37, 16  ;;  %3753 = vmatmul.mubr.bf16.gmra.mrb[100].mxu1 %v3137_v54  ;;  %v2661_v41 = vsel %vm2473_vm8, %v2656_v59, %v2660_v61 }
 0x329   : > { %2741 = vrot.lane.b32.xlu0 %v2661_v41, %s11345_s27  ;;  %10717 = vmatprep.mubr.msk.bf16.mxu1 %vm656_vm7, %v3163_v58  ;;  %v2662_v21 = vshrl.u32 %v13388_v44, 16  ;;  %v3277_v55 = vrot.slane %v3275_v15, 3  ;;  %v3280_v9 = vrot.slane %v3278_v4, 4  ;;  %v2682_v7 = vshll.u32 %v13415_v6, 16 }
 0x32a   : > { %v2394_v40 = vmul.bf16 %v2370_v35, %v13386_v52  ;;  %v3149_v0 = vrot.slane %v3147_v57, 3  ;;  %v3152_v23 = vrot.slane %v3150_v39, 4  ;;  %v13411_v2 = vld [vmem:[#allocation2 + $0xc0] sm:$0xff]  ;;  %v13419_v33 = vor.u32 %v3263_v43, %v3260_v50 }
 0x32b   : > { %v2666_v26 = vshll.u32 %v13411_v2, 16  ;;  %v2664_v38 = vor.u32 %v2662_v21, %v2660_v61  ;;  %v13421_v22 = vor.u32 %v3280_v9, %v3277_v55  ;;  %v3192_v60 = vrot.slane %v3190_v49, 3 }
 0x32c   : > { %2418 = vst.msk [vmem:[#allocation2 + $0xc8] sm:$0xff] %vm656_vm7, %v2394_v40  ;;  %v3153_v58 = vor.u32 %v3152_v23, %v3149_v0  ;;  %v3195_v61 = vrot.slane %v3193_v34, 4  ;;  %v3180_v49 = vsel %vm1444_vm5, %v13361_v53, %v3179_v19  ;;  %v2684_v30 = vrot.slane %v2682_v7, 1 }
 0x32d   : > { %v2668_v47 = vrot.slane %v2666_v26, 1  ;;  %v13437_v37 = vsel %vm1444_vm5, %v13419_v33, %v13421_v22  ;;  %v2690_v16 = vshll.u32 %v13424_v46, 16  ;;  %v3207_v35 = vshrl.u32 %v2820_v62, 16 }
 0x32e   : > { %v3154_v48 = vsel %vm1444_vm5, %v3136_v14, %v3153_v58  ;;  %v3196_v50 = vor.u32 %v3195_v61, %v3192_v60  ;;  %v3210_v43 = vshll.u32 %v2820_v62, 16  ;;  %v2821_v15 = vrot.slane %v13240_v17, 1 }
 0x32f   : > { %v2730_v8 = vpop.permute.xlu0 %2729  ;;  %v2669_v59 = vsel %vm2473_vm8, %v2664_v38, %v2668_v47  ;;  %v2670_v40 = vshrl.u32 %v13411_v2, 16  ;;  %v2692_v23 = vrot.slane %v2690_v16, 1  ;;  %v3209_v34 = vrot.slane %v3207_v35, 3 }
 0x330   : > { %v2871_v42 = vsel %vm656_vm7, %v13131_v13, %v2730_v8  ;;  %3763 = vmatmul.mubr.bf16.gmra.mrb[104].mxu1 %v3154_v48  ;;  %2743 = vrot.lane.b32.xlu1 %v2669_v59, %s11345_s27  ;;  %v2686_v13 = vshrl.u32 %v13415_v6, 16  ;;  %v2694_v21 = vshrl.u32 %v13424_v46, 16  ;;  %v3197_v48 = vsel %vm1444_vm5, %v3179_v19, %v3196_v50 }
 0x331   : > { %v3164_v14 = vshrl.u32 %v2871_v42, 16  ;;  %v3167_v54 = vshll.u32 %v2871_v42, 16  ;;  %10718 = vmatprep.mubr.msk.bf16.mxu1 %vm656_vm7, %v3180_v49  ;;  %v2672_v9 = vor.u32 %v2670_v40, %v2668_v47  ;;  %v3212_v60 = vrot.slane %v3210_v43, 4 }
 0x332   : > { %v2688_v0 = vor.u32 %v2686_v13, %v2684_v30  ;;  %v2822_v62 = vsel %vm2781_vm13, %v2819_v11, %v2821_v15 }
 0x333   : > { %v3166_v57 = vrot.slane %v3164_v14, 3  ;;  %v3169_v39 = vrot.slane %v3167_v54, 4  ;;  %v13445_v41 = vld [vmem:[#allocation2 + $0xc8] sm:$0xff]  ;;  %v2696_v54 = vor.u32 %v2694_v21, %v2692_v23  ;;  %v3224_v11 = vshrl.u32 %v2822_v62, 16 }
 0x334   : > { %v2674_v53 = vshll.u32 %v13445_v41, 16  ;;  %v2678_v38 = vshrl.u32 %v13445_v41, 16  ;;  %v2693_v19 = vsel %vm2473_vm8, %v2688_v0, %v2692_v23  ;;  %v3227_v49 = vshll.u32 %v2822_v62, 16 }
 0x335   : > { %v3170_v4 = vor.u32 %v3169_v39, %v3166_v57  ;;  %v3213_v16 = vor.u32 %v3212_v60, %v3209_v34  ;;  %v2824_v23 = vsel %vm2781_vm13, %v2821_v15, %v2823_v51 }
 0x336   : > { %v2732_v26 = vpop.permute.xlu1 %2731  ;;  %v2676_v7 = vrot.slane %v2674_v53, 1  ;;  %v3229_v43 = vrot.slane %v3227_v49, 4 }
 0x337   : > { %v3171_v55 = vsel %vm1444_vm5, %v3153_v58, %v3170_v4  ;;  %v2873_v8 = vsel %vm656_vm7, %v13165_v32, %v2732_v26  ;;  %v3214_v0 = vsel %vm1444_vm5, %v3196_v50, %v3213_v16 }
 0x338   : > { %v3181_v42 = vshrl.u32 %v2873_v8, 16  ;;  %v3184_v59 = vshll.u32 %v2873_v8, 16  ;;  %3773 = vmatmul.mubr.bf16.gmra.mrb[108].mxu1 %v3171_v55  ;;  %v2677_v61 = vsel %vm2473_vm8, %v2672_v9, %v2676_v7  ;;  %v2680_v58 = vor.u32 %v2678_v38, %v2676_v7 }
 0x339   : > { %2745 = vrot.lane.b32.xlu0 %v2677_v61, %s11345_s27  ;;  %10719 = vmatprep.mubr.msk.bf16.mxu1 %vm656_vm7, %v3197_v48  ;;  %v3244_v55 = vshll.u32 %v2824_v23, 16 }
 0x33a   : > { %v3183_v47 = vrot.slane %v3181_v42, 3  ;;  %v3186_v14 = vrot.slane %v3184_v59, 4  ;;  %v2685_v32 = vsel %vm2473_vm8, %v2680_v58, %v2684_v30  ;;  %v3226_v30 = vrot.slane %v3224_v11, 3 }
 0x33b   : > { %2747 = vrot.lane.b32.xlu1 %v2685_v32, %s11345_s27  ;;  %v3246_v62 = vrot.slane %v3244_v55, 4 }
 0x33c   : > { %v3187_v13 = vor.u32 %v3186_v14, %v3183_v47  ;;  %v3230_v21 = vor.u32 %v3229_v43, %v3226_v30 }
 0x33d   : > { %2749 = vrot.lane.b32.xlu0 %v2693_v19, %s11345_s27 }
 0x33e   : > { %v2734_v35 = vpop.permute.xlu0 %2733  ;;  %v3188_v57 = vsel %vm1444_vm5, %v3170_v4, %v3187_v13  ;;  %v3231_v50 = vsel %vm1444_vm5, %v3213_v16, %v3230_v21 }
 0x33f   : > { %v2875_v39 = vsel %vm656_vm7, %v13190_v24, %v2734_v35  ;;  %2751 = vrot.lane.b32.xlu1 %v2696_v54, %s11345_s27  ;;  %v3241_v24 = vshrl.u32 %v2824_v23, 16 }
 0x340   : > { %v3198_v40 = vshrl.u32 %v2875_v39, 16  ;;  %v3201_v53 = vshll.u32 %v2875_v39, 16  ;;  %3783 = vmatmul.mubr.bf16.gmra.mrb[112].mxu1 %v3188_v57 }
 0x341   : > { %10720 = vmatprep.mubr.msk.bf16.mxu1 %vm656_vm7, %v3214_v0  ;;  %v3243_v60 = vrot.slane %v3241_v24, 3 }
 0x342   : > { %v3200_v34 = vrot.slane %v3198_v40, 3  ;;  %v3203_v4 = vrot.slane %v3201_v53, 4 }
 0x343   : > { %v3247_v59 = vor.u32 %v3246_v62, %v3243_v60  ;;  %v11220_v60 = vld [vmem:[%s17374_s2 + $0xc0] ss:$8 sps:$4 sm:$0xff]   ;;  %v11222_v62 = vld [vmem:[%s17374_s2 + $0xc4] ss:$8 sps:$4 sm:$0xff]  }
 0x344   : > { %v3204_v26 = vor.u32 %v3203_v4, %v3200_v34  ;;  %5474 = vmatprep.subr.bf16.mxu0 %v11222_v62 }
 0x345   : > { %v3248_v32 = vsel %vm1444_vm5, %v3230_v21, %v3247_v59  ;;  %5475 = vmatpush1.bf16.msra.mxu0 %v11220_v60 }
 0x346   : > { %v2736_v9 = vpop.permute.xlu1 %2735  ;;  %v3205_v7 = vsel %vm1444_vm5, %v3187_v13, %v3204_v26 }
 0x347   : > { %v2877_v38 = vsel %vm656_vm7, %v13217_v27, %v2736_v9 }
 0x348   : > { %v3215_v8 = vshrl.u32 %v2877_v38, 16  ;;  %v3218_v48 = vshll.u32 %v2877_v38, 16  ;;  %3793 = vmatmul.mubr.bf16.gmra.mrb[116].mxu1 %v3205_v7 }
 0x349   : > { %10721 = vmatprep.mubr.msk.bf16.mxu1 %vm656_vm7, %v3231_v50 }
 0x34a   : > { %v3217_v51 = vrot.slane %v3215_v8, 3  ;;  %v3220_v15 = vrot.slane %v3218_v48, 4 }
 0x34c   : > { %v3221_v42 = vor.u32 %v3220_v15, %v3217_v51 }
 0x34e   : > { %v2738_v61 = vpop.permute.xlu0 %2737  ;;  %v3222_v58 = vsel %vm1444_vm5, %v3204_v26, %v3221_v42 }
 0x34f   : > { %v2879_v47 = vsel %vm656_vm7, %v13240_v17, %v2738_v61  ;;  %v3265_v17 = vsel %vm1444_vm5, %v3247_v59, %v13419_v33  ;;  %v11223_v61 = vld [vmem:[%s17374_s2 + $0xd0] ss:$8 sps:$4 sm:$0xff]  }
 0x350   : > { %v3232_v27 = vshrl.u32 %v2879_v47, 16  ;;  %v3235_v14 = vshll.u32 %v2879_v47, 16  ;;  %3803 = vmatmul.mubr.bf16.gmra.mrb[120].mxu1 %v3222_v58  ;;  %v11225_v58 = vld [vmem:[%s17374_s2 + $0xd4] ss:$8 sps:$4 sm:$0xff]  }
 0x351   : > { %10722 = vmatprep.mubr.msk.bf16.mxu1 %vm656_vm7, %v3248_v32  ;;  %5476 = vmatprep.subr.bf16.mxu0 %v11225_v58  ;;  %v2829_v32 = vrot.slane %v13411_v2, 1 }
 0x352   : > { %v3234_v19 = vrot.slane %v3232_v27, 3  ;;  %v3237_v54 = vrot.slane %v3235_v14, 4  ;;  %5477 = vmatpush1.bf16.msra.mxu0 %v11223_v61 }
 0x354   : > { %v13485_v11 = vor.u32 %v3237_v54, %v3234_v19 }
 0x356   : > { %v13487_v49 = vpop.f32.mrb[48].mxu1  ;;  %v3239_v13 = vsel %vm1444_vm5, %v3221_v42, %v13485_v11 }
 0x357   : > { %v3632_v16 = vpop.f32.mrb[49].mxu1 }
 0x358   : > { %3813 = vmatmul.mubr.bf16.gmra.mrb[124].mxu1 %v3239_v13  ;;  %v13491_v35 = vpop.f32.mrb[50].mxu1 }
 0x359   : > { %10723 = vmatprep.mubr.msk.bf16.mxu1 %vm656_vm7, %v3265_v17  ;;  %v3635_v57 = vpop.f32.mrb[51].mxu1 }
 0x35a   : > { %v2830_v57 = vsel %vm2781_vm13, %v2827_v1, %v2829_v32  ;;  %v2831_v1 = vrot.slane %v13445_v41, 1 }
 0x35b   : > { %v3292_v60 = vshrl.u32 %v2830_v57, 16  ;;  %v3295_v62 = vshll.u32 %v2830_v57, 16 }
 0x35e   : > { %v13496_v39 = vpop.f32.mrb[52].mxu1 }
 0x35f   : > { %v3640_v30 = vpop.f32.mrb[53].mxu1 }
 0x360   : > { %v13498_v43 = vpop.f32.mrb[54].mxu1 }
 0x361   : > { %v3643_v40 = vpop.f32.mrb[55].mxu1  ;;  %3938 = vrot.lane.b32.xlu0 %v13498_v43, %s11345_s27 }
 0x366   : > { %v13502_v53 = vpop.f32.mrb[56].mxu1 }
 0x367   : > { %v3648_v0 = vpop.f32.mrb[57].mxu1  ;;  %3940 = vrot.lane.b32.xlu1 %v13502_v53, %s11345_s27 }
 0x368   : > { %v13506_v23 = vpop.f32.mrb[58].mxu1 }
 0x369   : > { %v3651_v33 = vpop.f32.mrb[59].mxu1  ;;  %3942 = vrot.lane.b32.xlu0 %v13506_v23, %s11345_s27 }
 0x36e   : > { %v13510_v34 = vpop.f32.mrb[60].mxu1 }
 0x36f   : > { %v13512_v4 = vpop.f32.mrb[61].mxu1  ;;  %3944 = vrot.lane.b32.xlu1 %v13510_v34, %s11345_s27 }
 0x370   : > { %v13516_v21 = vpop.f32.mrb[62].mxu1 }
 0x371   : > { %v13518_v26 = vpop.f32.mrb[63].mxu1  ;;  %3946 = vrot.lane.b32.xlu0 %v13516_v21, %s11345_s27 }
 0x376   : > { %v13522_v24 = vpop.f32.mrb[64].mxu1 }
 0x377   : > { %v13524_v55 = vpop.f32.mrb[65].mxu1  ;;  %3948 = vrot.lane.b32.xlu1 %v13522_v24, %s11345_s27 }
 0x378   : > { %v13528_v9 = vpop.f32.mrb[66].mxu1 }
 0x379   : > { %v13530_v7 = vpop.f32.mrb[67].mxu1  ;;  %3950 = vrot.lane.b32.xlu0 %v13528_v9, %s11345_s27 }
 0x37e   : > { %v13534_v38 = vpop.f32.mrb[68].mxu1 }
 0x37f   : > { %v13536_v50 = vpop.f32.mrb[69].mxu1  ;;  %3952 = vrot.lane.b32.xlu1 %v13534_v38, %s11345_s27 }
 0x380   : > { %v13540_v8 = vpop.f32.mrb[70].mxu1 }
 0x381   : > { %v13542_v48 = vpop.f32.mrb[71].mxu1  ;;  %3954 = vrot.lane.b32.xlu0 %v13540_v8, %s11345_s27 }
 0x386   : > { %v13552_v51 = vpop.f32.mrb[72].mxu1 }
 0x387   : > { %v13554_v15 = vpop.f32.mrb[73].mxu1  ;;  %3956 = vrot.lane.b32.xlu1 %v13552_v51, %s11345_s27 }
 0x388   : > { %v13558_v42 = vpop.f32.mrb[74].mxu1 }
 0x389   : > { %v13560_v59 = vpop.f32.mrb[75].mxu1  ;;  %3958 = vrot.lane.b32.xlu0 %v13558_v42, %s11345_s27 }
 0x38e   : > { %v13570_v47 = vpop.f32.mrb[76].mxu1 }
 0x38f   : > { %v13572_v27 = vpop.f32.mrb[77].mxu1  ;;  %3960 = vrot.lane.b32.xlu1 %v13570_v47, %s11345_s27 }
 0x390   : > { %v13576_v14 = vpop.f32.mrb[78].mxu1 }
 0x391   : > { %v13579_v19 = vpop.f32.mrb[79].mxu1  ;;  %3962 = vrot.lane.b32.xlu0 %v13576_v14, %s11345_s27 }
 0x392   : > { %v2740_v54 = vpop.permute.xlu1 %2739 }
 0x393   : > { %v2881_v13 = vsel %vm656_vm7, %v13247_v28, %v2740_v54 }
 0x394   : > { %v3249_v16 = vshrl.u32 %v2881_v13, 16  ;;  %v3252_v17 = vshll.u32 %v2881_v13, 16 }
 0x396   : > { %v3251_v30 = vrot.slane %v3249_v16, 3  ;;  %v3254_v40 = vrot.slane %v3252_v17, 4  ;;  %v13588_v0 = vpop.f32.mrb[80].mxu1  ;;  %v3294_v16 = vrot.slane %v3292_v60, 3  ;;  %v3297_v17 = vrot.slane %v3295_v62, 4 }
 0x397   : > { %v13590_v33 = vpop.f32.mrb[81].mxu1  ;;  %3964 = vrot.lane.b32.xlu1 %v13588_v0, %s11345_s27 }
 0x398   : > { %v3255_v61 = vor.u32 %v3254_v40, %v3251_v30  ;;  %v13594_v58 = vpop.f32.mrb[82].mxu1  ;;  %v11226_v30 = vld [vmem:[%s17374_s2 + $0xe0] ss:$8 sps:$4 sm:$0xff]   ;;  %v11228_v40 = vld [vmem:[%s17374_s2 + $0xe4] ss:$8 sps:$4 sm:$0xff]   ;;  %v3298_v10 = vor.u32 %v3297_v17, %v3294_v16 }
 0x399   : > { %v13596_v28 = vpop.f32.mrb[83].mxu1  ;;  %3966 = vrot.lane.b32.xlu0 %v13594_v58, %s11345_s27  ;;  %5478 = vmatprep.subr.bf16.mxu0 %v11228_v40 }
 0x39a   : > { %v3256_v54 = vsel %vm1444_vm5, %v13485_v11, %v3255_v61  ;;  %5479 = vmatpush1.bf16.msra.mxu0 %v11226_v30  ;;  %v3299_v30 = vsel %vm1444_vm5, %v13421_v22, %v3298_v10  ;;  %v11234_v22 = vld [vmem:[%s17374_s2 + $0x104] ss:$8 sps:$4 sm:$0xff]  }
 0x39b   : > { %v2742_v13 = vpop.permute.xlu0 %2741  ;;  %3823 = vmatmul.mubr.bf16.gmra.mrb[128].mxu1 %v3256_v54  ;;  %v2832_v54 = vsel %vm2781_vm13, %v2829_v32, %v2831_v1  ;;  %v11229_v32 = vld [vmem:[%s17374_s2 + $0xf0] ss:$8 sps:$4 sm:$0xff]  }
 0x39c   : > { %v2883_v57 = vsel %vm656_vm7, %v13350_v45, %v2742_v13  ;;  %10724 = vmatprep.mubr.msk.bf16.mxu1 %vm656_vm7, %v13437_v37  ;;  %v11231_v45 = vld [vmem:[%s17374_s2 + $0xf4] ss:$8 sps:$4 sm:$0xff]   ;;  %v3309_v40 = vshrl.u32 %v2832_v54, 16  ;;  %v3312_v25 = vshll.u32 %v2832_v54, 16 }
 0x39d   : > { %v3266_v52 = vshrl.u32 %v2883_v57, 16  ;;  %v3269_v11 = vshll.u32 %v2883_v57, 16  ;;  %5480 = vmatprep.subr.bf16.mxu0 %v11231_v45 }
 0x39e   : > { %v13614_v60 = vpop.f32.mrb[84].mxu1  ;;  %5481 = vmatpush1.bf16.msra.mxu0 %v11229_v32 }
 0x39f   : > { %v3268_v37 = vrot.slane %v3266_v52, 3  ;;  %v3271_v62 = vrot.slane %v3269_v11, 4  ;;  %v13619_v13 = vpop.f32.mrb[85].mxu1  ;;  %3968 = vrot.lane.b32.xlu1 %v13614_v60, %s11345_s27  ;;  %v2833_v52 = vrot.slane %v13415_v6, 1  ;;  %5482 = vmatprep.subr.bf16.mxu0 %v11234_v22 }
 0x3a0   : > { %v13626_v57 = vpop.f32.mrb[86].mxu1 }
 0x3a1   : > { %v3272_v5 = vor.u32 %v3271_v62, %v3268_v37  ;;  %v13628_v36 = vpop.f32.mrb[87].mxu1  ;;  %3970 = vrot.lane.b32.xlu0 %v13626_v57, %s11345_s27  ;;  %v3311_v37 = vrot.slane %v3309_v40, 3  ;;  %v3314_v62 = vrot.slane %v3312_v25, 4  ;;  %v2834_v31 = vsel %vm2781_vm13, %v2831_v1, %v2833_v52 }
 0x3a2   : > { %v2744_v11 = vpop.permute.xlu1 %2743  ;;  %v3329_v40 = vshll.u32 %v2834_v31, 16  ;;  %v2835_v25 = vrot.slane %v2472_v56, 1 }
 0x3a3   : > { %v2885_v16 = vsel %vm656_vm7, %v13388_v44, %v2744_v11  ;;  %v3273_v17 = vsel %vm1444_vm5, %v3255_v61, %v3272_v5  ;;  %v11232_v44 = vld [vmem:[%s17374_s2 + $0x100] ss:$8 sps:$4 sm:$0xff]   ;;  %v3315_v32 = vor.u32 %v3314_v62, %v3311_v37  ;;  %v3326_v11 = vshrl.u32 %v2834_v31, 16 }
 0x3a4   : > { %v3283_v54 = vshrl.u32 %v2885_v16, 16  ;;  %v3286_v45 = vshll.u32 %v2885_v16, 16  ;;  %3833 = vmatmul.mubr.bf16.gmra.mrb[132].mxu1 %v3273_v17  ;;  %5483 = vmatpush1.bf16.msra.mxu0 %v11232_v44 }
 0x3a5   : > { %10725 = vmatprep.mubr.msk.bf16.mxu1 %vm656_vm7, %v3299_v30  ;;  %v3316_v30 = vsel %vm1444_vm5, %v3298_v10, %v3315_v32  ;;  %v11235_v10 = vld [vmem:[%s17374_s2 + $0x110] ss:$8 sps:$4 sm:$0xff]  }
 0x3a6   : > { %v3285_v3 = vrot.slane %v3283_v54, 3  ;;  %v3288_v18 = vrot.slane %v3286_v45, 4  ;;  %v3328_v54 = vrot.slane %v3326_v11, 3  ;;  %v3331_v45 = vrot.slane %v3329_v40, 4  ;;  %v11237_v11 = vld [vmem:[%s17374_s2 + $0x114] ss:$8 sps:$4 sm:$0xff]  }
 0x3a7   : > { %5484 = vmatprep.subr.bf16.mxu0 %v11237_v11 }
 0x3a8   : > { %v3289_v61 = vor.u32 %v3288_v18, %v3285_v3  ;;  %v2836_v3 = vsel %vm2781_vm13, %v2833_v52, %v2835_v25  ;;  %5485 = vmatpush1.bf16.msra.mxu0 %v11235_v10 }
 0x3a9   : > { %v3343_v44 = vshrl.u32 %v2836_v3, 16  ;;  %v3346_v22 = vshll.u32 %v2836_v3, 16  ;;  %v3363_v3 = vshll.u32 %v2835_v25, 16 }
 0x3aa   : > { %v3290_v1 = vsel %vm1444_vm5, %v3272_v5, %v3289_v61 }
 0x3ab   : > { %v2746_v16 = vpop.permute.xlu0 %2745 }
 0x3ac   : > { %v2887_v17 = vsel %vm656_vm7, %v13411_v2, %v2746_v16  ;;  %3843 = vmatmul.mubr.bf16.gmra.mrb[136].mxu1 %v3290_v1  ;;  %v3332_v2 = vor.u32 %v3331_v45, %v3328_v54  ;;  %v11238_v16 = vld [vmem:[%s17374_s2 + $0x120] ss:$8 sps:$4 sm:$0xff]   ;;  %v3345_v54 = vrot.slane %v3343_v44, 3  ;;  %v3348_v45 = vrot.slane %v3346_v22, 4 }
 0x3ad   : > { %v3300_v20 = vshrl.u32 %v2887_v17, 16  ;;  %v3303_v63 = vshll.u32 %v2887_v17, 16  ;;  %v2748_v18 = vpop.permute.xlu1 %2747  ;;  %10726 = vmatprep.mubr.msk.bf16.mxu1 %vm656_vm7, %v3316_v30  ;;  %v3365_v22 = vrot.slane %v3363_v3, 4 }
 0x3ae   : > { %v2889_v56 = vsel %vm656_vm7, %v13445_v41, %v2748_v18  ;;  %v3333_v30 = vsel %vm1444_vm5, %v3315_v32, %v3332_v2  ;;  %v11243_v18 = vld [vmem:[%s17374_s2 + $0x134] ss:$8 sps:$4 sm:$0xff]   ;;  %v3349_v32 = vor.u32 %v3348_v45, %v3345_v54 }
 0x3af   : > { %v3302_v31 = vrot.slane %v3300_v20, 3  ;;  %v3305_v5 = vrot.slane %v3303_v63, 4  ;;  %v3317_v37 = vshrl.u32 %v2889_v56, 16  ;;  %v3320_v62 = vshll.u32 %v2889_v56, 16  ;;  %v2750_v52 = vpop.permute.xlu0 %2749  ;;  %v11240_v20 = vld [vmem:[%s17374_s2 + $0x124] ss:$8 sps:$4 sm:$0xff]  }
 0x3b0   : > { %v2891_v17 = vsel %vm656_vm7, %v13415_v6, %v2750_v52  ;;  %5486 = vmatprep.subr.bf16.mxu0 %v11240_v20  ;;  %v11241_v6 = vld [vmem:[%s17374_s2 + $0x130] ss:$8 sps:$4 sm:$0xff]   ;;  %v11244_v52 = vld [vmem:[%s17374_s2 + $0x140] ss:$8 sps:$4 sm:$0xff]  }
 0x3b1   : > { %v3306_v40 = vor.u32 %v3305_v5, %v3302_v31  ;;  %v3319_v63 = vrot.slane %v3317_v37, 3  ;;  %v3322_v41 = vrot.slane %v3320_v62, 4  ;;  %v3334_v31 = vshrl.u32 %v2891_v17, 16  ;;  %5487 = vmatpush1.bf16.msra.mxu0 %v11238_v16  ;;  %v11246_v37 = vld [vmem:[%s17374_s2 + $0x144] ss:$8 sps:$4 sm:$0xff]   ;;  %v2752_v62 = vpop.permute.xlu1 %2751 }
 0x3b2   : > { %v3337_v5 = vshll.u32 %v2891_v17, 16  ;;  %5488 = vmatprep.subr.bf16.mxu0 %v11243_v18  ;;  %v2893_v20 = vsel %vm656_vm7, %v13424_v46, %v2752_v62 }
 0x3b3   : > { %v3307_v1 = vsel %vm1444_vm5, %v3289_v61, %v3306_v40  ;;  %v3360_v61 = vshrl.u32 %v2835_v25, 16  ;;  %v3323_v56 = vor.u32 %v3322_v41, %v3319_v63  ;;  %v3336_v10 = vrot.slane %v3334_v31, 3 }
 0x3b4   : > { %3853 = vmatmul.mubr.bf16.gmra.mrb[140].mxu1 %v3307_v1  ;;  %v3339_v11 = vrot.slane %v3337_v5, 4  ;;  %v3350_v63 = vsel %vm1444_vm5, %v3332_v2, %v3349_v32  ;;  %v3351_v16 = vshrl.u32 %v2893_v20, 16  ;;  %v3354_v17 = vshll.u32 %v2893_v20, 16 }
 0x3b5   : > { %10727 = vmatprep.mubr.msk.bf16.mxu1 %vm656_vm7, %v3333_v30  ;;  %v3362_v44 = vrot.slane %v3360_v61, 3  ;;  %v3324_v25 = vsel %vm1444_vm5, %v3306_v40, %v3323_v56  ;;  %5489 = vmatpush1.bf16.msra.mxu0 %v11241_v6 }
 0x3b6   : > { %5490 = vmatprep.subr.bf16.mxu0 %v11246_v37  ;;  %v3340_v1 = vor.u32 %v3339_v11, %v3336_v10  ;;  %v3353_v30 = vrot.slane %v3351_v16, 3  ;;  %v3356_v54 = vrot.slane %v3354_v17, 4  ;;  %v4351_v10 = vld [vmem:[#allocation3] sm:$0xf0]  ;;  %v13704_v11 = vld [vmem:[#allocation3 + $0x8] sm:$0xff] }
 0x3b7   : > { %v3366_v41 = vor.u32 %v3365_v22, %v3362_v44  ;;  %v4661_v20 = vrot.slane %v13704_v11, 1 }
 0x3b8   : > { %v3341_v45 = vsel %vm1444_vm5, %v3323_v56, %v3340_v1  ;;  %v3357_v46 = vor.u32 %v3356_v54, %v3353_v30 }
 0x3b9   : > { %5491 = vmatpush1.bf16.msra.mxu0 %v11244_v52  ;;  %v3367_v40 = vsel %vm1444_vm5, %v3349_v32, %v3366_v41 }
 0x3ba   : > { %v3358_v2 = vsel %vm1444_vm5, %v3340_v1, %v3357_v46  ;;  %v4356_v1 = vshll.u32 %v4351_v10, 16 }
 0x3bc   : > { %3863 = vmatmul.mubr.bf16.gmra.mrb[144].mxu1 %v3324_v25 }
 0x3bd   : > { %10728 = vmatprep.mubr.msk.bf16.mxu1 %vm656_vm7, %v3350_v63 }
 0x3c4   : > { %3873 = vmatmul.mubr.bf16.gmra.mrb[148].mxu1 %v3341_v45 }
 0x3c5   : > { %10729 = vmatprep.mubr.msk.bf16.mxu1 %vm656_vm7, %v3367_v40 }
 0x3cc   : > { %3882 = vmatmul.mubr.bf16.gmra.mrb[152].mxu1 %v3358_v2  ;;  %v4354_v2 = vshrl.u32 %v4351_v10, 16 }
 0x3d3   : > { %v3939_v18 = vpop.permute.xlu0 %3938 }
 0x3d4   : > { %v4082_v61 = vadd.f32 %v3939_v18, %v13487_v49  ;;  %v11247_v49 = vld [vmem:[%s17374_s2 + $0x150] ss:$8 sps:$4 sm:$0xff]   ;;  %v4358_v18 = vrot.slane %v4356_v1, 1 }
 0x3d6   : > { %v4130_v3 = vadd.f32 %v4082_v61, %v13512_v4  ;;  %v11249_v4 = vld [vmem:[%s17374_s2 + $0x154] ss:$8 sps:$4 sm:$0xff]  }
 0x3d7   : > { %5492 = vmatprep.subr.bf16.mxu0 %v11249_v4 }
 0x3d8   : > { %v4178_v37 = vmax.f32 %v4130_v3, 0.0  ;;  %5493 = vmatpush1.bf16.msra.mxu0 %v11247_v49 }
 0x3d9   : > { %v3941_v31 = vpop.permute.xlu1 %3940 }
 0x3da   : > { %v4083_v5 = vadd.f32 %v3941_v31, %v13491_v35 }
 0x3db   : > { %v3943_v6 = vpop.permute.xlu0 %3942 }
 0x3dc   : > { %v4131_v32 = vadd.f32 %v4083_v5, %v13518_v26  ;;  %v4084_v56 = vadd.f32 %v3943_v6, %v13496_v39  ;;  %v17834_v26 = vld [vmem:[#allocation57_spill] sm:$0xff] }
 0x3dd   : > { %v11250_v5 = vld [vmem:[%s17374_s2 + $0x160] ss:$8 sps:$4 sm:$0xff]   ;;  %v11252_v6 = vld [vmem:[%s17374_s2 + $0x164] ss:$8 sps:$4 sm:$0xff]  }
 0x3de   : > { %v4179_v62 = vmax.f32 %v4131_v32, 0.0  ;;  %v4132_v44 = vadd.f32 %v4084_v56, %v13524_v55  ;;  %v4660_v55 = vrot.slane %v4351_v10, 1  ;;  %v17835_v32 = vld [vmem:[#allocation58_spill] sm:$0xff]  ;;  %5494 = vmatprep.subr.bf16.mxu0 %v11252_v6 }
 0x3df   : > { %5495 = vmatpush1.bf16.msra.mxu0 %v11250_v5  ;;  %v11253_v5 = vld [vmem:[%s17374_s2 + $0x170] ss:$8 sps:$4 sm:$0xff]   ;;  %v11255_v6 = vld [vmem:[%s17374_s2 + $0x174] ss:$8 sps:$4 sm:$0xff]  }
 0x3e0   : > { %v4226_v22 = vpack.c.bf16 %v4179_v62, %v4178_v37  ;;  %v4180_v30 = vmax.f32 %v4132_v44, 0.0  ;;  %v4662_v46 = vsel %vm2781_vm13, %v4660_v55, %v4661_v20  ;;  %v4359_v44 = vor.u32 %v4358_v18, %v4354_v2  ;;  %5496 = vmatprep.subr.bf16.mxu0 %v11255_v6 }
 0x3e1   : > { %v3945_v35 = vpop.permute.xlu1 %3944  ;;  %v4791_v31 = vshll.u32 %v4662_v46, 16 }
 0x3e2   : > { %v4250_v25 = vmul.bf16 %v4226_v22, %v17834_v26  ;;  %v4085_v39 = vadd.f32 %v3945_v35, %v13498_v43  ;;  %v13708_v52 = vpop.f32.mrb[88].mxu1 }
 0x3e3   : > { %v13711_v63 = vpop.f32.mrb[89].mxu1  ;;  %3972 = vrot.lane.b32.xlu1 %v13708_v52, %s11345_s27  ;;  %v3947_v41 = vpop.permute.xlu0 %3946  ;;  %5497 = vmatpush1.bf16.msra.mxu0 %v11253_v5 }
 0x3e4   : > { %4274 = vst.msk [vmem:[#allocation3 + $0x10] sm:$0xff] %vm656_vm7, %v4250_v25  ;;  %v4133_v16 = vadd.f32 %v4085_v39, %v13530_v7  ;;  %v4086_v43 = vadd.f32 %v3947_v41, %v13502_v53  ;;  %v13718_v17 = vpop.f32.mrb[90].mxu1  ;;  %v4361_v7 = vshll.u32 %v13704_v11, 16  ;;  %v4788_v53 = vshrl.u32 %v4662_v46, 16 }
 0x3e5   : > { %v13720_v40 = vpop.f32.mrb[91].mxu1  ;;  %3974 = vrot.lane.b32.xlu0 %v13718_v17, %s11345_s27  ;;  %v4793_v41 = vrot.slane %v4791_v31, 4  ;;  %v4365_v46 = vshrl.u32 %v13704_v11, 16 }
 0x3e6   : > { %v4181_v54 = vmax.f32 %v4133_v16, 0.0  ;;  %v4134_v45 = vadd.f32 %v4086_v43, %v13536_v50  ;;  %v4363_v39 = vrot.slane %v4361_v7, 1  ;;  %v4790_v55 = vrot.slane %v4788_v53, 3 }
 0x3e8   : > { %v4227_v61 = vpack.c.bf16 %v4181_v54, %v4180_v30  ;;  %v4182_v35 = vmax.f32 %v4134_v45, 0.0  ;;  %v4364_v30 = vsel %vm2473_vm8, %v4359_v44, %v4363_v39  ;;  %v4367_v44 = vor.u32 %v4365_v46, %v4363_v39 }
 0x3e9   : > { %v3949_v3 = vpop.permute.xlu1 %3948 }
 0x3ea   : > { %v4251_v50 = vmul.bf16 %v4227_v61, %v17835_v32  ;;  %v4087_v56 = vadd.f32 %v3949_v3, %v13506_v23  ;;  %v4794_v61 = vor.u32 %v4793_v41, %v4790_v55  ;;  %v17836_v3 = vld [vmem:[#allocation59_spill] sm:$0xff] }
 0x3eb   : > { %v13735_v37 = vpop.f32.mrb[92].mxu1  ;;  %v3951_v62 = vpop.permute.xlu0 %3950  ;;  %v13737_v22 = vld [vmem:[#allocation3 + $0x10] sm:$0xff] }
 0x3ec   : > { %4275 = vst.msk [vmem:[#allocation3 + $0x18] sm:$0xff] %vm656_vm7, %v4251_v50  ;;  %v4135_v10 = vadd.f32 %v4087_v56, %v13542_v48  ;;  %v13741_v49 = vpop.f32.mrb[93].mxu1  ;;  %3976 = vrot.lane.b32.xlu1 %v13735_v37, %s11345_s27  ;;  %v4088_v4 = vadd.f32 %v3951_v62, %v13510_v34  ;;  %v4663_v23 = vrot.slane %v13737_v22, 1  ;;  %v4369_v34 = vshll.u32 %v13737_v22, 16 }
 0x3ed   : > { %v13747_v25 = vpop.f32.mrb[94].mxu1  ;;  %v4373_v55 = vshrl.u32 %v13737_v22, 16 }
 0x3ee   : > { %v4183_v1 = vmax.f32 %v4135_v10, 0.0  ;;  %v4136_v16 = vadd.f32 %v4088_v4, %v13554_v15  ;;  %v13750_v48 = vpop.f32.mrb[95].mxu1  ;;  %3978 = vrot.lane.b32.xlu0 %v13747_v25, %s11345_s27  ;;  %v4664_v43 = vsel %vm2781_vm13, %v4661_v20, %v4663_v23  ;;  %v4371_v20 = vrot.slane %v4369_v34, 1 }
 0x3ef   : > { %v4796_v54 = vshrl.u32 %v4664_v43, 16  ;;  %v4799_v45 = vshll.u32 %v4664_v43, 16 }
 0x3f0   : > { %v4228_v2 = vpack.c.bf16 %v4183_v1, %v4182_v35  ;;  %v4184_v1 = vmax.f32 %v4136_v16, 0.0  ;;  %v4372_v16 = vsel %vm2473_vm8, %v4367_v44, %v4371_v20 }
 0x3f1   : > { %v3953_v18 = vpop.permute.xlu1 %3952  ;;  %v4798_v7 = vrot.slane %v4796_v54, 3  ;;  %v4801_v15 = vrot.slane %v4799_v45, 4 }
 0x3f2   : > { %v4252_v53 = vmul.bf16 %v4228_v2, %v17836_v3  ;;  %v4089_v31 = vadd.f32 %v3953_v18, %v13516_v21  ;;  %4576 = vrot.lane.b32.xlu0 %v4364_v30, %s11345_s27  ;;  %v17837_v2 = vmov 0  }
 0x3f3   : > { %v13767_v50 = vpop.f32.mrb[96].mxu1  ;;  %v3955_v56 = vpop.permute.xlu0 %3954  ;;  %v4802_v62 = vor.u32 %v4801_v15, %v4798_v7  ;;  %v13769_v10 = vld [vmem:[#allocation3 + $0x18] sm:$0xff]  ;;  %9111 = vmatprep.subr.bf16.mxu0 %v17837_v2 }
 0x3f4   : > { %4276 = vst.msk [vmem:[#allocation3 + $0x20] sm:$0xff] %vm656_vm7, %v4252_v53  ;;  %v4137_v21 = vadd.f32 %v4089_v31, %v13560_v59  ;;  %v13773_v4 = vpop.f32.mrb[97].mxu1  ;;  %3980 = vrot.lane.b32.xlu1 %v13767_v50, %s11345_s27  ;;  %v4090_v35 = vadd.f32 %v3955_v56, %v13522_v24  ;;  %v4377_v41 = vshll.u32 %v13769_v10, 16  ;;  %v17490_v59 = vrot.slane %v13769_v10, 1  ;;  %v17838_v53 = vld [vmem:[#allocation60_spill] sm:$0xff] }
 0x3f5   : > { %v13780_v39 = vpop.f32.mrb[98].mxu1  ;;  %v4803_v43 = vsel %vm1444_vm5, %v4794_v61, %v4802_v62  ;;  %v4375_v24 = vor.u32 %v4373_v55, %v4371_v20 }
 0x3f6   : > { %v4185_v34 = vmax.f32 %v4137_v21, 0.0  ;;  %v4138_v30 = vadd.f32 %v4090_v35, %v13572_v27  ;;  %v13785_v54 = vpop.f32.mrb[99].mxu1  ;;  %3982 = vrot.lane.b32.xlu0 %v13780_v39, %s11345_s27  ;;  %10778 = vmatprep.mubr.msk.bf16.mxu0 %vm656_vm7, %v4803_v43  ;;  %v4379_v45 = vrot.slane %v4377_v41, 1  ;;  %v4666_v46 = vsel %vm2781_vm13, %v4663_v23, %v17490_v59 }
 0x3f7   : > { %v4813_v7 = vshrl.u32 %v4666_v46, 16  ;;  %v4816_v15 = vshll.u32 %v4666_v46, 16 }
 0x3f8   : > { %v4229_v18 = vpack.c.bf16 %v4185_v34, %v4184_v1  ;;  %4578 = vrot.lane.b32.xlu1 %v4372_v16, %s11345_s27  ;;  %v4380_v27 = vsel %vm2473_vm8, %v4375_v24, %v4379_v45  ;;  %v4186_v43 = vmax.f32 %v4138_v30, 0.0 }
 0x3f9   : > { %v3957_v61 = vpop.permute.xlu1 %3956  ;;  %v4815_v56 = vrot.slane %v4813_v7, 3  ;;  %v4818_v44 = vrot.slane %v4816_v15, 4  ;;  %v17839_v7 = vld [vmem:[#allocation63_spill] sm:$0xff] }
 0x3fa   : > { %v4253_v31 = vmul.bf16 %v4229_v18, %v17838_v53  ;;  %v4091_v5 = vadd.f32 %v3957_v61, %v13528_v9  ;;  %4580 = vrot.lane.b32.xlu0 %v4380_v27, %s11345_s27 }
 0x3fb   : > { %v13800_v20 = vpop.f32.mrb[100].mxu1  ;;  %v3959_v6 = vpop.permute.xlu0 %3958  ;;  %v13802_v23 = vld [vmem:[#allocation3 + $0x20] sm:$0xff]  ;;  %v13814_v1 = vor.u32 %v4818_v44, %v4815_v56 }
 0x3fc   : > { %4277 = vst.msk [vmem:[#allocation3 + $0x28] sm:$0xff] %vm656_vm7, %v4253_v31  ;;  %v4139_v21 = vadd.f32 %v4091_v5, %v13579_v19  ;;  %v13806_v35 = vpop.f32.mrb[101].mxu1  ;;  %3984 = vrot.lane.b32.xlu1 %v13800_v20, %s11345_s27  ;;  %v4092_v9 = vadd.f32 %v3959_v6, %v13534_v38  ;;  %v4385_v55 = vshll.u32 %v13802_v23, 16  ;;  %v4381_v19 = vshrl.u32 %v13769_v10, 16 }
 0x3fd   : > { %v13812_v41 = vpop.f32.mrb[102].mxu1  ;;  %v13822_v18 = vsel %vm1444_vm5, %v4802_v62, %v13814_v1 }
 0x3fe   : > { %v4187_v34 = vmax.f32 %v4139_v21, 0.0  ;;  %v4140_v24 = vadd.f32 %v4092_v9, %v13590_v33  ;;  %v13817_v16 = vpop.f32.mrb[103].mxu1  ;;  %v4387_v46 = vrot.slane %v4385_v55, 1  ;;  %v4383_v61 = vor.u32 %v4381_v19, %v4379_v45 }
 0x400   : > { %v4230_v38 = vpack.c.bf16 %v4187_v34, %v4186_v43  ;;  %3986 = vrot.lane.b32.xlu1 %v13812_v41, %s11345_s27  ;;  %v4388_v31 = vsel %vm2473_vm8, %v4383_v61, %v4387_v46  ;;  %v4188_v21 = vmax.f32 %v4140_v24, 0.0 }
 0x401   : > { %v3961_v27 = vpop.permute.xlu1 %3960 }
 0x402   : > { %v4254_v30 = vmul.bf16 %v4230_v38, %v17839_v7  ;;  %v4093_v15 = vadd.f32 %v3961_v27, %v13540_v8 }
 0x403   : > { %v13828_v33 = vpop.f32.mrb[104].mxu1  ;;  %v3963_v5 = vpop.permute.xlu0 %3962  ;;  %v13831_v6 = vld [vmem:[#allocation3 + $0x28] sm:$0xff] }
 0x404   : > { %4278 = vst.msk [vmem:[#allocation3 + $0x30] sm:$0xff] %vm656_vm7, %v4254_v30  ;;  %v4141_v62 = vadd.f32 %v4093_v15, %v13596_v28  ;;  %v13835_v56 = vpop.f32.mrb[105].mxu1  ;;  %3988 = vrot.lane.b32.xlu0 %v13828_v33, %s11345_s27  ;;  %4582 = vrot.lane.b32.xlu1 %v4388_v31, %s11345_s27  ;;  %v4094_v8 = vadd.f32 %v3963_v5, %v13552_v51  ;;  %v4393_v45 = vshll.u32 %v13831_v6, 16  ;;  %v4389_v28 = vshrl.u32 %v13802_v23, 16  ;;  %v17840_v51 = vld [vmem:[#allocation67_spill] sm:$0xff] }
 0x405   : > { %v13842_v44 = vpop.f32.mrb[106].mxu1 }
 0x406   : > { %v4189_v9 = vmax.f32 %v4141_v62, 0.0  ;;  %v4142_v55 = vadd.f32 %v4094_v8, %v13619_v13  ;;  %v13845_v43 = vpop.f32.mrb[107].mxu1  ;;  %v4395_v34 = vrot.slane %v4393_v45, 1  ;;  %v4391_v27 = vor.u32 %v4389_v28, %v4387_v46 }
 0x408   : > { %v4231_v19 = vpack.c.bf16 %v4189_v9, %v4188_v21  ;;  %3990 = vrot.lane.b32.xlu0 %v13842_v44, %s11345_s27  ;;  %v4396_v24 = vsel %vm2473_vm8, %v4391_v27, %v4395_v34  ;;  %v4190_v45 = vmax.f32 %v4142_v55, 0.0 }
 0x409   : > { %v3965_v38 = vpop.permute.xlu1 %3964 }
 0x40a   : > { %v4255_v61 = vmul.bf16 %v4231_v19, %v17840_v51  ;;  %v4095_v30 = vadd.f32 %v3965_v38, %v13558_v42 }
 0x40b   : > { %v13852_v15 = vpop.f32.mrb[108].mxu1  ;;  %v3967_v13 = vpop.permute.xlu0 %3966  ;;  %v13855_v31 = vld [vmem:[#allocation3 + $0x30] sm:$0xff] }
 0x40c   : > { %4279 = vst.msk [vmem:[#allocation3 + $0x38] sm:$0xff] %vm656_vm7, %v4255_v61  ;;  %v4143_v5 = vadd.f32 %v4095_v30, %v13628_v36  ;;  %v13859_v62 = vpop.f32.mrb[109].mxu1  ;;  %3992 = vrot.lane.b32.xlu1 %v13852_v15, %s11345_s27  ;;  %4584 = vrot.lane.b32.xlu0 %v4396_v24, %s11345_s27  ;;  %v4096_v42 = vadd.f32 %v3967_v13, %v13570_v47  ;;  %v4401_v46 = vshll.u32 %v13855_v31, 16  ;;  %v4397_v36 = vshrl.u32 %v13831_v6, 16  ;;  %v17841_v47 = vld [vmem:[#allocation5_spill] sm:$0xff] }
 0x40d   : > { %v13866_v8 = vpop.f32.mrb[110].mxu1 }
 0x40e   : > { %v4191_v21 = vmax.f32 %v4143_v5, 0.0  ;;  %v4144_v9 = vadd.f32 %v4096_v42, %v13711_v63  ;;  %v13869_v28 = vpop.f32.mrb[111].mxu1  ;;  %v4403_v19 = vrot.slane %v4401_v46, 1  ;;  %v4399_v61 = vor.u32 %v4397_v36, %v4395_v34 }
 0x410   : > { %v4232_v38 = vpack.c.bf16 %v4191_v21, %v4190_v45  ;;  %3994 = vrot.lane.b32.xlu1 %v13866_v8, %s11345_s27  ;;  %v4404_v55 = vsel %vm2473_vm8, %v4399_v61, %v4403_v19  ;;  %v4192_v21 = vmax.f32 %v4144_v9, 0.0 }
 0x411   : > { %v3969_v27 = vpop.permute.xlu1 %3968 }
 0x412   : > { %v4256_v30 = vmul.bf16 %v4232_v38, %v17841_v47  ;;  %v4097_v24 = vadd.f32 %v3969_v27, %v13576_v14 }
 0x413   : > { %v13876_v13 = vpop.f32.mrb[112].mxu1  ;;  %v3971_v63 = vpop.permute.xlu0 %3970  ;;  %v13879_v5 = vld [vmem:[#allocation3 + $0x38] sm:$0xff] }
 0x414   : > { %4280 = vst.msk [vmem:[#allocation3 + $0x40] sm:$0xff] %vm656_vm7, %v4256_v30  ;;  %v4145_v42 = vadd.f32 %v4097_v24, %v13720_v40  ;;  %v13883_v46 = vpop.f32.mrb[113].mxu1  ;;  %3996 = vrot.lane.b32.xlu0 %v13876_v13, %s11345_s27  ;;  %4586 = vrot.lane.b32.xlu1 %v4404_v55, %s11345_s27  ;;  %v4098_v14 = vadd.f32 %v3971_v63, %v13588_v0  ;;  %v4409_v34 = vshll.u32 %v13879_v5, 16  ;;  %v4405_v40 = vshrl.u32 %v13855_v31, 16  ;;  %v17842_v55 = vld [vmem:[#allocation7_spill] sm:$0xff] }
 0x415   : > { %v13890_v45 = vpop.f32.mrb[114].mxu1 }
 0x416   : > { %v4193_v36 = vmax.f32 %v4145_v42, 0.0  ;;  %v4146_v38 = vadd.f32 %v4098_v14, %v13741_v49  ;;  %v13893_v27 = vpop.f32.mrb[115].mxu1  ;;  %v4411_v61 = vrot.slane %v4409_v34, 1  ;;  %v4407_v24 = vor.u32 %v4405_v40, %v4403_v19 }
 0x417   : > { %v4413_v34 = vshrl.u32 %v13879_v5, 16 }
 0x418   : > { %v4233_v30 = vpack.c.bf16 %v4193_v36, %v4192_v21  ;;  %3998 = vrot.lane.b32.xlu0 %v13890_v45, %s11345_s27  ;;  %v4412_v59 = vsel %vm2473_vm8, %v4407_v24, %v4411_v61  ;;  %v4194_v32 = vmax.f32 %v4146_v38, 0.0 }
 0x419   : > { %v4415_v36 = vor.u32 %v4413_v34, %v4411_v61 }
 0x41a   : > { %v4257_v0 = vmul.bf16 %v4233_v30, %v17842_v55 }
 0x41b   : > { %v13899_v63 = vpop.f32.mrb[116].mxu1  ;;  %v13902_v9 = vld [vmem:[#allocation3 + $0x40] sm:$0xff] }
 0x41c   : > { %17843 = vst [vmem:[#allocation10_spill] sm:$0xff] %v13899_v63  ;;  %4281 = vst.msk [vmem:[#allocation3 + $0x48] sm:$0xff] %vm656_vm7, %v4257_v0  ;;  %v13905_v49 = vpop.f32.mrb[117].mxu1  ;;  %4000 = vrot.lane.b32.xlu1 %v13899_v63, %s11345_s27  ;;  %4588 = vrot.lane.b32.xlu0 %v4412_v59, %s11345_s27  ;;  %v4417_v42 = vshll.u32 %v13902_v9, 16  ;;  %v4421_v61 = vshrl.u32 %v13902_v9, 16 }
 0x41d   : > { %v13911_v19 = vpop.f32.mrb[118].mxu1 }
 0x41e   : > { %17844 = vst [vmem:[#allocation14_spill] sm:$0xff] %v13911_v19  ;;  %v13913_v14 = vpop.f32.mrb[119].mxu1  ;;  %v4419_v21 = vrot.slane %v4417_v42, 1 }
 0x420   : > { %4002 = vrot.lane.b32.xlu1 %v13911_v19, %s11345_s27  ;;  %v4420_v30 = vsel %vm2473_vm8, %v4415_v36, %v4419_v21  ;;  %v4423_v36 = vor.u32 %v4421_v61, %v4419_v21 }
 0x423   : > { %v13918_v40 = vpop.f32.mrb[120].mxu1  ;;  %v13921_v24 = vld [vmem:[#allocation3 + $0x48] sm:$0xff] }
 0x424   : > { %17845 = vst [vmem:[#allocation17_spill] sm:$0xff] %v13918_v40  ;;  %v13923_v59 = vpop.f32.mrb[121].mxu1  ;;  %4004 = vrot.lane.b32.xlu0 %v13918_v40, %s11345_s27  ;;  %4590 = vrot.lane.b32.xlu1 %v4420_v30, %s11345_s27  ;;  %v4425_v0 = vshll.u32 %v13921_v24, 16 }
 0x425   : > { %v13929_v42 = vpop.f32.mrb[122].mxu1 }
 0x426   : > { %17846 = vst [vmem:[#allocation23_spill] sm:$0xff] %v13929_v42  ;;  %v13931_v55 = vpop.f32.mrb[123].mxu1  ;;  %v4427_v34 = vrot.slane %v4425_v0, 1 }
 0x428   : > { %4006 = vrot.lane.b32.xlu0 %v13929_v42, %s11345_s27  ;;  %v4428_v51 = vsel %vm2473_vm8, %v4423_v36, %v4427_v34 }
 0x42b   : > { %v13936_v47 = vpop.f32.mrb[124].mxu1 }
 0x42c   : > { %17847 = vst [vmem:[#allocation25_spill] sm:$0xff] %v13936_v47  ;;  %v13939_v7 = vpop.f32.mrb[125].mxu1  ;;  %4008 = vrot.lane.b32.xlu1 %v13936_v47, %s11345_s27  ;;  %4592 = vrot.lane.b32.xlu0 %v4428_v51, %s11345_s27  ;;  %v17849_v47 = vld [vmem:[#allocation13_spill] sm:$0xff] }
 0x42d   : > { %v13944_v30 = vpop.f32.mrb[126].mxu1 }
 0x42e   : > { %17848 = vst [vmem:[#allocation9_spill] sm:$0xff] %v13944_v30  ;;  %v13946_v53 = vpop.f32.mrb[127].mxu1 }
 0x430   : > { %4010 = vrot.lane.b32.xlu1 %v13944_v30, %s11345_s27 }
 0x455   : > { %v3973_v0 = vpop.permute.xlu1 %3972 }
 0x456   : > { %v4099_v21 = vadd.f32 %v3973_v0, %v13594_v58 }
 0x457   : > { %v3975_v61 = vpop.permute.xlu0 %3974 }
 0x458   : > { %v4147_v36 = vadd.f32 %v4099_v21, %v13750_v48  ;;  %v4100_v3 = vadd.f32 %v3975_v61, %v13614_v60  ;;  %v4323_v48 = vld [vmem:[#allocation3] sm:$0xf8] }
 0x45a   : > { %v4195_v2 = vmax.f32 %v4147_v36, 0.0  ;;  %v4148_v26 = vadd.f32 %v4100_v3, %v13773_v4  ;;  %v4667_v3 = vrot.slane %v13802_v23, 1 }
 0x45c   : > { %v4234_v51 = vpack.c.bf16 %v4195_v2, %v4194_v32  ;;  %v4196_v21 = vmax.f32 %v4148_v26, 0.0  ;;  %v17851_v26 = vrot.slane %v13769_v10, 1 }
 0x45e   : > { %v4258_v42 = vmul.bf16 %v4234_v51, %v17849_v47  ;;  %v3977_v40 = vpop.permute.xlu1 %3976 }
 0x45f   : > { %v4101_v19 = vadd.f32 %v3977_v40, %v13626_v57 }
 0x460   : > { %4282 = vst.msk [vmem:[#allocation3 + $0x50] sm:$0xff] %vm656_vm7, %v4258_v42  ;;  %v3979_v30 = vpop.permute.xlu0 %3978  ;;  %v17850_v42 = vld [vmem:[#allocation12_spill] sm:$0xff] }
 0x461   : > { %v4149_v58 = vadd.f32 %v4101_v19, %v13785_v54  ;;  %v4102_v0 = vadd.f32 %v3979_v30, %v13708_v52  ;;  %v4668_v52 = vsel %vm2781_vm13, %v17851_v26, %v4667_v3  ;;  %v4429_v30 = vshrl.u32 %v13921_v24, 16 }
 0x463   : > { %v4197_v60 = vmax.f32 %v4149_v58, 0.0  ;;  %v4150_v38 = vadd.f32 %v4102_v0, %v13806_v35 }
 0x464   : > { %v4577_v32 = vpop.permute.xlu0 %4576 }
 0x465   : > { %v4235_v4 = vpack.c.bf16 %v4197_v60, %v4196_v21  ;;  %v4717_v2 = vsel %vm656_vm7, %v4323_v48, %v4577_v32  ;;  %v4431_v32 = vor.u32 %v4429_v30, %v4427_v34  ;;  %v17852_v34 = vrot.slane %v13831_v6, 1 }
 0x466   : > { %v4772_v61 = vshrl.u32 %v4717_v2, 16  ;;  %v4775_v57 = vshll.u32 %v4717_v2, 16  ;;  %v3981_v40 = vpop.permute.xlu1 %3980  ;;  %v4830_v2 = vshrl.u32 %v4668_v52, 16 }
 0x467   : > { %v4259_v36 = vmul.bf16 %v4235_v4, %v17850_v42  ;;  %v4103_v54 = vadd.f32 %v3981_v40, %v13718_v17  ;;  %v13964_v19 = vld [vmem:[#allocation3 + $0x50] sm:$0xff]  ;;  %v4198_v40 = vmax.f32 %v4150_v38, 0.0 }
 0x468   : > { %v3983_v35 = vpop.permute.xlu0 %3982  ;;  %v4433_v51 = vshll.u32 %v13964_v19, 16  ;;  %v4774_v0 = vrot.slane %v4772_v61, 3  ;;  %v4777_v48 = vrot.slane %v4775_v57, 4  ;;  %v4833_v57 = vshll.u32 %v4668_v52, 16 }
 0x469   : > { %4283 = vst.msk [vmem:[#allocation3 + $0x58] sm:$0xff] %vm656_vm7, %v4259_v36  ;;  %v4151_v21 = vadd.f32 %v4103_v54, %v13817_v16  ;;  %v4104_v17 = vadd.f32 %v3983_v35, %v13735_v37 }
 0x46a   : > { %v4579_v60 = vpop.permute.xlu1 %4578  ;;  %v4435_v4 = vrot.slane %v4433_v51, 1  ;;  %v4778_v16 = vor.u32 %v4777_v48, %v4774_v0 }
 0x46b   : > { %v4199_v26 = vmax.f32 %v4151_v21, 0.0  ;;  %v4152_v42 = vadd.f32 %v4104_v17, %v13835_v56  ;;  %v4719_v47 = vsel %vm656_vm7, %v13704_v11, %v4579_v60  ;;  %v4670_v56 = vsel %vm2781_vm13, %v4667_v3, %v17852_v34 }
 0x46c   : > { %v4779_v58 = vshrl.u32 %v4719_v47, 16  ;;  %v4782_v63 = vshll.u32 %v4719_v47, 16  ;;  %v4581_v36 = vpop.permute.xlu0 %4580  ;;  %v4436_v61 = vsel %vm2473_vm8, %v4431_v32, %v4435_v4  ;;  %v4847_v17 = vshrl.u32 %v4670_v56, 16 }
 0x46d   : > { %v4236_v54 = vpack.c.bf16 %v4199_v26, %v4198_v40  ;;  %v4721_v37 = vsel %vm656_vm7, %v13737_v22, %v4581_v36  ;;  %4594 = vrot.lane.b32.xlu1 %v4436_v61, %s11345_s27  ;;  %v4850_v40 = vshll.u32 %v4670_v56, 16  ;;  %v4671_v26 = vrot.slane %v13855_v31, 1 }
 0x46e   : > { %v4781_v38 = vrot.slane %v4779_v58, 3  ;;  %v4784_v35 = vrot.slane %v4782_v63, 4  ;;  %v4804_v11 = vshrl.u32 %v4721_v37, 16  ;;  %v4807_v30 = vshll.u32 %v4721_v37, 16  ;;  %v3985_v47 = vpop.permute.xlu1 %3984  ;;  %v13985_v51 = vpop.f32.mrb[128].mxu1 }
 0x46f   : > { %v4260_v52 = vmul.bf16 %v4236_v54, %v12845_v12  ;;  %v4105_v0 = vadd.f32 %v3985_v47, %v13747_v25  ;;  %v13989_v48 = vpop.f32.mrb[129].mxu1  ;;  %4012 = vrot.lane.b32.xlu0 %v13985_v51, %s11345_s27  ;;  %v4832_v63 = vrot.slane %v4830_v2, 3  ;;  %v4835_v58 = vrot.slane %v4833_v57, 4 }
 0x470   : > { %v4785_v22 = vor.u32 %v4784_v35, %v4781_v38  ;;  %v13993_v21 = vpop.f32.mrb[130].mxu1  ;;  %v13995_v3 = vld [vmem:[#allocation3 + $0x58] sm:$0xff]  ;;  %v4806_v36 = vrot.slane %v4804_v11, 3  ;;  %v4809_v61 = vrot.slane %v4807_v30, 4  ;;  %v4437_v2 = vshrl.u32 %v13964_v19, 16 }
 0x471   : > { %4284 = vst.msk [vmem:[#allocation3 + $0x60] sm:$0xff] %vm656_vm7, %v4260_v52  ;;  %v4153_v60 = vadd.f32 %v4105_v0, %v13845_v43  ;;  %v13999_v32 = vpop.f32.mrb[131].mxu1  ;;  %v4441_v25 = vshll.u32 %v13995_v3, 16  ;;  %v4200_v57 = vmax.f32 %v4152_v42, 0.0  ;;  %v4836_v30 = vor.u32 %v4835_v58, %v4832_v63 }
 0x472   : > { %v3987_v54 = vpop.permute.xlu1 %3986  ;;  %v4786_v37 = vsel %vm1444_vm5, %v4778_v16, %v4785_v22  ;;  %v4439_v56 = vor.u32 %v4437_v2, %v4435_v4  ;;  %v17853_v42 = vrot.slane %v13831_v6, 1  ;;  %v4852_v58 = vrot.slane %v4850_v40, 4 }
 0x473   : > { %v4201_v34 = vmax.f32 %v4153_v60, 0.0  ;;  %v4106_v38 = vadd.f32 %v3987_v54, %v13767_v50  ;;  %5507 = vmatmul.mubr.bf16.vlgmr.msra.gmra.mrb[60].mxu0 %v4786_v37  ;;  %4014 = vrot.lane.b32.xlu0 %v13993_v21, %s11345_s27  ;;  %v4443_v43 = vrot.slane %v4441_v25, 1  ;;  %v14016_v50 = vor.u32 %v4809_v61, %v4806_v36 }
 0x474   : > { %10779 = vmatprep.mubr.msk.bf16.mxu0 %vm656_vm7, %v13822_v18  ;;  %v4672_v16 = vsel %vm2781_vm13, %v17853_v42, %v4671_v26  ;;  %v4849_v60 = vrot.slane %v4847_v17, 3  ;;  %v4837_v40 = vsel %vm1444_vm5, %v13814_v1, %v4836_v30  ;;  %v4445_v42 = vshrl.u32 %v13995_v3, 16 }
 0x475   : > { %v4237_v35 = vpack.c.bf16 %v4201_v34, %v4200_v57  ;;  %v4154_v11 = vadd.f32 %v4106_v38, %v13859_v62  ;;  %v4444_v0 = vsel %vm2473_vm8, %v4439_v56, %v4443_v43  ;;  %v4864_v54 = vshrl.u32 %v4672_v16, 16 }
 0x476   : > { %v4583_v47 = vpop.permute.xlu1 %4582  ;;  %v3989_v52 = vpop.permute.xlu0 %3988  ;;  %v4867_v37 = vshll.u32 %v4672_v16, 16  ;;  %v4853_v1 = vor.u32 %v4852_v58, %v4849_v60 }
 0x477   : > { %v4261_v18 = vmul.bf16 %v4237_v35, %v12860_v29  ;;  %v4723_v4 = vsel %vm656_vm7, %v13769_v10, %v4583_v47  ;;  %v4107_v62 = vadd.f32 %v3989_v52, %v13780_v39  ;;  %v14023_v63 = vpop.f32.mrb[132].mxu1  ;;  %4596 = vrot.lane.b32.xlu0 %v4444_v0, %s11345_s27  ;;  %v4811_v35 = vsel %vm1444_vm5, %v4785_v22, %v14016_v50 }
 0x478   : > { %v4821_v25 = vshrl.u32 %v4723_v4, 16  ;;  %v4824_v36 = vshll.u32 %v4723_v4, 16  ;;  %v14026_v61 = vpop.f32.mrb[133].mxu1  ;;  %4016 = vrot.lane.b32.xlu1 %v14023_v63, %s11345_s27  ;;  %v14030_v17 = vld [vmem:[#allocation3 + $0x60] sm:$0xff]  ;;  %v4202_v16 = vmax.f32 %v4154_v11, 0.0  ;;  %v4866_v0 = vrot.slane %v4864_v54, 3 }
 0x479   : > { %4285 = vst.msk [vmem:[#allocation3 + $0x68] sm:$0xff] %vm656_vm7, %v4261_v18  ;;  %v4155_v10 = vadd.f32 %v4107_v62, %v13869_v28  ;;  %v14034_v39 = vpop.f32.mrb[134].mxu1  ;;  %v4449_v2 = vshll.u32 %v14030_v17, 16  ;;  %v4869_v18 = vrot.slane %v4867_v37, 4  ;;  %v4447_v22 = vor.u32 %v4445_v42, %v4443_v43 }
 0x47a   : > { %v4823_v57 = vrot.slane %v4821_v25, 3  ;;  %v4826_v34 = vrot.slane %v4824_v36, 4  ;;  %v14039_v38 = vpop.f32.mrb[135].mxu1  ;;  %v3991_v56 = vpop.permute.xlu0 %3990  ;;  %v4673_v25 = vrot.slane %v13879_v5, 1  ;;  %v4854_v37 = vsel %vm1444_vm5, %v4836_v30, %v4853_v1 }
 0x47b   : > { %v4203_v47 = vmax.f32 %v4155_v10, 0.0  ;;  %v4108_v28 = vadd.f32 %v3991_v56, %v13800_v20  ;;  %5515 = vmatmul.mubr.bf16.gmra.mrb[64].mxu0 %v4811_v35  ;;  %v4451_v52 = vrot.slane %v4449_v2, 1  ;;  %v17854_v10 = vld [vmem:[#allocation42_spill] sm:$0xff]  ;;  %v14072_v35 = vor.u32 %v4869_v18, %v4866_v0 }
 0x47c   : > { %4018 = vrot.lane.b32.xlu1 %v14034_v39, %s11345_s27  ;;  %10780 = vmatprep.mubr.msk.bf16.mxu0 %vm656_vm7, %v4837_v40  ;;  %v14050_v11 = vor.u32 %v4826_v34, %v4823_v57  ;;  %v4674_v42 = vsel %vm2781_vm13, %v4671_v26, %v4673_v25 }
 0x47d   : > { %v4238_v4 = vpack.c.bf16 %v4203_v47, %v4202_v16  ;;  %v4156_v62 = vadd.f32 %v4108_v28, %v13883_v46  ;;  %v4452_v58 = vsel %vm2473_vm8, %v4447_v22, %v4451_v52  ;;  %v4881_v26 = vshrl.u32 %v4674_v42, 16 }
 0x47e   : > { %v3993_v36 = vpop.permute.xlu1 %3992  ;;  %v4585_v20 = vpop.permute.xlu0 %4584 }
 0x47f   : > { %v4262_v2 = vmul.bf16 %v4238_v4, %v17854_v10  ;;  %v4109_v56 = vadd.f32 %v3993_v36, %v13812_v41  ;;  %v4725_v40 = vsel %vm656_vm7, %v13802_v23, %v4585_v20  ;;  %v14056_v60 = vpop.f32.mrb[136].mxu1  ;;  %v4453_v4 = vshrl.u32 %v14030_v17, 16 }
 0x480   : > { %v4838_v54 = vshrl.u32 %v4725_v40, 16  ;;  %v4841_v46 = vshll.u32 %v4725_v40, 16  ;;  %v14059_v43 = vpop.f32.mrb[137].mxu1  ;;  %4020 = vrot.lane.b32.xlu0 %v14056_v60, %s11345_s27  ;;  %4598 = vrot.lane.b32.xlu1 %v4452_v58, %s11345_s27  ;;  %v14065_v57 = vld [vmem:[#allocation3 + $0x68] sm:$0xff]  ;;  %v4204_v22 = vmax.f32 %v4156_v62, 0.0  ;;  %v4884_v20 = vshll.u32 %v4674_v42, 16 }
 0x481   : > { %4286 = vst.msk [vmem:[#allocation3 + $0x70] sm:$0xff] %vm656_vm7, %v4262_v2  ;;  %v4157_v23 = vadd.f32 %v4109_v56, %v13893_v27  ;;  %v14069_v41 = vpop.f32.mrb[138].mxu1  ;;  %v4457_v34 = vshll.u32 %v14065_v57, 16  ;;  %v4828_v27 = vsel %vm1444_vm5, %v14016_v50, %v14050_v11  ;;  %v4455_v40 = vor.u32 %v4453_v4, %v4451_v52 }
 0x482   : > { %v4840_v16 = vrot.slane %v4838_v54, 3  ;;  %v4843_v30 = vrot.slane %v4841_v46, 4  ;;  %v14079_v47 = vpop.f32.mrb[139].mxu1  ;;  %v3995_v28 = vpop.permute.xlu1 %3994  ;;  %v4675_v50 = vrot.slane %v13902_v9, 1  ;;  %v17855_v46 = vld [vmem:[#allocation20_spill] sm:$0xff] }
 0x483   : > { %v4205_v0 = vmax.f32 %v4157_v23, 0.0  ;;  %v4110_v18 = vadd.f32 %v3995_v28, %v13828_v33  ;;  %5523 = vmatmul.mubr.bf16.gmra.mrb[68].mxu0 %v4828_v27  ;;  %v4459_v36 = vrot.slane %v4457_v34, 1  ;;  %v4871_v33 = vsel %vm1444_vm5, %v4853_v1, %v14072_v35 }
 0x484   : > { %4022 = vrot.lane.b32.xlu0 %v14069_v41, %s11345_s27  ;;  %10781 = vmatprep.mubr.msk.bf16.mxu0 %vm656_vm7, %v4854_v37  ;;  %v14091_v58 = vor.u32 %v4843_v30, %v4840_v16  ;;  %v4883_v30 = vrot.slane %v4881_v26, 3  ;;  %v4886_v27 = vrot.slane %v4884_v20, 4 }
 0x485   : > { %v4239_v2 = vpack.c.bf16 %v4205_v0, %v4204_v22  ;;  %v4158_v56 = vadd.f32 %v4110_v18, %v13905_v49  ;;  %v4460_v49 = vsel %vm2473_vm8, %v4455_v40, %v4459_v36  ;;  %v4676_v22 = vsel %vm2781_vm13, %v4673_v25, %v4675_v50 }
 0x486   : > { %v4587_v62 = vpop.permute.xlu1 %4586  ;;  %v3997_v54 = vpop.permute.xlu0 %3996  ;;  %v4845_v20 = vsel %vm1444_vm5, %v14050_v11, %v14091_v58  ;;  %v4898_v25 = vshrl.u32 %v4676_v22, 16  ;;  %v14129_v11 = vor.u32 %v4886_v27, %v4883_v30 }
 0x487   : > { %v4263_v23 = vmul.bf16 %v4239_v2, %v17855_v46  ;;  %v4727_v37 = vsel %vm656_vm7, %v13831_v6, %v4587_v62  ;;  %v4111_v34 = vadd.f32 %v3997_v54, %v13842_v44  ;;  %v14099_v42 = vpop.f32.mrb[140].mxu1  ;;  %v4206_v62 = vmax.f32 %v4158_v56, 0.0 }
 0x488   : > { %v4855_v52 = vshrl.u32 %v4727_v37, 16  ;;  %v4858_v28 = vshll.u32 %v4727_v37, 16  ;;  %v14102_v16 = vpop.f32.mrb[141].mxu1  ;;  %4024 = vrot.lane.b32.xlu1 %v14099_v42, %s11345_s27  ;;  %4600 = vrot.lane.b32.xlu0 %v4460_v49, %s11345_s27  ;;  %v14107_v1 = vld [vmem:[#allocation3 + $0x70] sm:$0xff] }
 0x489   : > { %4287 = vst.msk [vmem:[#allocation3 + $0x78] sm:$0xff] %vm656_vm7, %v4263_v23  ;;  %v4159_v6 = vadd.f32 %v4111_v34, %v13913_v14  ;;  %v14111_v44 = vpop.f32.mrb[142].mxu1  ;;  %v4465_v4 = vshll.u32 %v14107_v1, 16  ;;  %v4461_v14 = vshrl.u32 %v14065_v57, 16  ;;  %v4901_v34 = vshll.u32 %v4676_v22, 16 }
 0x48a   : > { %v4857_v18 = vrot.slane %v4855_v52, 3  ;;  %v4860_v2 = vrot.slane %v4858_v28, 4  ;;  %v14118_v40 = vpop.f32.mrb[143].mxu1  ;;  %v3999_v26 = vpop.permute.xlu0 %3998 }
 0x48b   : > { %v4207_v54 = vmax.f32 %v4159_v6, 0.0  ;;  %v4112_v23 = vadd.f32 %v3999_v26, %v13852_v15  ;;  %5531 = vmatmul.mubr.bf16.gmra.mrb[72].mxu0 %v4845_v20  ;;  %v4467_v37 = vrot.slane %v4465_v4, 1  ;;  %v4463_v28 = vor.u32 %v4461_v14, %v4459_v36  ;;  %v17857_v26 = vld [vmem:[#allocation43_spill] sm:$0xff] }
 0x48c   : > { %4026 = vrot.lane.b32.xlu1 %v14111_v44, %s11345_s27  ;;  %10782 = vmatprep.mubr.msk.bf16.mxu0 %vm656_vm7, %v4871_v33  ;;  %v14131_v0 = vor.u32 %v4860_v2, %v4857_v18  ;;  %v17856_v15 = vrot.slane %v13921_v24, 1  ;;  %v4903_v2 = vrot.slane %v4901_v34, 4  ;;  %v4888_v14 = vsel %vm1444_vm5, %v14072_v35, %v14129_v11 }
 0x48d   : > { %v4240_v49 = vpack.c.bf16 %v4207_v54, %v4206_v62  ;;  %v4160_v52 = vadd.f32 %v4112_v23, %v13923_v59  ;;  %v4468_v59 = vsel %vm2473_vm8, %v4463_v28, %v4467_v37  ;;  %v4469_v34 = vshrl.u32 %v14107_v1, 16 }
 0x48e   : > { %v4001_v56 = vpop.permute.xlu1 %4000  ;;  %v4589_v6 = vpop.permute.xlu0 %4588  ;;  %v4678_v4 = vsel %vm2781_vm13, %v4675_v50, %v17856_v15  ;;  %v4900_v50 = vrot.slane %v4898_v25, 3  ;;  %v4862_v25 = vsel %vm1444_vm5, %v14091_v58, %v14131_v0  ;;  %v17497_v58 = vrot.slane %v13964_v19, 1 }
 0x48f   : > { %v4264_v20 = vmul.bf16 %v4240_v49, %v17857_v26  ;;  %v4113_v33 = vadd.f32 %v4001_v56, %v13866_v8  ;;  %v4729_v22 = vsel %vm656_vm7, %v13855_v31, %v4589_v6  ;;  %v3864_v62 = vpop.f32.mrb[144].mxu1  ;;  %v4915_v23 = vshrl.u32 %v4678_v4, 16 }
 0x490   : > { %v4872_v36 = vshrl.u32 %v4729_v22, 16  ;;  %v4875_v30 = vshll.u32 %v4729_v22, 16  ;;  %v14141_v27 = vpop.f32.mrb[145].mxu1  ;;  %4028 = vrot.lane.b32.xlu0 %v3864_v62, %s11345_s27  ;;  %4602 = vrot.lane.b32.xlu1 %v4468_v59, %s11345_s27  ;;  %v14145_v18 = vld [vmem:[#allocation3 + $0x78] sm:$0xff]  ;;  %v4918_v22 = vshll.u32 %v4678_v4, 16 }
 0x491   : > { %4288 = vst.msk [vmem:[#allocation3 + $0x80] sm:$0xff] %vm656_vm7, %v4264_v20  ;;  %v4161_v8 = vadd.f32 %v4113_v33, %v13931_v55  ;;  %v3868_v31 = vpop.f32.mrb[146].mxu1  ;;  %v4473_v54 = vshll.u32 %v14145_v18, 16  ;;  %v4208_v55 = vmax.f32 %v4160_v52, 0.0  ;;  %v4904_v33 = vor.u32 %v4903_v2, %v4900_v50 }
 0x492   : > { %v4874_v49 = vrot.slane %v4872_v36, 3  ;;  %v4877_v28 = vrot.slane %v4875_v30, 4  ;;  %v14153_v56 = vpop.f32.mrb[147].mxu1  ;;  %v4003_v6 = vpop.permute.xlu1 %4002  ;;  %v4471_v36 = vor.u32 %v4469_v34, %v4467_v37  ;;  %v4917_v26 = vrot.slane %v4915_v23, 3 }
 0x493   : > { %v4209_v15 = vmax.f32 %v4161_v8, 0.0  ;;  %v4114_v20 = vadd.f32 %v4003_v6, %v13876_v13  ;;  %5541 = vmatmul.mubr.bf16.gmra.mrb[76].mxu0 %v4862_v25  ;;  %v4475_v35 = vrot.slane %v4473_v54, 1  ;;  %v17858_v13 = vld [vmem:[#allocation26_spill] sm:$0xff]  ;;  %v4477_v23 = vshrl.u32 %v14145_v18, 16 }
 0x494   : > { %4030 = vrot.lane.b32.xlu0 %v3868_v31, %s11345_s27  ;;  %10783 = vmatprep.mubr.msk.bf16.mxu0 %vm656_vm7, %v4888_v14  ;;  %v14164_v30 = vor.u32 %v4877_v28, %v4874_v49  ;;  %v4920_v49 = vrot.slane %v4918_v22, 4  ;;  %v4905_v28 = vsel %vm1444_vm5, %v14129_v11, %v4904_v33  ;;  %v17859_v34 = vrot.slane %v13921_v24, 1 }
 0x495   : > { %v4241_v62 = vpack.c.bf16 %v4209_v15, %v4208_v55  ;;  %v4162_v59 = vadd.f32 %v4114_v20, %v13939_v7  ;;  %v4476_v4 = vsel %vm2473_vm8, %v4471_v36, %v4475_v35  ;;  %v4479_v36 = vor.u32 %v4477_v23, %v4475_v35  ;;  %v17861_v35 = vld [vmem:[#allocation48_spill] sm:$0xff]  ;;  %v17862_v23 = vld [vmem:[#allocation14_spill] sm:$0xff] }
 0x496   : > { %v4591_v52 = vpop.permute.xlu1 %4590  ;;  %v4005_v8 = vpop.permute.xlu0 %4004  ;;  %v4680_v55 = vsel %vm2781_vm13, %v17859_v34, %v17497_v58 }
 0x497   : > { %v4265_v6 = vmul.bf16 %v4241_v62, %v17858_v13  ;;  %v4731_v31 = vsel %vm656_vm7, %v13879_v5, %v4591_v52  ;;  %v4115_v14 = vadd.f32 %v4005_v8, %v13890_v45  ;;  %v3874_v50 = vpop.f32.mrb[148].mxu1  ;;  %v4210_v52 = vmax.f32 %v4162_v59, 0.0  ;;  %v17860_v8 = vld [vmem:[#allocation10_spill] sm:$0xff]  ;;  %v17887_v13 = vld [vmem:[#allocation5_spill] sm:$0xff] }
 0x498   : > { %v4889_v2 = vshrl.u32 %v4731_v31, 16  ;;  %v4892_v7 = vshll.u32 %v4731_v31, 16  ;;  %v14171_v37 = vpop.f32.mrb[149].mxu1  ;;  %4032 = vrot.lane.b32.xlu1 %v3874_v50, %s11345_s27  ;;  %4604 = vrot.lane.b32.xlu0 %v4476_v4, %s11345_s27  ;;  %v14175_v54 = vld [vmem:[#allocation3 + $0x80] sm:$0xff]  ;;  %v4932_v50 = vshrl.u32 %v4680_v55, 16 }
 0x499   : > { %4289 = vst.msk [vmem:[#allocation3 + $0x88] sm:$0xff] %vm656_vm7, %v4265_v6  ;;  %v4163_v5 = vadd.f32 %v4115_v14, %v13946_v53  ;;  %v3878_v45 = vpop.f32.mrb[150].mxu1  ;;  %v4481_v25 = vshll.u32 %v14175_v54, 16  ;;  %v4879_v53 = vsel %vm1444_vm5, %v14131_v0, %v14164_v30  ;;  %v4921_v14 = vor.u32 %v4920_v49, %v4917_v26 }
 0x49a   : > { %v4891_v15 = vrot.slane %v4889_v2, 3  ;;  %v4894_v20 = vrot.slane %v4892_v7, 4  ;;  %v14188_v62 = vpop.f32.mrb[151].mxu1  ;;  %v4007_v22 = vpop.permute.xlu0 %4006  ;;  %v4935_v45 = vshll.u32 %v4680_v55, 16 }
 0x49b   : > { %v4211_v11 = vmax.f32 %v4163_v5, 0.0  ;;  %v4116_v6 = vadd.f32 %v4007_v22, %v17860_v8  ;;  %5551 = vmatmul.mubr.bf16.gmra.mrb[80].mxu0 %v4879_v53  ;;  %v4483_v31 = vrot.slane %v4481_v25, 1 }
 0x49c   : > { %10784 = vmatprep.mubr.msk.bf16.mxu0 %vm656_vm7, %v4905_v28  ;;  %v4895_v34 = vor.u32 %v4894_v20, %v4891_v15  ;;  %v4485_v15 = vshrl.u32 %v14175_v54, 16 }
 0x49d   : > { %v4242_v4 = vpack.c.bf16 %v4211_v11, %v4210_v52  ;;  %v4164_v2 = vadd.f32 %v4116_v6, %v13989_v48  ;;  %v4484_v7 = vsel %vm2473_vm8, %v4479_v36, %v4483_v31  ;;  %v4922_v48 = vsel %vm1444_vm5, %v4904_v33, %v4921_v14 }
 0x49e   : > { %v4009_v58 = vpop.permute.xlu1 %4008  ;;  %4606 = vrot.lane.b32.xlu1 %v4484_v7, %s11345_s27  ;;  %v4593_v0 = vpop.permute.xlu0 %4592  ;;  %v4934_v36 = vrot.slane %v4932_v50, 3  ;;  %v4896_v33 = vsel %vm1444_vm5, %v14164_v30, %v4895_v34 }
 0x49f   : > { %v4266_v59 = vmul.bf16 %v4242_v4, %v17861_v35  ;;  %v4117_v5 = vadd.f32 %v4009_v58, %v17862_v23  ;;  %v4733_v28 = vsel %vm656_vm7, %v13902_v9, %v4593_v0  ;;  %v3883_v26 = vpop.f32.mrb[152].mxu1  ;;  %v4937_v9 = vrot.slane %v4935_v45, 4  ;;  %v17863_v23 = vld [vmem:[#allocation17_spill] sm:$0xff] }
 0x4a0   : > { %v4906_v49 = vshrl.u32 %v4733_v28, 16  ;;  %v4909_v25 = vshll.u32 %v4733_v28, 16  ;;  %v14202_v22 = vpop.f32.mrb[153].mxu1  ;;  %v14205_v55 = vld [vmem:[#allocation3 + $0x88] sm:$0xff]  ;;  %v4487_v4 = vor.u32 %v4485_v15, %v4483_v31  ;;  %v4212_v7 = vmax.f32 %v4164_v2, 0.0  ;;  %v17864_v26 = vld [vmem:[#allocation28_spill] sm:$0xff] }
 0x4a1   : > { %4290 = vst.msk [vmem:[#allocation3 + $0x90] sm:$0xff] %vm656_vm7, %v4266_v59  ;;  %v4165_v20 = vadd.f32 %v4117_v5, %v13999_v32  ;;  %v3886_v53 = vpop.f32.mrb[154].mxu1  ;;  %v4489_v58 = vshll.u32 %v14205_v55, 16  ;;  %v4938_v30 = vor.u32 %v4937_v9, %v4934_v36  ;;  %v4493_v2 = vshrl.u32 %v14205_v55, 16 }
 0x4a2   : > { %v4908_v52 = vrot.slane %v4906_v49, 3  ;;  %v4911_v11 = vrot.slane %v4909_v25, 4  ;;  %v14211_v8 = vpop.f32.mrb[155].mxu1  ;;  %v4011_v6 = vpop.permute.xlu1 %4010 }
 0x4a3   : > { %v4213_v0 = vmax.f32 %v4165_v20, 0.0  ;;  %v4118_v59 = vadd.f32 %v4011_v6, %v17863_v23  ;;  %5561 = vmatmul.mubr.bf16.gmra.mrb[84].mxu0 %v4896_v33  ;;  %v4491_v32 = vrot.slane %v4489_v58, 1  ;;  %v17865_v6 = vrot.slane %v13964_v19, 1 }
 0x4a4   : > { %10785 = vmatprep.mubr.msk.bf16.mxu0 %vm656_vm7, %v4922_v48  ;;  %v4912_v28 = vor.u32 %v4911_v11, %v4908_v52 }
 0x4a5   : > { %v4243_v5 = vpack.c.bf16 %v4213_v0, %v4212_v7  ;;  %v4166_v50 = vadd.f32 %v4118_v59, %v14026_v61  ;;  %v4492_v45 = vsel %vm2473_vm8, %v4487_v4, %v4491_v32  ;;  %v4939_v61 = vsel %vm1444_vm5, %v4921_v14, %v4938_v30 }
 0x4a6   : > { %4608 = vrot.lane.b32.xlu0 %v4492_v45, %s11345_s27  ;;  %v4913_v48 = vsel %vm1444_vm5, %v4895_v34, %v4912_v28  ;;  %v4495_v15 = vor.u32 %v4493_v2, %v4491_v32  ;;  %v4681_v34 = vrot.slane %v13995_v3, 1  ;;  %v4683_v0 = vrot.slane %v14030_v17, 1 }
 0x4a7   : > { %v4267_v49 = vmul.bf16 %v4243_v5, %v17864_v26 }
 0x4a8   : > { %v14221_v31 = vld [vmem:[#allocation3 + $0x90] sm:$0xff]  ;;  %v4682_v33 = vsel %vm2781_vm13, %v17865_v6, %v4681_v34 }
 0x4a9   : > { %4291 = vst.msk [vmem:[#allocation3 + $0x98] sm:$0xff] %vm656_vm7, %v4267_v49  ;;  %v4497_v25 = vshll.u32 %v14221_v31, 16  ;;  %v4501_v36 = vshrl.u32 %v14221_v31, 16  ;;  %v4949_v4 = vshrl.u32 %v4682_v33, 16  ;;  %v4952_v7 = vshll.u32 %v4682_v33, 16 }
 0x4ab   : > { %5571 = vmatmul.mubr.bf16.gmra.mrb[88].mxu0 %v4913_v48  ;;  %v4499_v20 = vrot.slane %v4497_v25, 1  ;;  %v4951_v32 = vrot.slane %v4949_v4, 3  ;;  %v4954_v5 = vrot.slane %v4952_v7, 4  ;;  %v17866_v25 = vld [vmem:[#allocation23_spill] sm:$0xff]  ;;  %v4214_v4 = vmax.f32 %v4166_v50, 0.0 }
 0x4ac   : > { %10786 = vmatprep.mubr.msk.bf16.mxu0 %vm656_vm7, %v4939_v61  ;;  %v4684_v61 = vsel %vm2781_vm13, %v4681_v34, %v4683_v0 }
 0x4ad   : > { %v4500_v53 = vsel %vm2473_vm8, %v4495_v15, %v4499_v20  ;;  %v4503_v52 = vor.u32 %v4501_v36, %v4499_v20  ;;  %v4685_v15 = vrot.slane %v14065_v57, 1  ;;  %v4687_v36 = vrot.slane %v14107_v1, 1 }
 0x4ae   : > { %4610 = vrot.lane.b32.xlu1 %v4500_v53, %s11345_s27  ;;  %v4966_v6 = vshrl.u32 %v4684_v61, 16  ;;  %v4969_v33 = vshll.u32 %v4684_v61, 16 }
 0x4b0   : > { %v14231_v58 = vld [vmem:[#allocation3 + $0x98] sm:$0xff]  ;;  %v4971_v50 = vrot.slane %v4969_v33, 4 }
 0x4b1   : > { %v4505_v9 = vshll.u32 %v14231_v58, 16 }
 0x4b3   : > { %v14235_v11 = vrot.slane %v4505_v9, 1 }
 0x4b5   : > { %v4508_v14 = vsel %vm2473_vm8, %v4503_v52, %v14235_v11  ;;  %v4955_v52 = vor.u32 %v4954_v5, %v4951_v32  ;;  %v4968_v5 = vrot.slane %v4966_v6, 3 }
 0x4b6   : > { %4612 = vrot.lane.b32.xlu0 %v4508_v14, %s11345_s27 }
 0x4df   : > { %v4595_v23 = vpop.permute.xlu1 %4594 }
 0x4e0   : > { %v4735_v59 = vsel %vm656_vm7, %v13921_v24, %v4595_v23  ;;  %v17867_v23 = vld [vmem:[#allocation25_spill] sm:$0xff] }
 0x4e1   : > { %v4923_v45 = vshrl.u32 %v4735_v59, 16  ;;  %v4926_v49 = vshll.u32 %v4735_v59, 16  ;;  %v4013_v2 = vpop.permute.xlu0 %4012 }
 0x4e2   : > { %v4119_v48 = vadd.f32 %v4013_v2, %v17866_v25  ;;  %v4686_v2 = vsel %vm2781_vm13, %v4683_v0, %v4685_v15 }
 0x4e3   : > { %v4925_v20 = vrot.slane %v4923_v45, 3  ;;  %v4928_v53 = vrot.slane %v4926_v49, 4  ;;  %v4688_v45 = vsel %vm2781_vm13, %v4685_v15, %v4687_v36  ;;  %v4986_v61 = vshll.u32 %v4686_v2, 16 }
 0x4e4   : > { %v4167_v9 = vadd.f32 %v4119_v48, %v14039_v38  ;;  %v4956_v38 = vsel %vm1444_vm5, %v4938_v30, %v4955_v52  ;;  %v4983_v48 = vshrl.u32 %v4686_v2, 16  ;;  %v5000_v15 = vshrl.u32 %v4688_v45, 16 }
 0x4e5   : > { %v4929_v14 = vor.u32 %v4928_v53, %v4925_v20  ;;  %v4015_v24 = vpop.permute.xlu0 %4014  ;;  %v17868_v20 = vld [vmem:[#allocation49_spill] sm:$0xff]  ;;  %v4689_v30 = vrot.slane %v14145_v18, 1 }
 0x4e6   : > { %v4215_v7 = vmax.f32 %v4167_v9, 0.0  ;;  %v4120_v59 = vadd.f32 %v4015_v24, %v17867_v23  ;;  %v5003_v9 = vshll.u32 %v4688_v45, 16  ;;  %v17869_v24 = vld [vmem:[#allocation9_spill] sm:$0xff] }
 0x4e7   : > { %v4930_v34 = vsel %vm1444_vm5, %v4912_v28, %v4929_v14 }
 0x4e8   : > { %v4244_v49 = vpack.c.bf16 %v4215_v7, %v4214_v4  ;;  %v4168_v25 = vadd.f32 %v4120_v59, %v14059_v43  ;;  %5581 = vmatmul.mubr.bf16.gmra.mrb[92].mxu0 %v4930_v34  ;;  %v4972_v59 = vor.u32 %v4971_v50, %v4968_v5  ;;  %v4985_v34 = vrot.slane %v4983_v48, 3 }
 0x4e9   : > { %10787 = vmatprep.mubr.msk.bf16.mxu0 %vm656_vm7, %v4956_v38  ;;  %v4597_v32 = vpop.permute.xlu0 %4596  ;;  %v5002_v38 = vrot.slane %v5000_v15, 3  ;;  %v17870_v15 = vld [vmem:[#allocation34_spill] sm:$0xff] }
 0x4ea   : > { %v4268_v53 = vmul.bf16 %v4244_v49, %v17868_v20  ;;  %v4017_v0 = vpop.permute.xlu1 %4016  ;;  %v4737_v28 = vsel %vm656_vm7, %v13964_v19, %v4597_v32  ;;  %v4988_v49 = vrot.slane %v4986_v61, 4  ;;  %v5005_v19 = vrot.slane %v5003_v9, 4 }
 0x4eb   : > { %v4121_v43 = vadd.f32 %v4017_v0, %v17869_v24  ;;  %v4940_v4 = vshrl.u32 %v4737_v28, 16  ;;  %v4943_v7 = vshll.u32 %v4737_v28, 16  ;;  %v4216_v32 = vmax.f32 %v4168_v25, 0.0 }
 0x4ec   : > { %4292 = vst.msk [vmem:[#allocation3 + $0xa0] sm:$0xff] %vm656_vm7, %v4268_v53  ;;  %v4690_v53 = vsel %vm2781_vm13, %v4687_v36, %v4689_v30  ;;  %v4973_v48 = vsel %vm1444_vm5, %v4955_v52, %v4972_v59  ;;  %v4989_v61 = vor.u32 %v4988_v49, %v4985_v34  ;;  %v14273_v25 = vor.u32 %v5005_v19, %v5002_v38 }
 0x4ed   : > { %v4169_v6 = vadd.f32 %v4121_v43, %v14079_v47  ;;  %v4942_v33 = vrot.slane %v4940_v4, 3  ;;  %v4945_v23 = vrot.slane %v4943_v7, 4  ;;  %v4509_v7 = vshrl.u32 %v14231_v58, 16 }
 0x4ee   : > { %v4019_v2 = vpop.permute.xlu1 %4018 }
 0x4ef   : > { %v4217_v45 = vmax.f32 %v4169_v6, 0.0  ;;  %v4946_v20 = vor.u32 %v4945_v23, %v4942_v33  ;;  %v4122_v0 = vadd.f32 %v4019_v2, %v13985_v51  ;;  %v5020_v33 = vshll.u32 %v4690_v53, 16 }
 0x4f0   : > { %v4511_v49 = vor.u32 %v4509_v7, %v14235_v11  ;;  %v4990_v11 = vsel %vm1444_vm5, %v4972_v59, %v4989_v61 }
 0x4f1   : > { %v4245_v28 = vpack.c.bf16 %v4217_v45, %v4216_v32  ;;  %v4170_v47 = vadd.f32 %v4122_v0, %v14102_v16  ;;  %v4947_v24 = vsel %vm1444_vm5, %v4929_v14, %v4946_v20  ;;  %v5017_v14 = vshrl.u32 %v4690_v53, 16 }
 0x4f2   : > { %v4599_v5 = vpop.permute.xlu1 %4598  ;;  %v4021_v50 = vpop.permute.xlu0 %4020  ;;  %5591 = vmatmul.mubr.bf16.gmra.mrb[96].mxu0 %v4947_v24 }
 0x4f3   : > { %v4269_v9 = vmul.bf16 %v4245_v28, %v17870_v15  ;;  %v4739_v51 = vsel %vm656_vm7, %v13995_v3, %v4599_v5  ;;  %v4123_v36 = vadd.f32 %v4021_v50, %v13993_v21  ;;  %10788 = vmatprep.mubr.msk.bf16.mxu0 %vm656_vm7, %v4973_v48  ;;  %v14280_v16 = vld [vmem:[#allocation3 + $0xa0] sm:$0xff]  ;;  %v4697_v3 = vrot.slane %v14231_v58, 1 }
 0x4f4   : > { %v4957_v43 = vshrl.u32 %v4739_v51, 16  ;;  %v4960_v4 = vshll.u32 %v4739_v51, 16  ;;  %v4513_v52 = vshll.u32 %v14280_v16, 16  ;;  %v4699_v21 = vrot.slane %v14280_v16, 1 }
 0x4f5   : > { %4293 = vst.msk [vmem:[#allocation3 + $0xa8] sm:$0xff] %vm656_vm7, %v4269_v9  ;;  %v4171_v6 = vadd.f32 %v4123_v36, %v14118_v40  ;;  %v4218_v19 = vmax.f32 %v4170_v47, 0.0  ;;  %v4691_v28 = vrot.slane %v14175_v54, 1  ;;  %v5007_v47 = vsel %vm1444_vm5, %v4989_v61, %v14273_v25 }
 0x4f6   : > { %v4959_v23 = vrot.slane %v4957_v43, 3  ;;  %v4962_v2 = vrot.slane %v4960_v4, 4  ;;  %v4023_v34 = vpop.permute.xlu0 %4022  ;;  %v4515_v38 = vrot.slane %v4513_v52, 1  ;;  %v4700_v0 = vsel %vm2781_vm13, %v4697_v3, %v4699_v21  ;;  %v17871_v43 = vld [vmem:[#allocation54_spill] sm:$0xff] }
 0x4f7   : > { %v4219_v32 = vmax.f32 %v4171_v6, 0.0  ;;  %v4124_v45 = vadd.f32 %v4023_v34, %v14023_v63  ;;  %v5019_v9 = vrot.slane %v5017_v14, 3  ;;  %v5022_v51 = vrot.slane %v5020_v33, 4 }
 0x4f8   : > { %v4963_v40 = vor.u32 %v4962_v2, %v4959_v23  ;;  %v4516_v53 = vsel %vm2473_vm8, %v4511_v49, %v4515_v38  ;;  %v5102_v36 = vshrl.u32 %v4700_v0, 16  ;;  %v4517_v59 = vshrl.u32 %v14280_v16, 16 }
 0x4f9   : > { %v4246_v24 = vpack.c.bf16 %v4219_v32, %v4218_v19  ;;  %v4172_v5 = vadd.f32 %v4124_v45, %v14141_v27  ;;  %4614 = vrot.lane.b32.xlu1 %v4516_v53, %s11345_s27 }
 0x4fa   : > { %v4025_v63 = vpop.permute.xlu1 %4024  ;;  %v4601_v50 = vpop.permute.xlu0 %4600  ;;  %v4964_v48 = vsel %vm1444_vm5, %v4946_v20, %v4963_v40  ;;  %v14314_v20 = vsel %vm2781_vm13, %v4689_v30, %v4691_v28  ;;  %v4519_v14 = vor.u32 %v4517_v59, %v4515_v38  ;;  %v5104_v32 = vrot.slane %v5102_v36, 3  ;;  %v17872_v59 = vld [vmem:[#allocation36_spill] sm:$0xff] }
 0x4fb   : > { %v4270_v4 = vmul.bf16 %v4246_v24, %v17871_v43  ;;  %v4125_v7 = vadd.f32 %v4025_v63, %v14034_v39  ;;  %v4741_v27 = vsel %vm656_vm7, %v14030_v17, %v4601_v50  ;;  %5601 = vmatmul.mubr.bf16.gmra.mrb[100].mxu0 %v4964_v48  ;;  %v5105_v39 = vshll.u32 %v4700_v0, 16 }
 0x4fc   : > { %v4974_v52 = vshrl.u32 %v4741_v27, 16  ;;  %v4977_v6 = vshll.u32 %v4741_v27, 16  ;;  %10789 = vmatprep.mubr.msk.bf16.mxu0 %vm656_vm7, %v4990_v11  ;;  %v14307_v61 = vld [vmem:[#allocation3 + $0xa8] sm:$0xff]  ;;  %v4220_v2 = vmax.f32 %v4172_v5, 0.0  ;;  %v14326_v48 = vor.u32 %v5022_v51, %v5019_v9 }
 0x4fd   : > { %4294 = vst.msk [vmem:[#allocation3 + $0xb0] sm:$0xff] %vm656_vm7, %v4270_v4  ;;  %v4173_v17 = vadd.f32 %v4125_v7, %v14153_v56  ;;  %v4521_v33 = vshll.u32 %v14307_v61, 16  ;;  %v4701_v23 = vrot.slane %v14307_v61, 1  ;;  %v5107_v56 = vrot.slane %v5105_v39, 4 }
 0x4fe   : > { %v4976_v34 = vrot.slane %v4974_v52, 3  ;;  %v4979_v49 = vrot.slane %v4977_v6, 4  ;;  %v4027_v19 = vpop.permute.xlu1 %4026  ;;  %v5034_v7 = vshrl.u32 %v14314_v20, 16  ;;  %v4525_v9 = vshrl.u32 %v14307_v61, 16 }
 0x4ff   : > { %v4221_v45 = vmax.f32 %v4173_v17, 0.0  ;;  %v4126_v53 = vadd.f32 %v4027_v19, %v14056_v60  ;;  %v4523_v30 = vrot.slane %v4521_v33, 1  ;;  %v4702_v0 = vsel %vm2781_vm13, %v4699_v21, %v4701_v23 }
 0x500   : > { %v4980_v24 = vor.u32 %v4979_v49, %v4976_v34  ;;  %v5119_v38 = vshrl.u32 %v4702_v0, 16  ;;  %v5122_v11 = vshll.u32 %v4702_v0, 16 }
 0x501   : > { %v4247_v63 = vpack.c.bf16 %v4221_v45, %v4220_v2  ;;  %v4174_v50 = vadd.f32 %v4126_v53, %v14171_v37  ;;  %v4524_v5 = vsel %vm2473_vm8, %v4519_v14, %v4523_v30  ;;  %v4693_v2 = vrot.slane %v14205_v55, 1 }
 0x502   : > { %v4603_v36 = vpop.permute.xlu1 %4602  ;;  %4616 = vrot.lane.b32.xlu0 %v4524_v5, %s11345_s27  ;;  %v4029_v60 = vpop.permute.xlu0 %4028  ;;  %v4981_v4 = vsel %vm1444_vm5, %v4963_v40, %v4980_v24  ;;  %v5121_v21 = vrot.slane %v5119_v38, 3  ;;  %v5124_v27 = vrot.slane %v5122_v11, 4  ;;  %v14339_v40 = vor.u32 %v5107_v56, %v5104_v32 }
 0x503   : > { %v4271_v52 = vmul.bf16 %v4247_v63, %v17872_v59  ;;  %v4743_v6 = vsel %vm656_vm7, %v14065_v57, %v4603_v36  ;;  %v4127_v37 = vadd.f32 %v4029_v60, %v14069_v41  ;;  %5611 = vmatmul.mubr.bf16.gmra.mrb[104].mxu0 %v4981_v4  ;;  %v5037_v41 = vshll.u32 %v14314_v20, 16  ;;  %v17873_v4 = vld [vmem:[#allocation56_spill] sm:$0xff] }
 0x504   : > { %v4991_v51 = vshrl.u32 %v4743_v6, 16  ;;  %v4994_v39 = vshll.u32 %v4743_v6, 16  ;;  %10790 = vmatprep.mubr.msk.bf16.mxu0 %vm656_vm7, %v5007_v47  ;;  %v14337_v17 = vld [vmem:[#allocation3 + $0xb0] sm:$0xff]  ;;  %v14341_v14 = vor.u32 %v5124_v27, %v5121_v21  ;;  %v4527_v47 = vor.u32 %v4525_v9, %v4523_v30 }
 0x505   : > { %4295 = vst.msk [vmem:[#allocation3 + $0xb8] sm:$0xff] %vm656_vm7, %v4271_v52  ;;  %v4175_v33 = vadd.f32 %v4127_v37, %v14188_v62  ;;  %v4529_v57 = vshll.u32 %v14337_v17, 16  ;;  %v4222_v45 = vmax.f32 %v4174_v50, 0.0  ;;  %v5036_v36 = vrot.slane %v5034_v7, 3  ;;  %v11258_v50 = vld [vmem:[%s17374_s2 + $0x184] ss:$8 sps:$4 sm:$0xff]  }
 0x506   : > { %v4993_v34 = vrot.slane %v4991_v51, 3  ;;  %v4996_v49 = vrot.slane %v4994_v39, 4  ;;  %v4031_v19 = vpop.permute.xlu0 %4030  ;;  %v14351_v32 = vsel %vm1444_vm5, %v14339_v40, %v14341_v14  ;;  %v5039_v60 = vrot.slane %v5037_v41, 4  ;;  %7352 = vmatprep.subr.bf16.mxu1 %v11258_v50 }
 0x507   : > { %v4223_v53 = vmax.f32 %v4175_v33, 0.0  ;;  %v4128_v0 = vadd.f32 %v4031_v19, %v14099_v42  ;;  %v4531_v62 = vrot.slane %v4529_v57, 1  ;;  %v4694_v42 = vsel %vm2781_vm13, %v4691_v28, %v4693_v2 }
 0x508   : > { %v4997_v56 = vor.u32 %v4996_v49, %v4993_v34  ;;  %v5024_v28 = vsel %vm1444_vm5, %v14273_v25, %v14326_v48  ;;  %v5051_v9 = vshrl.u32 %v4694_v42, 16  ;;  %v5040_v25 = vor.u32 %v5039_v60, %v5036_v36 }
 0x509   : > { %v4248_v38 = vpack.c.bf16 %v4223_v53, %v4222_v45  ;;  %v4176_v20 = vadd.f32 %v4128_v0, %v14202_v22  ;;  %v4532_v11 = vsel %vm2473_vm8, %v4527_v47, %v4531_v62  ;;  %v11256_v22 = vld [vmem:[%s17374_s2 + $0x180] ss:$8 sps:$4 sm:$0xff]   ;;  %v5054_v33 = vshll.u32 %v4694_v42, 16 }
 0x50a   : > { %v4033_v63 = vpop.permute.xlu1 %4032  ;;  %4618 = vrot.lane.b32.xlu1 %v4532_v11, %s11345_s27  ;;  %v4605_v30 = vpop.permute.xlu0 %4604  ;;  %v4998_v5 = vsel %vm1444_vm5, %v4980_v24, %v4997_v56  ;;  %7353 = vmatpush1.bf16.msra.mxu1 %v11256_v22  ;;  %v4695_v45 = vrot.slane %v14221_v31, 1  ;;  %v5041_v36 = vsel %vm1444_vm5, %v14326_v48, %v5040_v25 }
 0x50b   : > { %v4272_v21 = vmul.bf16 %v4248_v38, %v17873_v4  ;;  %v4129_v24 = vadd.f32 %v4033_v63, %v14111_v44  ;;  %v4745_v7 = vsel %vm656_vm7, %v14107_v1, %v4605_v30  ;;  %5621 = vmatmul.mubr.bf16.gmra.mrb[108].mxu0 %v4998_v5  ;;  %v4533_v44 = vshrl.u32 %v14337_v17, 16 }
 0x50c   : > { %v5008_v27 = vshrl.u32 %v4745_v7, 16  ;;  %v5011_v52 = vshll.u32 %v4745_v7, 16  ;;  %10791 = vmatprep.mubr.msk.bf16.mxu0 %vm656_vm7, %v5024_v28  ;;  %v14377_v6 = vld [vmem:[#allocation3 + $0xb8] sm:$0xff]  ;;  %v4224_v57 = vmax.f32 %v4176_v20, 0.0  ;;  %v5053_v38 = vrot.slane %v5051_v9, 3 }
 0x50d   : > { %4296 = vst.msk [vmem:[#allocation3 + $0xc0] sm:$0xff] %vm656_vm7, %v4272_v21  ;;  %v4177_v37 = vadd.f32 %v4129_v24, %v14211_v8  ;;  %v4537_v1 = vshll.u32 %v14377_v6, 16  ;;  %v4535_v34 = vor.u32 %v4533_v44, %v4531_v62  ;;  %v5056_v30 = vrot.slane %v5054_v33, 4  ;;  %v17874_v62 = vld [vmem:[#allocation8_spill] sm:$0xff]  ;;  %v14401_v21 = vld [vmem:[#allocation3 + $0xd0] sm:$0xff] }
 0x50e   : > { %v5010_v51 = vrot.slane %v5008_v27, 3  ;;  %v5013_v39 = vrot.slane %v5011_v52, 4  ;;  %v4696_v22 = vsel %vm2781_vm13, %v4693_v2, %v4695_v45  ;;  %v4561_v7 = vshll.u32 %v14401_v21, 16  ;;  %v14404_v28 = vld [vmem:[#allocation3 + $0xd8] sm:$0xf] }
 0x50f   : > { %v4225_v41 = vmax.f32 %v4177_v37, 0.0  ;;  %v4539_v49 = vrot.slane %v4537_v1, 1  ;;  %v5057_v48 = vor.u32 %v5056_v30, %v5053_v38  ;;  %v5068_v37 = vshrl.u32 %v4696_v22, 16 }
 0x510   : > { %v5014_v19 = vor.u32 %v5013_v39, %v5010_v51  ;;  %v4607_v47 = vpop.permute.xlu1 %4606  ;;  %v5071_v44 = vshll.u32 %v4696_v22, 16  ;;  %v4565_v51 = vshrl.u32 %v14401_v21, 16  ;;  %v4569_v39 = vshll.u32 %v14404_v28, 16  ;;  %v11261_v22 = vld [vmem:[%s17374_s2 + $0x194] ss:$8 sps:$4 sm:$0xff]  }
 0x511   : > { %v4249_v53 = vpack.c.bf16 %v4225_v41, %v4224_v57  ;;  %v4747_v8 = vsel %vm656_vm7, %v14145_v18, %v4607_v47  ;;  %v4540_v0 = vsel %vm2473_vm8, %v4535_v34, %v4539_v49  ;;  %v4563_v34 = vrot.slane %v4561_v7, 1  ;;  %7354 = vmatprep.subr.bf16.mxu1 %v11261_v22 }
 0x512   : > { %v5025_v11 = vshrl.u32 %v4747_v8, 16  ;;  %v5028_v63 = vshll.u32 %v4747_v8, 16  ;;  %4620 = vrot.lane.b32.xlu0 %v4540_v0, %s11345_s27  ;;  %v5015_v20 = vsel %vm1444_vm5, %v4997_v56, %v5014_v19  ;;  %v4541_v56 = vshrl.u32 %v14377_v6, 16 }
 0x513   : > { %v4273_v5 = vmul.bf16 %v4249_v53, %v17874_v62  ;;  %5631 = vmatmul.mubr.bf16.gmra.mrb[112].mxu0 %v5015_v20  ;;  %v5070_v47 = vrot.slane %v5068_v37, 3  ;;  %v5073_v53 = vrot.slane %v5071_v44, 4  ;;  %v4567_v30 = vor.u32 %v4565_v51, %v4563_v34 }
 0x514   : > { %v5027_v60 = vrot.slane %v5025_v11, 3  ;;  %v5030_v42 = vrot.slane %v5028_v63, 4  ;;  %10792 = vmatprep.mubr.msk.bf16.mxu0 %vm656_vm7, %v5041_v36  ;;  %v14393_v18 = vld [vmem:[#allocation3 + $0xc0] sm:$0xff]  ;;  %v4543_v27 = vor.u32 %v4541_v56, %v4539_v49  ;;  %v5058_v49 = vsel %vm1444_vm5, %v5040_v25, %v5057_v48 }
 0x515   : > { %4297 = vst.msk [vmem:[#allocation3 + $0xc8] sm:$0xff] %vm656_vm7, %v4273_v5  ;;  %v4545_v50 = vshll.u32 %v14393_v18, 16  ;;  %v4549_v11 = vshrl.u32 %v14393_v18, 16  ;;  %v4571_v63 = vrot.slane %v4569_v39, 1 }
 0x516   : > { %v5031_v24 = vor.u32 %v5030_v42, %v5027_v60 }
 0x517   : > { %v4547_v52 = vrot.slane %v4545_v50, 1  ;;  %v4573_v50 = vshrl.u32 %v14404_v28, 16 }
 0x518   : > { %v4609_v1 = vpop.permute.xlu0 %4608  ;;  %v5032_v41 = vsel %vm1444_vm5, %v5014_v19, %v5031_v24 }
 0x519   : > { %v4749_v2 = vsel %vm656_vm7, %v14175_v54, %v4609_v1  ;;  %v4548_v9 = vsel %vm2473_vm8, %v4543_v27, %v4547_v52  ;;  %v4698_v54 = vsel %vm2781_vm13, %v4695_v45, %v4697_v3  ;;  %v4551_v36 = vor.u32 %v4549_v11, %v4547_v52  ;;  %v11259_v45 = vld [vmem:[%s17374_s2 + $0x190] ss:$8 sps:$4 sm:$0xff]  }
 0x51a   : > { %v5042_v33 = vshrl.u32 %v4749_v2, 16  ;;  %v5045_v57 = vshll.u32 %v4749_v2, 16  ;;  %4622 = vrot.lane.b32.xlu1 %v4548_v9, %s11345_s27  ;;  %v5085_v25 = vshrl.u32 %v4698_v54, 16  ;;  %v5088_v5 = vshll.u32 %v4698_v54, 16  ;;  %7355 = vmatpush1.bf16.msra.mxu1 %v11259_v45 }
 0x51b   : > { %5641 = vmatmul.mubr.bf16.gmra.mrb[116].mxu0 %v5032_v41  ;;  %v5074_v3 = vor.u32 %v5073_v53, %v5070_v47  ;;  %v4572_v2 = vsel %vm2473_vm8, %v4567_v30, %v4571_v63  ;;  %v4575_v41 = vor.u32 %v4573_v50, %v4571_v63  ;;  %v11264_v63 = vld [vmem:[%s17374_s2 + $0x1a4] ss:$8 sps:$4 sm:$0xff]   ;;  %v11268_v50 = vld [vmem:[%s17374_s2 + $0x1c0] ss:$8 sps:$4 sm:$0xff]  }
 0x51c   : > { %v5044_v8 = vrot.slane %v5042_v33, 3  ;;  %v5047_v0 = vrot.slane %v5045_v57, 4  ;;  %10793 = vmatprep.mubr.msk.bf16.mxu0 %vm656_vm7, %v5058_v49  ;;  %v14418_v38 = vld [vmem:[#allocation3 + $0xc8] sm:$0xff]  ;;  %v5087_v39 = vrot.slane %v5085_v25, 3  ;;  %7356 = vmatprep.subr.bf16.mxu1 %v11264_v63  ;;  %v11265_v25 = vld [vmem:[%s17374_s2 + $0x1b0] ss:$8 sps:$4 sm:$0xff]  }
 0x51d   : > { %v4553_v19 = vshll.u32 %v14418_v38, 16  ;;  %v4557_v42 = vshrl.u32 %v14418_v38, 16  ;;  %v5075_v51 = vsel %vm1444_vm5, %v5057_v48, %v5074_v3 }
 0x51e   : > { %v5048_v20 = vor.u32 %v5047_v0, %v5044_v8 }
 0x51f   : > { %v4555_v60 = vrot.slane %v4553_v19, 1  ;;  %v11262_v19 = vld [vmem:[%s17374_s2 + $0x1a0] ss:$8 sps:$4 sm:$0xff]  }
 0x520   : > { %v4611_v56 = vpop.permute.xlu1 %4610  ;;  %v5049_v1 = vsel %vm1444_vm5, %v5031_v24, %v5048_v20  ;;  %7357 = vmatpush1.bf16.msra.mxu1 %v11262_v19 }
 0x521   : > { %v4751_v7 = vsel %vm656_vm7, %v14205_v55, %v4611_v56  ;;  %v4556_v27 = vsel %vm2473_vm8, %v4551_v36, %v4555_v60  ;;  %v4559_v52 = vor.u32 %v4557_v42, %v4555_v60  ;;  %v5090_v55 = vrot.slane %v5088_v5, 4  ;;  %v11267_v5 = vld [vmem:[%s17374_s2 + $0x1b4] ss:$8 sps:$4 sm:$0xff]  }
 0x522   : > { %v5059_v37 = vshrl.u32 %v4751_v7, 16  ;;  %v5062_v44 = vshll.u32 %v4751_v7, 16  ;;  %4624 = vrot.lane.b32.xlu0 %v4556_v27, %s11345_s27  ;;  %7358 = vmatprep.subr.bf16.mxu1 %v11267_v5  ;;  %v11270_v7 = vld [vmem:[%s17374_s2 + $0x1c4] ss:$8 sps:$4 sm:$0xff]  }
 0x523   : > { %5651 = vmatmul.mubr.bf16.gmra.mrb[120].mxu0 %v5049_v1  ;;  %v4564_v9 = vsel %vm2473_vm8, %v4559_v52, %v4563_v34  ;;  %v5091_v24 = vor.u32 %v5090_v55, %v5087_v39 }
 0x524   : > { %v5061_v33 = vrot.slane %v5059_v37, 3  ;;  %v5064_v57 = vrot.slane %v5062_v44, 4  ;;  %4626 = vrot.lane.b32.xlu1 %v4564_v9, %s11345_s27  ;;  %10794 = vmatprep.mubr.msk.bf16.mxu0 %vm656_vm7, %v5075_v51 }
 0x525   : > { %v5092_v8 = vsel %vm1444_vm5, %v5074_v3, %v5091_v24  ;;  %v5109_v30 = vsel %vm1444_vm5, %v5091_v24, %v14339_v40  ;;  %7359 = vmatpush1.bf16.msra.mxu1 %v11265_v25 }
 0x526   : > { %v5065_v49 = vor.u32 %v5064_v57, %v5061_v33  ;;  %4628 = vrot.lane.b32.xlu0 %v4572_v2, %s11345_s27  ;;  %7360 = vmatprep.subr.bf16.mxu1 %v11270_v7 }
 0x528   : > { %v4613_v47 = vpop.permute.xlu0 %4612  ;;  %4630 = vrot.lane.b32.xlu1 %v4575_v41, %s11345_s27  ;;  %v5066_v54 = vsel %vm1444_vm5, %v5048_v20, %v5065_v49  ;;  %v4703_v41 = vrot.slane %v14337_v17, 1 }
 0x529   : > { %v4753_v34 = vsel %vm656_vm7, %v14221_v31, %v4613_v47  ;;  %7361 = vmatpush1.bf16.msra.mxu1 %v11268_v50  ;;  %v11271_v47 = vld [vmem:[%s17374_s2 + $0x1d0] ss:$8 sps:$4 sm:$0xff]  }
 0x52a   : > { %v5076_v48 = vshrl.u32 %v4753_v34, 16  ;;  %v5079_v53 = vshll.u32 %v4753_v34, 16  ;;  %v11273_v34 = vld [vmem:[%s17374_s2 + $0x1d4] ss:$8 sps:$4 sm:$0xff]  }
 0x52b   : > { %5661 = vmatmul.mubr.bf16.gmra.mrb[124].mxu0 %v5066_v54  ;;  %7362 = vmatprep.subr.bf16.mxu1 %v11273_v34 }
 0x52c   : > { %v5078_v0 = vrot.slane %v5076_v48, 3  ;;  %v5081_v11 = vrot.slane %v5079_v53, 4  ;;  %10795 = vmatprep.mubr.msk.bf16.mxu0 %vm656_vm7, %v5092_v8  ;;  %v4704_v8 = vsel %vm2781_vm13, %v4701_v23, %v4703_v41  ;;  %v4705_v23 = vrot.slane %v14377_v6, 1 }
 0x52d   : > { %7363 = vmatpush1.bf16.msra.mxu1 %v11271_v47  ;;  %v5139_v25 = vshll.u32 %v4704_v8, 16 }
 0x52e   : > { %v14453_v31 = vor.u32 %v5081_v11, %v5078_v0 }
 0x530   : > { %v5083_v20 = vsel %vm1444_vm5, %v5065_v49, %v14453_v31 }
 0x533   : > { %5671 = vmatmul.mubr.bf16.gmra.mrb[128].mxu0 %v5083_v20 }
 0x534   : > { %10796 = vmatprep.mubr.msk.bf16.mxu0 %vm656_vm7, %v5109_v30  ;;  %v5136_v30 = vshrl.u32 %v4704_v8, 16 }
 0x546   : > { %v14466_v36 = vpop.f32.mrb[60].mxu0 }
 0x547   : > { %v5510_v60 = vpop.f32.mrb[61].mxu0 }
 0x548   : > { %v14468_v42 = vpop.f32.mrb[62].mxu0 }
 0x549   : > { %v5513_v3 = vpop.f32.mrb[63].mxu0 }
 0x54e   : > { %v14470_v45 = vpop.f32.mrb[64].mxu0 }
 0x54f   : > { %v5518_v40 = vpop.f32.mrb[65].mxu0 }
 0x550   : > { %v14472_v22 = vpop.f32.mrb[66].mxu0  ;;  %v5138_v40 = vrot.slane %v5136_v30, 3  ;;  %v11276_v30 = vld [vmem:[%s17374_s2 + $0x1e4] ss:$8 sps:$4 sm:$0xff]  }
 0x551   : > { %v5521_v56 = vpop.f32.mrb[67].mxu0  ;;  %5816 = vrot.lane.b32.xlu0 %v14472_v22, %s11345_s27  ;;  %7364 = vmatprep.subr.bf16.mxu1 %v11276_v30 }
 0x552   : > { %v5141_v56 = vrot.slane %v5139_v25, 4 }
 0x556   : > { %v14482_v27 = vpop.f32.mrb[68].mxu0 }
 0x557   : > { %v5526_v52 = vpop.f32.mrb[69].mxu0  ;;  %5818 = vrot.lane.b32.xlu1 %v14482_v27, %s11345_s27 }
 0x558   : > { %v14486_v37 = vpop.f32.mrb[70].mxu0 }
 0x559   : > { %v5529_v44 = vpop.f32.mrb[71].mxu0  ;;  %5820 = vrot.lane.b32.xlu0 %v14486_v37, %s11345_s27 }
 0x55a   : > { %v4706_v44 = vsel %vm2781_vm13, %v4703_v41, %v4705_v23  ;;  %v4707_v41 = vrot.slane %v14393_v18, 1 }
 0x55b   : > { %v5153_v34 = vshrl.u32 %v4706_v44, 16 }
 0x55e   : > { %v14490_v1 = vpop.f32.mrb[72].mxu0 }
 0x55f   : > { %v14492_v2 = vpop.f32.mrb[73].mxu0  ;;  %5822 = vrot.lane.b32.xlu1 %v14490_v1, %s11345_s27 }
 0x560   : > { %v14496_v9 = vpop.f32.mrb[74].mxu0 }
 0x561   : > { %v14498_v51 = vpop.f32.mrb[75].mxu0  ;;  %5824 = vrot.lane.b32.xlu0 %v14496_v9, %s11345_s27 }
 0x566   : > { %v14502_v39 = vpop.f32.mrb[76].mxu0 }
 0x567   : > { %v14504_v55 = vpop.f32.mrb[77].mxu0  ;;  %5826 = vrot.lane.b32.xlu1 %v14502_v39, %s11345_s27 }
 0x568   : > { %v14508_v33 = vpop.f32.mrb[78].mxu0 }
 0x569   : > { %v14510_v57 = vpop.f32.mrb[79].mxu0  ;;  %5828 = vrot.lane.b32.xlu0 %v14508_v33, %s11345_s27 }
 0x56b   : > { %v4615_v49 = vpop.permute.xlu1 %4614 }
 0x56c   : > { %v4755_v24 = vsel %vm656_vm7, %v14231_v58, %v4615_v49 }
 0x56d   : > { %v5093_v48 = vshrl.u32 %v4755_v24, 16  ;;  %v5096_v53 = vshll.u32 %v4755_v24, 16 }
 0x56e   : > { %v14523_v54 = vpop.f32.mrb[80].mxu0 }
 0x56f   : > { %v5095_v0 = vrot.slane %v5093_v48, 3  ;;  %v5098_v11 = vrot.slane %v5096_v53, 4  ;;  %v14528_v58 = vpop.f32.mrb[81].mxu0  ;;  %5830 = vrot.lane.b32.xlu1 %v14523_v54, %s11345_s27  ;;  %v5156_v48 = vshll.u32 %v4706_v44, 16 }
 0x570   : > { %v14532_v19 = vpop.f32.mrb[82].mxu0 }
 0x571   : > { %v5099_v63 = vor.u32 %v5098_v11, %v5095_v0  ;;  %v14534_v20 = vpop.f32.mrb[83].mxu0  ;;  %5832 = vrot.lane.b32.xlu0 %v14532_v19, %s11345_s27  ;;  %v11274_v11 = vld [vmem:[%s17374_s2 + $0x1e0] ss:$8 sps:$4 sm:$0xff]  }
 0x572   : > { %7365 = vmatpush1.bf16.msra.mxu1 %v11274_v11 }
 0x573   : > { %v5100_v5 = vsel %vm1444_vm5, %v14453_v31, %v5099_v63 }
 0x574   : > { %v4617_v60 = vpop.permute.xlu0 %4616  ;;  %5681 = vmatmul.mubr.bf16.gmra.mrb[132].mxu0 %v5100_v5 }
 0x575   : > { %v4757_v3 = vsel %vm656_vm7, %v14280_v16, %v4617_v60  ;;  %10797 = vmatprep.mubr.msk.bf16.mxu0 %vm656_vm7, %v14351_v32  ;;  %v5142_v32 = vor.u32 %v5141_v56, %v5138_v40  ;;  %v5155_v60 = vrot.slane %v5153_v34, 3 }
 0x576   : > { %v5110_v50 = vshrl.u32 %v4757_v3, 16  ;;  %v5113_v7 = vshll.u32 %v4757_v3, 16  ;;  %v14545_v52 = vpop.f32.mrb[84].mxu0  ;;  %v5158_v3 = vrot.slane %v5156_v48, 4 }
 0x577   : > { %v14548_v49 = vpop.f32.mrb[85].mxu0  ;;  %5834 = vrot.lane.b32.xlu1 %v14545_v52, %s11345_s27  ;;  %v5143_v5 = vsel %vm1444_vm5, %v14341_v14, %v5142_v32 }
 0x578   : > { %v5112_v31 = vrot.slane %v5110_v50, 3  ;;  %v5115_v24 = vrot.slane %v5113_v7, 4  ;;  %v14552_v47 = vpop.f32.mrb[86].mxu0  ;;  %v4708_v50 = vsel %vm2781_vm13, %v4705_v23, %v4707_v41 }
 0x579   : > { %v14554_v16 = vpop.f32.mrb[87].mxu0  ;;  %5836 = vrot.lane.b32.xlu0 %v14552_v47, %s11345_s27  ;;  %v5170_v34 = vshrl.u32 %v4708_v50, 16  ;;  %v5173_v48 = vshll.u32 %v4708_v50, 16 }
 0x57a   : > { %v5116_v53 = vor.u32 %v5115_v24, %v5112_v31  ;;  %v5159_v24 = vor.u32 %v5158_v3, %v5155_v60  ;;  %v11277_v3 = vld [vmem:[%s17374_s2 + $0x1f0] ss:$8 sps:$4 sm:$0xff]  }
 0x57c   : > { %v4619_v8 = vpop.permute.xlu1 %4618  ;;  %v5117_v0 = vsel %vm1444_vm5, %v5099_v63, %v5116_v53 }
 0x57d   : > { %v4759_v25 = vsel %vm656_vm7, %v14307_v61, %v4619_v8  ;;  %5691 = vmatmul.mubr.bf16.gmra.mrb[136].mxu0 %v5117_v0  ;;  %v4709_v8 = vrot.slane %v14418_v38, 1 }
 0x57e   : > { %v5127_v40 = vshrl.u32 %v4759_v25, 16  ;;  %v5130_v56 = vshll.u32 %v4759_v25, 16  ;;  %v14570_v63 = vpop.f32.mrb[88].mxu0  ;;  %10798 = vmatprep.mubr.msk.bf16.mxu0 %vm656_vm7, %v5143_v5  ;;  %v5160_v25 = vsel %vm1444_vm5, %v5142_v32, %v5159_v24  ;;  %v5172_v5 = vrot.slane %v5170_v34, 3 }
 0x57f   : > { %v14574_v7 = vpop.f32.mrb[89].mxu0  ;;  %5838 = vrot.lane.b32.xlu1 %v14570_v63, %s11345_s27  ;;  %v4710_v60 = vsel %vm2781_vm13, %v4707_v41, %v4709_v8  ;;  %v11280_v41 = vld [vmem:[%s17374_s2 + $0x200] ss:$8 sps:$4 sm:$0xff]  }
 0x580   : > { %v5129_v61 = vrot.slane %v5127_v40, 3  ;;  %v5132_v44 = vrot.slane %v5130_v56, 4  ;;  %v14578_v14 = vpop.f32.mrb[90].mxu0  ;;  %v5175_v40 = vrot.slane %v5173_v48, 4  ;;  %v5187_v32 = vshrl.u32 %v4710_v60, 16 }
 0x581   : > { %v14580_v31 = vpop.f32.mrb[91].mxu0  ;;  %5840 = vrot.lane.b32.xlu0 %v14578_v14, %s11345_s27  ;;  %v4711_v48 = vrot.slane %v14401_v21, 1 }
 0x582   : > { %v5133_v23 = vor.u32 %v5132_v44, %v5129_v61  ;;  %v5176_v61 = vor.u32 %v5175_v40, %v5172_v5  ;;  %v5190_v44 = vshll.u32 %v4710_v60, 16  ;;  %v5189_v40 = vrot.slane %v5187_v32, 3 }
 0x584   : > { %v4621_v0 = vpop.permute.xlu0 %4620  ;;  %v5134_v30 = vsel %vm1444_vm5, %v5116_v53, %v5133_v23  ;;  %v11279_v53 = vld [vmem:[%s17374_s2 + $0x1f4] ss:$8 sps:$4 sm:$0xff]   ;;  %v5177_v5 = vsel %vm1444_vm5, %v5159_v24, %v5176_v61 }
 0x585   : > { %v4761_v11 = vsel %vm656_vm7, %v14337_v17, %v4621_v0  ;;  %5701 = vmatmul.mubr.bf16.gmra.mrb[140].mxu0 %v5134_v30  ;;  %7366 = vmatprep.subr.bf16.mxu1 %v11279_v53  ;;  %v11282_v0 = vld [vmem:[%s17374_s2 + $0x204] ss:$8 sps:$4 sm:$0xff]   ;;  %v4712_v53 = vsel %vm2781_vm13, %v4709_v8, %v4711_v48 }
 0x586   : > { %v5144_v56 = vshrl.u32 %v4761_v11, 16  ;;  %v5147_v62 = vshll.u32 %v4761_v11, 16  ;;  %10799 = vmatprep.mubr.msk.bf16.mxu0 %vm656_vm7, %v5160_v25  ;;  %7367 = vmatpush1.bf16.msra.mxu1 %v11277_v3  ;;  %v5204_v24 = vshrl.u32 %v4712_v53, 16  ;;  %v5207_v32 = vshll.u32 %v4712_v53, 16 }
 0x587   : > { %7368 = vmatprep.subr.bf16.mxu1 %v11282_v0 }
 0x588   : > { %v5146_v17 = vrot.slane %v5144_v56, 3  ;;  %v5149_v50 = vrot.slane %v5147_v62, 4  ;;  %v11285_v62 = vld [vmem:[%s17374_s2 + $0x214] ss:$8 sps:$4 sm:$0xff]   ;;  %v5192_v56 = vrot.slane %v5190_v44, 4  ;;  %v5209_v4 = vrot.slane %v5207_v32, 4 }
 0x58a   : > { %v5150_v34 = vor.u32 %v5149_v50, %v5146_v17  ;;  %7369 = vmatpush1.bf16.msra.mxu1 %v11280_v41  ;;  %v4352_v17 = vld [vmem:[#allocation3 + $0xd8] sm:$0x1f] }
 0x58b   : > { %7370 = vmatprep.subr.bf16.mxu1 %v11285_v62  ;;  %v4713_v0 = vrot.slane %v4352_v17, 1 }
 0x58c   : > { %v4623_v30 = vpop.permute.xlu1 %4622  ;;  %v5151_v11 = vsel %vm1444_vm5, %v5133_v23, %v5150_v34  ;;  %v11283_v23 = vld [vmem:[%s17374_s2 + $0x210] ss:$8 sps:$4 sm:$0xff]  }
 0x58d   : > { %v4763_v25 = vsel %vm656_vm7, %v14377_v6, %v4623_v30  ;;  %5711 = vmatmul.mubr.bf16.gmra.mrb[144].mxu0 %v5151_v11  ;;  %v5193_v30 = vor.u32 %v5192_v56, %v5189_v40  ;;  %v4714_v40 = vsel %vm2781_vm13, %v4711_v48, %v4713_v0 }
 0x58e   : > { %v5161_v60 = vshrl.u32 %v4763_v25, 16  ;;  %v5164_v3 = vshll.u32 %v4763_v25, 16  ;;  %10800 = vmatprep.mubr.msk.bf16.mxu0 %vm656_vm7, %v5177_v5  ;;  %7371 = vmatpush1.bf16.msra.mxu1 %v11283_v23  ;;  %v5206_v5 = vrot.slane %v5204_v24, 3 }
 0x58f   : > { %v5194_v41 = vsel %vm1444_vm5, %v5176_v61, %v5193_v30 }
 0x590   : > { %v5163_v6 = vrot.slane %v5161_v60, 3  ;;  %v5166_v50 = vrot.slane %v5164_v3, 4 }
 0x592   : > { %v5167_v44 = vor.u32 %v5166_v50, %v5163_v6  ;;  %v5221_v6 = vshrl.u32 %v4714_v40, 16  ;;  %v5224_v50 = vshll.u32 %v4714_v40, 16 }
 0x594   : > { %v4625_v11 = vpop.permute.xlu0 %4624  ;;  %v5168_v25 = vsel %vm1444_vm5, %v5150_v34, %v5167_v44 }
 0x595   : > { %v4765_v8 = vsel %vm656_vm7, %v14393_v18, %v4625_v11  ;;  %5721 = vmatmul.mubr.bf16.gmra.mrb[148].mxu0 %v5168_v25  ;;  %v5210_v18 = vor.u32 %v5209_v4, %v5206_v5  ;;  %v5241_v4 = vshll.u32 %v4713_v0, 16 }
 0x596   : > { %v5178_v62 = vshrl.u32 %v4765_v8, 16  ;;  %v5181_v60 = vshll.u32 %v4765_v8, 16  ;;  %v4627_v3 = vpop.permute.xlu1 %4626  ;;  %10801 = vmatprep.mubr.msk.bf16.mxu0 %vm656_vm7, %v5194_v41  ;;  %v5226_v41 = vrot.slane %v5224_v50, 4 }
 0x597   : > { %v4767_v56 = vsel %vm656_vm7, %v14418_v38, %v4627_v3  ;;  %v5211_v48 = vsel %vm1444_vm5, %v5193_v30, %v5210_v18  ;;  %v5223_v38 = vrot.slane %v5221_v6, 3 }
 0x598   : > { %v5180_v53 = vrot.slane %v5178_v62, 3  ;;  %v5183_v34 = vrot.slane %v5181_v60, 4  ;;  %v5195_v23 = vshrl.u32 %v4767_v56, 16  ;;  %v5198_v17 = vshll.u32 %v4767_v56, 16  ;;  %v4629_v24 = vpop.permute.xlu0 %4628 }
 0x599   : > { %v4769_v8 = vsel %vm656_vm7, %v14401_v21, %v4629_v24  ;;  %v5238_v62 = vshrl.u32 %v4713_v0, 16  ;;  %v5227_v40 = vor.u32 %v5226_v41, %v5223_v38 }
 0x59a   : > { %v5184_v61 = vor.u32 %v5183_v34, %v5180_v53  ;;  %v5197_v32 = vrot.slane %v5195_v23, 3  ;;  %v5200_v11 = vrot.slane %v5198_v17, 4  ;;  %v5212_v60 = vshrl.u32 %v4769_v8, 16  ;;  %v4631_v56 = vpop.permute.xlu1 %4630 }
 0x59b   : > { %v5215_v3 = vshll.u32 %v4769_v8, 16  ;;  %v5240_v53 = vrot.slane %v5238_v62, 3  ;;  %v5243_v34 = vrot.slane %v5241_v4, 4  ;;  %v4771_v30 = vsel %vm656_vm7, %v14404_v28, %v4631_v56  ;;  %v11286_v4 = vld [vmem:[%s17374_s2 + $0x220] ss:$8 sps:$4 sm:$0xff]  }
 0x59c   : > { %v5185_v25 = vsel %vm1444_vm5, %v5167_v44, %v5184_v61  ;;  %v5201_v5 = vor.u32 %v5200_v11, %v5197_v32  ;;  %v5214_v44 = vrot.slane %v5212_v60, 3  ;;  %v5228_v17 = vsel %vm1444_vm5, %v5210_v18, %v5227_v40 }
 0x59d   : > { %5731 = vmatmul.mubr.bf16.gmra.mrb[152].mxu0 %v5185_v25  ;;  %v5217_v23 = vrot.slane %v5215_v3, 4  ;;  %v5244_v0 = vor.u32 %v5243_v34, %v5240_v53  ;;  %v5229_v50 = vshrl.u32 %v4771_v30, 16  ;;  %v5232_v24 = vshll.u32 %v4771_v30, 16 }
 0x59e   : > { %10802 = vmatprep.mubr.msk.bf16.mxu0 %vm656_vm7, %v5211_v48  ;;  %v5202_v21 = vsel %vm1444_vm5, %v5184_v61, %v5201_v5 }
 0x59f   : > { %v5218_v6 = vor.u32 %v5217_v23, %v5214_v44  ;;  %v5245_v32 = vsel %vm1444_vm5, %v5227_v40, %v5244_v0  ;;  %v5231_v11 = vrot.slane %v5229_v50, 3  ;;  %v5234_v25 = vrot.slane %v5232_v24, 4  ;;  %v6229_v23 = vld [vmem:[#allocation2] sm:$0xf0] }
 0x5a1   : > { %v5219_v8 = vsel %vm1444_vm5, %v5201_v5, %v5218_v6  ;;  %v5235_v61 = vor.u32 %v5234_v25, %v5231_v11  ;;  %v11288_v5 = vld [vmem:[%s17374_s2 + $0x224] ss:$8 sps:$4 sm:$0xff]  }
 0x5a2   : > { %7372 = vmatprep.subr.bf16.mxu1 %v11288_v5  ;;  %v6538_v5 = vrot.slane %v6229_v23, 1 }
 0x5a3   : > { %v5236_v28 = vsel %vm1444_vm5, %v5218_v6, %v5235_v61  ;;  %7373 = vmatpush1.bf16.msra.mxu1 %v11286_v4 }
 0x5a5   : > { %5741 = vmatmul.mubr.bf16.gmra.mrb[156].mxu0 %v5202_v21 }
 0x5a6   : > { %10803 = vmatprep.mubr.msk.bf16.mxu0 %vm656_vm7, %v5228_v17  ;;  %v6234_v17 = vshll.u32 %v6229_v23, 16 }
 0x5ad   : > { %5751 = vmatmul.mubr.bf16.gmra.mrb[160].mxu0 %v5219_v8  ;;  %v6232_v8 = vshrl.u32 %v6229_v23, 16 }
 0x5ae   : > { %10804 = vmatprep.mubr.msk.bf16.mxu0 %vm656_vm7, %v5245_v32  ;;  %v14676_v32 = vld [vmem:[#allocation2 + $0x8] sm:$0xff] }
 0x5af   : > { %v6239_v61 = vshll.u32 %v14676_v32, 16 }
 0x5b5   : > { %5760 = vmatmul.mubr.bf16.gmra.mrb[164].mxu0 %v5236_v28  ;;  %v17875_v28 = vld [vmem:[#allocation57_spill] sm:$0xff] }
 0x5bb   : > { %v14638_v18 = vpop.f32.mrb[92].mxu0 }
 0x5bc   : > { %v14640_v48 = vpop.f32.mrb[93].mxu0  ;;  %5842 = vrot.lane.b32.xlu1 %v14638_v18, %s11345_s27 }
 0x5bd   : > { %v14644_v38 = vpop.f32.mrb[94].mxu0 }
 0x5be   : > { %v14646_v41 = vpop.f32.mrb[95].mxu0  ;;  %5844 = vrot.lane.b32.xlu0 %v14644_v38, %s11345_s27 }
 0x5c3   : > { %v5817_v62 = vpop.permute.xlu0 %5816 }
 0x5c4   : > { %v5960_v60 = vadd.f32 %v5817_v62, %v14466_v36 }
 0x5c5   : > { %v14657_v3 = vpop.f32.mrb[96].mxu0 }
 0x5c6   : > { %v6008_v40 = vadd.f32 %v5960_v60, %v14492_v2  ;;  %v14660_v56 = vpop.f32.mrb[97].mxu0  ;;  %5846 = vrot.lane.b32.xlu1 %v14657_v3, %s11345_s27  ;;  %v6539_v60 = vrot.slane %v14676_v32, 1 }
 0x5c7   : > { %v14664_v53 = vpop.f32.mrb[98].mxu0 }
 0x5c8   : > { %v14666_v34 = vpop.f32.mrb[99].mxu0  ;;  %5848 = vrot.lane.b32.xlu0 %v14664_v53, %s11345_s27  ;;  %v6056_v0 = vmax.f32 %v6008_v40, 0.0 }
 0x5c9   : > { %v5819_v44 = vpop.permute.xlu1 %5818 }
 0x5ca   : > { %v5961_v36 = vadd.f32 %v5819_v44, %v14468_v42 }
 0x5cb   : > { %v5821_v21 = vpop.permute.xlu0 %5820 }
 0x5cc   : > { %v6009_v2 = vadd.f32 %v5961_v36, %v14498_v51  ;;  %v5962_v30 = vadd.f32 %v5821_v21, %v14470_v45  ;;  %v11289_v21 = vld [vmem:[%s17374_s2 + $0x230] ss:$8 sps:$4 sm:$0xff]  }
 0x5ce   : > { %v6057_v6 = vmax.f32 %v6009_v2, 0.0  ;;  %v6010_v50 = vadd.f32 %v5962_v30, %v14504_v55  ;;  %v14674_v24 = vpop.f32.mrb[100].mxu0  ;;  %v6236_v55 = vrot.slane %v6234_v17, 1  ;;  %v11291_v2 = vld [vmem:[%s17374_s2 + $0x234] ss:$8 sps:$4 sm:$0xff]  }
 0x5cf   : > { %v14678_v11 = vpop.f32.mrb[101].mxu0  ;;  %5850 = vrot.lane.b32.xlu1 %v14674_v24, %s11345_s27  ;;  %7374 = vmatprep.subr.bf16.mxu1 %v11291_v2 }
 0x5d0   : > { %v6104_v42 = vpack.c.bf16 %v6057_v6, %v6056_v0  ;;  %v14682_v25 = vpop.f32.mrb[102].mxu0  ;;  %v6237_v30 = vor.u32 %v6236_v55, %v6232_v8  ;;  %v6058_v23 = vmax.f32 %v6010_v50, 0.0  ;;  %7375 = vmatpush1.bf16.msra.mxu1 %v11289_v21  ;;  %v17876_v8 = vmov 0  }
 0x5d1   : > { %v14684_v51 = vpop.f32.mrb[103].mxu0  ;;  %v5823_v45 = vpop.permute.xlu1 %5822  ;;  %5852 = vrot.lane.b32.xlu0 %v14682_v25, %s11345_s27  ;;  %9715 = vmatprep.subr.bf16.mxu1 %v17876_v8 }
 0x5d2   : > { %v6128_v62 = vmul.bf16 %v6104_v42, %v17875_v28  ;;  %v5963_v4 = vadd.f32 %v5823_v45, %v14472_v22  ;;  %v6241_v22 = vrot.slane %v6239_v61, 1 }
 0x5d3   : > { %v5825_v40 = vpop.permute.xlu0 %5824 }
 0x5d4   : > { %6152 = vst.msk [vmem:[#allocation2 + $0x10] sm:$0xff] %vm656_vm7, %v6128_v62  ;;  %v6011_v44 = vadd.f32 %v5963_v4, %v14510_v57  ;;  %v5964_v36 = vadd.f32 %v5825_v40, %v14482_v27  ;;  %v6540_v57 = vsel %vm2781_vm13, %v6538_v5, %v6539_v60  ;;  %v17877_v4 = vld [vmem:[#allocation58_spill] sm:$0xff] }
 0x5d5   : > { %v6666_v61 = vshrl.u32 %v6540_v57, 16  ;;  %v6669_v62 = vshll.u32 %v6540_v57, 16 }
 0x5d6   : > { %v6059_v17 = vmax.f32 %v6011_v44, 0.0  ;;  %v6012_v0 = vadd.f32 %v5964_v36, %v14528_v58  ;;  %v14702_v6 = vpop.f32.mrb[104].mxu0  ;;  %v6243_v58 = vshrl.u32 %v14676_v32, 16  ;;  %v6242_v44 = vsel %vm2473_vm8, %v6237_v30, %v6241_v22 }
 0x5d7   : > { %v14705_v27 = vpop.f32.mrb[105].mxu0  ;;  %5854 = vrot.lane.b32.xlu1 %v14702_v6, %s11345_s27 }
 0x5d8   : > { %v6105_v42 = vpack.c.bf16 %v6059_v17, %v6058_v23  ;;  %v14709_v45 = vpop.f32.mrb[106].mxu0  ;;  %v6060_v57 = vmax.f32 %v6012_v0, 0.0 }
 0x5d9   : > { %v14712_v50 = vpop.f32.mrb[107].mxu0  ;;  %v5827_v55 = vpop.permute.xlu1 %5826  ;;  %5856 = vrot.lane.b32.xlu0 %v14709_v45, %s11345_s27 }
 0x5da   : > { %v6129_v5 = vmul.bf16 %v6105_v42, %v17877_v4  ;;  %v5965_v40 = vadd.f32 %v5827_v55, %v14486_v37  ;;  %v6245_v42 = vor.u32 %v6243_v58, %v6241_v22  ;;  %v6668_v37 = vrot.slane %v6666_v61, 3 }
 0x5db   : > { %v5829_v36 = vpop.permute.xlu0 %5828  ;;  %v14720_v21 = vld [vmem:[#allocation2 + $0x10] sm:$0xff]  ;;  %v6671_v55 = vrot.slane %v6669_v62, 4 }
 0x5dc   : > { %6153 = vst.msk [vmem:[#allocation2 + $0x18] sm:$0xff] %vm656_vm7, %v6129_v5  ;;  %v6013_v2 = vadd.f32 %v5965_v40, %v14534_v20  ;;  %v5966_v23 = vadd.f32 %v5829_v36, %v14490_v1  ;;  %v6247_v17 = vshll.u32 %v14720_v21, 16  ;;  %v6541_v28 = vrot.slane %v14720_v21, 1 }
 0x5dd   : > { %6454 = vrot.lane.b32.xlu0 %v6242_v44, %s11345_s27 }
 0x5de   : > { %v6061_v30 = vmax.f32 %v6013_v2, 0.0  ;;  %v6014_v4 = vadd.f32 %v5966_v23, %v14548_v49  ;;  %v14729_v8 = vpop.f32.mrb[108].mxu0  ;;  %v6249_v5 = vrot.slane %v6247_v17, 1  ;;  %v6542_v20 = vsel %vm2781_vm13, %v6539_v60, %v6541_v28  ;;  %v17878_v60 = vld [vmem:[#allocation59_spill] sm:$0xff] }
 0x5df   : > { %v14732_v40 = vpop.f32.mrb[109].mxu0  ;;  %5858 = vrot.lane.b32.xlu1 %v14729_v8, %s11345_s27  ;;  %v6674_v1 = vshrl.u32 %v6542_v20, 16  ;;  %v6677_v0 = vshll.u32 %v6542_v20, 16  ;;  %v6672_v49 = vor.u32 %v6671_v55, %v6668_v37  ;;  %v6251_v55 = vshrl.u32 %v14720_v21, 16 }
 0x5e0   : > { %v6106_v36 = vpack.c.bf16 %v6061_v30, %v6060_v57  ;;  %v14736_v44 = vpop.f32.mrb[110].mxu0  ;;  %v6250_v17 = vsel %vm2473_vm8, %v6245_v42, %v6249_v5 }
 0x5e1   : > { %v14738_v22 = vpop.f32.mrb[111].mxu0  ;;  %v5831_v58 = vpop.permute.xlu1 %5830  ;;  %5860 = vrot.lane.b32.xlu0 %v14736_v44, %s11345_s27  ;;  %v6676_v61 = vrot.slane %v6674_v1, 3  ;;  %v6679_v62 = vrot.slane %v6677_v0, 4  ;;  %v6062_v0 = vmax.f32 %v6014_v4, 0.0 }
 0x5e2   : > { %v6130_v2 = vmul.bf16 %v6106_v36, %v17878_v60  ;;  %v5967_v23 = vadd.f32 %v5831_v58, %v14496_v9 }
 0x5e3   : > { %6456 = vrot.lane.b32.xlu1 %v6250_v17, %s11345_s27  ;;  %v5833_v57 = vpop.permute.xlu0 %5832  ;;  %v6680_v30 = vor.u32 %v6679_v62, %v6676_v61  ;;  %v14746_v20 = vld [vmem:[#allocation2 + $0x18] sm:$0xff]  ;;  %v6253_v62 = vor.u32 %v6251_v55, %v6249_v5 }
 0x5e4   : > { %6154 = vst.msk [vmem:[#allocation2 + $0x20] sm:$0xff] %vm656_vm7, %v6130_v2  ;;  %v6015_v59 = vadd.f32 %v5967_v23, %v14554_v16  ;;  %v5968_v37 = vadd.f32 %v5833_v57, %v14502_v39  ;;  %v6255_v1 = vshll.u32 %v14746_v20, 16  ;;  %v17498_v42 = vrot.slane %v14746_v20, 1  ;;  %v17879_v57 = vld [vmem:[#allocation60_spill] sm:$0xff] }
 0x5e5   : > { %v6681_v9 = vsel %vm1444_vm5, %v6672_v49, %v6680_v30 }
 0x5e6   : > { %v6063_v36 = vmax.f32 %v6015_v59, 0.0  ;;  %v6016_v58 = vadd.f32 %v5968_v37, %v14574_v7  ;;  %v14756_v61 = vpop.f32.mrb[112].mxu0  ;;  %10853 = vmatprep.mubr.msk.bf16.mxu1 %vm656_vm7, %v6681_v9  ;;  %v6257_v16 = vrot.slane %v6255_v1, 1  ;;  %v6544_v39 = vsel %vm2781_vm13, %v6541_v28, %v17498_v42 }
 0x5e7   : > { %v14759_v2 = vpop.f32.mrb[113].mxu0  ;;  %5862 = vrot.lane.b32.xlu1 %v14756_v61, %s11345_s27  ;;  %v6691_v5 = vshrl.u32 %v6544_v39, 16  ;;  %v6694_v17 = vshll.u32 %v6544_v39, 16  ;;  %v6259_v39 = vshrl.u32 %v14746_v20, 16 }
 0x5e8   : > { %v6107_v4 = vpack.c.bf16 %v6063_v36, %v6062_v0  ;;  %v14766_v49 = vpop.f32.mrb[114].mxu0  ;;  %v6258_v59 = vsel %vm2473_vm8, %v6253_v62, %v6257_v16 }
 0x5e9   : > { %v5835_v7 = vpop.permute.xlu1 %5834  ;;  %v14769_v23 = vpop.f32.mrb[115].mxu0  ;;  %6458 = vrot.lane.b32.xlu0 %v6258_v59, %s11345_s27  ;;  %v6693_v0 = vrot.slane %v6691_v5, 3  ;;  %v6696_v9 = vrot.slane %v6694_v17, 4  ;;  %v6064_v59 = vmax.f32 %v6016_v58, 0.0  ;;  %v6261_v5 = vor.u32 %v6259_v39, %v6257_v16  ;;  %v17880_v16 = vld [vmem:[#allocation63_spill] sm:$0xff] }
 0x5ea   : > { %v6131_v37 = vmul.bf16 %v6107_v4, %v17879_v57  ;;  %v5969_v55 = vadd.f32 %v5835_v7, %v14508_v33 }
 0x5eb   : > { %5864 = vrot.lane.b32.xlu1 %v14766_v49, %s11345_s27  ;;  %v5837_v28 = vpop.permute.xlu0 %5836  ;;  %v14776_v1 = vld [vmem:[#allocation2 + $0x20] sm:$0xff]  ;;  %v14783_v33 = vor.u32 %v6696_v9, %v6693_v0 }
 0x5ec   : > { %6155 = vst.msk [vmem:[#allocation2 + $0x28] sm:$0xff] %vm656_vm7, %v6131_v37  ;;  %v6017_v36 = vadd.f32 %v5969_v55, %v14580_v31  ;;  %v5970_v62 = vadd.f32 %v5837_v28, %v14523_v54  ;;  %v6263_v4 = vshll.u32 %v14776_v1, 16  ;;  %v6267_v39 = vshrl.u32 %v14776_v1, 16 }
 0x5ed   : > { %v14794_v54 = vsel %vm1444_vm5, %v6680_v30, %v14783_v33 }
 0x5ee   : > { %v6065_v7 = vmax.f32 %v6017_v36, 0.0  ;;  %v6018_v42 = vadd.f32 %v5970_v62, %v14640_v48  ;;  %v14786_v57 = vpop.f32.mrb[116].mxu0  ;;  %v6265_v17 = vrot.slane %v6263_v4, 1 }
 0x5ef   : > { %v14788_v60 = vpop.f32.mrb[117].mxu0  ;;  %5866 = vrot.lane.b32.xlu0 %v14786_v57, %s11345_s27 }
 0x5f0   : > { %v6108_v31 = vpack.c.bf16 %v6065_v7, %v6064_v59  ;;  %v14796_v58 = vpop.f32.mrb[118].mxu0  ;;  %v6266_v37 = vsel %vm2473_vm8, %v6261_v5, %v6265_v17  ;;  %v6066_v59 = vmax.f32 %v6018_v42, 0.0  ;;  %v17882_v42 = vld [vmem:[#allocation67_spill] sm:$0xff] }
 0x5f1   : > { %v5839_v55 = vpop.permute.xlu1 %5838  ;;  %v14799_v48 = vpop.f32.mrb[119].mxu0  ;;  %6460 = vrot.lane.b32.xlu1 %v6266_v37, %s11345_s27 }
 0x5f2   : > { %v6132_v28 = vmul.bf16 %v6108_v31, %v17880_v16  ;;  %v5971_v0 = vadd.f32 %v5839_v55, %v14532_v19  ;;  %v6269_v31 = vor.u32 %v6267_v39, %v6265_v17 }
 0x5f3   : > { %5868 = vrot.lane.b32.xlu0 %v14796_v58, %s11345_s27  ;;  %v5841_v9 = vpop.permute.xlu0 %5840  ;;  %v14806_v30 = vld [vmem:[#allocation2 + $0x28] sm:$0xff] }
 0x5f4   : > { %6156 = vst.msk [vmem:[#allocation2 + $0x30] sm:$0xff] %vm656_vm7, %v6132_v28  ;;  %v6019_v36 = vadd.f32 %v5971_v0, %v14646_v41  ;;  %v5972_v62 = vadd.f32 %v5841_v9, %v14545_v52  ;;  %v6271_v4 = vshll.u32 %v14806_v30, 16  ;;  %v6275_v9 = vshrl.u32 %v14806_v30, 16 }
 0x5f6   : > { %v6067_v7 = vmax.f32 %v6019_v36, 0.0  ;;  %v6020_v19 = vadd.f32 %v5972_v62, %v14660_v56  ;;  %v14814_v5 = vpop.f32.mrb[120].mxu0  ;;  %v6273_v37 = vrot.slane %v6271_v4, 1 }
 0x5f7   : > { %v14816_v55 = vpop.f32.mrb[121].mxu0  ;;  %5870 = vrot.lane.b32.xlu1 %v14814_v5, %s11345_s27 }
 0x5f8   : > { %v6109_v41 = vpack.c.bf16 %v6067_v7, %v6066_v59  ;;  %v14820_v28 = vpop.f32.mrb[122].mxu0  ;;  %v6274_v52 = vsel %vm2473_vm8, %v6269_v31, %v6273_v37  ;;  %v6277_v39 = vor.u32 %v6275_v9, %v6273_v37  ;;  %v6068_v35 = vmax.f32 %v6020_v19, 0.0 }
 0x5f9   : > { %17881 = vst [vmem:[#allocation31_spill] sm:$0xff] %v14820_v28  ;;  %v14823_v0 = vpop.f32.mrb[123].mxu0  ;;  %6462 = vrot.lane.b32.xlu0 %v6274_v52, %s11345_s27 }
 0x5fa   : > { %v6133_v56 = vmul.bf16 %v6109_v41, %v17882_v42 }
 0x5fb   : > { %5872 = vrot.lane.b32.xlu1 %v14820_v28, %s11345_s27  ;;  %v14829_v17 = vld [vmem:[#allocation2 + $0x30] sm:$0xff] }
 0x5fc   : > { %6157 = vst.msk [vmem:[#allocation2 + $0x38] sm:$0xff] %vm656_vm7, %v6133_v56  ;;  %v6279_v36 = vshll.u32 %v14829_v17, 16  ;;  %v6283_v37 = vshrl.u32 %v14829_v17, 16 }
 0x5fe   : > { %v14834_v62 = vpop.f32.mrb[124].mxu0  ;;  %v6281_v4 = vrot.slane %v6279_v36, 1 }
 0x5ff   : > { %17883 = vst [vmem:[#allocation65_spill] sm:$0xff] %v14834_v62  ;;  %v14836_v59 = vpop.f32.mrb[125].mxu0  ;;  %5874 = vrot.lane.b32.xlu0 %v14834_v62, %s11345_s27 }
 0x600   : > { %v14840_v7 = vpop.f32.mrb[126].mxu0  ;;  %v6282_v31 = vsel %vm2473_vm8, %v6277_v39, %v6281_v4  ;;  %v6285_v36 = vor.u32 %v6283_v37, %v6281_v4 }
 0x601   : > { %17884 = vst [vmem:[#allocation11_spill] sm:$0xff] %v14840_v7  ;;  %v14843_v41 = vpop.f32.mrb[127].mxu0  ;;  %6464 = vrot.lane.b32.xlu1 %v6282_v31, %s11345_s27 }
 0x603   : > { %5876 = vrot.lane.b32.xlu0 %v14840_v7, %s11345_s27  ;;  %v14848_v52 = vld [vmem:[#allocation2 + $0x38] sm:$0xff] }
 0x604   : > { %v6287_v56 = vshll.u32 %v14848_v52, 16 }
 0x606   : > { %v14852_v9 = vpop.f32.mrb[128].mxu0  ;;  %v6289_v42 = vrot.slane %v6287_v56, 1 }
 0x607   : > { %17885 = vst [vmem:[#allocation4_spill] sm:$0xff] %v14852_v9  ;;  %v14854_v16 = vpop.f32.mrb[129].mxu0  ;;  %5878 = vrot.lane.b32.xlu1 %v14852_v9, %s11345_s27 }
 0x608   : > { %v14858_v39 = vpop.f32.mrb[130].mxu0  ;;  %v6290_v31 = vsel %vm2473_vm8, %v6285_v36, %v6289_v42 }
 0x609   : > { %17886 = vst [vmem:[#allocation33_spill] sm:$0xff] %v14858_v39  ;;  %v14861_v43 = vpop.f32.mrb[131].mxu0  ;;  %6466 = vrot.lane.b32.xlu0 %v6290_v31, %s11345_s27 }
 0x60b   : > { %5880 = vrot.lane.b32.xlu1 %v14858_v39, %s11345_s27 }
 0x62e   : > { %v5843_v15 = vpop.permute.xlu1 %5842 }
 0x62f   : > { %v5973_v4 = vadd.f32 %v5843_v15, %v14552_v47 }
 0x630   : > { %v5845_v37 = vpop.permute.xlu0 %5844 }
 0x631   : > { %v6021_v56 = vadd.f32 %v5973_v4, %v14666_v34  ;;  %v5974_v26 = vadd.f32 %v5845_v37, %v14570_v63 }
 0x633   : > { %v6069_v9 = vmax.f32 %v6021_v56, 0.0  ;;  %v6022_v7 = vadd.f32 %v5974_v26, %v14678_v11 }
 0x635   : > { %v6110_v36 = vpack.c.bf16 %v6069_v9, %v6068_v35  ;;  %v6070_v34 = vmax.f32 %v6022_v7, 0.0  ;;  %v17888_v35 = vld [vmem:[#allocation7_spill] sm:$0xff]  ;;  %v6291_v9 = vshrl.u32 %v14848_v52, 16 }
 0x637   : > { %v6134_v62 = vmul.bf16 %v6110_v36, %v17887_v13 }
 0x638   : > { %v5847_v28 = vpop.permute.xlu1 %5846 }
 0x639   : > { %6158 = vst.msk [vmem:[#allocation2 + $0x40] sm:$0xff] %vm656_vm7, %v6134_v62  ;;  %v5975_v31 = vadd.f32 %v5847_v28, %v14578_v14 }
 0x63a   : > { %v5849_v39 = vpop.permute.xlu0 %5848 }
 0x63b   : > { %v6023_v15 = vadd.f32 %v5975_v31, %v14684_v51  ;;  %v5976_v47 = vadd.f32 %v5849_v39, %v14638_v18  ;;  %v6293_v18 = vor.u32 %v6291_v9, %v6289_v42 }
 0x63d   : > { %v6071_v4 = vmax.f32 %v6023_v15, 0.0  ;;  %v6024_v63 = vadd.f32 %v5976_v47, %v14705_v27 }
 0x63f   : > { %v6111_v19 = vpack.c.bf16 %v6071_v4, %v6070_v34  ;;  %v6072_v56 = vmax.f32 %v6024_v63, 0.0  ;;  %v17889_v34 = vld [vmem:[#allocation13_spill] sm:$0xff] }
 0x640   : > { %v14876_v37 = vld [vmem:[#allocation2 + $0x40] sm:$0xff] }
 0x641   : > { %v6135_v26 = vmul.bf16 %v6111_v19, %v17888_v35  ;;  %v5851_v11 = vpop.permute.xlu1 %5850  ;;  %v6295_v62 = vshll.u32 %v14876_v37, 16 }
 0x642   : > { %v5977_v14 = vadd.f32 %v5851_v11, %v14644_v38  ;;  %v6299_v11 = vshrl.u32 %v14876_v37, 16 }
 0x643   : > { %6159 = vst.msk [vmem:[#allocation2 + $0x48] sm:$0xff] %vm656_vm7, %v6135_v26  ;;  %v5853_v51 = vpop.permute.xlu0 %5852  ;;  %v6297_v28 = vrot.slane %v6295_v62, 1 }
 0x644   : > { %v6025_v7 = vadd.f32 %v5977_v14, %v14712_v50  ;;  %v5978_v27 = vadd.f32 %v5853_v51, %v14657_v3  ;;  %v17504_v50 = vrot.slane %v14776_v1, 1 }
 0x645   : > { %v6298_v39 = vsel %vm2473_vm8, %v6293_v18, %v6297_v28  ;;  %v6201_v18 = vld [vmem:[#allocation2] sm:$0xf8] }
 0x646   : > { %v6073_v36 = vmax.f32 %v6025_v7, 0.0  ;;  %v6026_v31 = vadd.f32 %v5978_v27, %v14732_v40  ;;  %6468 = vrot.lane.b32.xlu1 %v6298_v39, %s11345_s27  ;;  %v6301_v7 = vor.u32 %v6299_v11, %v6297_v28 }
 0x647   : > { %v14888_v15 = vpop.f32.mrb[132].mxu0 }
 0x648   : > { %v6112_v38 = vpack.c.bf16 %v6073_v36, %v6072_v56  ;;  %v14890_v47 = vpop.f32.mrb[133].mxu0  ;;  %5882 = vrot.lane.b32.xlu0 %v14888_v15, %s11345_s27  ;;  %v6074_v39 = vmax.f32 %v6026_v31, 0.0 }
 0x649   : > { %v5855_v42 = vpop.permute.xlu1 %5854  ;;  %v14895_v3 = vpop.f32.mrb[134].mxu0 }
 0x64a   : > { %v6136_v4 = vmul.bf16 %v6112_v38, %v17889_v34  ;;  %v5979_v63 = vadd.f32 %v5855_v42, %v14664_v53  ;;  %v14899_v40 = vpop.f32.mrb[135].mxu0  ;;  %v14901_v19 = vld [vmem:[#allocation2 + $0x48] sm:$0xff]  ;;  %v17890_v53 = vrot.slane %v14746_v20, 1 }
 0x64b   : > { %v5857_v26 = vpop.permute.xlu0 %5856  ;;  %v6303_v9 = vshll.u32 %v14901_v19, 16 }
 0x64c   : > { %6160 = vst.msk [vmem:[#allocation2 + $0x50] sm:$0xff] %vm656_vm7, %v6136_v4  ;;  %v6027_v62 = vadd.f32 %v5979_v63, %v14738_v22  ;;  %v5980_v14 = vadd.f32 %v5857_v26, %v14674_v24  ;;  %5884 = vrot.lane.b32.xlu0 %v14895_v3, %s11345_s27  ;;  %v6546_v51 = vsel %vm2781_vm13, %v17890_v53, %v17504_v50 }
 0x64d   : > { %v6305_v27 = vrot.slane %v6303_v9, 1  ;;  %v6708_v24 = vshrl.u32 %v6546_v51, 16  ;;  %v6711_v42 = vshll.u32 %v6546_v51, 16 }
 0x64e   : > { %v6075_v56 = vmax.f32 %v6027_v62, 0.0  ;;  %v6028_v36 = vadd.f32 %v5980_v14, %v14759_v2  ;;  %v17891_v2 = vld [vmem:[#allocation12_spill] sm:$0xff] }
 0x64f   : > { %v6455_v38 = vpop.permute.xlu0 %6454  ;;  %v6306_v22 = vsel %vm2473_vm8, %v6301_v7, %v6305_v27  ;;  %v6307_v7 = vshrl.u32 %v14901_v19, 16 }
 0x650   : > { %v6113_v4 = vpack.c.bf16 %v6075_v56, %v6074_v39  ;;  %v6595_v63 = vsel %vm656_vm7, %v6201_v18, %v6455_v38  ;;  %v14918_v26 = vpop.f32.mrb[136].mxu0  ;;  %6470 = vrot.lane.b32.xlu0 %v6306_v22, %s11345_s27  ;;  %v6710_v39 = vrot.slane %v6708_v24, 3  ;;  %v6713_v56 = vrot.slane %v6711_v42, 4 }
 0x651   : > { %v6650_v53 = vshrl.u32 %v6595_v63, 16  ;;  %v6653_v50 = vshll.u32 %v6595_v63, 16  ;;  %v5859_v28 = vpop.permute.xlu1 %5858  ;;  %v14921_v11 = vpop.f32.mrb[137].mxu0  ;;  %5886 = vrot.lane.b32.xlu1 %v14918_v26, %s11345_s27  ;;  %v6076_v63 = vmax.f32 %v6028_v36, 0.0  ;;  %v6309_v35 = vor.u32 %v6307_v7, %v6305_v27 }
 0x652   : > { %v6137_v31 = vmul.bf16 %v6113_v4, %v17891_v2  ;;  %v5981_v9 = vadd.f32 %v5859_v28, %v14682_v25  ;;  %v14927_v62 = vpop.f32.mrb[138].mxu0  ;;  %v6547_v25 = vrot.slane %v14806_v30, 1 }
 0x653   : > { %17892 = vst [vmem:[#allocation15_spill] sm:$0xff] %v14927_v62  ;;  %v14929_v14 = vpop.f32.mrb[139].mxu0  ;;  %v5861_v51 = vpop.permute.xlu0 %5860  ;;  %v14931_v18 = vld [vmem:[#allocation2 + $0x50] sm:$0xff]  ;;  %v6652_v28 = vrot.slane %v6650_v53, 3  ;;  %v6655_v2 = vrot.slane %v6653_v50, 4  ;;  %v17893_v50 = vrot.slane %v14776_v1, 1 }
 0x654   : > { %6161 = vst.msk [vmem:[#allocation2 + $0x58] sm:$0xff] %vm656_vm7, %v6137_v31  ;;  %v6029_v38 = vadd.f32 %v5981_v9, %v14769_v23  ;;  %v5982_v22 = vadd.f32 %v5861_v51, %v14702_v6  ;;  %v6311_v4 = vshll.u32 %v14931_v18, 16 }
 0x655   : > { %v6457_v34 = vpop.permute.xlu1 %6456  ;;  %5888 = vrot.lane.b32.xlu1 %v14927_v62, %s11345_s27  ;;  %v6548_v53 = vsel %vm2781_vm13, %v17893_v50, %v6547_v25  ;;  %v6656_v62 = vor.u32 %v6655_v2, %v6652_v28 }
 0x656   : > { %v6077_v24 = vmax.f32 %v6029_v38, 0.0  ;;  %v6030_v42 = vadd.f32 %v5982_v22, %v14788_v60  ;;  %v6597_v23 = vsel %vm656_vm7, %v14676_v32, %v6457_v34  ;;  %v6313_v31 = vrot.slane %v6311_v4, 1 }
 0x657   : > { %v6657_v6 = vshrl.u32 %v6597_v23, 16  ;;  %v6660_v9 = vshll.u32 %v6597_v23, 16  ;;  %v14959_v22 = vor.u32 %v6713_v56, %v6710_v39  ;;  %v6728_v23 = vshll.u32 %v6548_v53, 16 }
 0x658   : > { %v6114_v51 = vpack.c.bf16 %v6077_v24, %v6076_v63  ;;  %v14944_v13 = vpop.f32.mrb[140].mxu0  ;;  %v6314_v36 = vsel %vm2473_vm8, %v6309_v35, %v6313_v31  ;;  %v6725_v24 = vshrl.u32 %v6548_v53, 16  ;;  %v6315_v39 = vshrl.u32 %v14931_v18, 16 }
 0x659   : > { %v6659_v27 = vrot.slane %v6657_v6, 3  ;;  %v6662_v7 = vrot.slane %v6660_v9, 4  ;;  %v14950_v38 = vpop.f32.mrb[141].mxu0  ;;  %v5863_v60 = vpop.permute.xlu1 %5862  ;;  %5890 = vrot.lane.b32.xlu0 %v14944_v13, %s11345_s27  ;;  %6472 = vrot.lane.b32.xlu1 %v6314_v36, %s11345_s27 }
 0x65a   : > { %v6138_v32 = vmul.bf16 %v6114_v51, %v12845_v12  ;;  %v5983_v34 = vadd.f32 %v5863_v60, %v14709_v45  ;;  %v14957_v35 = vpop.f32.mrb[142].mxu0  ;;  %v6078_v51 = vmax.f32 %v6030_v42, 0.0  ;;  %v6727_v42 = vrot.slane %v6725_v24, 3 }
 0x65b   : > { %v6663_v4 = vor.u32 %v6662_v7, %v6659_v27  ;;  %v14961_v2 = vpop.f32.mrb[143].mxu0  ;;  %v6459_v63 = vpop.permute.xlu0 %6458  ;;  %v14963_v28 = vld [vmem:[#allocation2 + $0x58] sm:$0xff] }
 0x65c   : > { %6162 = vst.msk [vmem:[#allocation2 + $0x60] sm:$0xff] %vm656_vm7, %v6138_v32  ;;  %v6031_v9 = vadd.f32 %v5983_v34, %v14799_v48  ;;  %v6599_v45 = vsel %vm656_vm7, %v14720_v21, %v6459_v63  ;;  %v6319_v56 = vshll.u32 %v14963_v28, 16  ;;  %v6317_v48 = vor.u32 %v6315_v39, %v6313_v31 }
 0x65d   : > { %v6682_v36 = vshrl.u32 %v6599_v45, 16  ;;  %v6685_v50 = vshll.u32 %v6599_v45, 16  ;;  %v5865_v27 = vpop.permute.xlu1 %5864  ;;  %5892 = vrot.lane.b32.xlu0 %v14957_v35, %s11345_s27  ;;  %v6664_v53 = vsel %vm1444_vm5, %v6656_v62, %v6663_v4  ;;  %v6730_v63 = vrot.slane %v6728_v23, 4 }
 0x65e   : > { %v6079_v7 = vmax.f32 %v6031_v9, 0.0  ;;  %v5984_v60 = vadd.f32 %v5865_v27, %v14729_v8  ;;  %7385 = vmatmul.mubr.bf16.vlgmr.msra.gmra.mrb[156].mxu1 %v6664_v53  ;;  %v6321_v32 = vrot.slane %v6319_v56, 1  ;;  %v17894_v9 = vrot.slane %v14829_v17, 1 }
 0x65f   : > { %v6684_v21 = vrot.slane %v6682_v36, 3  ;;  %v6687_v34 = vrot.slane %v6685_v50, 4  ;;  %10854 = vmatprep.mubr.msk.bf16.mxu1 %vm656_vm7, %v14794_v54  ;;  %v6323_v50 = vshrl.u32 %v14963_v28, 16 }
 0x660   : > { %v6115_v45 = vpack.c.bf16 %v6079_v7, %v6078_v51  ;;  %v6032_v6 = vadd.f32 %v5984_v60, %v14816_v55  ;;  %v14979_v12 = vpop.f32.mrb[144].mxu0  ;;  %v6322_v62 = vsel %vm2473_vm8, %v6317_v48, %v6321_v32  ;;  %v6550_v8 = vsel %vm2781_vm13, %v6547_v25, %v17894_v9 }
 0x661   : > { %v14985_v31 = vor.u32 %v6687_v34, %v6684_v21  ;;  %v14987_v39 = vpop.f32.mrb[145].mxu0  ;;  %5894 = vrot.lane.b32.xlu1 %v14979_v12, %s11345_s27  ;;  %6474 = vrot.lane.b32.xlu0 %v6322_v62, %s11345_s27  ;;  %v5867_v54 = vpop.permute.xlu0 %5866  ;;  %v6715_v25 = vsel %vm1444_vm5, %v14783_v33, %v14959_v22  ;;  %v6742_v27 = vshrl.u32 %v6550_v8, 16  ;;  %v6745_v53 = vshll.u32 %v6550_v8, 16 }
 0x662   : > { %v6139_v55 = vmul.bf16 %v6115_v45, %v12860_v29  ;;  %v5985_v24 = vadd.f32 %v5867_v54, %v14736_v44  ;;  %v14994_v23 = vpop.f32.mrb[146].mxu0  ;;  %v15009_v48 = vor.u32 %v6730_v63, %v6727_v42  ;;  %v6325_v62 = vor.u32 %v6323_v50, %v6321_v32 }
 0x663   : > { %v14996_v56 = vpop.f32.mrb[147].mxu0  ;;  %v6461_v51 = vpop.permute.xlu1 %6460  ;;  %v15001_v36 = vld [vmem:[#allocation2 + $0x60] sm:$0xff]  ;;  %v6689_v45 = vsel %vm1444_vm5, %v6663_v4, %v14985_v31  ;;  %v6080_v9 = vmax.f32 %v6032_v6, 0.0  ;;  %v6744_v42 = vrot.slane %v6742_v27, 3  ;;  %v6747_v63 = vrot.slane %v6745_v53, 4 }
 0x664   : > { %6163 = vst.msk [vmem:[#allocation2 + $0x68] sm:$0xff] %vm656_vm7, %v6139_v55  ;;  %v6033_v7 = vadd.f32 %v5985_v24, %v14823_v0  ;;  %v6601_v44 = vsel %vm656_vm7, %v14746_v20, %v6461_v51  ;;  %v6327_v60 = vshll.u32 %v15001_v36, 16  ;;  %v6551_v6 = vrot.slane %v14848_v52, 1 }
 0x665   : > { %v6699_v21 = vshrl.u32 %v6601_v44, 16  ;;  %v6702_v34 = vshll.u32 %v6601_v44, 16  ;;  %5896 = vrot.lane.b32.xlu1 %v14994_v23, %s11345_s27  ;;  %v5869_v33 = vpop.permute.xlu0 %5868 }
 0x666   : > { %v6081_v8 = vmax.f32 %v6033_v7, 0.0  ;;  %v5986_v0 = vadd.f32 %v5869_v33, %v14756_v61  ;;  %7393 = vmatmul.mubr.bf16.gmra.mrb[160].mxu1 %v6689_v45  ;;  %v6329_v20 = vrot.slane %v6327_v60, 1  ;;  %v6732_v60 = vsel %vm1444_vm5, %v14959_v22, %v15009_v48 }
 0x667   : > { %v6701_v54 = vrot.slane %v6699_v21, 3  ;;  %v6704_v55 = vrot.slane %v6702_v34, 4  ;;  %10855 = vmatprep.mubr.msk.bf16.mxu1 %vm656_vm7, %v6715_v25  ;;  %v6331_v34 = vshrl.u32 %v15001_v36, 16  ;;  %v15041_v33 = vor.u32 %v6747_v63, %v6744_v42 }
 0x668   : > { %v6116_v24 = vpack.c.bf16 %v6081_v8, %v6080_v9  ;;  %v6034_v51 = vadd.f32 %v5986_v0, %v14836_v59  ;;  %v15018_v44 = vpop.f32.mrb[148].mxu0  ;;  %v6330_v4 = vsel %vm2473_vm8, %v6325_v62, %v6329_v20  ;;  %v17895_v9 = vrot.slane %v14829_v17, 1 }
 0x669   : > { %v15022_v32 = vor.u32 %v6704_v55, %v6701_v54  ;;  %v15024_v61 = vpop.f32.mrb[149].mxu0  ;;  %v5871_v50 = vpop.permute.xlu1 %5870  ;;  %5898 = vrot.lane.b32.xlu0 %v15018_v44, %s11345_s27  ;;  %6476 = vrot.lane.b32.xlu1 %v6330_v4, %s11345_s27 }
 0x66a   : > { %v6140_v25 = vmul.bf16 %v6116_v24, %v17854_v10  ;;  %v5987_v59 = vadd.f32 %v5871_v50, %v14766_v49  ;;  %v15031_v27 = vpop.f32.mrb[150].mxu0  ;;  %v6552_v8 = vsel %vm2781_vm13, %v17895_v9, %v6551_v6  ;;  %v6082_v42 = vmax.f32 %v6034_v51, 0.0  ;;  %v17902_v10 = vld [vmem:[#allocation4_spill] sm:$0xff] }
 0x66b   : > { %v15033_v53 = vpop.f32.mrb[151].mxu0  ;;  %v6463_v7 = vpop.permute.xlu0 %6462  ;;  %v15038_v21 = vld [vmem:[#allocation2 + $0x68] sm:$0xff]  ;;  %v6706_v55 = vsel %vm1444_vm5, %v14985_v31, %v15022_v32 }
 0x66c   : > { %6164 = vst.msk [vmem:[#allocation2 + $0x70] sm:$0xff] %vm656_vm7, %v6140_v25  ;;  %v6035_v45 = vadd.f32 %v5987_v59, %v14843_v41  ;;  %v6603_v49 = vsel %vm656_vm7, %v14776_v1, %v6463_v7  ;;  %v6335_v62 = vshll.u32 %v15038_v21, 16  ;;  %v6333_v41 = vor.u32 %v6331_v34, %v6329_v20 }
 0x66d   : > { %v6716_v22 = vshrl.u32 %v6603_v49, 16  ;;  %v6719_v0 = vshll.u32 %v6603_v49, 16  ;;  %v5873_v54 = vpop.permute.xlu1 %5872  ;;  %5900 = vrot.lane.b32.xlu0 %v15031_v27, %s11345_s27  ;;  %v6759_v25 = vshrl.u32 %v6552_v8, 16  ;;  %v6762_v59 = vshll.u32 %v6552_v8, 16 }
 0x66e   : > { %v6083_v63 = vmax.f32 %v6035_v45, 0.0  ;;  %v5988_v1 = vadd.f32 %v5873_v54, %v14786_v57  ;;  %7401 = vmatmul.mubr.bf16.gmra.mrb[164].mxu1 %v6706_v55  ;;  %v6337_v24 = vrot.slane %v6335_v62, 1  ;;  %v17507_v20 = vrot.slane %v14876_v37, 1 }
 0x66f   : > { %v6718_v4 = vrot.slane %v6716_v22, 3  ;;  %v6721_v50 = vrot.slane %v6719_v0, 4  ;;  %10856 = vmatprep.mubr.msk.bf16.mxu1 %vm656_vm7, %v6732_v60  ;;  %v6749_v22 = vsel %vm1444_vm5, %v15009_v48, %v15041_v33  ;;  %v6339_v54 = vshrl.u32 %v15038_v21, 16 }
 0x670   : > { %v6117_v7 = vpack.c.bf16 %v6083_v63, %v6082_v42  ;;  %v6036_v49 = vadd.f32 %v5988_v1, %v14854_v16  ;;  %v15059_v9 = vpop.f32.mrb[152].mxu0  ;;  %v6338_v31 = vsel %vm2473_vm8, %v6333_v41, %v6337_v24  ;;  %v6761_v55 = vrot.slane %v6759_v25, 3 }
 0x671   : > { %v15063_v51 = vor.u32 %v6721_v50, %v6718_v4  ;;  %v15065_v57 = vpop.f32.mrb[153].mxu0  ;;  %5902 = vrot.lane.b32.xlu1 %v15059_v9, %s11345_s27  ;;  %6478 = vrot.lane.b32.xlu0 %v6338_v31, %s11345_s27  ;;  %v5875_v60 = vpop.permute.xlu0 %5874  ;;  %v6764_v41 = vrot.slane %v6762_v59, 4  ;;  %v6554_v1 = vsel %vm2781_vm13, %v6551_v6, %v17507_v20 }
 0x672   : > { %v6141_v34 = vmul.bf16 %v6117_v7, %v17855_v46  ;;  %v5989_v16 = vadd.f32 %v5875_v60, %v14796_v58  ;;  %v15072_v45 = vpop.f32.mrb[154].mxu0  ;;  %v6084_v59 = vmax.f32 %v6036_v49, 0.0 }
 0x673   : > { %v15074_v62 = vpop.f32.mrb[155].mxu0  ;;  %v6465_v8 = vpop.permute.xlu1 %6464  ;;  %v15079_v0 = vld [vmem:[#allocation2 + $0x70] sm:$0xff]  ;;  %v6723_v25 = vsel %vm1444_vm5, %v15022_v32, %v15063_v51  ;;  %v6765_v6 = vor.u32 %v6764_v41, %v6761_v55  ;;  %v6779_v32 = vshll.u32 %v6554_v1, 16 }
 0x674   : > { %6165 = vst.msk [vmem:[#allocation2 + $0x78] sm:$0xff] %vm656_vm7, %v6141_v34  ;;  %v6037_v42 = vadd.f32 %v5989_v16, %v14861_v43  ;;  %v6605_v58 = vsel %vm656_vm7, %v14806_v30, %v6465_v8  ;;  %v6343_v63 = vshll.u32 %v15079_v0, 16  ;;  %v6341_v43 = vor.u32 %v6339_v54, %v6337_v24 }
 0x675   : > { %v6733_v48 = vshrl.u32 %v6605_v58, 16  ;;  %v6736_v4 = vshll.u32 %v6605_v58, 16  ;;  %5904 = vrot.lane.b32.xlu1 %v15072_v45, %s11345_s27  ;;  %v5877_v50 = vpop.permute.xlu0 %5876  ;;  %v6776_v16 = vshrl.u32 %v6554_v1, 16 }
 0x676   : > { %v6085_v7 = vmax.f32 %v6037_v42, 0.0  ;;  %v5990_v30 = vadd.f32 %v5877_v50, %v14814_v5  ;;  %7409 = vmatmul.mubr.bf16.gmra.mrb[168].mxu1 %v6723_v25  ;;  %v6345_v31 = vrot.slane %v6343_v63, 1  ;;  %v17896_v5 = vld [vmem:[#allocation43_spill] sm:$0xff] }
 0x677   : > { %v6735_v60 = vrot.slane %v6733_v48, 3  ;;  %v6738_v34 = vrot.slane %v6736_v4, 4  ;;  %10857 = vmatprep.mubr.msk.bf16.mxu1 %vm656_vm7, %v6749_v22  ;;  %v17897_v22 = vld [vmem:[#allocation31_spill] sm:$0xff]  ;;  %v6766_v48 = vsel %vm1444_vm5, %v15041_v33, %v6765_v6  ;;  %v6347_v4 = vshrl.u32 %v15079_v0, 16 }
 0x678   : > { %v6118_v8 = vpack.c.bf16 %v6085_v7, %v6084_v59  ;;  %v6038_v58 = vadd.f32 %v5990_v30, %v14890_v47  ;;  %v5742_v20 = vpop.f32.mrb[156].mxu0  ;;  %v6346_v46 = vsel %vm2473_vm8, %v6341_v43, %v6345_v31  ;;  %v6778_v50 = vrot.slane %v6776_v16, 3 }
 0x679   : > { %v6739_v24 = vor.u32 %v6738_v34, %v6735_v60  ;;  %v15099_v49 = vpop.f32.mrb[157].mxu0  ;;  %v5879_v54 = vpop.permute.xlu1 %5878  ;;  %5906 = vrot.lane.b32.xlu0 %v5742_v20, %s11345_s27  ;;  %6480 = vrot.lane.b32.xlu1 %v6346_v46, %s11345_s27  ;;  %v6781_v43 = vrot.slane %v6779_v32, 4  ;;  %v6349_v60 = vor.u32 %v6347_v4, %v6345_v31  ;;  %v17899_v31 = vld [vmem:[#allocation26_spill] sm:$0xff] }
 0x67a   : > { %v6142_v42 = vmul.bf16 %v6118_v8, %v17896_v5  ;;  %v5991_v55 = vadd.f32 %v5879_v54, %v17897_v22  ;;  %v5746_v41 = vpop.f32.mrb[158].mxu0  ;;  %v6086_v34 = vmax.f32 %v6038_v58, 0.0  ;;  %v17898_v8 = vld [vmem:[#allocation65_spill] sm:$0xff] }
 0x67b   : > { %v15105_v63 = vpop.f32.mrb[159].mxu0  ;;  %v6467_v47 = vpop.permute.xlu0 %6466  ;;  %v15109_v1 = vld [vmem:[#allocation2 + $0x78] sm:$0xff]  ;;  %v6740_v33 = vsel %vm1444_vm5, %v15063_v51, %v6739_v24 }
 0x67c   : > { %6166 = vst.msk [vmem:[#allocation2 + $0x80] sm:$0xff] %vm656_vm7, %v6142_v42  ;;  %v6039_v46 = vadd.f32 %v5991_v55, %v14899_v40  ;;  %v6607_v20 = vsel %vm656_vm7, %v14829_v17, %v6467_v47  ;;  %v6351_v25 = vshll.u32 %v15109_v1, 16 }
 0x67d   : > { %v6750_v59 = vshrl.u32 %v6607_v20, 16  ;;  %v6753_v7 = vshll.u32 %v6607_v20, 16  ;;  %v5881_v30 = vpop.permute.xlu1 %5880  ;;  %5908 = vrot.lane.b32.xlu0 %v5746_v41, %s11345_s27 }
 0x67e   : > { %v6087_v16 = vmax.f32 %v6039_v46, 0.0  ;;  %v5992_v54 = vadd.f32 %v5881_v30, %v17898_v8  ;;  %7419 = vmatmul.mubr.bf16.gmra.mrb[172].mxu1 %v6740_v33  ;;  %v6353_v40 = vrot.slane %v6351_v25, 1  ;;  %v6782_v46 = vor.u32 %v6781_v43, %v6778_v50 }
 0x67f   : > { %v6752_v42 = vrot.slane %v6750_v59, 3  ;;  %v6755_v17 = vrot.slane %v6753_v7, 4  ;;  %10858 = vmatprep.mubr.msk.bf16.mxu1 %vm656_vm7, %v6766_v48 }
 0x680   : > { %v6119_v32 = vpack.c.bf16 %v6087_v16, %v6086_v34  ;;  %v15123_v22 = vadd.f32 %v5992_v54, %v14921_v11  ;;  %v5752_v55 = vpop.f32.mrb[160].mxu0  ;;  %v6354_v41 = vsel %vm2473_vm8, %v6349_v60, %v6353_v40  ;;  %v6355_v11 = vshrl.u32 %v15109_v1, 16 }
 0x681   : > { %v6756_v47 = vor.u32 %v6755_v17, %v6752_v42  ;;  %v15126_v51 = vpop.f32.mrb[161].mxu0  ;;  %5910 = vrot.lane.b32.xlu1 %v5752_v55, %s11345_s27  ;;  %6482 = vrot.lane.b32.xlu0 %v6354_v41, %s11345_s27  ;;  %v6783_v7 = vsel %vm1444_vm5, %v6765_v6, %v6782_v46  ;;  %v6555_v17 = vrot.slane %v14901_v19, 1 }
 0x682   : > { %v6143_v58 = vmul.bf16 %v6119_v32, %v17899_v31  ;;  %v5756_v4 = vpop.f32.mrb[162].mxu0  ;;  %v6357_v30 = vor.u32 %v6355_v11, %v6353_v40  ;;  %v17900_v32 = vrot.slane %v14876_v37, 1 }
 0x683   : > { %v15131_v20 = vpop.f32.mrb[163].mxu0  ;;  %v15133_v48 = vld [vmem:[#allocation2 + $0x80] sm:$0xff]  ;;  %v6757_v59 = vsel %vm1444_vm5, %v6739_v24, %v6756_v47  ;;  %v6557_v4 = vrot.slane %v14931_v18, 1 }
 0x684   : > { %6167 = vst.msk [vmem:[#allocation2 + $0x88] sm:$0xff] %vm656_vm7, %v6143_v58  ;;  %v6359_v25 = vshll.u32 %v15133_v48, 16  ;;  %v6363_v24 = vshrl.u32 %v15133_v48, 16  ;;  %v6556_v55 = vsel %vm2781_vm13, %v17900_v32, %v6555_v17  ;;  %v6561_v32 = vrot.slane %v15001_v36, 1 }
 0x685   : > { %v6793_v41 = vshrl.u32 %v6556_v55, 16  ;;  %v6796_v58 = vshll.u32 %v6556_v55, 16 }
 0x686   : > { %7429 = vmatmul.mubr.bf16.gmra.mrb[176].mxu1 %v6757_v59  ;;  %v6361_v33 = vrot.slane %v6359_v25, 1 }
 0x687   : > { %10859 = vmatprep.mubr.msk.bf16.mxu1 %vm656_vm7, %v6783_v7  ;;  %v6795_v59 = vrot.slane %v6793_v41, 3  ;;  %v6798_v7 = vrot.slane %v6796_v58, 4 }
 0x688   : > { %v5761_v50 = vpop.f32.mrb[164].mxu0  ;;  %v6362_v43 = vsel %vm2473_vm8, %v6357_v30, %v6361_v33  ;;  %v6365_v54 = vor.u32 %v6363_v24, %v6361_v33  ;;  %v6558_v24 = vsel %vm2781_vm13, %v6555_v17, %v6557_v4 }
 0x689   : > { %v15142_v60 = vpop.f32.mrb[165].mxu0  ;;  %6484 = vrot.lane.b32.xlu1 %v6362_v43, %s11345_s27  ;;  %v17901_v43 = vld [vmem:[#allocation11_spill] sm:$0xff]  ;;  %v6799_v31 = vor.u32 %v6798_v7, %v6795_v59  ;;  %v6810_v41 = vshrl.u32 %v6558_v24, 16  ;;  %v6813_v58 = vshll.u32 %v6558_v24, 16 }
 0x68a   : > { %v5764_v34 = vpop.f32.mrb[166].mxu0 }
 0x68b   : > { %v15145_v16 = vpop.f32.mrb[167].mxu0  ;;  %v15147_v8 = vld [vmem:[#allocation2 + $0x88] sm:$0xff]  ;;  %v6812_v7 = vrot.slane %v6810_v41, 3 }
 0x68c   : > { %v6367_v6 = vshll.u32 %v15147_v8, 16 }
 0x68e   : > { %v15151_v40 = vrot.slane %v6367_v6, 1  ;;  %v6559_v6 = vrot.slane %v14963_v28, 1 }
 0x690   : > { %v6370_v42 = vsel %vm2473_vm8, %v6365_v54, %v15151_v40  ;;  %v6560_v17 = vsel %vm2781_vm13, %v6557_v4, %v6559_v6 }
 0x691   : > { %6486 = vrot.lane.b32.xlu0 %v6370_v42, %s11345_s27  ;;  %v6830_v24 = vshll.u32 %v6560_v17, 16 }
 0x6b8   : > { %v6469_v11 = vpop.permute.xlu1 %6468 }
 0x6b9   : > { %v6609_v25 = vsel %vm656_vm7, %v14848_v52, %v6469_v11  ;;  %v6088_v11 = vmax.f32 %v15123_v22, 0.0  ;;  %v6815_v22 = vrot.slane %v6813_v58, 4 }
 0x6ba   : > { %v6767_v30 = vshrl.u32 %v6609_v25, 16  ;;  %v6770_v33 = vshll.u32 %v6609_v25, 16  ;;  %v5883_v50 = vpop.permute.xlu0 %5882 }
 0x6bb   : > { %v5993_v34 = vadd.f32 %v5883_v50, %v17901_v43 }
 0x6bc   : > { %v6769_v54 = vrot.slane %v6767_v30, 3  ;;  %v6772_v42 = vrot.slane %v6770_v33, 4  ;;  %v6562_v30 = vsel %vm2781_vm13, %v6559_v6, %v6561_v32 }
 0x6bd   : > { %v6041_v55 = vadd.f32 %v5993_v34, %v14929_v14  ;;  %v6800_v14 = vsel %vm1444_vm5, %v6782_v46, %v6799_v31  ;;  %v6827_v34 = vshrl.u32 %v6560_v17, 16  ;;  %v6844_v6 = vshrl.u32 %v6562_v30, 16 }
 0x6be   : > { %v6773_v5 = vor.u32 %v6772_v42, %v6769_v54  ;;  %v5885_v52 = vpop.permute.xlu0 %5884  ;;  %v6847_v42 = vshll.u32 %v6562_v30, 16  ;;  %v6563_v46 = vrot.slane %v15038_v21, 1 }
 0x6bf   : > { %v6089_v25 = vmax.f32 %v6041_v55, 0.0  ;;  %v5994_v50 = vadd.f32 %v5885_v52, %v17902_v10  ;;  %v17903_v10 = vld [vmem:[#allocation48_spill] sm:$0xff]  ;;  %v17904_v55 = vld [vmem:[#allocation33_spill] sm:$0xff] }
 0x6c0   : > { %v6774_v43 = vsel %vm1444_vm5, %v6756_v47, %v6773_v5 }
 0x6c1   : > { %v6120_v33 = vpack.c.bf16 %v6089_v25, %v6088_v11  ;;  %v6042_v29 = vadd.f32 %v5994_v50, %v14950_v38  ;;  %7439 = vmatmul.mubr.bf16.gmra.mrb[180].mxu1 %v6774_v43  ;;  %v6816_v50 = vor.u32 %v6815_v22, %v6812_v7  ;;  %v6829_v43 = vrot.slane %v6827_v34, 3 }
 0x6c2   : > { %10860 = vmatprep.mubr.msk.bf16.mxu1 %vm656_vm7, %v6800_v14  ;;  %v6471_v59 = vpop.permute.xlu0 %6470  ;;  %v6846_v14 = vrot.slane %v6844_v6, 3  ;;  %v17905_v6 = vld [vmem:[#allocation28_spill] sm:$0xff] }
 0x6c3   : > { %v6144_v54 = vmul.bf16 %v6120_v33, %v17903_v10  ;;  %v5887_v4 = vpop.permute.xlu1 %5886  ;;  %v6611_v47 = vsel %vm656_vm7, %v14876_v37, %v6471_v59  ;;  %v6832_v33 = vrot.slane %v6830_v24, 4  ;;  %v6849_v37 = vrot.slane %v6847_v42, 4 }
 0x6c4   : > { %v5995_v38 = vadd.f32 %v5887_v4, %v17904_v55  ;;  %v6784_v52 = vshrl.u32 %v6611_v47, 16  ;;  %v6787_v11 = vshll.u32 %v6611_v47, 16  ;;  %v6090_v59 = vmax.f32 %v6042_v29, 0.0 }
 0x6c5   : > { %6168 = vst.msk [vmem:[#allocation2 + $0x90] sm:$0xff] %vm656_vm7, %v6144_v54  ;;  %v6564_v54 = vsel %vm2781_vm13, %v6561_v32, %v6563_v46  ;;  %v6817_v34 = vsel %vm1444_vm5, %v6799_v31, %v6816_v50  ;;  %v6833_v24 = vor.u32 %v6832_v33, %v6829_v43  ;;  %v15190_v29 = vor.u32 %v6849_v37, %v6846_v14 }
 0x6c6   : > { %v6043_v41 = vadd.f32 %v5995_v38, %v14961_v2  ;;  %v6786_v58 = vrot.slane %v6784_v52, 3  ;;  %v6789_v25 = vrot.slane %v6787_v11, 4  ;;  %v6371_v11 = vshrl.u32 %v15147_v8, 16 }
 0x6c7   : > { %v5889_v17 = vpop.permute.xlu1 %5888 }
 0x6c8   : > { %v6091_v30 = vmax.f32 %v6043_v41, 0.0  ;;  %v6790_v10 = vor.u32 %v6789_v25, %v6786_v58  ;;  %v5996_v4 = vadd.f32 %v5889_v17, %v14888_v15  ;;  %v6864_v58 = vshll.u32 %v6564_v54, 16 }
 0x6c9   : > { %v6373_v33 = vor.u32 %v6371_v11, %v15151_v40  ;;  %v6834_v40 = vsel %vm1444_vm5, %v6816_v50, %v6833_v24  ;;  %v17907_v11 = vld [vmem:[#allocation15_spill] sm:$0xff] }
 0x6ca   : > { %v6121_v47 = vpack.c.bf16 %v6091_v30, %v6090_v59  ;;  %v6044_v2 = vadd.f32 %v5996_v4, %v14987_v39  ;;  %v6791_v55 = vsel %vm1444_vm5, %v6773_v5, %v6790_v10  ;;  %v6861_v5 = vshrl.u32 %v6564_v54, 16 }
 0x6cb   : > { %v6473_v7 = vpop.permute.xlu1 %6472  ;;  %v5891_v22 = vpop.permute.xlu0 %5890  ;;  %7449 = vmatmul.mubr.bf16.gmra.mrb[184].mxu1 %v6791_v55 }
 0x6cc   : > { %v6145_v42 = vmul.bf16 %v6121_v47, %v17905_v6  ;;  %v6613_v15 = vsel %vm656_vm7, %v14901_v19, %v6473_v7  ;;  %v5997_v32 = vadd.f32 %v5891_v22, %v14895_v3  ;;  %10861 = vmatprep.mubr.msk.bf16.mxu1 %vm656_vm7, %v6817_v34  ;;  %v15197_v39 = vld [vmem:[#allocation2 + $0x90] sm:$0xff]  ;;  %v6571_v19 = vrot.slane %v15147_v8, 1 }
 0x6cd   : > { %v6801_v38 = vshrl.u32 %v6613_v15, 16  ;;  %v6804_v52 = vshll.u32 %v6613_v15, 16  ;;  %v6375_v31 = vshll.u32 %v15197_v39, 16  ;;  %v6573_v3 = vrot.slane %v15197_v39, 1 }
 0x6ce   : > { %6169 = vst.msk [vmem:[#allocation2 + $0x98] sm:$0xff] %vm656_vm7, %v6145_v42  ;;  %v6045_v41 = vadd.f32 %v5997_v32, %v14996_v56  ;;  %v6092_v37 = vmax.f32 %v6044_v2, 0.0  ;;  %v6565_v47 = vrot.slane %v15079_v0, 1  ;;  %v6851_v2 = vsel %vm1444_vm5, %v6833_v24, %v15190_v29 }
 0x6cf   : > { %v6803_v25 = vrot.slane %v6801_v38, 3  ;;  %v6806_v17 = vrot.slane %v6804_v52, 4  ;;  %v5893_v43 = vpop.permute.xlu0 %5892  ;;  %v6377_v14 = vrot.slane %v6375_v31, 1  ;;  %v6574_v4 = vsel %vm2781_vm13, %v6571_v19, %v6573_v3  ;;  %v17906_v38 = vld [vmem:[#allocation49_spill] sm:$0xff] }
 0x6d0   : > { %v6093_v59 = vmax.f32 %v6045_v41, 0.0  ;;  %v5998_v30 = vadd.f32 %v5893_v43, %v14918_v26  ;;  %v6863_v42 = vrot.slane %v6861_v5, 3  ;;  %v6866_v15 = vrot.slane %v6864_v58, 4 }
 0x6d1   : > { %v6807_v56 = vor.u32 %v6806_v17, %v6803_v25  ;;  %v6378_v54 = vsel %vm2473_vm8, %v6373_v33, %v6377_v14  ;;  %v6946_v32 = vshrl.u32 %v6574_v4, 16  ;;  %v6379_v50 = vshrl.u32 %v15197_v39, 16 }
 0x6d2   : > { %v6122_v55 = vpack.c.bf16 %v6093_v59, %v6092_v37  ;;  %v6046_v7 = vadd.f32 %v5998_v30, %v15024_v61  ;;  %6488 = vrot.lane.b32.xlu1 %v6378_v54, %s11345_s27  ;;  %v6949_v5 = vshll.u32 %v6574_v4, 16 }
 0x6d3   : > { %v5895_v26 = vpop.permute.xlu1 %5894  ;;  %v6475_v22 = vpop.permute.xlu0 %6474  ;;  %v6808_v34 = vsel %vm1444_vm5, %v6790_v10, %v6807_v56  ;;  %v6566_v10 = vsel %vm2781_vm13, %v6563_v46, %v6565_v47  ;;  %v6381_v58 = vor.u32 %v6379_v50, %v6377_v14  ;;  %v6948_v54 = vrot.slane %v6946_v32, 3 }
 0x6d4   : > { %v6146_v52 = vmul.bf16 %v6122_v55, %v17906_v38  ;;  %v5999_v31 = vadd.f32 %v5895_v26, %v17907_v11  ;;  %v6615_v61 = vsel %vm656_vm7, %v14931_v18, %v6475_v22  ;;  %7459 = vmatmul.mubr.bf16.gmra.mrb[188].mxu1 %v6808_v34  ;;  %v6094_v33 = vmax.f32 %v6046_v7, 0.0 }
 0x6d5   : > { %v6818_v41 = vshrl.u32 %v6615_v61, 16  ;;  %v6821_v25 = vshll.u32 %v6615_v61, 16  ;;  %10862 = vmatprep.mubr.msk.bf16.mxu1 %vm656_vm7, %v6834_v40  ;;  %v15224_v24 = vld [vmem:[#allocation2 + $0x98] sm:$0xff]  ;;  %v6878_v11 = vshrl.u32 %v6566_v10, 16  ;;  %v6881_v61 = vshll.u32 %v6566_v10, 16 }
 0x6d6   : > { %6170 = vst.msk [vmem:[#allocation2 + $0xa0] sm:$0xff] %vm656_vm7, %v6146_v52  ;;  %v6047_v18 = vadd.f32 %v5999_v31, %v15033_v53  ;;  %v6383_v17 = vshll.u32 %v15224_v24, 16  ;;  %v6575_v43 = vrot.slane %v15224_v24, 1  ;;  %v6951_v53 = vrot.slane %v6949_v5, 4 }
 0x6d7   : > { %v6820_v37 = vrot.slane %v6818_v41, 3  ;;  %v6823_v59 = vrot.slane %v6821_v25, 4  ;;  %v5897_v30 = vpop.permute.xlu1 %5896 }
 0x6d8   : > { %v6095_v55 = vmax.f32 %v6047_v18, 0.0  ;;  %v6000_v40 = vadd.f32 %v5897_v30, %v14944_v13  ;;  %v6385_v26 = vrot.slane %v6383_v17, 1  ;;  %v6576_v46 = vsel %vm2781_vm13, %v6573_v3, %v6575_v43  ;;  %v17908_v3 = vld [vmem:[#allocation34_spill] sm:$0xff] }
 0x6d9   : > { %v6824_v4 = vor.u32 %v6823_v59, %v6820_v37  ;;  %v6963_v14 = vshrl.u32 %v6576_v46, 16  ;;  %v6966_v22 = vshll.u32 %v6576_v46, 16  ;;  %v6567_v59 = vrot.slane %v15109_v1, 1 }
 0x6da   : > { %v6123_v34 = vpack.c.bf16 %v6095_v55, %v6094_v33  ;;  %v6048_v52 = vadd.f32 %v6000_v40, %v15065_v57  ;;  %v6386_v7 = vsel %vm2473_vm8, %v6381_v58, %v6385_v26  ;;  %v6387_v57 = vshrl.u32 %v15224_v24, 16 }
 0x6db   : > { %v6477_v31 = vpop.permute.xlu1 %6476  ;;  %6490 = vrot.lane.b32.xlu0 %v6386_v7, %s11345_s27  ;;  %v5899_v32 = vpop.permute.xlu0 %5898  ;;  %v6825_v13 = vsel %vm1444_vm5, %v6807_v56, %v6824_v4  ;;  %v6965_v50 = vrot.slane %v6963_v14, 3  ;;  %v6968_v41 = vrot.slane %v6966_v22, 4  ;;  %v15251_v56 = vor.u32 %v6951_v53, %v6948_v54 }
 0x6dc   : > { %v6147_v25 = vmul.bf16 %v6123_v34, %v17908_v3  ;;  %v6617_v5 = vsel %vm656_vm7, %v14963_v28, %v6477_v31  ;;  %v6001_v18 = vadd.f32 %v5899_v32, %v14957_v35  ;;  %7469 = vmatmul.mubr.bf16.gmra.mrb[192].mxu1 %v6825_v13  ;;  %v15258_v35 = vor.u32 %v6866_v15, %v6863_v42 }
 0x6dd   : > { %v6835_v58 = vshrl.u32 %v6617_v5, 16  ;;  %v6838_v17 = vshll.u32 %v6617_v5, 16  ;;  %10863 = vmatprep.mubr.msk.bf16.mxu1 %vm656_vm7, %v6851_v2  ;;  %v15249_v33 = vld [vmem:[#allocation2 + $0xa0] sm:$0xff]  ;;  %v15253_v10 = vor.u32 %v6968_v41, %v6965_v50  ;;  %v6389_v2 = vor.u32 %v6387_v57, %v6385_v26 }
 0x6de   : > { %6171 = vst.msk [vmem:[#allocation2 + $0xa8] sm:$0xff] %vm656_vm7, %v6147_v25  ;;  %v6049_v37 = vadd.f32 %v6001_v18, %v15074_v62  ;;  %v6391_v28 = vshll.u32 %v15249_v33, 16  ;;  %v6096_v46 = vmax.f32 %v6048_v52, 0.0  ;;  %v6880_v34 = vrot.slane %v6878_v11, 3 }
 0x6df   : > { %v6837_v30 = vrot.slane %v6835_v58, 3  ;;  %v6840_v55 = vrot.slane %v6838_v17, 4  ;;  %v5901_v40 = vpop.permute.xlu0 %5900  ;;  %v15264_v54 = vsel %vm1444_vm5, %v15251_v56, %v15253_v10  ;;  %v6883_v42 = vrot.slane %v6881_v61, 4 }
 0x6e0   : > { %v6097_v53 = vmax.f32 %v6049_v37, 0.0  ;;  %v6002_v14 = vadd.f32 %v5901_v40, %v14979_v12  ;;  %v6393_v62 = vrot.slane %v6391_v28, 1  ;;  %v6568_v52 = vsel %vm2781_vm13, %v6565_v47, %v6567_v59  ;;  %v17909_v12 = vld [vmem:[#allocation54_spill] sm:$0xff] }
 0x6e1   : > { %v6841_v22 = vor.u32 %v6840_v55, %v6837_v30  ;;  %v6395_v47 = vshrl.u32 %v15249_v33, 16  ;;  %v6884_v5 = vor.u32 %v6883_v42, %v6880_v34  ;;  %v6895_v18 = vshrl.u32 %v6568_v52, 16 }
 0x6e2   : > { %v6124_v15 = vpack.c.bf16 %v6097_v53, %v6096_v46  ;;  %v6050_v7 = vadd.f32 %v6002_v14, %v15099_v49  ;;  %v6394_v31 = vsel %vm2473_vm8, %v6389_v2, %v6393_v62  ;;  %v6868_v49 = vsel %vm1444_vm5, %v15190_v29, %v15258_v35 }
 0x6e3   : > { %v5903_v32 = vpop.permute.xlu1 %5902  ;;  %6492 = vrot.lane.b32.xlu1 %v6394_v31, %s11345_s27  ;;  %v6479_v26 = vpop.permute.xlu0 %6478  ;;  %v6842_v13 = vsel %vm1444_vm5, %v6824_v4, %v6841_v22  ;;  %v6569_v57 = vrot.slane %v15133_v48, 1  ;;  %v6397_v37 = vor.u32 %v6395_v47, %v6393_v62  ;;  %v6898_v28 = vshll.u32 %v6568_v52, 16 }
 0x6e4   : > { %v6148_v50 = vmul.bf16 %v6124_v15, %v17909_v12  ;;  %v6003_v11 = vadd.f32 %v5903_v32, %v14994_v23  ;;  %v6619_v61 = vsel %vm656_vm7, %v15001_v36, %v6479_v26  ;;  %7479 = vmatmul.mubr.bf16.gmra.mrb[196].mxu1 %v6842_v13  ;;  %v6098_v30 = vmax.f32 %v6050_v7, 0.0  ;;  %v17910_v32 = vld [vmem:[#allocation36_spill] sm:$0xff] }
 0x6e5   : > { %v6852_v41 = vshrl.u32 %v6619_v61, 16  ;;  %v6855_v25 = vshll.u32 %v6619_v61, 16  ;;  %10864 = vmatprep.mubr.msk.bf16.mxu1 %vm656_vm7, %v6868_v49  ;;  %v15282_v4 = vld [vmem:[#allocation2 + $0xa8] sm:$0xff]  ;;  %v6570_v34 = vsel %vm2781_vm13, %v6567_v59, %v6569_v57  ;;  %v6897_v31 = vrot.slane %v6895_v18, 3 }
 0x6e6   : > { %6172 = vst.msk [vmem:[#allocation2 + $0xb0] sm:$0xff] %vm656_vm7, %v6148_v50  ;;  %v6051_v23 = vadd.f32 %v6003_v11, %v15105_v63  ;;  %v6399_v36 = vshll.u32 %v15282_v4, 16  ;;  %v6900_v7 = vrot.slane %v6898_v28, 4  ;;  %v6912_v11 = vshrl.u32 %v6570_v34, 16 }
 0x6e7   : > { %v6854_v58 = vrot.slane %v6852_v41, 3  ;;  %v6857_v29 = vrot.slane %v6855_v25, 4  ;;  %v5905_v17 = vpop.permute.xlu1 %5904 }
 0x6e8   : > { %v6099_v55 = vmax.f32 %v6051_v23, 0.0  ;;  %v6004_v40 = vadd.f32 %v5905_v17, %v15018_v44  ;;  %v6401_v2 = vrot.slane %v6399_v36, 1  ;;  %v6901_v47 = vor.u32 %v6900_v7, %v6897_v31 }
 0x6e9   : > { %v6858_v46 = vor.u32 %v6857_v29, %v6854_v58  ;;  %v6914_v17 = vrot.slane %v6912_v11, 3 }
 0x6ea   : > { %v6125_v53 = vpack.c.bf16 %v6099_v55, %v6098_v30  ;;  %v6052_v14 = vadd.f32 %v6004_v40, %v15126_v51  ;;  %v6402_v63 = vsel %vm2473_vm8, %v6397_v37, %v6401_v2  ;;  %v6885_v51 = vsel %vm1444_vm5, %v15258_v35, %v6884_v5 }
 0x6eb   : > { %v6481_v42 = vpop.permute.xlu1 %6480  ;;  %6494 = vrot.lane.b32.xlu0 %v6402_v63, %s11345_s27  ;;  %v5907_v15 = vpop.permute.xlu0 %5906  ;;  %v6859_v62 = vsel %vm1444_vm5, %v6841_v22, %v6858_v46  ;;  %v6403_v22 = vshrl.u32 %v15282_v4, 16 }
 0x6ec   : > { %v6149_v26 = vmul.bf16 %v6125_v53, %v17910_v32  ;;  %v6621_v44 = vsel %vm656_vm7, %v15038_v21, %v6481_v42  ;;  %v6005_v13 = vadd.f32 %v5907_v15, %v15031_v27  ;;  %7489 = vmatmul.mubr.bf16.gmra.mrb[200].mxu1 %v6859_v62  ;;  %v6915_v27 = vshll.u32 %v6570_v34, 16 }
 0x6ed   : > { %v6869_v59 = vshrl.u32 %v6621_v44, 16  ;;  %v6872_v52 = vshll.u32 %v6621_v44, 16  ;;  %10865 = vmatprep.mubr.msk.bf16.mxu1 %vm656_vm7, %v6885_v51  ;;  %v15302_v50 = vld [vmem:[#allocation2 + $0xb0] sm:$0xff]  ;;  %v6405_v35 = vor.u32 %v6403_v22, %v6401_v2  ;;  %v6100_v23 = vmax.f32 %v6052_v14, 0.0  ;;  %v17911_v14 = vld [vmem:[#allocation56_spill] sm:$0xff] }
 0x6ee   : > { %6173 = vst.msk [vmem:[#allocation2 + $0xb8] sm:$0xff] %vm656_vm7, %v6149_v26  ;;  %v6053_v61 = vadd.f32 %v6005_v13, %v15131_v20  ;;  %v6407_v21 = vshll.u32 %v15302_v50, 16  ;;  %v6917_v30 = vrot.slane %v6915_v27, 4  ;;  %v6902_v53 = vsel %vm1444_vm5, %v6884_v5, %v6901_v47 }
 0x6ef   : > { %v6871_v49 = vrot.slane %v6869_v59, 3  ;;  %v6874_v41 = vrot.slane %v6872_v52, 4  ;;  %v5909_v25 = vpop.permute.xlu0 %5908 }
 0x6f0   : > { %v6101_v36 = vmax.f32 %v6053_v61, 0.0  ;;  %v6006_v18 = vadd.f32 %v5909_v25, %v15059_v9  ;;  %v6409_v58 = vrot.slane %v6407_v21, 1  ;;  %v17912_v21 = vld [vmem:[#allocation8_spill] sm:$0xff] }
 0x6f1   : > { %v6875_v29 = vor.u32 %v6874_v41, %v6871_v49 }
 0x6f2   : > { %v6126_v37 = vpack.c.bf16 %v6101_v36, %v6100_v23  ;;  %v6054_v28 = vadd.f32 %v6006_v18, %v15142_v60  ;;  %v6410_v20 = vsel %vm2473_vm8, %v6405_v35, %v6409_v58  ;;  %v6572_v60 = vsel %vm2781_vm13, %v6569_v57, %v6571_v19 }
 0x6f3   : > { %v5911_v55 = vpop.permute.xlu1 %5910  ;;  %6496 = vrot.lane.b32.xlu1 %v6410_v20, %s11345_s27  ;;  %v6483_v40 = vpop.permute.xlu0 %6482  ;;  %v6876_v2 = vsel %vm1444_vm5, %v6858_v46, %v6875_v29  ;;  %v6929_v26 = vshrl.u32 %v6572_v60, 16  ;;  %v6932_v44 = vshll.u32 %v6572_v60, 16 }
 0x6f4   : > { %v6150_v63 = vmul.bf16 %v6126_v37, %v17911_v14  ;;  %v6007_v9 = vadd.f32 %v5911_v55, %v15072_v45  ;;  %v6623_v34 = vsel %vm656_vm7, %v15079_v0, %v6483_v40  ;;  %7499 = vmatmul.mubr.bf16.gmra.mrb[204].mxu1 %v6876_v2  ;;  %v6411_v45 = vshrl.u32 %v15302_v50, 16 }
 0x6f5   : > { %v6886_v42 = vshrl.u32 %v6623_v34, 16  ;;  %v6889_v15 = vshll.u32 %v6623_v34, 16  ;;  %10866 = vmatprep.mubr.msk.bf16.mxu1 %vm656_vm7, %v6902_v53  ;;  %v15322_v62 = vld [vmem:[#allocation2 + $0xb8] sm:$0xff]  ;;  %v6918_v0 = vor.u32 %v6917_v30, %v6914_v17  ;;  %v6102_v19 = vmax.f32 %v6054_v28, 0.0  ;;  %v15341_v17 = vld [vmem:[#allocation2 + $0xd0] sm:$0xff] }
 0x6f6   : > { %6174 = vst.msk [vmem:[#allocation2 + $0xc0] sm:$0xff] %vm656_vm7, %v6150_v63  ;;  %v6055_v5 = vadd.f32 %v6007_v9, %v15145_v16  ;;  %v6415_v46 = vshll.u32 %v15322_v62, 16  ;;  %v6413_v13 = vor.u32 %v6411_v45, %v6409_v58  ;;  %v6931_v41 = vrot.slane %v6929_v26, 3  ;;  %v15344_v30 = vld [vmem:[#allocation2 + $0xd8] sm:$0xf] }
 0x6f7   : > { %v6888_v31 = vrot.slane %v6886_v42, 3  ;;  %v6891_v7 = vrot.slane %v6889_v15, 4  ;;  %v6919_v61 = vsel %vm1444_vm5, %v6901_v47, %v6918_v0  ;;  %v6934_v25 = vrot.slane %v6932_v44, 4 }
 0x6f8   : > { %v6103_v57 = vmax.f32 %v6055_v5, 0.0  ;;  %v6417_v51 = vrot.slane %v6415_v46, 1  ;;  %v6419_v18 = vshrl.u32 %v15322_v62, 16  ;;  %v6439_v20 = vshll.u32 %v15341_v17, 16 }
 0x6f9   : > { %v6892_v59 = vor.u32 %v6891_v7, %v6888_v31  ;;  %v6935_v28 = vor.u32 %v6934_v25, %v6931_v41  ;;  %v6447_v63 = vshll.u32 %v15344_v30, 16  ;;  %v6443_v42 = vshrl.u32 %v15341_v17, 16 }
 0x6fa   : > { %v6127_v52 = vpack.c.bf16 %v6103_v57, %v6102_v19  ;;  %v6418_v22 = vsel %vm2473_vm8, %v6413_v13, %v6417_v51  ;;  %v6441_v60 = vrot.slane %v6439_v20, 1 }
 0x6fb   : > { %v6485_v11 = vpop.permute.xlu1 %6484  ;;  %6498 = vrot.lane.b32.xlu0 %v6418_v22, %s11345_s27  ;;  %v6893_v16 = vsel %vm1444_vm5, %v6875_v29, %v6892_v59  ;;  %v6936_v34 = vsel %vm1444_vm5, %v6918_v0, %v6935_v28  ;;  %v6449_v44 = vrot.slane %v6447_v63, 1 }
 0x6fc   : > { %v6151_v27 = vmul.bf16 %v6127_v52, %v17912_v21  ;;  %v6625_v49 = vsel %vm656_vm7, %v15109_v1, %v6485_v11  ;;  %7509 = vmatmul.mubr.bf16.gmra.mrb[208].mxu1 %v6893_v16  ;;  %v6421_v1 = vor.u32 %v6419_v18, %v6417_v51  ;;  %v6445_v57 = vor.u32 %v6443_v42, %v6441_v60 }
 0x6fd   : > { %v6903_v35 = vshrl.u32 %v6625_v49, 16  ;;  %v6906_v23 = vshll.u32 %v6625_v49, 16  ;;  %10867 = vmatprep.mubr.msk.bf16.mxu1 %vm656_vm7, %v6919_v61  ;;  %v15336_v36 = vld [vmem:[#allocation2 + $0xc0] sm:$0xff]  ;;  %v6451_v51 = vshrl.u32 %v15344_v30, 16  ;;  %v6953_v16 = vsel %vm1444_vm5, %v6935_v28, %v15251_v56 }
 0x6fe   : > { %6175 = vst.msk [vmem:[#allocation2 + $0xc8] sm:$0xff] %vm656_vm7, %v6151_v27  ;;  %v6423_v47 = vshll.u32 %v15336_v36, 16  ;;  %v6427_v46 = vshrl.u32 %v15336_v36, 16  ;;  %v6450_v61 = vsel %vm2473_vm8, %v6445_v57, %v6449_v44 }
 0x6ff   : > { %v6905_v58 = vrot.slane %v6903_v35, 3  ;;  %v6908_v29 = vrot.slane %v6906_v23, 4  ;;  %v6453_v27 = vor.u32 %v6451_v51, %v6449_v44 }
 0x700   : > { %v6425_v37 = vrot.slane %v6423_v47, 1 }
 0x701   : > { %v6909_v55 = vor.u32 %v6908_v29, %v6905_v58 }
 0x702   : > { %v6426_v40 = vsel %vm2473_vm8, %v6421_v1, %v6425_v37 }
 0x703   : > { %6500 = vrot.lane.b32.xlu1 %v6426_v40, %s11345_s27  ;;  %v6487_v2 = vpop.permute.xlu0 %6486  ;;  %v6910_v53 = vsel %vm1444_vm5, %v6892_v59, %v6909_v55 }
 0x704   : > { %v6627_v9 = vsel %vm656_vm7, %v15133_v48, %v6487_v2  ;;  %7519 = vmatmul.mubr.bf16.gmra.mrb[212].mxu1 %v6910_v53  ;;  %v6429_v48 = vor.u32 %v6427_v46, %v6425_v37  ;;  %v6577_v37 = vrot.slane %v15249_v33, 1 }
 0x705   : > { %v6920_v15 = vshrl.u32 %v6627_v9, 16  ;;  %v6923_v5 = vshll.u32 %v6627_v9, 16  ;;  %10868 = vmatprep.mubr.msk.bf16.mxu1 %vm656_vm7, %v6936_v34  ;;  %v15355_v45 = vld [vmem:[#allocation2 + $0xc8] sm:$0xff] }
 0x706   : > { %v6431_v31 = vshll.u32 %v15355_v45, 16  ;;  %v6435_v0 = vshrl.u32 %v15355_v45, 16  ;;  %v6578_v53 = vsel %vm2781_vm13, %v6575_v43, %v6577_v37 }
 0x707   : > { %v6922_v7 = vrot.slane %v6920_v15, 3  ;;  %v6925_v26 = vrot.slane %v6923_v5, 4  ;;  %v6980_v15 = vshrl.u32 %v6578_v53, 16  ;;  %v6983_v5 = vshll.u32 %v6578_v53, 16 }
 0x708   : > { %v6433_v19 = vrot.slane %v6431_v31, 1 }
 0x709   : > { %v6926_v13 = vor.u32 %v6925_v26, %v6922_v7  ;;  %v6982_v44 = vrot.slane %v6980_v15, 3 }
 0x70a   : > { %v6434_v59 = vsel %vm2473_vm8, %v6429_v48, %v6433_v19  ;;  %v6437_v52 = vor.u32 %v6435_v0, %v6433_v19  ;;  %v6985_v48 = vrot.slane %v6983_v5, 4  ;;  %v6583_v5 = vrot.slane %v15322_v62, 1 }
 0x70b   : > { %6502 = vrot.lane.b32.xlu0 %v6434_v59, %s11345_s27  ;;  %v6927_v22 = vsel %vm1444_vm5, %v6909_v55, %v6926_v13 }
 0x70c   : > { %7529 = vmatmul.mubr.bf16.gmra.mrb[216].mxu1 %v6927_v22  ;;  %v6442_v11 = vsel %vm2473_vm8, %v6437_v52, %v6441_v60 }
 0x70d   : > { %6504 = vrot.lane.b32.xlu1 %v6442_v11, %s11345_s27  ;;  %10869 = vmatprep.mubr.msk.bf16.mxu1 %vm656_vm7, %v6953_v16 }
 0x70f   : > { %6506 = vrot.lane.b32.xlu0 %v6450_v61, %s11345_s27  ;;  %v6581_v61 = vrot.slane %v15302_v50, 1 }
 0x711   : > { %6508 = vrot.lane.b32.xlu1 %v6453_v27, %s11345_s27 }
 0x731   : > { %v15372_v49 = vpop.f32.mrb[156].mxu1 }
 0x732   : > { %v7388_v41 = vpop.f32.mrb[157].mxu1 }
 0x733   : > { %v15374_v25 = vpop.f32.mrb[158].mxu1 }
 0x734   : > { %v7391_v35 = vpop.f32.mrb[159].mxu1 }
 0x739   : > { %v15376_v23 = vpop.f32.mrb[160].mxu1 }
 0x73a   : > { %v7396_v56 = vpop.f32.mrb[161].mxu1 }
 0x73b   : > { %v15378_v18 = vpop.f32.mrb[162].mxu1 }
 0x73c   : > { %v7399_v47 = vpop.f32.mrb[163].mxu1  ;;  %7694 = vrot.lane.b32.xlu0 %v15378_v18, %s11345_s27 }
 0x741   : > { %v15382_v58 = vpop.f32.mrb[164].mxu1 }
 0x742   : > { %v7404_v29 = vpop.f32.mrb[165].mxu1  ;;  %7696 = vrot.lane.b32.xlu1 %v15382_v58, %s11345_s27 }
 0x743   : > { %v15386_v1 = vpop.f32.mrb[166].mxu1 }
 0x744   : > { %v7407_v28 = vpop.f32.mrb[167].mxu1  ;;  %7698 = vrot.lane.b32.xlu0 %v15386_v1, %s11345_s27  ;;  %v6489_v20 = vpop.permute.xlu1 %6488 }
 0x745   : > { %v6629_v55 = vsel %vm656_vm7, %v15147_v8, %v6489_v20  ;;  %v6579_v8 = vrot.slane %v15282_v4, 1 }
 0x746   : > { %v6937_v40 = vshrl.u32 %v6629_v55, 16  ;;  %v6940_v2 = vshll.u32 %v6629_v55, 16 }
 0x747   : > { %v6580_v57 = vsel %vm2781_vm13, %v6577_v37, %v6579_v8  ;;  %v6582_v55 = vsel %vm2781_vm13, %v6579_v8, %v6581_v61 }
 0x748   : > { %v6939_v63 = vrot.slane %v6937_v40, 3  ;;  %v6942_v9 = vrot.slane %v6940_v2, 4  ;;  %v7000_v11 = vshll.u32 %v6580_v57, 16 }
 0x749   : > { %v15396_v34 = vpop.f32.mrb[168].mxu1 }
 0x74a   : > { %v6943_v60 = vor.u32 %v6942_v9, %v6939_v63  ;;  %v15398_v42 = vpop.f32.mrb[169].mxu1  ;;  %7700 = vrot.lane.b32.xlu1 %v15396_v34, %s11345_s27  ;;  %v7002_v37 = vrot.slane %v7000_v11, 4  ;;  %v7014_v9 = vshrl.u32 %v6582_v55, 16 }
 0x74b   : > { %v15402_v46 = vpop.f32.mrb[170].mxu1 }
 0x74c   : > { %v15405_v31 = vpop.f32.mrb[171].mxu1  ;;  %7702 = vrot.lane.b32.xlu0 %v15402_v46, %s11345_s27  ;;  %v6944_v43 = vsel %vm1444_vm5, %v6926_v13, %v6943_v60  ;;  %v6986_v13 = vor.u32 %v6985_v48, %v6982_v44  ;;  %v7016_v48 = vrot.slane %v7014_v9, 3  ;;  %v17913_v9 = vmov 0  }
 0x74d   : > { %v6491_v7 = vpop.permute.xlu0 %6490  ;;  %7539 = vmatmul.mubr.bf16.gmra.mrb[220].mxu1 %v6944_v43 }
 0x74e   : > { %v6631_v26 = vsel %vm656_vm7, %v15197_v39, %v6491_v7  ;;  %10870 = vmatprep.mubr.msk.bf16.mxu1 %vm656_vm7, %v15264_v54  ;;  %v6997_v39 = vshrl.u32 %v6580_v57, 16  ;;  %v6987_v47 = vsel %vm1444_vm5, %v15253_v10, %v6986_v13  ;;  %v7017_v10 = vshll.u32 %v6582_v55, 16 }
 0x74f   : > { %v6954_v19 = vshrl.u32 %v6631_v26, 16  ;;  %v6957_v0 = vshll.u32 %v6631_v26, 16 }
 0x750   : > { %v6999_v29 = vrot.slane %v6997_v39, 3 }
 0x751   : > { %v6956_v51 = vrot.slane %v6954_v19, 3  ;;  %v6959_v59 = vrot.slane %v6957_v0, 4  ;;  %v15415_v52 = vpop.f32.mrb[172].mxu1  ;;  %v7019_v19 = vrot.slane %v7017_v10, 4 }
 0x752   : > { %v15417_v22 = vpop.f32.mrb[173].mxu1  ;;  %7704 = vrot.lane.b32.xlu1 %v15415_v52, %s11345_s27 }
 0x753   : > { %v6960_v16 = vor.u32 %v6959_v59, %v6956_v51  ;;  %v15421_v54 = vpop.f32.mrb[174].mxu1  ;;  %v6584_v51 = vsel %vm2781_vm13, %v6581_v61, %v6583_v5  ;;  %v7020_v11 = vor.u32 %v7019_v19, %v7016_v48 }
 0x754   : > { %v15424_v27 = vpop.f32.mrb[175].mxu1  ;;  %7706 = vrot.lane.b32.xlu0 %v15421_v54, %s11345_s27 }
 0x755   : > { %v6493_v41 = vpop.permute.xlu1 %6492  ;;  %v6961_v35 = vsel %vm1444_vm5, %v6943_v60, %v6960_v16 }
 0x756   : > { %v6633_v56 = vsel %vm656_vm7, %v15224_v24, %v6493_v41  ;;  %7549 = vmatmul.mubr.bf16.gmra.mrb[224].mxu1 %v6961_v35  ;;  %v7003_v24 = vor.u32 %v7002_v37, %v6999_v29  ;;  %v7031_v41 = vshrl.u32 %v6584_v51, 16  ;;  %v7034_v35 = vshll.u32 %v6584_v51, 16 }
 0x757   : > { %v6971_v28 = vshrl.u32 %v6633_v56, 16  ;;  %v6974_v20 = vshll.u32 %v6633_v56, 16  ;;  %10871 = vmatprep.mubr.msk.bf16.mxu1 %vm656_vm7, %v6987_v47  ;;  %v6585_v56 = vrot.slane %v15336_v36, 1 }
 0x758   : > { %v7004_v44 = vsel %vm1444_vm5, %v6986_v13, %v7003_v24  ;;  %v7021_v61 = vsel %vm1444_vm5, %v7003_v24, %v7020_v11  ;;  %v7033_v37 = vrot.slane %v7031_v41, 3 }
 0x759   : > { %v6973_v40 = vrot.slane %v6971_v28, 3  ;;  %v6976_v2 = vrot.slane %v6974_v20, 4  ;;  %v15435_v53 = vpop.f32.mrb[176].mxu1  ;;  %v7036_v28 = vrot.slane %v7034_v35, 4  ;;  %v11293_v20 = vld [vmem:[%s17375_s3 + $0x68] sm:$0xff]  }
 0x75a   : > { %v15437_v63 = vpop.f32.mrb[177].mxu1  ;;  %7708 = vrot.lane.b32.xlu1 %v15435_v53, %s11345_s27 }
 0x75b   : > { %v6977_v60 = vor.u32 %v6976_v2, %v6973_v40  ;;  %v15441_v15 = vpop.f32.mrb[178].mxu1  ;;  %v6586_v2 = vsel %vm2781_vm13, %v6583_v5, %v6585_v56 }
 0x75c   : > { %v15444_v43 = vpop.f32.mrb[179].mxu1  ;;  %7710 = vrot.lane.b32.xlu0 %v15441_v15, %s11345_s27  ;;  %v7051_v24 = vshll.u32 %v6586_v2, 16 }
 0x75d   : > { %v6495_v8 = vpop.permute.xlu0 %6494  ;;  %v6978_v7 = vsel %vm1444_vm5, %v6960_v16, %v6977_v60 }
 0x75e   : > { %v6635_v26 = vsel %vm656_vm7, %v15249_v33, %v6495_v8  ;;  %7559 = vmatmul.mubr.bf16.gmra.mrb[228].mxu1 %v6978_v7  ;;  %v11292_v33 = vld [vmem:[%s17375_s3 + $0x60] sm:$0xff]   ;;  %v7048_v8 = vshrl.u32 %v6586_v2, 16  ;;  %v6230_v2 = vld [vmem:[#allocation2 + $0xd8] sm:$0x1f] }
 0x75f   : > { %v6988_v0 = vshrl.u32 %v6635_v26, 16  ;;  %v6991_v57 = vshll.u32 %v6635_v26, 16  ;;  %10872 = vmatprep.mubr.msk.bf16.mxu1 %vm656_vm7, %v7004_v44  ;;  %9112 = vmatpush1.bf16.msra.mxu0 %v11292_v33  ;;  %v6587_v26 = vrot.slane %v15355_v45, 1 }
 0x760   : > { %9113 = vmatprep.subr.bf16.mxu0 %v17913_v9 }
 0x761   : > { %v6990_v59 = vrot.slane %v6988_v0, 3  ;;  %v6993_v39 = vrot.slane %v6991_v57, 4  ;;  %v7050_v0 = vrot.slane %v7048_v8, 3  ;;  %v7053_v57 = vrot.slane %v7051_v24, 4 }
 0x763   : > { %v6994_v16 = vor.u32 %v6993_v39, %v6990_v59  ;;  %9114 = vmatpush1.bf16.msra.mxu0 %v11293_v20  ;;  %v6588_v39 = vsel %vm2781_vm13, %v6585_v56, %v6587_v26  ;;  %v7054_v33 = vor.u32 %v7053_v57, %v7050_v0 }
 0x764   : > { %9115 = vmatprep.subr.bf16.mxu0 %v17913_v9 }
 0x765   : > { %v6497_v13 = vpop.permute.xlu1 %6496  ;;  %v6995_v47 = vsel %vm1444_vm5, %v6977_v60, %v6994_v16  ;;  %v7037_v60 = vor.u32 %v7036_v28, %v7033_v37 }
 0x766   : > { %v6637_v29 = vsel %vm656_vm7, %v15282_v4, %v6497_v13  ;;  %7569 = vmatmul.mubr.bf16.gmra.mrb[232].mxu1 %v6995_v47  ;;  %v7065_v13 = vshrl.u32 %v6588_v39, 16  ;;  %v7068_v47 = vshll.u32 %v6588_v39, 16 }
 0x767   : > { %v7005_v55 = vshrl.u32 %v6637_v29, 16  ;;  %v7008_v40 = vshll.u32 %v6637_v29, 16  ;;  %10873 = vmatprep.mubr.msk.bf16.mxu1 %vm656_vm7, %v7021_v61  ;;  %v7038_v5 = vsel %vm1444_vm5, %v7020_v11, %v7037_v60  ;;  %v6589_v29 = vrot.slane %v15341_v17, 1 }
 0x768   : > { %v7055_v37 = vsel %vm1444_vm5, %v7037_v60, %v7054_v33  ;;  %v7067_v28 = vrot.slane %v7065_v13, 3  ;;  %v7070_v20 = vrot.slane %v7068_v47, 4 }
 0x769   : > { %v7007_v10 = vrot.slane %v7005_v55, 3  ;;  %v7010_v4 = vrot.slane %v7008_v40, 4  ;;  %v6590_v40 = vsel %vm2781_vm13, %v6587_v26, %v6589_v29 }
 0x76a   : > { %v7071_v8 = vor.u32 %v7070_v20, %v7067_v28  ;;  %v7082_v24 = vshrl.u32 %v6590_v40, 16 }
 0x76b   : > { %v7011_v7 = vor.u32 %v7010_v4, %v7007_v10 }
 0x76c   : > { %v7084_v0 = vrot.slane %v7082_v24, 3 }
 0x76d   : > { %v6499_v44 = vpop.permute.xlu0 %6498  ;;  %v7012_v48 = vsel %vm1444_vm5, %v6994_v16, %v7011_v7 }
 0x76e   : > { %v6639_v19 = vsel %vm656_vm7, %v15302_v50, %v6499_v44  ;;  %7579 = vmatmul.mubr.bf16.gmra.mrb[236].mxu1 %v7012_v48  ;;  %v6591_v48 = vrot.slane %v6230_v2, 1 }
 0x76f   : > { %v7022_v51 = vshrl.u32 %v6639_v19, 16  ;;  %v7025_v59 = vshll.u32 %v6639_v19, 16  ;;  %10874 = vmatprep.mubr.msk.bf16.mxu1 %vm656_vm7, %v7038_v5  ;;  %v7072_v5 = vsel %vm1444_vm5, %v7054_v33, %v7071_v8 }
 0x770   : > { %v6592_v39 = vsel %vm2781_vm13, %v6589_v29, %v6591_v48  ;;  %v7119_v2 = vshll.u32 %v6591_v48, 16 }
 0x771   : > { %v7024_v41 = vrot.slane %v7022_v51, 3  ;;  %v7027_v35 = vrot.slane %v7025_v59, 4 }
 0x773   : > { %v7028_v16 = vor.u32 %v7027_v35, %v7024_v41 }
 0x775   : > { %v6501_v50 = vpop.permute.xlu1 %6500  ;;  %v7029_v61 = vsel %vm1444_vm5, %v7011_v7, %v7028_v16  ;;  %v7085_v7 = vshll.u32 %v6590_v40, 16  ;;  %v7116_v40 = vshrl.u32 %v6591_v48, 16 }
 0x776   : > { %v6641_v11 = vsel %vm656_vm7, %v15322_v62, %v6501_v50  ;;  %7589 = vmatmul.mubr.bf16.gmra.mrb[240].mxu1 %v7029_v61  ;;  %v7099_v50 = vshrl.u32 %v6592_v39, 16  ;;  %v7102_v61 = vshll.u32 %v6592_v39, 16 }
 0x777   : > { %v7039_v56 = vshrl.u32 %v6641_v11, 16  ;;  %v7042_v55 = vshll.u32 %v6641_v11, 16  ;;  %10875 = vmatprep.mubr.msk.bf16.mxu1 %vm656_vm7, %v7055_v37  ;;  %v7087_v57 = vrot.slane %v7085_v7, 4 }
 0x779   : > { %v7041_v10 = vrot.slane %v7039_v56, 3  ;;  %v7044_v4 = vrot.slane %v7042_v55, 4  ;;  %v7104_v55 = vrot.slane %v7102_v61, 4 }
 0x77b   : > { %v7045_v44 = vor.u32 %v7044_v4, %v7041_v10 }
 0x77d   : > { %v6503_v62 = vpop.permute.xlu0 %6502  ;;  %v7046_v19 = vsel %vm1444_vm5, %v7028_v16, %v7045_v44 }
 0x77e   : > { %v6643_v60 = vsel %vm656_vm7, %v15336_v36, %v6503_v62  ;;  %7599 = vmatmul.mubr.bf16.gmra.mrb[244].mxu1 %v7046_v19  ;;  %v7088_v36 = vor.u32 %v7087_v57, %v7084_v0  ;;  %v7118_v19 = vrot.slane %v7116_v40, 3 }
 0x77f   : > { %v7056_v26 = vshrl.u32 %v6643_v60, 16  ;;  %v7059_v51 = vshll.u32 %v6643_v60, 16  ;;  %v6505_v59 = vpop.permute.xlu1 %6504  ;;  %10876 = vmatprep.mubr.msk.bf16.mxu1 %vm656_vm7, %v7072_v5  ;;  %v7121_v60 = vrot.slane %v7119_v2, 4 }
 0x780   : > { %v6645_v41 = vsel %vm656_vm7, %v15355_v45, %v6505_v59  ;;  %v7089_v29 = vsel %vm1444_vm5, %v7071_v8, %v7088_v36  ;;  %v7101_v45 = vrot.slane %v7099_v50, 3  ;;  %v11294_v59 = vld [vmem:[%s17375_s3 + $0x70] sm:$0xff]  }
 0x781   : > { %v7058_v35 = vrot.slane %v7056_v26, 3  ;;  %v7061_v13 = vrot.slane %v7059_v51, 4  ;;  %v7073_v47 = vshrl.u32 %v6645_v41, 16  ;;  %v7076_v16 = vshll.u32 %v6645_v41, 16  ;;  %v6507_v11 = vpop.permute.xlu0 %6506  ;;  %9116 = vmatpush1.bf16.msra.mxu0 %v11294_v59  ;;  %v15583_v59 = vld [vmem:[#allocation3 + $0x8] sm:$0xff] }
 0x782   : > { %v6647_v56 = vsel %vm656_vm7, %v15341_v17, %v6507_v11  ;;  %v7105_v7 = vor.u32 %v7104_v55, %v7101_v45  ;;  %v7122_v48 = vor.u32 %v7121_v60, %v7118_v19  ;;  %9117 = vmatprep.subr.bf16.mxu0 %v17913_v9 }
 0x783   : > { %v7062_v33 = vor.u32 %v7061_v13, %v7058_v35  ;;  %v7075_v37 = vrot.slane %v7073_v47, 3  ;;  %v7078_v28 = vrot.slane %v7076_v16, 4  ;;  %v7090_v4 = vshrl.u32 %v6647_v56, 16  ;;  %v6509_v62 = vpop.permute.xlu1 %6508 }
 0x784   : > { %v7093_v24 = vshll.u32 %v6647_v56, 16  ;;  %v6649_v8 = vsel %vm656_vm7, %v15344_v30, %v6509_v62  ;;  %v7106_v0 = vsel %vm1444_vm5, %v7088_v36, %v7105_v7  ;;  %v7123_v41 = vsel %vm1444_vm5, %v7105_v7, %v7122_v48 }
 0x785   : > { %v7063_v20 = vsel %vm1444_vm5, %v7045_v44, %v7062_v33  ;;  %v7079_v10 = vor.u32 %v7078_v28, %v7075_v37  ;;  %v7092_v44 = vrot.slane %v7090_v4, 3  ;;  %v7107_v26 = vshrl.u32 %v6649_v8, 16 }
 0x786   : > { %7609 = vmatmul.mubr.bf16.gmra.mrb[248].mxu1 %v7063_v20  ;;  %v7095_v5 = vrot.slane %v7093_v24, 4  ;;  %v7110_v51 = vshll.u32 %v6649_v8, 16  ;;  %v11295_v20 = vld [vmem:[%s17375_s3 + $0x78] sm:$0xff]  }
 0x787   : > { %10877 = vmatprep.mubr.msk.bf16.mxu1 %vm656_vm7, %v7089_v29  ;;  %v7080_v17 = vsel %vm1444_vm5, %v7062_v33, %v7079_v10  ;;  %v7109_v35 = vrot.slane %v7107_v26, 3  ;;  %9118 = vmatpush1.bf16.msra.mxu0 %v11295_v20 }
 0x788   : > { %v7096_v57 = vor.u32 %v7095_v5, %v7092_v44  ;;  %v7112_v13 = vrot.slane %v7110_v51, 4  ;;  %9119 = vmatprep.subr.bf16.mxu0 %v17913_v9 }
 0x78a   : > { %v7097_v30 = vsel %vm1444_vm5, %v7079_v10, %v7096_v57  ;;  %v7113_v50 = vor.u32 %v7112_v13, %v7109_v35 }
 0x78c   : > { %v7114_v61 = vsel %vm1444_vm5, %v7096_v57, %v7113_v50  ;;  %v8464_v50 = vrot.slane %v15583_v59, 1 }
 0x78e   : > { %7619 = vmatmul.mubr.bf16.gmra.mrb[252].mxu1 %v7080_v17 }
 0x78f   : > { %10878 = vmatprep.mubr.msk.bf16.mxu1 %vm656_vm7, %v7106_v0 }
 0x794   : > { %v15504_v39 = vpop.f32.mrb[180].mxu1 }
 0x795   : > { %v15508_v47 = vpop.f32.mrb[181].mxu1  ;;  %7712 = vrot.lane.b32.xlu1 %v15504_v39, %s11345_s27 }
 0x796   : > { %7629 = vmatmul.mubr.bf16.gmra.mrb[0].mxu1 %v7097_v30  ;;  %v15513_v16 = vpop.f32.mrb[182].mxu1 }
 0x797   : > { %v15515_v36 = vpop.f32.mrb[183].mxu1  ;;  %7714 = vrot.lane.b32.xlu0 %v15513_v16, %s11345_s27  ;;  %10879 = vmatprep.mubr.msk.bf16.mxu1 %vm656_vm7, %v7123_v41  ;;  %v17914_v41 = vld [vmem:[#allocation57_spill] sm:$0xff] }
 0x79e   : > { %7638 = vmatmul.mubr.bf16.gmra.mrb[4].mxu1 %v7114_v61  ;;  %v15521_v33 = vpop.f32.mrb[184].mxu1 }
 0x79f   : > { %v15523_v11 = vpop.f32.mrb[185].mxu1  ;;  %7716 = vrot.lane.b32.xlu1 %v15521_v33, %s11345_s27 }
 0x7a0   : > { %v15527_v37 = vpop.f32.mrb[186].mxu1 }
 0x7a1   : > { %v15529_v28 = vpop.f32.mrb[187].mxu1  ;;  %7718 = vrot.lane.b32.xlu0 %v15527_v37, %s11345_s27 }
 0x7a7   : > { %v15536_v56 = vpop.f32.mrb[188].mxu1 }
 0x7a8   : > { %v15538_v29 = vpop.f32.mrb[189].mxu1  ;;  %7720 = vrot.lane.b32.xlu1 %v15536_v56, %s11345_s27 }
 0x7a9   : > { %v15543_v45 = vpop.f32.mrb[190].mxu1 }
 0x7aa   : > { %v15545_v55 = vpop.f32.mrb[191].mxu1  ;;  %7722 = vrot.lane.b32.xlu0 %v15543_v45, %s11345_s27 }
 0x7ae   : > { %v7695_v40 = vpop.permute.xlu0 %7694 }
 0x7af   : > { %v7838_v2 = vadd.f32 %v7695_v40, %v15372_v49  ;;  %v15550_v10 = vpop.f32.mrb[192].mxu1  ;;  %v11296_v49 = vld [vmem:[%s17375_s3 + $0x80] sm:$0xff]  }
 0x7b0   : > { %v15552_v4 = vpop.f32.mrb[193].mxu1  ;;  %7724 = vrot.lane.b32.xlu1 %v15550_v10, %s11345_s27  ;;  %9120 = vmatpush1.bf16.msra.mxu0 %v11296_v49 }
 0x7b1   : > { %v7886_v24 = vadd.f32 %v7838_v2, %v15398_v42  ;;  %v15557_v7 = vpop.f32.mrb[194].mxu1  ;;  %9121 = vmatprep.subr.bf16.mxu0 %v17913_v9 }
 0x7b2   : > { %v15559_v62 = vpop.f32.mrb[195].mxu1  ;;  %7726 = vrot.lane.b32.xlu0 %v15557_v7, %s11345_s27 }
 0x7b4   : > { %v7697_v19 = vpop.permute.xlu1 %7696 }
 0x7b5   : > { %v7839_v60 = vadd.f32 %v7697_v19, %v15374_v25  ;;  %v7934_v25 = vmax.f32 %v7886_v24, 0.0 }
 0x7b6   : > { %v7699_v44 = vpop.permute.xlu0 %7698 }
 0x7b7   : > { %v7887_v5 = vadd.f32 %v7839_v60, %v15405_v31  ;;  %v7840_v17 = vadd.f32 %v7699_v44, %v15376_v23  ;;  %v15569_v42 = vpop.f32.mrb[196].mxu1  ;;  %v8154_v23 = vld [vmem:[#allocation3] sm:$0xf0] }
 0x7b8   : > { %v15571_v8 = vpop.f32.mrb[197].mxu1  ;;  %7728 = vrot.lane.b32.xlu1 %v15569_v42, %s11345_s27  ;;  %v8463_v13 = vrot.slane %v8154_v23, 1 }
 0x7b9   : > { %v7935_v0 = vmax.f32 %v7887_v5, 0.0  ;;  %v7888_v48 = vadd.f32 %v7840_v17, %v15417_v22  ;;  %v15577_v57 = vpop.f32.mrb[198].mxu1  ;;  %v11297_v22 = vld [vmem:[%s17375_s3 + $0x88] sm:$0xff]  }
 0x7ba   : > { %v15579_v26 = vpop.f32.mrb[199].mxu1  ;;  %7730 = vrot.lane.b32.xlu0 %v15577_v57, %s11345_s27  ;;  %9122 = vmatpush1.bf16.msra.mxu0 %v11297_v22 }
 0x7bb   : > { %v7982_v31 = vpack.c.bf16 %v7935_v0, %v7934_v25  ;;  %9123 = vmatprep.subr.bf16.mxu0 %v17913_v9  ;;  %v7936_v19 = vmax.f32 %v7888_v48, 0.0  ;;  %v17915_v48 = vld [vmem:[#allocation58_spill] sm:$0xff] }
 0x7bc   : > { %v7701_v51 = vpop.permute.xlu1 %7700 }
 0x7bd   : > { %v8006_v30 = vmul.bf16 %v7982_v31, %v17914_v41  ;;  %v7841_v35 = vadd.f32 %v7701_v51, %v15378_v18  ;;  %v11298_v18 = vld [vmem:[%s17375_s3 + $0x90] sm:$0xff]   ;;  %v11299_v31 = vld [vmem:[%s17375_s3 + $0x98] sm:$0xff]  }
 0x7be   : > { %v7703_v61 = vpop.permute.xlu0 %7702  ;;  %9124 = vmatpush1.bf16.msra.mxu0 %v11298_v18 }
 0x7bf   : > { %8030 = vst.msk [vmem:[#allocation3 + $0x10] sm:$0xff] %vm656_vm7, %v8006_v30  ;;  %v7889_v20 = vadd.f32 %v7841_v35, %v15424_v27  ;;  %v7842_v40 = vadd.f32 %v7703_v61, %v15382_v58  ;;  %v15594_v2 = vpop.f32.mrb[200].mxu1  ;;  %v8465_v58 = vsel %vm2781_vm13, %v8463_v13, %v8464_v50  ;;  %9125 = vmatprep.subr.bf16.mxu0 %v17913_v9  ;;  %v8164_v30 = vshll.u32 %v15583_v59, 16 }
 0x7c0   : > { %v15599_v24 = vpop.f32.mrb[201].mxu1  ;;  %7732 = vrot.lane.b32.xlu1 %v15594_v2, %s11345_s27  ;;  %v9350_v25 = vshrl.u32 %v8465_v58, 16  ;;  %v9353_v0 = vshll.u32 %v8465_v58, 16 }
 0x7c1   : > { %v7937_v60 = vmax.f32 %v7889_v20, 0.0  ;;  %v7890_v27 = vadd.f32 %v7842_v40, %v15437_v63  ;;  %v15605_v49 = vpop.f32.mrb[202].mxu1 }
 0x7c2   : > { %v15608_v44 = vpop.f32.mrb[203].mxu1  ;;  %7734 = vrot.lane.b32.xlu0 %v15605_v49, %s11345_s27  ;;  %9126 = vmatpush1.bf16.msra.mxu0 %v11299_v31  ;;  %v9352_v40 = vrot.slane %v9350_v25, 3  ;;  %v9355_v18 = vrot.slane %v9353_v0, 4  ;;  %v15644_v0 = vrot.slane %v8164_v30, 1  ;;  %v11301_v30 = vld [vmem:[%s17375_s3 + $0xa8] sm:$0xff]  }
 0x7c3   : > { %v7983_v5 = vpack.c.bf16 %v7937_v60, %v7936_v19  ;;  %9127 = vmatprep.subr.bf16.mxu0 %v17913_v9 }
 0x7c4   : > { %v7705_v17 = vpop.permute.xlu1 %7704  ;;  %17916 = vst [vmem:[#allocation55_spill] sm:$0xff] %v15644_v0  ;;  %v9356_v31 = vor.u32 %v9355_v18, %v9352_v40 }
 0x7c5   : > { %v8007_v23 = vmul.bf16 %v7983_v5, %v17915_v48  ;;  %v7843_v63 = vadd.f32 %v7705_v17, %v15386_v1  ;;  %v11300_v1 = vld [vmem:[%s17375_s3 + $0xa0] sm:$0xff]  }
 0x7c6   : > { %v7707_v51 = vpop.permute.xlu0 %7706  ;;  %v15618_v41 = vld [vmem:[#allocation3 + $0x10] sm:$0xff]  ;;  %9128 = vmatpush1.bf16.msra.mxu0 %v11300_v1 }
 0x7c7   : > { %8031 = vst.msk [vmem:[#allocation3 + $0x18] sm:$0xff] %vm656_vm7, %v8007_v23  ;;  %v7891_v35 = vadd.f32 %v7843_v63, %v15444_v43  ;;  %v7844_v13 = vadd.f32 %v7707_v51, %v15396_v34  ;;  %v15624_v22 = vpop.f32.mrb[204].mxu1  ;;  %v8466_v61 = vrot.slane %v15618_v41, 1  ;;  %v8172_v43 = vshll.u32 %v15618_v41, 16  ;;  %9129 = vmatprep.subr.bf16.mxu0 %v17913_v9 }
 0x7c8   : > { %v15630_v20 = vpop.f32.mrb[205].mxu1  ;;  %7736 = vrot.lane.b32.xlu1 %v15624_v22, %s11345_s27  ;;  %v7938_v34 = vmax.f32 %v7890_v27, 0.0  ;;  %v8168_v23 = vshrl.u32 %v15583_v59, 16  ;;  %v8176_v40 = vshrl.u32 %v15618_v41, 16 }
 0x7c9   : > { %v7939_v19 = vmax.f32 %v7891_v35, 0.0  ;;  %v7892_v60 = vadd.f32 %v7844_v13, %v15508_v47  ;;  %v15637_v58 = vpop.f32.mrb[206].mxu1  ;;  %v8467_v5 = vsel %vm2781_vm13, %v8464_v50, %v8466_v61  ;;  %v8174_v35 = vrot.slane %v8172_v43, 1  ;;  %v17917_v50 = vld [vmem:[#allocation59_spill] sm:$0xff] }
 0x7ca   : > { %v15640_v17 = vpop.f32.mrb[207].mxu1  ;;  %7738 = vrot.lane.b32.xlu0 %v15637_v58, %s11345_s27  ;;  %v8587_v48 = vshrl.u32 %v8467_v5, 16  ;;  %v9358_v25 = vshll.u32 %v8467_v5, 16  ;;  %9130 = vmatpush1.bf16.msra.mxu0 %v11301_v30 }
 0x7cb   : > { %v7984_v63 = vpack.c.bf16 %v7939_v19, %v7938_v34  ;;  %v8170_v34 = vor.u32 %v8168_v23, %v15644_v0  ;;  %v11302_v23 = vld [vmem:[%s17375_s3 + $0xb0] sm:$0xff]   ;;  %9131 = vmatprep.subr.bf16.mxu0 %v17913_v9 }
 0x7cc   : > { %v7709_v27 = vpop.permute.xlu1 %7708  ;;  %v9357_v47 = vrot.slane %v8587_v48, 3  ;;  %v9360_v51 = vrot.slane %v9358_v25, 4 }
 0x7cd   : > { %v8008_v13 = vmul.bf16 %v7984_v63, %v17917_v50  ;;  %v7845_v21 = vadd.f32 %v7709_v27, %v15402_v46  ;;  %v7940_v63 = vmax.f32 %v7892_v60, 0.0 }
 0x7ce   : > { %v7711_v5 = vpop.permute.xlu0 %7710  ;;  %v9361_v14 = vor.u32 %v9360_v51, %v9357_v47  ;;  %v15654_v1 = vld [vmem:[#allocation3 + $0x18] sm:$0xff]  ;;  %9132 = vmatpush1.bf16.msra.mxu0 %v11302_v23 }
 0x7cf   : > { %8032 = vst.msk [vmem:[#allocation3 + $0x20] sm:$0xff] %vm656_vm7, %v8008_v13  ;;  %v7893_v18 = vadd.f32 %v7845_v21, %v15515_v36  ;;  %v7846_v43 = vadd.f32 %v7711_v5, %v15415_v52  ;;  %v15660_v19 = vpop.f32.mrb[208].mxu1  ;;  %v8180_v46 = vshll.u32 %v15654_v1, 16  ;;  %v8468_v25 = vrot.slane %v15654_v1, 1  ;;  %9133 = vmatprep.subr.bf16.mxu0 %v17913_v9 }
 0x7d0   : > { %7740 = vrot.lane.b32.xlu1 %v15660_v19, %s11345_s27  ;;  %v15669_v27 = vpop.f32.mrb[209].mxu1  ;;  %v9362_v21 = vsel %vm1444_vm5, %v9356_v31, %v9361_v14  ;;  %v8178_v52 = vor.u32 %v8176_v40, %v8174_v35  ;;  %v8175_v31 = vsel %vm2473_vm8, %v8170_v34, %v8174_v35  ;;  %v11303_v35 = vld [vmem:[%s17375_s3 + $0xb8] sm:$0xff]  }
 0x7d1   : > { %v7941_v36 = vmax.f32 %v7893_v18, 0.0  ;;  %v15674_v47 = vadd.f32 %v7846_v43, %v15523_v11  ;;  %v15676_v51 = vpop.f32.mrb[210].mxu1  ;;  %10928 = vmatprep.mubr.msk.bf16.mxu1 %vm656_vm7, %v9362_v21  ;;  %v8182_v50 = vrot.slane %v8180_v46, 1  ;;  %v8469_v60 = vsel %vm2781_vm13, %v8466_v61, %v8468_v25  ;;  %v17918_v46 = vld [vmem:[#allocation60_spill] sm:$0xff] }
 0x7d2   : > { %v15680_v13 = vpop.f32.mrb[211].mxu1  ;;  %v8591_v30 = vshrl.u32 %v8469_v60, 16  ;;  %v8594_v5 = vshll.u32 %v8469_v60, 16  ;;  %v8589_v61 = vrot.slane %v8587_v48, 7  ;;  %9134 = vmatpush1.bf16.msra.mxu0 %v11303_v35 }
 0x7d3   : > { %v7985_v0 = vpack.c.bf16 %v7941_v36, %v7940_v63  ;;  %v8183_v40 = vsel %vm2473_vm8, %v8178_v52, %v8182_v50  ;;  %v8184_v52 = vshrl.u32 %v15654_v1, 16  ;;  %10066 = vmatprep.subr.bf16.mxu0 %v17913_v9 }
 0x7d4   : > { %8381 = vrot.lane.b32.xlu1 %v8175_v31, %s11345_s27  ;;  %8383 = vrot.lane.b32.xlu0 %v8183_v40, %s11345_s27  ;;  %v8593_v11 = vrot.slane %v8591_v30, 7  ;;  %v9367_v18 = vrot.slane %v8591_v30, 3  ;;  %v9368_v43 = vrot.slane %v8594_v5, 4 }
 0x7d5   : > { %v8009_v21 = vmul.bf16 %v7985_v0, %v17918_v46  ;;  %v8186_v40 = vor.u32 %v8184_v52, %v8182_v50 }
 0x7d6   : > { %v8596_v60 = vor.u32 %v8594_v5, %v8593_v11  ;;  %v15688_v63 = vld [vmem:[#allocation3 + $0x20] sm:$0xff]  ;;  %v9369_v34 = vor.u32 %v9368_v43, %v9367_v18 }
 0x7d7   : > { %8033 = vst.msk [vmem:[#allocation3 + $0x28] sm:$0xff] %vm656_vm7, %v8009_v21  ;;  %v15694_v23 = vpop.f32.mrb[212].mxu1  ;;  %v8188_v0 = vshll.u32 %v15688_v63, 16  ;;  %v8470_v36 = vrot.slane %v15688_v63, 1 }
 0x7d8   : > { %17919 = vst [vmem:[#allocation39_spill] sm:$0xff] %v15694_v23  ;;  %v15699_v30 = vpop.f32.mrb[213].mxu1  ;;  %7744 = vrot.lane.b32.xlu1 %v15694_v23, %s11345_s27  ;;  %7742 = vrot.lane.b32.xlu0 %v15676_v51, %s11345_s27  ;;  %v8597_v48 = vsel %vm8575_vm14, %v8589_v61, %v8596_v60  ;;  %v15707_v5 = vsel %vm1444_vm5, %v9361_v14, %v9369_v34  ;;  %v17926_v23 = vld [vmem:[#allocation63_spill] sm:$0xff] }
 0x7d9   : > { %17920 = vst [vmem:[#allocation16_spill] sm:$0xff] %v15707_v5  ;;  %v15709_v31 = vpop.f32.mrb[214].mxu1  ;;  %10892 = vmatprep.mubr.msk.bf16.mxu0 %vm656_vm7, %v8597_v48  ;;  %v8190_v18 = vrot.slane %v8188_v0, 1  ;;  %v8471_v43 = vsel %vm2781_vm13, %v8468_v25, %v8470_v36  ;;  %v8192_v48 = vshrl.u32 %v15688_v63, 16 }
 0x7da   : > { %17921 = vst [vmem:[#allocation41_spill] sm:$0xff] %v15709_v31  ;;  %v15713_v46 = vpop.f32.mrb[215].mxu1  ;;  %v8606_v21 = vshrl.u32 %v8471_v43, 16  ;;  %v8609_v32 = vshll.u32 %v8471_v43, 16 }
 0x7db   : > { %v8191_v61 = vsel %vm2473_vm8, %v8186_v40, %v8190_v18 }
 0x7dc   : > { %7746 = vrot.lane.b32.xlu1 %v15709_v31, %s11345_s27  ;;  %8385 = vrot.lane.b32.xlu0 %v8191_v61, %s11345_s27  ;;  %v15720_v14 = vrot.slane %v8606_v21, 7  ;;  %v9375_v50 = vrot.slane %v8606_v21, 3  ;;  %v9376_v60 = vrot.slane %v8609_v32, 4 }
 0x7de   : > { %v15722_v35 = vld [vmem:[#allocation3 + $0x28] sm:$0xff]  ;;  %v8611_v25 = vor.u32 %v8609_v32, %v15720_v14  ;;  %v9377_v52 = vor.u32 %v9376_v60, %v9375_v50  ;;  %v8194_v50 = vor.u32 %v8192_v48, %v8190_v18 }
 0x7df   : > { %v15725_v0 = vpop.f32.mrb[216].mxu1  ;;  %v8196_v40 = vshll.u32 %v15722_v35, 16  ;;  %v8472_v43 = vrot.slane %v15722_v35, 1 }
 0x7e0   : > { %17922 = vst [vmem:[#allocation21_spill] sm:$0xff] %v15725_v0  ;;  %v15730_v5 = vpop.f32.mrb[217].mxu1  ;;  %7748 = vrot.lane.b32.xlu0 %v15725_v0, %s11345_s27  ;;  %v15735_v21 = vsel %vm8575_vm14, %v8593_v11, %v8611_v25  ;;  %v15738_v61 = vsel %vm1444_vm5, %v9369_v34, %v9377_v52 }
 0x7e1   : > { %17923 = vst [vmem:[#allocation22_spill] sm:$0xff] %v15738_v61  ;;  %v15740_v32 = vpop.f32.mrb[218].mxu1  ;;  %v8198_v60 = vrot.slane %v8196_v40, 1  ;;  %v15743_v12 = vsel %vm2781_vm13, %v8470_v36, %v8472_v43 }
 0x7e2   : > { %17924 = vst [vmem:[#allocation45_spill] sm:$0xff] %v15740_v32  ;;  %v15745_v3 = vpop.f32.mrb[219].mxu1  ;;  %v17514_v38 = vshrl.u32 %v15743_v12, 16  ;;  %v17517_v6 = vshll.u32 %v15743_v12, 16 }
 0x7e3   : > { %v8199_v0 = vsel %vm2473_vm8, %v8194_v50, %v8198_v60 }
 0x7e4   : > { %7750 = vrot.lane.b32.xlu0 %v15740_v32, %s11345_s27  ;;  %8387 = vrot.lane.b32.xlu1 %v8199_v0, %s11345_s27  ;;  %v9383_v11 = vrot.slane %v17514_v38, 3  ;;  %v9384_v34 = vrot.slane %v17517_v6, 4  ;;  %v7942_v0 = vmax.f32 %v15674_v47, 0.0 }
 0x7e6   : > { %v9385_v36 = vor.u32 %v9384_v34, %v9383_v11 }
 0x7e8   : > { %v15758_v18 = vsel %vm1444_vm5, %v9377_v52, %v9385_v36 }
 0x7e9   : > { %17925 = vst [vmem:[#allocation24_spill] sm:$0xff] %v15758_v18 }
 0x807   : > { %v7713_v25 = vpop.permute.xlu1 %7712 }
 0x808   : > { %v7847_v48 = vadd.f32 %v7713_v25, %v15421_v54 }
 0x809   : > { %v7715_v40 = vpop.permute.xlu0 %7714 }
 0x80a   : > { %v7895_v50 = vadd.f32 %v7847_v48, %v15529_v28  ;;  %v7848_v61 = vadd.f32 %v7715_v40, %v15435_v53 }
 0x80c   : > { %v7943_v32 = vmax.f32 %v7895_v50, 0.0  ;;  %v7896_v38 = vadd.f32 %v7848_v61, %v15538_v29  ;;  %v17927_v29 = vld [vmem:[#allocation67_spill] sm:$0xff] }
 0x80e   : > { %v7986_v31 = vpack.c.bf16 %v7943_v32, %v7942_v0  ;;  %v7944_v25 = vmax.f32 %v7896_v38, 0.0 }
 0x810   : > { %v8010_v6 = vmul.bf16 %v7986_v31, %v17926_v23  ;;  %v8200_v31 = vshrl.u32 %v15722_v35, 16 }
 0x811   : > { %v7717_v11 = vpop.permute.xlu1 %7716 }
 0x812   : > { %8034 = vst.msk [vmem:[#allocation3 + $0x30] sm:$0xff] %vm656_vm7, %v8010_v6  ;;  %v7849_v52 = vadd.f32 %v7717_v11, %v15441_v15 }
 0x813   : > { %v7719_v34 = vpop.permute.xlu0 %7718 }
 0x814   : > { %v7897_v54 = vadd.f32 %v7849_v52, %v15545_v55  ;;  %v7850_v28 = vadd.f32 %v7719_v34, %v15504_v39  ;;  %v8202_v39 = vor.u32 %v8200_v31, %v8198_v60 }
 0x816   : > { %v7945_v53 = vmax.f32 %v7897_v54, 0.0  ;;  %v7898_v47 = vadd.f32 %v7850_v28, %v15552_v4 }
 0x818   : > { %v7987_v48 = vpack.c.bf16 %v7945_v53, %v7944_v25  ;;  %v7946_v54 = vmax.f32 %v7898_v47, 0.0 }
 0x819   : > { %v15771_v40 = vld [vmem:[#allocation3 + $0x30] sm:$0xff] }
 0x81a   : > { %v8011_v61 = vmul.bf16 %v7987_v48, %v17927_v29  ;;  %v7721_v23 = vpop.permute.xlu1 %7720  ;;  %v8204_v6 = vshll.u32 %v15771_v40, 16  ;;  %v8474_v15 = vrot.slane %v15771_v40, 1  ;;  %v17928_v48 = vld [vmem:[#allocation5_spill] sm:$0xff] }
 0x81b   : > { %v7851_v55 = vadd.f32 %v7721_v23, %v15513_v16 }
 0x81c   : > { %8035 = vst.msk [vmem:[#allocation3 + $0x38] sm:$0xff] %vm656_vm7, %v8011_v61  ;;  %v7723_v38 = vpop.permute.xlu0 %7722  ;;  %v8206_v32 = vrot.slane %v8204_v6, 1  ;;  %v15780_v4 = vsel %vm2781_vm13, %v8472_v43, %v8474_v15 }
 0x81d   : > { %v7899_v50 = vadd.f32 %v7851_v55, %v15559_v62  ;;  %v7852_v0 = vadd.f32 %v7723_v38, %v15521_v33  ;;  %v17522_v11 = vshrl.u32 %v15780_v4, 16  ;;  %v17520_v52 = vshll.u32 %v15780_v4, 16 }
 0x81e   : > { %v8207_v34 = vsel %vm2473_vm8, %v8202_v39, %v8206_v32  ;;  %v8208_v55 = vshrl.u32 %v15771_v40, 16 }
 0x81f   : > { %v7947_v16 = vmax.f32 %v7899_v50, 0.0  ;;  %v7900_v28 = vadd.f32 %v7852_v0, %v15571_v8  ;;  %8389 = vrot.lane.b32.xlu0 %v8207_v34, %s11345_s27  ;;  %v9391_v43 = vrot.slane %v17522_v11, 3  ;;  %v9392_v33 = vrot.slane %v17520_v52, 4 }
 0x820   : > { %v15791_v60 = vpop.f32.mrb[220].mxu1 }
 0x821   : > { %v7988_v62 = vpack.c.bf16 %v7947_v16, %v7946_v54  ;;  %v15795_v25 = vpop.f32.mrb[221].mxu1  ;;  %7752 = vrot.lane.b32.xlu1 %v15791_v60, %s11345_s27  ;;  %v9393_v8 = vor.u32 %v9392_v33, %v9391_v43  ;;  %v7948_v34 = vmax.f32 %v7900_v28, 0.0  ;;  %v8210_v54 = vor.u32 %v8208_v55, %v8206_v32 }
 0x822   : > { %v7725_v53 = vpop.permute.xlu1 %7724  ;;  %v15799_v47 = vpop.f32.mrb[222].mxu1 }
 0x823   : > { %v8012_v29 = vmul.bf16 %v7988_v62, %v17928_v48  ;;  %v7853_v61 = vadd.f32 %v7725_v53, %v15527_v37  ;;  %v15803_v23 = vpop.f32.mrb[223].mxu1  ;;  %v15805_v31 = vld [vmem:[#allocation3 + $0x38] sm:$0xff]  ;;  %v15811_v50 = vsel %vm1444_vm5, %v9385_v36, %v9393_v8 }
 0x824   : > { %v7727_v6 = vpop.permute.xlu0 %7726  ;;  %v8212_v38 = vshll.u32 %v15805_v31, 16  ;;  %v8476_v39 = vrot.slane %v15805_v31, 1  ;;  %17929 = vst [vmem:[#allocation47_spill] sm:$0xff] %v15811_v50 }
 0x825   : > { %8036 = vst.msk [vmem:[#allocation3 + $0x40] sm:$0xff] %vm656_vm7, %v8012_v29  ;;  %v7901_v0 = vadd.f32 %v7853_v61, %v15579_v26  ;;  %v7854_v37 = vadd.f32 %v7727_v6, %v15536_v56  ;;  %7754 = vrot.lane.b32.xlu1 %v15799_v47, %s11345_s27  ;;  %v17930_v29 = vld [vmem:[#allocation7_spill] sm:$0xff] }
 0x826   : > { %v8214_v16 = vrot.slane %v8212_v38, 1  ;;  %v15819_v43 = vsel %vm2781_vm13, %v8474_v15, %v8476_v39 }
 0x827   : > { %v7949_v33 = vmax.f32 %v7901_v0, 0.0  ;;  %v7902_v62 = vadd.f32 %v7854_v37, %v15599_v24  ;;  %v17519_v36 = vshrl.u32 %v15819_v43, 16  ;;  %v17518_v53 = vshll.u32 %v15819_v43, 16 }
 0x828   : > { %v8215_v26 = vsel %vm2473_vm8, %v8210_v54, %v8214_v16 }
 0x829   : > { %v7989_v48 = vpack.c.bf16 %v7949_v33, %v7948_v34  ;;  %v15825_v56 = vpop.f32.mrb[224].mxu1  ;;  %8391 = vrot.lane.b32.xlu1 %v8215_v26, %s11345_s27  ;;  %v9399_v32 = vrot.slane %v17519_v36, 3  ;;  %v9400_v24 = vrot.slane %v17518_v53, 4  ;;  %v8216_v34 = vshrl.u32 %v15805_v31, 16 }
 0x82a   : > { %v7729_v28 = vpop.permute.xlu1 %7728  ;;  %v15830_v15 = vpop.f32.mrb[225].mxu1  ;;  %7756 = vrot.lane.b32.xlu0 %v15825_v56, %s11345_s27  ;;  %v7950_v53 = vmax.f32 %v7902_v62, 0.0 }
 0x82b   : > { %v8013_v61 = vmul.bf16 %v7989_v48, %v17930_v29  ;;  %v7855_v6 = vadd.f32 %v7729_v28, %v15543_v45  ;;  %v15838_v55 = vpop.f32.mrb[226].mxu1  ;;  %v9401_v54 = vor.u32 %v9400_v24, %v9399_v32  ;;  %v8218_v45 = vor.u32 %v8216_v34, %v8214_v16 }
 0x82c   : > { %v15840_v38 = vpop.f32.mrb[227].mxu1  ;;  %v7731_v0 = vpop.permute.xlu0 %7730  ;;  %v15842_v37 = vld [vmem:[#allocation3 + $0x40] sm:$0xff] }
 0x82d   : > { %8037 = vst.msk [vmem:[#allocation3 + $0x48] sm:$0xff] %vm656_vm7, %v8013_v61  ;;  %v7903_v33 = vadd.f32 %v7855_v6, %v15608_v44  ;;  %v7856_v26 = vadd.f32 %v7731_v0, %v15550_v10  ;;  %v8220_v48 = vshll.u32 %v15842_v37, 16  ;;  %v8478_v28 = vrot.slane %v15842_v37, 1  ;;  %v11304_v10 = vld [vmem:[%s17375_s3] sm:$0xff]  }
 0x82e   : > { %7758 = vrot.lane.b32.xlu0 %v15838_v55, %s11345_s27  ;;  %v15853_v29 = vsel %vm1444_vm5, %v9393_v8, %v9401_v54  ;;  %9716 = vmatpush1.bf16.msra.mxu1 %v11304_v10 }
 0x82f   : > { %17931 = vst [vmem:[#allocation30_spill] sm:$0xff] %v15853_v29  ;;  %v7951_v36 = vmax.f32 %v7903_v33, 0.0  ;;  %v7904_v32 = vadd.f32 %v7856_v26, %v15630_v20  ;;  %v8222_v24 = vrot.slane %v8220_v48, 1  ;;  %v15860_v44 = vsel %vm2781_vm13, %v8476_v39, %v8478_v28  ;;  %v17933_v39 = vld [vmem:[#allocation13_spill] sm:$0xff]  ;;  %9717 = vmatprep.subr.bf16.mxu1 %v17913_v9 }
 0x830   : > { %v17521_v20 = vshrl.u32 %v15860_v44, 16  ;;  %v17523_v62 = vshll.u32 %v15860_v44, 16 }
 0x831   : > { %v7990_v61 = vpack.c.bf16 %v7951_v36, %v7950_v53  ;;  %v15862_v6 = vpop.f32.mrb[228].mxu1  ;;  %v8223_v16 = vsel %vm2473_vm8, %v8218_v45, %v8222_v24 }
 0x832   : > { %17932 = vst [vmem:[#allocation51_spill] sm:$0xff] %v15862_v6  ;;  %v7733_v8 = vpop.permute.xlu1 %7732  ;;  %v15865_v0 = vpop.f32.mrb[229].mxu1  ;;  %7760 = vrot.lane.b32.xlu1 %v15862_v6, %s11345_s27  ;;  %8393 = vrot.lane.b32.xlu0 %v8223_v16, %s11345_s27  ;;  %v9407_v45 = vrot.slane %v17521_v20, 3  ;;  %v9408_v10 = vrot.slane %v17523_v62, 4  ;;  %v8224_v16 = vshrl.u32 %v15842_v37, 16 }
 0x833   : > { %v8014_v34 = vmul.bf16 %v7990_v61, %v17933_v39  ;;  %v7857_v36 = vadd.f32 %v7733_v8, %v15557_v7  ;;  %v15874_v53 = vpop.f32.mrb[230].mxu1  ;;  %v7952_v39 = vmax.f32 %v7904_v32, 0.0 }
 0x834   : > { %17934 = vst [vmem:[#allocation32_spill] sm:$0xff] %v15874_v53  ;;  %v15877_v33 = vpop.f32.mrb[231].mxu1  ;;  %v7735_v26 = vpop.permute.xlu0 %7734  ;;  %v15879_v48 = vld [vmem:[#allocation3 + $0x48] sm:$0xff]  ;;  %v9409_v20 = vor.u32 %v9408_v10, %v9407_v45  ;;  %v8226_v29 = vor.u32 %v8224_v16, %v8222_v24  ;;  %v17938_v24 = vld [vmem:[#allocation12_spill] sm:$0xff] }
 0x835   : > { %17935 = vst [vmem:[#allocation53_spill] sm:$0xff] %v15879_v48  ;;  %8038 = vst.msk [vmem:[#allocation3 + $0x50] sm:$0xff] %vm656_vm7, %v8014_v34  ;;  %v7905_v61 = vadd.f32 %v7857_v36, %v15640_v17  ;;  %v7858_v7 = vadd.f32 %v7735_v26, %v15569_v42  ;;  %v8228_v8 = vshll.u32 %v15879_v48, 16  ;;  %v8480_v52 = vrot.slane %v15879_v48, 1 }
 0x836   : > { %7762 = vrot.lane.b32.xlu1 %v15874_v53, %s11345_s27  ;;  %v15898_v42 = vsel %vm1444_vm5, %v9401_v54, %v9409_v20 }
 0x837   : > { %v7953_v11 = vmax.f32 %v7905_v61, 0.0  ;;  %v7906_v62 = vadd.f32 %v7858_v7, %v15669_v27  ;;  %v8230_v34 = vrot.slane %v8228_v8, 1  ;;  %v15895_v17 = vsel %vm2781_vm13, %v8478_v28, %v8480_v52  ;;  %17936 = vst [vmem:[#allocation38_spill] sm:$0xff] %v15898_v42 }
 0x838   : > { %v17527_v27 = vshrl.u32 %v15895_v17, 16  ;;  %v17528_v28 = vshll.u32 %v15895_v17, 16 }
 0x839   : > { %v7991_v36 = vpack.c.bf16 %v7953_v11, %v7952_v39  ;;  %v15900_v26 = vpop.f32.mrb[232].mxu1  ;;  %v8231_v32 = vsel %vm2473_vm8, %v8226_v29, %v8230_v34 }
 0x83a   : > { %17937 = vst [vmem:[#allocation61_spill] sm:$0xff] %v15900_v26  ;;  %v7737_v50 = vpop.permute.xlu1 %7736  ;;  %v15903_v18 = vpop.f32.mrb[233].mxu1  ;;  %7764 = vrot.lane.b32.xlu0 %v15900_v26, %s11345_s27  ;;  %8395 = vrot.lane.b32.xlu1 %v8231_v32, %s11345_s27  ;;  %v9415_v7 = vrot.slane %v17527_v27, 3  ;;  %v9416_v16 = vrot.slane %v17528_v28, 4 }
 0x83b   : > { %v8015_v54 = vmul.bf16 %v7991_v36, %v17938_v24  ;;  %v7859_v11 = vadd.f32 %v7737_v50, %v15577_v57  ;;  %v15912_v45 = vpop.f32.mrb[234].mxu1  ;;  %v8232_v57 = vshrl.u32 %v15879_v48, 16  ;;  %v7954_v36 = vmax.f32 %v7906_v62, 0.0 }
 0x83c   : > { %17939 = vst [vmem:[#allocation40_spill] sm:$0xff] %v15912_v45  ;;  %v15914_v10 = vpop.f32.mrb[235].mxu1  ;;  %v7739_v29 = vpop.permute.xlu0 %7738  ;;  %v15916_v61 = vld [vmem:[#allocation3 + $0x50] sm:$0xff]  ;;  %v15930_v24 = vor.u32 %v9416_v16, %v9415_v7 }
 0x83d   : > { %8039 = vst.msk [vmem:[#allocation3 + $0x58] sm:$0xff] %vm656_vm7, %v8015_v54  ;;  %v7907_v8 = vadd.f32 %v7859_v11, %v15680_v13  ;;  %v7860_v39 = vadd.f32 %v7739_v29, %v15594_v2  ;;  %v8236_v50 = vshll.u32 %v15916_v61, 16  ;;  %v17530_v32 = vrot.slane %v15916_v61, 1  ;;  %v11305_v2 = vld [vmem:[%s17375_s3 + $0x8] sm:$0xff]  }
 0x83e   : > { %7766 = vrot.lane.b32.xlu0 %v15912_v45, %s11345_s27  ;;  %v8234_v54 = vor.u32 %v8232_v57, %v8230_v34  ;;  %v15943_v62 = vsel %vm1444_vm5, %v9409_v20, %v15930_v24  ;;  %9718 = vmatpush1.bf16.msra.mxu1 %v11305_v2  ;;  %v17942_v20 = vld [vmem:[#allocation37_spill] sm:$0xff] }
 0x83f   : > { %v7955_v27 = vmax.f32 %v7907_v8, 0.0  ;;  %v7908_v28 = vadd.f32 %v7860_v39, %v15699_v30  ;;  %v8238_v42 = vrot.slane %v8236_v50, 1  ;;  %v15939_v13 = vsel %vm2781_vm13, %v8480_v52, %v17530_v32  ;;  %17940 = vst [vmem:[#allocation62_spill] sm:$0xff] %v15943_v62  ;;  %9719 = vmatprep.subr.bf16.mxu1 %v17913_v9 }
 0x840   : > { %v17533_v52 = vshrl.u32 %v15939_v13, 16  ;;  %v17534_v16 = vshll.u32 %v15939_v13, 16 }
 0x841   : > { %v7992_v11 = vpack.c.bf16 %v7955_v27, %v7954_v36  ;;  %v15945_v29 = vpop.f32.mrb[236].mxu1  ;;  %v8239_v30 = vsel %vm2473_vm8, %v8234_v54, %v8238_v42  ;;  %v8240_v36 = vshrl.u32 %v15916_v61, 16 }
 0x842   : > { %17941 = vst [vmem:[#allocation44_spill] sm:$0xff] %v15945_v29  ;;  %v7741_v34 = vpop.permute.xlu1 %7740  ;;  %v15948_v7 = vpop.f32.mrb[237].mxu1  ;;  %7768 = vrot.lane.b32.xlu1 %v15945_v29, %s11345_s27  ;;  %8397 = vrot.lane.b32.xlu0 %v8239_v30, %s11345_s27  ;;  %v9423_v54 = vrot.slane %v17533_v52, 3  ;;  %v9424_v2 = vrot.slane %v17534_v16, 4  ;;  %v7956_v30 = vmax.f32 %v7908_v28, 0.0 }
 0x843   : > { %v8016_v8 = vmul.bf16 %v7992_v11, %v17942_v20  ;;  %v7861_v27 = vadd.f32 %v7741_v34, %v15605_v49  ;;  %v15957_v39 = vpop.f32.mrb[238].mxu1  ;;  %v8242_v32 = vor.u32 %v8240_v36, %v8238_v42  ;;  %v17945_v36 = vshrl.u32 %v15743_v12, 16 }
 0x844   : > { %17943 = vst [vmem:[#allocation64_spill] sm:$0xff] %v15957_v39  ;;  %v15960_v57 = vpop.f32.mrb[239].mxu1  ;;  %v15962_v50 = vld [vmem:[#allocation3 + $0x58] sm:$0xff]  ;;  %v15974_v62 = vor.u32 %v9424_v2, %v9423_v54 }
 0x845   : > { %8040 = vst.msk [vmem:[#allocation3 + $0x60] sm:$0xff] %vm656_vm7, %v8016_v8  ;;  %v7909_v49 = vadd.f32 %v7861_v27, %v15713_v46  ;;  %v8244_v11 = vshll.u32 %v15962_v50, 16  ;;  %v8248_v42 = vshrl.u32 %v15962_v50, 16  ;;  %v15986_v54 = vrot.slane %v17945_v36, 7 }
 0x846   : > { %v8382_v34 = vpop.permute.xlu1 %8381  ;;  %7770 = vrot.lane.b32.xlu1 %v15957_v39, %s11345_s27  ;;  %v8384_v20 = vpop.permute.xlu0 %8383 }
 0x847   : > { %v7957_v29 = vmax.f32 %v7909_v49, 0.0  ;;  %v8522_v52 = vsel %vm656_vm7, %v15583_v59, %v8382_v34  ;;  %v8524_v8 = vsel %vm656_vm7, %v15618_v41, %v8384_v20  ;;  %v8246_v16 = vrot.slane %v8244_v11, 1 }
 0x848   : > { %v8576_v46 = vshrl.u32 %v8522_v52, 16  ;;  %v9344_v27 = vshll.u32 %v8522_v52, 16  ;;  %v8579_v45 = vshrl.u32 %v8524_v8, 16  ;;  %v8582_v28 = vshll.u32 %v8524_v8, 16 }
 0x849   : > { %v7993_v26 = vpack.c.bf16 %v7957_v29, %v7956_v30  ;;  %v15980_v48 = vpop.f32.mrb[240].mxu1  ;;  %v8247_v39 = vsel %vm2473_vm8, %v8242_v32, %v8246_v16  ;;  %v17542_v32 = vrot.slane %v15962_v50, 1  ;;  %v17947_v29 = vld [vmem:[#allocation18_spill] sm:$0xff] }
 0x84a   : > { %17944 = vst [vmem:[#allocation46_spill] sm:$0xff] %v15980_v48  ;;  %v9343_v59 = vrot.slane %v8576_v46, 3  ;;  %v9346_v2 = vrot.slane %v9344_v27, 4  ;;  %v15988_v49 = vrot.slane %v8579_v45, 7  ;;  %v15990_v41 = vpop.f32.mrb[241].mxu1  ;;  %v7745_v52 = vpop.permute.xlu1 %7744  ;;  %7772 = vrot.lane.b32.xlu0 %v15980_v48, %s11345_s27  ;;  %8399 = vrot.lane.b32.xlu1 %v8247_v39, %s11345_s27  ;;  %v9363_v30 = vrot.slane %v8579_v45, 3 }
 0x84b   : > { %17946 = vst [vmem:[#allocation66_spill] sm:$0xff] %v15990_v41  ;;  %v8017_v11 = vmul.bf16 %v7993_v26, %v17947_v29  ;;  %v9364_v34 = vrot.slane %v8582_v28, 4  ;;  %v7863_v20 = vadd.f32 %v7745_v52, %v15637_v58  ;;  %v7743_v8 = vpop.permute.xlu0 %7742  ;;  %v15998_v27 = vpop.f32.mrb[242].mxu1  ;;  %v8578_v36 = vrot.slane %v8576_v46, 7  ;;  %v11306_v26 = vld [vmem:[%s17375_s3 + $0xc0] sm:$0xff]  }
 0x84c   : > { %v16000_v53 = vor.u32 %v9346_v2, %v9343_v59  ;;  %v8584_v41 = vor.u32 %v8582_v28, %v15988_v49  ;;  %v7862_v48 = vadd.f32 %v7743_v8, %v15624_v22  ;;  %v16004_v6 = vpop.f32.mrb[243].mxu1  ;;  %v16006_v39 = vld [vmem:[#allocation3 + $0x60] sm:$0xff]  ;;  %v17949_v28 = vshll.u32 %v15743_v12, 16 }
 0x84d   : > { %8041 = vst.msk [vmem:[#allocation3 + $0x68] sm:$0xff] %vm656_vm7, %v8017_v11  ;;  %v9365_v58 = vor.u32 %v9364_v34, %v9363_v30  ;;  %v7911_v45 = vadd.f32 %v7863_v20, %v15745_v3  ;;  %v8252_v46 = vshll.u32 %v16006_v39, 16  ;;  %v8250_v29 = vor.u32 %v8248_v42, %v8246_v16 }
 0x84e   : > { %17948 = vst [vmem:[#allocation50_spill] sm:$0xff] %v16000_v53  ;;  %v8626_v59 = vor.u32 %v17949_v28, %v15986_v54  ;;  %v7910_v22 = vadd.f32 %v7862_v48, %v15730_v5  ;;  %v7747_v2 = vpop.permute.xlu1 %7746  ;;  %7774 = vrot.lane.b32.xlu0 %v15998_v27, %s11345_s27  ;;  %v8585_v52 = vsel %vm8575_vm14, %v8578_v36, %v8584_v41  ;;  %v17950_v11 = vshrl.u32 %v15780_v4, 16  ;;  %v11307_v48 = vld [vmem:[%s17375_s3 + $0x10] sm:$0xff]  }
 0x84f   : > { %v16027_v3 = vsel %vm1444_vm5, %v16000_v53, %v9365_v58  ;;  %v7959_v34 = vmax.f32 %v7911_v45, 0.0  ;;  %v7864_v12 = vadd.f32 %v7747_v2, %v15660_v19  ;;  %v8386_v20 = vpop.permute.xlu0 %8385  ;;  %9144 = vmatmul.mubr.bf16.vlgmr.msra.gmra.mrb[168].mxu0 %v8585_v52  ;;  %v8254_v5 = vrot.slane %v8252_v46, 1  ;;  %9720 = vmatpush1.bf16.msra.mxu1 %v11307_v48  ;;  %v17955_v48 = vld [vmem:[#allocation42_spill] sm:$0xff] }
 0x850   : > { %v16023_v30 = vrot.slane %v17950_v11, 7  ;;  %17951 = vst [vmem:[#allocation19_spill] sm:$0xff] %v16027_v3  ;;  %v7958_v41 = vmax.f32 %v7910_v22, 0.0  ;;  %v8526_v16 = vsel %vm656_vm7, %v15654_v1, %v8386_v20  ;;  %10893 = vmatprep.mubr.msk.bf16.mxu0 %vm656_vm7, %v15735_v21  ;;  %v17952_v42 = vrot.slane %v15916_v61, 1  ;;  %10067 = vmatpush1.bf16.msra.mxu0 %v11306_v26 }
 0x851   : > { %v7912_v8 = vadd.f32 %v7864_v12, %v15795_v25  ;;  %v8598_v36 = vshrl.u32 %v8526_v16, 16  ;;  %v8601_v45 = vshll.u32 %v8526_v16, 16  ;;  %v16045_v46 = vpop.f32.mrb[244].mxu1  ;;  %v8255_v28 = vsel %vm2473_vm8, %v8250_v29, %v8254_v5  ;;  %10068 = vmatprep.subr.bf16.mxu0 %v17913_v9  ;;  %9721 = vmatprep.subr.bf16.mxu1 %v17913_v9 }
 0x852   : > { %v16042_v19 = vsel %vm2781_vm13, %v17952_v42, %v17542_v32  ;;  %v7994_v1 = vpack.c.bf16 %v7959_v34, %v7958_v41  ;;  %v16049_v21 = vpop.f32.mrb[245].mxu1  ;;  %7776 = vrot.lane.b32.xlu1 %v16045_v46, %s11345_s27  ;;  %8401 = vrot.lane.b32.xlu0 %v8255_v28, %s11345_s27  ;;  %v8627_v25 = vsel %vm8575_vm14, %v15720_v14, %v8626_v59  ;;  %v17953_v26 = vshll.u32 %v15780_v4, 16  ;;  %v17959_v42 = vld [vmem:[#allocation39_spill] sm:$0xff] }
 0x853   : > { %v8486_v2 = vrot.slane %v16006_v39, 1  ;;  %v16062_v52 = vrot.slane %v8598_v36, 7  ;;  %v9371_v29 = vrot.slane %v8598_v36, 3  ;;  %v9372_v11 = vrot.slane %v8601_v45, 4  ;;  %v7749_v34 = vpop.permute.xlu0 %7748  ;;  %v16064_v12 = vpop.f32.mrb[246].mxu1 }
 0x854   : > { %v16059_v22 = vor.u32 %v17953_v26, %v16023_v30  ;;  %17954 = vst [vmem:[#allocation52_spill] sm:$0xff] %v16064_v12  ;;  %v8256_v20 = vshrl.u32 %v16006_v39, 16  ;;  %v8018_v14 = vmul.bf16 %v7994_v1, %v17955_v48  ;;  %v7865_v59 = vadd.f32 %v7749_v34, %v15676_v51  ;;  %v16070_v4 = vpop.f32.mrb[247].mxu1  ;;  %v16072_v41 = vld [vmem:[#allocation3 + $0x68] sm:$0xff] }
 0x855   : > { %17956 = vst [vmem:[#allocation68_spill] sm:$0xff] %v16072_v41  ;;  %v8603_v36 = vor.u32 %v8601_v45, %v16062_v52  ;;  %v9373_v28 = vor.u32 %v9372_v11, %v9371_v29  ;;  %v8260_v32 = vshll.u32 %v16072_v41, 16  ;;  %v7960_v3 = vmax.f32 %v7912_v8, 0.0 }
 0x856   : > { %v8258_v26 = vor.u32 %v8256_v20, %v8254_v5  ;;  %8042 = vst.msk [vmem:[#allocation3 + $0x70] sm:$0xff] %vm656_vm7, %v8018_v14  ;;  %v7913_v1 = vadd.f32 %v7865_v59, %v15803_v23  ;;  %v8388_v51 = vpop.permute.xlu1 %8387  ;;  %7778 = vrot.lane.b32.xlu1 %v16064_v12, %s11345_s27  ;;  %v17957_v34 = vrot.slane %v15962_v50, 1  ;;  %v8488_v45 = vrot.slane %v16072_v41, 1  ;;  %v11308_v20 = vld [vmem:[%s17375_s3 + $0xc8] sm:$0xff]  }
 0x857   : > { %v16089_v5 = vsel %vm1444_vm5, %v9365_v58, %v9373_v28  ;;  %v8528_v29 = vsel %vm656_vm7, %v15688_v63, %v8388_v51  ;;  %v7751_v8 = vpop.permute.xlu0 %7750  ;;  %v8604_v23 = vsel %vm8575_vm14, %v15988_v49, %v8603_v36  ;;  %v8262_v11 = vrot.slane %v8260_v32, 1  ;;  %10069 = vmatpush1.bf16.msra.mxu0 %v11308_v20 }
 0x858   : > { %v16085_v48 = vsel %vm2781_vm13, %v17957_v34, %v8486_v2  ;;  %17958 = vst [vmem:[#allocation6_spill] sm:$0xff] %v16089_v5  ;;  %v7961_v14 = vmax.f32 %v7913_v1, 0.0  ;;  %v8613_v59 = vshrl.u32 %v8528_v29, 16  ;;  %v8616_v34 = vshll.u32 %v8528_v29, 16  ;;  %9152 = vmatmul.mubr.bf16.gmra.mrb[172].mxu0 %v8604_v23  ;;  %10070 = vmatprep.subr.bf16.mxu0 %v17913_v9 }
 0x859   : > { %v7866_v16 = vadd.f32 %v7751_v8, %v17959_v42  ;;  %10894 = vmatprep.mubr.msk.bf16.mxu0 %vm656_vm7, %v8627_v25  ;;  %v16100_v58 = vpop.f32.mrb[248].mxu1  ;;  %v8263_v63 = vsel %vm2473_vm8, %v8258_v26, %v8262_v11  ;;  %v16105_v49 = vsel %vm2781_vm13, %v8486_v2, %v8488_v45  ;;  %v17961_v32 = vshrl.u32 %v16042_v19, 16 }
 0x85a   : > { %17960 = vst [vmem:[#allocation27_spill] sm:$0xff] %v16100_v58  ;;  %v7995_v1 = vpack.c.bf16 %v7961_v14, %v7960_v3  ;;  %v16109_v29 = vrot.slane %v8613_v59, 7  ;;  %v9379_v42 = vrot.slane %v8613_v59, 3  ;;  %v9380_v8 = vrot.slane %v8616_v34, 4  ;;  %v16111_v23 = vpop.f32.mrb[249].mxu1  ;;  %7780 = vrot.lane.b32.xlu0 %v16100_v58, %s11345_s27  ;;  %8403 = vrot.lane.b32.xlu1 %v8263_v63, %s11345_s27  ;;  %v17963_v14 = vld [vmem:[#allocation20_spill] sm:$0xff] }
 0x85b   : > { %v9431_v36 = vrot.slane %v17961_v32, 3  ;;  %v16117_v25 = vadd.f32 %v7866_v16, %v15830_v15  ;;  %v16119_v2 = vpop.f32.mrb[250].mxu1  ;;  %v16134_v15 = vsel %vm1444_vm5, %v15930_v24, %v15974_v62  ;;  %v8264_v3 = vshrl.u32 %v16072_v41, 16 }
 0x85c   : > { %17962 = vst [vmem:[#allocation29_spill] sm:$0xff] %v16119_v2  ;;  %v8019_v59 = vmul.bf16 %v7995_v1, %v17963_v14  ;;  %v8618_v32 = vor.u32 %v8616_v34, %v16109_v29  ;;  %v16127_v51 = vor.u32 %v9380_v8, %v9379_v42  ;;  %v16129_v63 = vpop.f32.mrb[251].mxu1  ;;  %17964 = vst [vmem:[#allocation35_spill] sm:$0xff] %v16134_v15  ;;  %v17966_v20 = vshll.u32 %v16042_v19, 16 }
 0x85d   : > { %v16136_v16 = vld [vmem:[#allocation3 + $0x70] sm:$0xff]  ;;  %v8642_v1 = vsel %vm8575_vm14, %v15986_v54, %v16059_v22  ;;  %v8266_v8 = vor.u32 %v8264_v3, %v8262_v11  ;;  %v17970_v54 = vshrl.u32 %v16105_v49, 16  ;;  %v17971_v11 = vshll.u32 %v16105_v49, 16 }
 0x85e   : > { %17965 = vst [vmem:[#allocation10_spill] sm:$0xff] %v16136_v16  ;;  %v9432_v26 = vrot.slane %v17966_v20, 4  ;;  %8043 = vst.msk [vmem:[#allocation3 + $0x78] sm:$0xff] %vm656_vm7, %v8019_v59  ;;  %v16144_v34 = vsel %vm1444_vm5, %v9373_v28, %v16127_v51  ;;  %7782 = vrot.lane.b32.xlu0 %v16119_v2, %s11345_s27  ;;  %v8619_v24 = vsel %vm8575_vm14, %v16062_v52, %v8618_v32  ;;  %v8268_v42 = vshll.u32 %v16136_v16, 16  ;;  %v11309_v28 = vld [vmem:[%s17375_s3 + $0x18] sm:$0xff]  }
 0x85f   : > { %17967 = vst [vmem:[#allocation14_spill] sm:$0xff] %v16144_v34  ;;  %v8490_v20 = vrot.slane %v16136_v16, 1  ;;  %v17968_v59 = vshrl.u32 %v16085_v48, 16  ;;  %v17969_v52 = vshll.u32 %v16085_v48, 16  ;;  %v9447_v22 = vrot.slane %v17970_v54, 3  ;;  %9722 = vmatpush1.bf16.msra.mxu1 %v11309_v28 }
 0x860   : > { %v9433_v14 = vor.u32 %v9432_v26, %v9431_v36  ;;  %9160 = vmatmul.mubr.bf16.gmra.mrb[176].mxu0 %v8619_v24  ;;  %v8270_v5 = vrot.slane %v8268_v42, 1  ;;  %v9448_v3 = vrot.slane %v17971_v11, 4  ;;  %9723 = vmatprep.subr.bf16.mxu1 %v17913_v9  ;;  %v17982_v2 = vshll.u32 %v15819_v43, 16 }
 0x861   : > { %v9439_v15 = vrot.slane %v17968_v59, 3  ;;  %v9440_v32 = vrot.slane %v17969_v52, 4  ;;  %10895 = vmatprep.mubr.msk.bf16.mxu0 %vm656_vm7, %v8642_v1  ;;  %v7620_v34 = vpop.f32.mrb[252].mxu1  ;;  %v16168_v53 = vsel %vm2781_vm13, %v8488_v45, %v8490_v20 }
 0x862   : > { %v16172_v36 = vsel %vm1444_vm5, %v15974_v62, %v9433_v14  ;;  %v16174_v26 = vpop.f32.mrb[253].mxu1  ;;  %7784 = vrot.lane.b32.xlu1 %v7620_v34, %s11345_s27  ;;  %v8271_v24 = vsel %vm2473_vm8, %v8266_v8, %v8270_v5  ;;  %v17547_v42 = vshrl.u32 %v16168_v53, 16  ;;  %v17546_v59 = vshll.u32 %v16168_v53, 16 }
 0x863   : > { %17972 = vst [vmem:[#allocation17_spill] sm:$0xff] %v16172_v36  ;;  %8405 = vrot.lane.b32.xlu0 %v8271_v24, %s11345_s27  ;;  %v7624_v45 = vpop.f32.mrb[254].mxu1  ;;  %v9441_v1 = vor.u32 %v9440_v32, %v9439_v15  ;;  %v9449_v28 = vor.u32 %v9448_v3, %v9447_v22  ;;  %v8272_v15 = vshrl.u32 %v16136_v16, 16  ;;  %v11310_v3 = vld [vmem:[%s17375_s3 + $0xd0] sm:$0xff]  }
 0x864   : > { %v16182_v52 = vpop.f32.mrb[255].mxu1  ;;  %v9455_v62 = vrot.slane %v17547_v42, 3  ;;  %v9456_v34 = vrot.slane %v17546_v59, 4  ;;  %10071 = vmatpush1.bf16.msra.mxu0 %v11310_v3 }
 0x865   : > { %v16188_v8 = vld [vmem:[#allocation3 + $0x78] sm:$0xff]  ;;  %v16191_v54 = vsel %vm1444_vm5, %v9433_v14, %v9441_v1  ;;  %v16194_v11 = vsel %vm1444_vm5, %v9441_v1, %v9449_v28  ;;  %v8274_v59 = vor.u32 %v8272_v15, %v8270_v5  ;;  %10072 = vmatprep.subr.bf16.mxu0 %v17913_v9  ;;  %v11311_v15 = vld [vmem:[%s17375_s3 + $0x20] sm:$0xff]  }
 0x866   : > { %17973 = vst [vmem:[#allocation23_spill] sm:$0xff] %v16191_v54  ;;  %17974 = vst [vmem:[#allocation25_spill] sm:$0xff] %v16194_v11  ;;  %7786 = vrot.lane.b32.xlu1 %v7624_v45, %s11345_s27  ;;  %v8276_v32 = vshll.u32 %v16188_v8, 16  ;;  %v17553_v22 = vrot.slane %v16188_v8, 1  ;;  %v9457_v24 = vor.u32 %v9456_v34, %v9455_v62  ;;  %9724 = vmatpush1.bf16.msra.mxu1 %v11311_v15  ;;  %v11316_v15 = vld [vmem:[%s17375_s3 + $0x30] sm:$0xff]  }
 0x867   : > { %9725 = vmatprep.subr.bf16.mxu1 %v17913_v9 }
 0x868   : > { %v16203_v42 = vrot.slane %v8276_v32, 1  ;;  %v16208_v14 = vsel %vm2781_vm13, %v8490_v20, %v17553_v22  ;;  %v16213_v54 = vsel %vm1444_vm5, %v9449_v28, %v9457_v24 }
 0x869   : > { %v7630_v45 = vpop.f32.mrb[0].mxu1  ;;  %v17552_v1 = vshrl.u32 %v16208_v14, 16  ;;  %v17551_v11 = vshll.u32 %v16208_v14, 16  ;;  %17975 = vst [vmem:[#allocation9_spill] sm:$0xff] %v16213_v54 }
 0x86a   : > { %v16215_v36 = vpop.f32.mrb[1].mxu1  ;;  %7788 = vrot.lane.b32.xlu0 %v7630_v45, %s11345_s27  ;;  %v8279_v5 = vsel %vm2473_vm8, %v8274_v59, %v16203_v42  ;;  %v11312_v59 = vld [vmem:[%s17375_s3 + $0xd8] sm:$0xff]  }
 0x86b   : > { %8407 = vrot.lane.b32.xlu1 %v8279_v5, %s11345_s27  ;;  %v7634_v20 = vpop.f32.mrb[2].mxu1  ;;  %v9463_v62 = vrot.slane %v17552_v1, 3  ;;  %v9464_v34 = vrot.slane %v17551_v11, 4  ;;  %10073 = vmatpush1.bf16.msra.mxu0 %v11312_v59 }
 0x86c   : > { %v16226_v28 = vpop.f32.mrb[3].mxu1  ;;  %10074 = vmatprep.subr.bf16.mxu0 %v17913_v9 }
 0x86d   : > { %17976 = vst [vmem:[#allocation31_spill] sm:$0xff] %v16226_v28  ;;  %v16234_v32 = vor.u32 %v9464_v34, %v9463_v62  ;;  %v11313_v62 = vld [vmem:[%s17375_s3 + $0x28] sm:$0xff]   ;;  %v11314_v34 = vld [vmem:[%s17375_s3 + $0xe0] sm:$0xff]  }
 0x86e   : > { %9726 = vmatpush1.bf16.msra.mxu1 %v11313_v62 }
 0x86f   : > { %v16240_v3 = vsel %vm1444_vm5, %v9457_v24, %v16234_v32  ;;  %10075 = vmatpush1.bf16.msra.mxu0 %v11314_v34  ;;  %v11315_v24 = vld [vmem:[%s17375_s3 + $0xe8] sm:$0xff]   ;;  %9727 = vmatprep.subr.bf16.mxu1 %v17913_v9 }
 0x870   : > { %17977 = vst [vmem:[#allocation65_spill] sm:$0xff] %v16240_v3  ;;  %10076 = vmatprep.subr.bf16.mxu0 %v17913_v9  ;;  %v17981_v3 = vld [vmem:[#allocation41_spill] sm:$0xff] }
 0x871   : > { %v7639_v45 = vpop.f32.mrb[4].mxu1 }
 0x872   : > { %v16242_v5 = vpop.f32.mrb[5].mxu1  ;;  %9728 = vmatpush1.bf16.msra.mxu1 %v11316_v15 }
 0x873   : > { %17978 = vst [vmem:[#allocation11_spill] sm:$0xff] %v16242_v5  ;;  %v7642_v20 = vpop.f32.mrb[6].mxu1  ;;  %10077 = vmatpush1.bf16.msra.mxu0 %v11315_v24  ;;  %9729 = vmatprep.subr.bf16.mxu1 %v17913_v9 }
 0x874   : > { %v16244_v11 = vpop.f32.mrb[7].mxu1  ;;  %10078 = vmatprep.subr.bf16.mxu0 %v17913_v9  ;;  %v17980_v20 = vshrl.u32 %v15819_v43, 16 }
 0x875   : > { %17979 = vst [vmem:[#allocation4_spill] sm:$0xff] %v16244_v11 }
 0x876   : > { %v8653_v62 = vrot.slane %v17980_v20, 7  ;;  %v17983_v20 = vld [vmem:[#allocation21_spill] sm:$0xff] }
 0x878   : > { %v8656_v5 = vor.u32 %v17982_v2, %v8653_v62 }
 0x87a   : > { %v8657_v43 = vsel %vm8575_vm14, %v16023_v30, %v8656_v5 }
 0x891   : > { %v8390_v59 = vpop.permute.xlu0 %8389 }
 0x892   : > { %v8530_v45 = vsel %vm656_vm7, %v15722_v35, %v8390_v59  ;;  %v7962_v35 = vmax.f32 %v16117_v25, 0.0  ;;  %v17984_v25 = vld [vmem:[#allocation43_spill] sm:$0xff] }
 0x893   : > { %v8628_v34 = vshrl.u32 %v8530_v45, 16  ;;  %v8631_v1 = vshll.u32 %v8530_v45, 16  ;;  %v7753_v22 = vpop.permute.xlu1 %7752 }
 0x894   : > { %v7867_v54 = vadd.f32 %v7753_v22, %v17981_v3 }
 0x895   : > { %v8630_v11 = vrot.slane %v8628_v34, 7  ;;  %v9387_v16 = vrot.slane %v8628_v34, 3  ;;  %v9388_v24 = vrot.slane %v8631_v1, 4 }
 0x896   : > { %v7915_v15 = vadd.f32 %v7867_v54, %v15840_v38  ;;  %v17985_v54 = vshrl.u32 %v15860_v44, 16 }
 0x897   : > { %v8633_v58 = vor.u32 %v8631_v1, %v8630_v11  ;;  %v9389_v28 = vor.u32 %v9388_v24, %v9387_v16  ;;  %v7755_v41 = vpop.permute.xlu1 %7754 }
 0x898   : > { %v7963_v59 = vmax.f32 %v7915_v15, 0.0  ;;  %v7868_v12 = vadd.f32 %v7755_v41, %v17983_v20  ;;  %v16287_v1 = vrot.slane %v17985_v54, 7 }
 0x899   : > { %v16274_v45 = vsel %vm1444_vm5, %v16127_v51, %v9389_v28  ;;  %v8634_v22 = vsel %vm8575_vm14, %v16109_v29, %v8633_v58 }
 0x89a   : > { %v7996_v3 = vpack.c.bf16 %v7963_v59, %v7962_v35  ;;  %v7916_v38 = vadd.f32 %v7868_v12, %v15865_v0  ;;  %9168 = vmatmul.mubr.bf16.gmra.mrb[180].mxu0 %v8634_v22  ;;  %v17986_v0 = vld [vmem:[#allocation45_spill] sm:$0xff] }
 0x89b   : > { %v8392_v2 = vpop.permute.xlu1 %8391  ;;  %10896 = vmatprep.mubr.msk.bf16.mxu0 %vm656_vm7, %v8657_v43 }
 0x89c   : > { %v8020_v16 = vmul.bf16 %v7996_v3, %v17984_v25  ;;  %v8532_v41 = vsel %vm656_vm7, %v15771_v40, %v8392_v2  ;;  %v7757_v51 = vpop.permute.xlu0 %7756  ;;  %v7964_v15 = vmax.f32 %v7916_v38, 0.0  ;;  %v17987_v40 = vshll.u32 %v15860_v44, 16 }
 0x89d   : > { %v8643_v58 = vshrl.u32 %v8532_v41, 16  ;;  %v8646_v29 = vshll.u32 %v8532_v41, 16  ;;  %v7869_v12 = vadd.f32 %v7757_v51, %v17986_v0  ;;  %v17988_v2 = vshrl.u32 %v15895_v17, 16 }
 0x89e   : > { %8044 = vst.msk [vmem:[#allocation3 + $0x80] sm:$0xff] %vm656_vm7, %v8020_v16  ;;  %v8671_v59 = vor.u32 %v17987_v40, %v16287_v1  ;;  %v17989_v16 = vshrl.u32 %v15939_v13, 16 }
 0x89f   : > { %v16291_v30 = vrot.slane %v8643_v58, 7  ;;  %v9395_v5 = vrot.slane %v8643_v58, 3  ;;  %v9396_v34 = vrot.slane %v8646_v29, 4  ;;  %v7917_v24 = vadd.f32 %v7869_v12, %v15877_v33 }
 0x8a0   : > { %v7759_v35 = vpop.permute.xlu0 %7758  ;;  %v8683_v25 = vrot.slane %v17988_v2, 7  ;;  %v16303_v41 = vrot.slane %v17989_v16, 7 }
 0x8a1   : > { %v8648_v20 = vor.u32 %v8646_v29, %v16291_v30  ;;  %v9397_v22 = vor.u32 %v9396_v34, %v9395_v5  ;;  %v7965_v3 = vmax.f32 %v7917_v24, 0.0  ;;  %v7870_v43 = vadd.f32 %v7759_v35, %v15791_v60  ;;  %v17990_v29 = vld [vmem:[#allocation26_spill] sm:$0xff] }
 0x8a2   : > { %v8672_v60 = vsel %vm8575_vm14, %v8653_v62, %v8671_v59  ;;  %v11318_v62 = vld [vmem:[%s17375_s3 + $0x38] sm:$0xff]   ;;  %v17992_v59 = vshll.u32 %v15939_v13, 16  ;;  %v17993_v13 = vshrl.u32 %v16042_v19, 16 }
 0x8a3   : > { %v16306_v33 = vsel %vm1444_vm5, %v9389_v28, %v9397_v22  ;;  %v7997_v38 = vpack.c.bf16 %v7965_v3, %v7964_v15  ;;  %v7918_v44 = vadd.f32 %v7870_v43, %v15903_v18  ;;  %v8649_v51 = vsel %vm8575_vm14, %v8630_v11, %v8648_v20  ;;  %v11317_v11 = vld [vmem:[%s17375_s3 + $0xf0] sm:$0xff]   ;;  %9730 = vmatpush1.bf16.msra.mxu1 %v11318_v62 }
 0x8a4   : > { %v7761_v54 = vpop.permute.xlu1 %7760  ;;  %v8394_v58 = vpop.permute.xlu0 %8393  ;;  %9176 = vmatmul.mubr.bf16.gmra.mrb[184].mxu0 %v8649_v51  ;;  %v8280_v18 = vshrl.u32 %v16188_v8, 16  ;;  %v8701_v20 = vor.u32 %v17992_v59, %v16303_v41  ;;  %9731 = vmatprep.subr.bf16.mxu1 %v17913_v9  ;;  %v17997_v59 = vshrl.u32 %v16085_v48, 16 }
 0x8a5   : > { %v8021_v0 = vmul.bf16 %v7997_v38, %v17990_v29  ;;  %v7871_v12 = vadd.f32 %v7761_v54, %v15799_v47  ;;  %v8534_v5 = vsel %vm656_vm7, %v15805_v31, %v8394_v58  ;;  %10897 = vmatprep.mubr.msk.bf16.mxu0 %vm656_vm7, %v8672_v60  ;;  %v16316_v28 = vld [vmem:[#allocation3 + $0x80] sm:$0xff]  ;;  %v17991_v31 = vshll.u32 %v15895_v17, 16  ;;  %10079 = vmatpush1.bf16.msra.mxu0 %v11317_v11 }
 0x8a6   : > { %v8658_v34 = vshrl.u32 %v8534_v5, 16  ;;  %v8661_v24 = vshll.u32 %v8534_v5, 16  ;;  %v8284_v47 = vshll.u32 %v16316_v28, 16  ;;  %v8282_v40 = vor.u32 %v8280_v18, %v16203_v42  ;;  %10080 = vmatprep.subr.bf16.mxu0 %v17913_v9 }
 0x8a7   : > { %v8686_v15 = vor.u32 %v17991_v31, %v8683_v25  ;;  %8045 = vst.msk [vmem:[#allocation3 + $0x88] sm:$0xff] %vm656_vm7, %v8021_v0  ;;  %v7919_v35 = vadd.f32 %v7871_v12, %v15914_v10  ;;  %v8494_v3 = vrot.slane %v16316_v28, 1  ;;  %v7966_v10 = vmax.f32 %v7918_v44, 0.0 }
 0x8a8   : > { %v16335_v43 = vrot.slane %v8658_v34, 7  ;;  %v9403_v2 = vrot.slane %v8658_v34, 3  ;;  %v9404_v16 = vrot.slane %v8661_v24, 4  ;;  %v7763_v17 = vpop.permute.xlu1 %7762  ;;  %v8286_v38 = vrot.slane %v8284_v47, 1  ;;  %v17995_v47 = vld [vmem:[#allocation48_spill] sm:$0xff] }
 0x8a9   : > { %v7967_v42 = vmax.f32 %v7919_v35, 0.0  ;;  %v7872_v51 = vadd.f32 %v7763_v17, %v15825_v56  ;;  %v16342_v54 = vrot.slane %v17993_v13, 7  ;;  %v8687_v44 = vsel %vm8575_vm14, %v16287_v1, %v8686_v15  ;;  %v17998_v13 = vld [vmem:[#allocation51_spill] sm:$0xff] }
 0x8aa   : > { %v8663_v58 = vor.u32 %v8661_v24, %v16335_v43  ;;  %v9405_v60 = vor.u32 %v9404_v16, %v9403_v2  ;;  %v8287_v29 = vsel %vm2473_vm8, %v8282_v40, %v8286_v38  ;;  %v8702_v5 = vsel %vm8575_vm14, %v8683_v25, %v8701_v20 }
 0x8ab   : > { %v7998_v0 = vpack.c.bf16 %v7967_v42, %v7966_v10  ;;  %v7920_v12 = vadd.f32 %v7872_v51, %v15948_v7  ;;  %8409 = vrot.lane.b32.xlu0 %v8287_v29, %s11345_s27  ;;  %v8288_v34 = vshrl.u32 %v16316_v28, 16  ;;  %v17994_v24 = vrot.slane %v16188_v8, 1 }
 0x8ac   : > { %v16352_v56 = vsel %vm1444_vm5, %v9397_v22, %v9405_v60  ;;  %v8396_v18 = vpop.permute.xlu1 %8395  ;;  %v7765_v11 = vpop.permute.xlu0 %7764  ;;  %v8664_v62 = vsel %vm8575_vm14, %v16291_v30, %v8663_v58  ;;  %v17996_v25 = vshll.u32 %v16042_v19, 16  ;;  %v16376_v20 = vrot.slane %v17997_v59, 7  ;;  %v18001_v59 = vld [vmem:[#allocation32_spill] sm:$0xff] }
 0x8ad   : > { %v16360_v7 = vsel %vm2781_vm13, %v17994_v24, %v8494_v3  ;;  %v8022_v31 = vmul.bf16 %v7998_v0, %v17995_v47  ;;  %v8536_v1 = vsel %vm656_vm7, %v15842_v37, %v8396_v18  ;;  %v7873_v22 = vadd.f32 %v7765_v11, %v15838_v55  ;;  %9184 = vmatmul.mubr.bf16.gmra.mrb[188].mxu0 %v8664_v62  ;;  %v17999_v62 = vld [vmem:[#allocation66_spill] sm:$0xff] }
 0x8ae   : > { %v16369_v15 = vor.u32 %v17996_v25, %v16342_v54  ;;  %v8673_v30 = vshrl.u32 %v8536_v1, 16  ;;  %v8676_v35 = vshll.u32 %v8536_v1, 16  ;;  %10898 = vmatprep.mubr.msk.bf16.mxu0 %vm656_vm7, %v8687_v44  ;;  %v16372_v8 = vld [vmem:[#allocation3 + $0x88] sm:$0xff]  ;;  %v8290_v40 = vor.u32 %v8288_v34, %v8286_v38 }
 0x8af   : > { %8046 = vst.msk [vmem:[#allocation3 + $0x90] sm:$0xff] %vm656_vm7, %v8022_v31  ;;  %v7921_v55 = vadd.f32 %v7873_v22, %v15960_v57  ;;  %v8292_v37 = vshll.u32 %v16372_v8, 16  ;;  %v8786_v19 = vshrl.u32 %v16360_v7, 16  ;;  %v8496_v2 = vrot.slane %v16372_v8, 1 }
 0x8b0   : > { %v7968_v16 = vmax.f32 %v7920_v12, 0.0  ;;  %v16383_v17 = vrot.slane %v8673_v30, 7  ;;  %v9411_v10 = vrot.slane %v8673_v30, 3  ;;  %v9412_v42 = vrot.slane %v8676_v35, 4  ;;  %v7767_v38 = vpop.permute.xlu0 %7766 }
 0x8b1   : > { %v7969_v51 = vmax.f32 %v7921_v55, 0.0  ;;  %v7874_v58 = vadd.f32 %v7767_v38, %v17998_v13  ;;  %v8294_v29 = vrot.slane %v8292_v37, 1  ;;  %v16389_v57 = vsel %vm2781_vm13, %v8494_v3, %v8496_v2  ;;  %v18002_v37 = vld [vmem:[#allocation53_spill] sm:$0xff]  ;;  %v11320_v13 = vld [vmem:[%s17375_s3 + $0x40] sm:$0xff]  }
 0x8b2   : > { %v8678_v0 = vor.u32 %v8676_v35, %v16383_v17  ;;  %v9413_v44 = vor.u32 %v9412_v42, %v9411_v10  ;;  %v8789_v18 = vshll.u32 %v16360_v7, 16  ;;  %v8801_v12 = vshrl.u32 %v16389_v57, 16  ;;  %v18000_v35 = vld [vmem:[#allocation28_spill] sm:$0xff]  ;;  %9732 = vmatpush1.bf16.msra.mxu1 %v11320_v13 }
 0x8b3   : > { %v7999_v11 = vpack.c.bf16 %v7969_v51, %v7968_v16  ;;  %v7922_v34 = vadd.f32 %v7874_v58, %v17999_v62  ;;  %v8295_v24 = vsel %vm2473_vm8, %v8290_v40, %v8294_v29  ;;  %v16396_v47 = vrot.slane %v8786_v19, 7  ;;  %v11319_v51 = vld [vmem:[%s17375_s3 + $0xf8] sm:$0xff]   ;;  %9733 = vmatprep.subr.bf16.mxu1 %v17913_v9 }
 0x8b4   : > { %v16399_v31 = vsel %vm1444_vm5, %v9405_v60, %v9413_v44  ;;  %v7769_v1 = vpop.permute.xlu1 %7768  ;;  %8411 = vrot.lane.b32.xlu1 %v8295_v24, %s11345_s27  ;;  %v8398_v3 = vpop.permute.xlu0 %8397  ;;  %v8679_v22 = vsel %vm8575_vm14, %v16335_v43, %v8678_v0  ;;  %v16406_v25 = vrot.slane %v8801_v12, 7  ;;  %v8804_v30 = vshll.u32 %v16389_v57, 16  ;;  %10081 = vmatpush1.bf16.msra.mxu0 %v11319_v51 }
 0x8b5   : > { %v8023_v40 = vmul.bf16 %v7999_v11, %v18000_v35  ;;  %v7875_v55 = vadd.f32 %v7769_v1, %v18001_v59  ;;  %v8538_v60 = vsel %vm656_vm7, %v18002_v37, %v8398_v3  ;;  %9192 = vmatmul.mubr.bf16.gmra.mrb[192].mxu0 %v8679_v22  ;;  %v8296_v16 = vshrl.u32 %v16372_v8, 16  ;;  %10082 = vmatprep.subr.bf16.mxu0 %v17913_v9 }
 0x8b6   : > { %v8688_v10 = vshrl.u32 %v8538_v60, 16  ;;  %v8691_v42 = vshll.u32 %v8538_v60, 16  ;;  %10899 = vmatprep.mubr.msk.bf16.mxu0 %vm656_vm7, %v8702_v5  ;;  %v16415_v43 = vld [vmem:[#allocation3 + $0x90] sm:$0xff]  ;;  %v8806_v38 = vor.u32 %v8804_v30, %v16406_v25  ;;  %v9471_v58 = vrot.slane %v8786_v19, 3 }
 0x8b7   : > { %8047 = vst.msk [vmem:[#allocation3 + $0x98] sm:$0xff] %vm656_vm7, %v8023_v40  ;;  %v7923_v0 = vadd.f32 %v7875_v55, %v16004_v6  ;;  %v8298_v5 = vor.u32 %v8296_v16, %v8294_v29  ;;  %v8300_v11 = vshll.u32 %v16415_v43, 16  ;;  %v9472_v62 = vrot.slane %v8789_v18, 4  ;;  %v18003_v6 = vld [vmem:[#allocation61_spill] sm:$0xff] }
 0x8b8   : > { %v16431_v24 = vrot.slane %v8688_v10, 7  ;;  %v9419_v1 = vrot.slane %v8688_v10, 3  ;;  %v9420_v3 = vrot.slane %v8691_v42, 4  ;;  %v7771_v22 = vpop.permute.xlu1 %7770  ;;  %v16435_v35 = vsel %vm8575_vm14, %v16396_v47, %v8806_v38 }
 0x8b9   : > { %v7970_v19 = vmax.f32 %v7922_v34, 0.0  ;;  %v7971_v40 = vmax.f32 %v7923_v0, 0.0  ;;  %v7876_v29 = vadd.f32 %v7771_v22, %v18003_v6  ;;  %v8302_v59 = vrot.slane %v8300_v11, 1 }
 0x8ba   : > { %v8693_v55 = vor.u32 %v8691_v42, %v16431_v24  ;;  %v9421_v37 = vor.u32 %v9420_v3, %v9419_v1  ;;  %v18004_v60 = vshrl.u32 %v16105_v49, 16  ;;  %v18005_v34 = vshrl.u32 %v16168_v53, 16 }
 0x8bb   : > { %v8000_v10 = vpack.c.bf16 %v7971_v40, %v7970_v19  ;;  %v7924_v38 = vadd.f32 %v7876_v29, %v16049_v21  ;;  %v8303_v51 = vsel %vm2473_vm8, %v8298_v5, %v8302_v59  ;;  %v8717_v21 = vsel %vm8575_vm14, %v16303_v41, %v16369_v15  ;;  %v18006_v5 = vld [vmem:[#allocation49_spill] sm:$0xff] }
 0x8bc   : > { %v8743_v16 = vrot.slane %v18004_v60, 7  ;;  %v16447_v13 = vrot.slane %v18005_v34, 7  ;;  %v16450_v0 = vsel %vm1444_vm5, %v9413_v44, %v9421_v37  ;;  %v8400_v11 = vpop.permute.xlu1 %8399  ;;  %8413 = vrot.lane.b32.xlu0 %v8303_v51, %s11345_s27  ;;  %v7773_v42 = vpop.permute.xlu0 %7772  ;;  %v8694_v1 = vsel %vm8575_vm14, %v16383_v17, %v8693_v55  ;;  %v18007_v44 = vld [vmem:[#allocation40_spill] sm:$0xff] }
 0x8bd   : > { %v16458_v3 = vor.u32 %v9472_v62, %v9471_v58  ;;  %v8024_v22 = vmul.bf16 %v8000_v10, %v18006_v5  ;;  %v8540_v19 = vsel %vm656_vm7, %v15916_v61, %v8400_v11  ;;  %v7877_v40 = vadd.f32 %v7773_v42, %v18007_v44  ;;  %9200 = vmatmul.mubr.bf16.gmra.mrb[196].mxu0 %v8694_v1 }
 0x8be   : > { %v18008_v6 = vshll.u32 %v16085_v48, 16  ;;  %v8703_v60 = vshrl.u32 %v8540_v19, 16  ;;  %v8706_v17 = vshll.u32 %v8540_v19, 16  ;;  %10900 = vmatprep.mubr.msk.bf16.mxu0 %vm656_vm7, %v8717_v21  ;;  %v16468_v55 = vld [vmem:[#allocation3 + $0x98] sm:$0xff]  ;;  %v8304_v41 = vshrl.u32 %v16415_v43, 16 }
 0x8bf   : > { %v16474_v15 = vsel %vm1444_vm5, %v16234_v32, %v16458_v3  ;;  %8048 = vst.msk [vmem:[#allocation3 + $0xa0] sm:$0xff] %vm656_vm7, %v8024_v22  ;;  %v7925_v61 = vadd.f32 %v7877_v40, %v16070_v4  ;;  %v8308_v48 = vshll.u32 %v16468_v55, 16  ;;  %v18009_v58 = vshll.u32 %v16105_v49, 16  ;;  %v18011_v22 = vld [vmem:[#allocation44_spill] sm:$0xff] }
 0x8c0   : > { %v8731_v29 = vor.u32 %v18008_v6, %v16376_v20  ;;  %v18010_v10 = vshll.u32 %v16168_v53, 16  ;;  %v16484_v34 = vrot.slane %v8703_v60, 7  ;;  %v9427_v11 = vrot.slane %v8703_v60, 3  ;;  %v7775_v1 = vpop.permute.xlu0 %7774 }
 0x8c1   : > { %v8746_v62 = vor.u32 %v18009_v58, %v8743_v16  ;;  %v9428_v42 = vrot.slane %v8706_v17, 4  ;;  %v8306_v32 = vor.u32 %v8304_v41, %v8302_v59  ;;  %v7972_v21 = vmax.f32 %v7924_v38, 0.0 }
 0x8c2   : > { %v8761_v51 = vor.u32 %v18010_v10, %v16447_v13  ;;  %v7973_v5 = vmax.f32 %v7925_v61, 0.0  ;;  %v7878_v19 = vadd.f32 %v7775_v1, %v18011_v22  ;;  %v8310_v4 = vrot.slane %v8308_v48, 1  ;;  %v18014_v1 = vld [vmem:[#allocation64_spill] sm:$0xff] }
 0x8c3   : > { %v8708_v44 = vor.u32 %v8706_v17, %v16484_v34  ;;  %v9429_v40 = vor.u32 %v9428_v42, %v9427_v11  ;;  %v18012_v49 = vshrl.u32 %v16208_v14, 16  ;;  %v8498_v53 = vrot.slane %v16415_v43, 1  ;;  %v18013_v11 = vld [vmem:[#allocation34_spill] sm:$0xff] }
 0x8c4   : > { %v8001_v58 = vpack.c.bf16 %v7973_v5, %v7972_v21  ;;  %v7926_v60 = vadd.f32 %v7878_v19, %v16111_v23  ;;  %v8311_v10 = vsel %vm2473_vm8, %v8306_v32, %v8310_v4  ;;  %v8732_v59 = vsel %vm8575_vm14, %v16342_v54, %v8731_v29  ;;  %v7777_v41 = vpop.permute.xlu1 %7776  ;;  %v8402_v17 = vpop.permute.xlu0 %8401 }
 0x8c5   : > { %v16490_v6 = vrot.slane %v18012_v49, 7  ;;  %v16498_v38 = vsel %vm1444_vm5, %v9421_v37, %v9429_v40  ;;  %8415 = vrot.lane.b32.xlu1 %v8311_v10, %s11345_s27  ;;  %v8709_v61 = vsel %vm8575_vm14, %v16431_v24, %v8708_v44  ;;  %v8747_v48 = vsel %vm8575_vm14, %v16376_v20, %v8746_v62 }
 0x8c6   : > { %v16506_v23 = vsel %vm8575_vm14, %v8743_v16, %v8761_v51  ;;  %v8025_v42 = vmul.bf16 %v8001_v58, %v18013_v11  ;;  %v7879_v54 = vadd.f32 %v7777_v41, %v18014_v1  ;;  %v8542_v37 = vsel %vm656_vm7, %v15962_v50, %v8402_v17  ;;  %9208 = vmatmul.mubr.bf16.gmra.mrb[200].mxu0 %v8709_v61  ;;  %v16514_v24 = vld [vmem:[#allocation3 + $0xa0] sm:$0xff]  ;;  %v18016_v41 = vld [vmem:[#allocation46_spill] sm:$0xff] }
 0x8c7   : > { %v8312_v29 = vshrl.u32 %v16468_v55, 16  ;;  %v8718_v32 = vshrl.u32 %v8542_v37, 16  ;;  %v8721_v21 = vshll.u32 %v8542_v37, 16  ;;  %10901 = vmatprep.mubr.msk.bf16.mxu0 %vm656_vm7, %v8732_v59  ;;  %v18015_v20 = vshll.u32 %v16208_v14, 16  ;;  %v11321_v50 = vld [vmem:[%s17375_s3 + $0x100] sm:$0xff]  }
 0x8c8   : > { %v16524_v62 = vsel %vm2781_vm13, %v8496_v2, %v8498_v53  ;;  %8049 = vst.msk [vmem:[#allocation3 + $0xa8] sm:$0xff] %vm656_vm7, %v8025_v42  ;;  %v7927_v51 = vadd.f32 %v7879_v54, %v16129_v63  ;;  %v8316_v22 = vshll.u32 %v16514_v24, 16  ;;  %v9479_v14 = vrot.slane %v8801_v12, 3  ;;  %v7779_v2 = vpop.permute.xlu1 %7778  ;;  %10083 = vmatpush1.bf16.msra.mxu0 %v11321_v50  ;;  %v11322_v50 = vld [vmem:[%s17375_s3 + $0x48] sm:$0xff]  }
 0x8c9   : > { %v8776_v16 = vor.u32 %v18015_v20, %v16490_v6  ;;  %v8314_v5 = vor.u32 %v8312_v29, %v8310_v4  ;;  %v16534_v19 = vrot.slane %v8718_v32, 7  ;;  %v9435_v44 = vrot.slane %v8718_v32, 3  ;;  %10084 = vmatprep.subr.bf16.mxu0 %v17913_v9  ;;  %9734 = vmatpush1.bf16.msra.mxu1 %v11322_v50 }
 0x8ca   : > { %v9436_v49 = vrot.slane %v8721_v21, 4  ;;  %v9480_v58 = vrot.slane %v8804_v30, 4  ;;  %v7974_v10 = vmax.f32 %v7926_v60, 0.0  ;;  %v7975_v59 = vmax.f32 %v7927_v51, 0.0  ;;  %9735 = vmatprep.subr.bf16.mxu1 %v17913_v9 }
 0x8cb   : > { %v7880_v17 = vadd.f32 %v7779_v2, %v18016_v41  ;;  %v8318_v63 = vrot.slane %v8316_v22, 1  ;;  %v8723_v4 = vor.u32 %v8721_v21, %v16534_v19  ;;  %v16543_v12 = vsel %vm8575_vm14, %v16447_v13, %v8776_v16 }
 0x8cc   : > { %v9437_v61 = vor.u32 %v9436_v49, %v9435_v44  ;;  %v16548_v11 = vor.u32 %v8789_v18, %v16396_v47  ;;  %v8002_v57 = vpack.c.bf16 %v7975_v59, %v7974_v10  ;;  %v8500_v42 = vrot.slane %v16468_v55, 1  ;;  %v8404_v54 = vpop.permute.xlu1 %8403  ;;  %v7781_v13 = vpop.permute.xlu0 %7780  ;;  %v18017_v47 = vld [vmem:[#allocation54_spill] sm:$0xff] }
 0x8cd   : > { %v7928_v30 = vadd.f32 %v7880_v17, %v16174_v26  ;;  %v8319_v60 = vsel %vm2473_vm8, %v8314_v5, %v8318_v63  ;;  %v8724_v37 = vsel %vm8575_vm14, %v16484_v34, %v8723_v4  ;;  %v17575_v7 = vshrl.u32 %v16524_v62, 16 }
 0x8ce   : > { %v16554_v1 = vsel %vm1444_vm5, %v9429_v40, %v9437_v61  ;;  %8417 = vrot.lane.b32.xlu0 %v8319_v60, %s11345_s27  ;;  %v16560_v18 = vor.u32 %v9480_v58, %v9479_v14  ;;  %v8026_v26 = vmul.bf16 %v8002_v57, %v18017_v47  ;;  %v8544_v29 = vsel %vm656_vm7, %v16006_v39, %v8404_v54 }
 0x8cf   : > { %v7881_v32 = vadd.f32 %v7781_v13, %v15998_v27  ;;  %9216 = vmatmul.mubr.bf16.gmra.mrb[204].mxu0 %v8724_v37  ;;  %v17573_v40 = vshll.u32 %v16524_v62, 16  ;;  %v8733_v21 = vshrl.u32 %v8544_v29, 16  ;;  %v8736_v20 = vshll.u32 %v8544_v29, 16  ;;  %v16568_v16 = vld [vmem:[#allocation3 + $0xa8] sm:$0xff] }
 0x8d0   : > { %10902 = vmatprep.mubr.msk.bf16.mxu0 %vm656_vm7, %v8747_v48  ;;  %v8320_v34 = vshrl.u32 %v16514_v24, 16  ;;  %v16577_v39 = vsel %vm1444_vm5, %v16458_v3, %v16560_v18  ;;  %8050 = vst.msk [vmem:[#allocation3 + $0xb0] sm:$0xff] %vm656_vm7, %v8026_v26  ;;  %v8324_v51 = vshll.u32 %v16568_v16, 16  ;;  %v16585_v48 = vsel %vm2781_vm13, %v8498_v53, %v8500_v42  ;;  %v7783_v49 = vpop.permute.xlu0 %7782  ;;  %v18019_v26 = vld [vmem:[#allocation52_spill] sm:$0xff] }
 0x8d1   : > { %v7929_v27 = vadd.f32 %v7881_v32, %v16182_v52  ;;  %v8502_v5 = vrot.slane %v16514_v24, 1  ;;  %v16588_v22 = vrot.slane %v8733_v21, 7  ;;  %v9443_v14 = vrot.slane %v8733_v21, 3  ;;  %v18020_v21 = vld [vmem:[#allocation68_spill] sm:$0xff] }
 0x8d2   : > { %v9444_v44 = vrot.slane %v8736_v20, 4  ;;  %v8322_v3 = vor.u32 %v8320_v34, %v8318_v63  ;;  %v7976_v2 = vmax.f32 %v7928_v30, 0.0  ;;  %v7882_v52 = vadd.f32 %v7783_v49, %v16045_v46 }
 0x8d3   : > { %v7977_v58 = vmax.f32 %v7929_v27, 0.0  ;;  %v8326_v10 = vrot.slane %v8324_v51, 1  ;;  %v8738_v59 = vor.u32 %v8736_v20, %v16588_v22  ;;  %v17572_v41 = vshrl.u32 %v16585_v48, 16  ;;  %v18021_v51 = vld [vmem:[#allocation31_spill] sm:$0xff] }
 0x8d4   : > { %v9445_v53 = vor.u32 %v9444_v44, %v9443_v14  ;;  %v8504_v17 = vrot.slane %v16568_v16, 1  ;;  %v7930_v57 = vadd.f32 %v7882_v52, %v16215_v36  ;;  %v16598_v30 = vsel %vm2781_vm13, %v8500_v42, %v8502_v5  ;;  %v7785_v60 = vpop.permute.xlu1 %7784  ;;  %v18018_v36 = vld [vmem:[#allocation36_spill] sm:$0xff] }
 0x8d5   : > { %v8003_v4 = vpack.c.bf16 %v7977_v58, %v7976_v2  ;;  %v8327_v63 = vsel %vm2473_vm8, %v8322_v3, %v8326_v10  ;;  %v8739_v54 = vsel %vm8575_vm14, %v16534_v19, %v8738_v59  ;;  %v8328_v13 = vshrl.u32 %v16568_v16, 16  ;;  %v8406_v42 = vpop.permute.xlu0 %8405 }
 0x8d6   : > { %v16601_v46 = vsel %vm1444_vm5, %v9437_v61, %v9445_v53  ;;  %8419 = vrot.lane.b32.xlu1 %v8327_v63, %s11345_s27  ;;  %v9487_v37 = vrot.slane %v17575_v7, 3  ;;  %v7883_v29 = vadd.f32 %v7785_v60, %v18019_v26  ;;  %v17571_v61 = vshll.u32 %v16585_v48, 16 }
 0x8d7   : > { %v8027_v47 = vmul.bf16 %v8003_v4, %v18018_v36  ;;  %9224 = vmatmul.mubr.bf16.gmra.mrb[208].mxu0 %v8739_v54  ;;  %v9488_v32 = vrot.slane %v17573_v40, 4  ;;  %v8546_v20 = vsel %vm656_vm7, %v18020_v21, %v8406_v42  ;;  %v16618_v19 = vld [vmem:[#allocation3 + $0xb0] sm:$0xff]  ;;  %v8330_v34 = vor.u32 %v8328_v13, %v8326_v10  ;;  %v18022_v54 = vld [vmem:[#allocation27_spill] sm:$0xff] }
 0x8d8   : > { %10903 = vmatprep.mubr.msk.bf16.mxu0 %vm656_vm7, %v16506_v23  ;;  %v17570_v50 = vshrl.u32 %v16598_v30, 16  ;;  %v16622_v27 = vsel %vm2781_vm13, %v8502_v5, %v8504_v17  ;;  %v7931_v14 = vadd.f32 %v7883_v29, %v18021_v51  ;;  %v8748_v44 = vshrl.u32 %v8546_v20, 16  ;;  %v11323_v23 = vld [vmem:[%s17375_s3 + $0x108] sm:$0xff]   ;;  %v7787_v58 = vpop.permute.xlu1 %7786 }
 0x8d9   : > { %8051 = vst.msk [vmem:[#allocation3 + $0xb8] sm:$0xff] %vm656_vm7, %v8027_v47  ;;  %v8751_v49 = vshll.u32 %v8546_v20, 16  ;;  %v8332_v3 = vshll.u32 %v16618_v19, 16  ;;  %v7978_v2 = vmax.f32 %v7930_v57, 0.0  ;;  %v8506_v52 = vrot.slane %v16618_v19, 1  ;;  %10085 = vmatpush1.bf16.msra.mxu0 %v11323_v23 }
 0x8da   : > { %v9489_v10 = vor.u32 %v9488_v32, %v9487_v37  ;;  %v9495_v5 = vrot.slane %v17572_v41, 3  ;;  %v7979_v59 = vmax.f32 %v7931_v14, 0.0  ;;  %v16633_v4 = vrot.slane %v8748_v44, 7  ;;  %10086 = vmatprep.subr.bf16.mxu0 %v17913_v9  ;;  %v18023_v32 = vld [vmem:[#allocation11_spill] sm:$0xff] }
 0x8db   : > { %v9451_v63 = vrot.slane %v8748_v44, 3  ;;  %v9452_v60 = vrot.slane %v8751_v49, 4  ;;  %v7884_v13 = vadd.f32 %v7787_v58, %v18022_v54  ;;  %v8334_v36 = vrot.slane %v8332_v3, 1 }
 0x8dc   : > { %v16639_v57 = vsel %vm1444_vm5, %v16560_v18, %v9489_v10  ;;  %v9496_v37 = vrot.slane %v17571_v61, 4  ;;  %v8004_v47 = vpack.c.bf16 %v7979_v59, %v7978_v2  ;;  %v8753_v26 = vor.u32 %v8751_v49, %v16633_v4  ;;  %v7789_v51 = vpop.permute.xlu0 %7788  ;;  %v18024_v18 = vld [vmem:[#allocation56_spill] sm:$0xff]  ;;  %v18025_v49 = vld [vmem:[#allocation29_spill] sm:$0xff] }
 0x8dd   : > { %v9453_v29 = vor.u32 %v9452_v60, %v9451_v63  ;;  %v17567_v42 = vshll.u32 %v16598_v30, 16  ;;  %v7932_v21 = vadd.f32 %v7884_v13, %v18023_v32  ;;  %v8335_v20 = vsel %vm2473_vm8, %v8330_v34, %v8334_v36  ;;  %v8408_v2 = vpop.permute.xlu1 %8407  ;;  %v18026_v34 = vld [vmem:[#allocation10_spill] sm:$0xff]  ;;  %v18027_v32 = vld [vmem:[#allocation4_spill] sm:$0xff] }
 0x8de   : > { %v17563_v14 = vshrl.u32 %v16622_v27, 16  ;;  %v16649_v44 = vsel %vm2781_vm13, %v8504_v17, %v8506_v52  ;;  %v8028_v3 = vmul.bf16 %v8004_v47, %v18024_v18  ;;  %8421 = vrot.lane.b32.xlu0 %v8335_v20, %s11345_s27  ;;  %v7885_v58 = vadd.f32 %v7789_v51, %v18025_v49 }
 0x8df   : > { %v16653_v23 = vsel %vm1444_vm5, %v9445_v53, %v9453_v29  ;;  %v8754_v59 = vsel %vm8575_vm14, %v16588_v22, %v8753_v26  ;;  %v8548_v63 = vsel %vm656_vm7, %v18026_v34, %v8408_v2  ;;  %v8336_v17 = vshrl.u32 %v16618_v19, 16  ;;  %v11324_v26 = vld [vmem:[%s17375_s3 + $0x50] sm:$0xff]  }
 0x8e0   : > { %9232 = vmatmul.mubr.bf16.gmra.mrb[212].mxu0 %v8754_v59  ;;  %v16661_v60 = vld [vmem:[#allocation3 + $0xb8] sm:$0xff]  ;;  %v17562_v54 = vshll.u32 %v16622_v27, 16  ;;  %v9497_v53 = vor.u32 %v9496_v37, %v9495_v5  ;;  %8052 = vst.msk [vmem:[#allocation3 + $0xc0] sm:$0xff] %vm656_vm7, %v8028_v3  ;;  %v8763_v13 = vshrl.u32 %v8548_v63, 16  ;;  %v8766_v47 = vshll.u32 %v8548_v63, 16  ;;  %9736 = vmatpush1.bf16.msra.mxu1 %v11324_v26 }
 0x8e1   : > { %v7933_v20 = vadd.f32 %v7885_v58, %v18027_v32  ;;  %10904 = vmatprep.mubr.msk.bf16.mxu0 %vm656_vm7, %v16543_v12  ;;  %v8340_v22 = vshll.u32 %v16661_v60, 16  ;;  %v7980_v51 = vmax.f32 %v7932_v21, 0.0  ;;  %v17561_v18 = vshrl.u32 %v16649_v44, 16  ;;  %9737 = vmatprep.subr.bf16.mxu1 %v17913_v9 }
 0x8e2   : > { %v8508_v5 = vrot.slane %v16661_v60, 1  ;;  %v16676_v37 = vsel %vm1444_vm5, %v9489_v10, %v9497_v53  ;;  %v16678_v3 = vrot.slane %v8763_v13, 7  ;;  %v9459_v2 = vrot.slane %v8763_v13, 3 }
 0x8e3   : > { %v9460_v49 = vrot.slane %v8766_v47, 4  ;;  %v7981_v58 = vmax.f32 %v7933_v20, 0.0  ;;  %v8338_v12 = vor.u32 %v8336_v17, %v8334_v36  ;;  %v8342_v59 = vrot.slane %v8340_v22, 1 }
 0x8e4   : > { %v16681_v34 = vsel %vm2781_vm13, %v8506_v52, %v8508_v5  ;;  %v9503_v21 = vrot.slane %v17570_v50, 3  ;;  %v8768_v63 = vor.u32 %v8766_v47, %v16678_v3  ;;  %v8792_v13 = vsel %vm8575_vm14, %v16490_v6, %v16548_v11  ;;  %v18028_v47 = vld [vmem:[#allocation8_spill] sm:$0xff] }
 0x8e5   : > { %v16687_v10 = vor.u32 %v9460_v49, %v9459_v2  ;;  %v8005_v32 = vpack.c.bf16 %v7981_v58, %v7980_v51  ;;  %v8343_v36 = vsel %vm2473_vm8, %v8338_v12, %v8342_v59  ;;  %v17566_v17 = vshll.u32 %v16649_v44, 16  ;;  %v11325_v2 = vld [vmem:[%s17375_s3 + $0x110] sm:$0xff]  }
 0x8e6   : > { %v17564_v52 = vshrl.u32 %v16681_v34, 16  ;;  %v9504_v20 = vrot.slane %v17567_v42, 4  ;;  %8423 = vrot.lane.b32.xlu1 %v8343_v36, %s11345_s27  ;;  %v8769_v6 = vsel %vm8575_vm14, %v16633_v4, %v8768_v63  ;;  %v17565_v11 = vshll.u32 %v16681_v34, 16  ;;  %10087 = vmatpush1.bf16.msra.mxu0 %v11325_v2 }
 0x8e7   : > { %v16699_v22 = vsel %vm1444_vm5, %v9453_v29, %v16687_v10  ;;  %v8029_v26 = vmul.bf16 %v8005_v32, %v18028_v47  ;;  %v16706_v51 = vld [vmem:[#allocation3 + $0xc0] sm:$0xff]  ;;  %v9511_v29 = vrot.slane %v17563_v14, 3  ;;  %v9512_v58 = vrot.slane %v17562_v54, 4  ;;  %10088 = vmatprep.subr.bf16.mxu0 %v17913_v9  ;;  %v16735_v14 = vld [vmem:[#allocation3 + $0xd0] sm:$0xff] }
 0x8e8   : > { %9240 = vmatmul.mubr.bf16.gmra.mrb[216].mxu0 %v8769_v6  ;;  %v9505_v49 = vor.u32 %v9504_v20, %v9503_v21  ;;  %v9519_v12 = vrot.slane %v17561_v18, 3  ;;  %v8344_v4 = vshrl.u32 %v16661_v60, 16  ;;  %v8348_v63 = vshll.u32 %v16706_v51, 16  ;;  %v11332_v32 = vld [vmem:[#allocation3] sm:$0xf0] }
 0x8e9   : > { %8053 = vst.msk [vmem:[#allocation3 + $0xc8] sm:$0xff] %vm656_vm7, %v8029_v26  ;;  %10905 = vmatprep.mubr.msk.bf16.mxu0 %vm656_vm7, %v8792_v13  ;;  %v8159_v36 = vshll.u32 %v11332_v32, 16  ;;  %v8510_v21 = vrot.slane %v16706_v51, 1  ;;  %v9513_v47 = vor.u32 %v9512_v58, %v9511_v29  ;;  %v9520_v6 = vrot.slane %v17566_v17, 4 }
 0x8ea   : > { %v16723_v20 = vsel %vm1444_vm5, %v9497_v53, %v9505_v49  ;;  %v9527_v26 = vrot.slane %v17564_v52, 3  ;;  %v8346_v13 = vor.u32 %v8344_v4, %v8342_v59  ;;  %v8350_v18 = vrot.slane %v8348_v63, 1 }
 0x8eb   : > { %v16730_v54 = vsel %vm2781_vm13, %v8508_v5, %v8510_v21  ;;  %v9528_v2 = vrot.slane %v17565_v11, 4  ;;  %v16740_v58 = vsel %vm1444_vm5, %v9505_v49, %v9513_v47  ;;  %v9521_v52 = vor.u32 %v9520_v6, %v9519_v12  ;;  %v16745_v11 = vld [vmem:[#allocation3 + $0xd8] sm:$0xf] }
 0x8ec   : > { %v17568_v53 = vshrl.u32 %v16730_v54, 16  ;;  %v17569_v29 = vshll.u32 %v16730_v54, 16  ;;  %v8351_v59 = vsel %vm2473_vm8, %v8346_v13, %v8350_v18  ;;  %v8364_v5 = vshll.u32 %v16735_v14, 16 }
 0x8ed   : > { %v8157_v4 = vshrl.u32 %v11332_v32, 16  ;;  %v9529_v63 = vor.u32 %v9528_v2, %v9527_v26  ;;  %8425 = vrot.lane.b32.xlu0 %v8351_v59, %s11345_s27  ;;  %v8161_v9 = vrot.slane %v8159_v36, 1  ;;  %v16748_v17 = vsel %vm1444_vm5, %v9513_v47, %v9521_v52 }
 0x8ee   : > { %v9535_v42 = vrot.slane %v17568_v53, 3  ;;  %v9536_v49 = vrot.slane %v17569_v29, 4  ;;  %v17574_v12 = vrot.slane %v16735_v14, 1  ;;  %v8352_v36 = vshrl.u32 %v16706_v51, 16 }
 0x8ef   : > { %v16756_v6 = vsel %vm1444_vm5, %v9521_v52, %v9529_v63  ;;  %v8368_v47 = vshrl.u32 %v16735_v14, 16  ;;  %v8372_v2 = vshll.u32 %v16745_v11, 16  ;;  %v8366_v29 = vrot.slane %v8364_v5, 1 }
 0x8f0   : > { %v16758_v32 = vld [vmem:[#allocation3 + $0xc8] sm:$0xff]  ;;  %v9537_v26 = vor.u32 %v9536_v49, %v9535_v42  ;;  %v8354_v53 = vor.u32 %v8352_v36, %v8350_v18  ;;  %v8162_v50 = vor.u32 %v8161_v9, %v8157_v4  ;;  %v18029_v4 = vld [vmem:[#allocation55_spill] sm:$0xff] }
 0x8f1   : > { %v8356_v13 = vshll.u32 %v16758_v32, 16  ;;  %v8512_v59 = vrot.slane %v16758_v32, 1  ;;  %v8360_v41 = vshrl.u32 %v16758_v32, 16  ;;  %v8370_v36 = vor.u32 %v8368_v47, %v8366_v29 }
 0x8f2   : > { %v16766_v61 = vsel %vm1444_vm5, %v9529_v63, %v9537_v26 }
 0x8f3   : > { %v8358_v52 = vrot.slane %v8356_v13, 1  ;;  %v16770_v40 = vsel %vm2781_vm13, %v8510_v21, %v8512_v59  ;;  %v16775_v42 = vsel %vm2781_vm13, %v8512_v59, %v17574_v12  ;;  %v16782_v13 = vrot.slane %v8372_v2, 1  ;;  %v11326_v21 = vld [vmem:[%s17375_s3 + $0x58] sm:$0xff]  }
 0x8f4   : > { %v17578_v49 = vshrl.u32 %v16770_v40, 16  ;;  %v17577_v18 = vshll.u32 %v16770_v40, 16  ;;  %v17576_v5 = vshrl.u32 %v16775_v42, 16  ;;  %9738 = vmatpush1.bf16.msra.mxu1 %v11326_v21  ;;  %v18030_v2 = vshll.u32 %v16775_v42, 16 }
 0x8f5   : > { %v8359_v63 = vsel %vm2473_vm8, %v8354_v53, %v8358_v52  ;;  %v8362_v9 = vor.u32 %v8360_v41, %v8358_v52  ;;  %v8167_v41 = vsel %vm2473_vm8, %v8162_v50, %v18029_v4  ;;  %v11327_v53 = vld [vmem:[%s17375_s3 + $0x118] sm:$0xff]  }
 0x8f6   : > { %8427 = vrot.lane.b32.xlu1 %v8359_v63, %s11345_s27  ;;  %v9543_v59 = vrot.slane %v17578_v49, 3  ;;  %v9544_v12 = vrot.slane %v17577_v18, 4  ;;  %v9944_v47 = vrot.slane %v17576_v5, 3  ;;  %v9945_v52 = vrot.slane %v18030_v2, 4  ;;  %10089 = vmatpush1.bf16.msra.mxu0 %v11327_v53 }
 0x8f7   : > { %v8367_v7 = vsel %vm2473_vm8, %v8362_v9, %v8366_v29  ;;  %v8375_v29 = vsel %vm2473_vm8, %v8370_v36, %v16782_v13 }
 0x8f8   : > { %8429 = vrot.lane.b32.xlu0 %v8367_v7, %s11345_s27  ;;  %v9545_v63 = vor.u32 %v9544_v12, %v9543_v59  ;;  %v16805_v9 = vor.u32 %v9945_v52, %v9944_v47  ;;  %v11333_v7 = vld [vmem:[#allocation3 + $0x78] sm:$0xff] }
 0x8fa   : > { %8379 = vrot.lane.b32.xlu1 %v8167_v41, %s11345_s27  ;;  %v16809_v50 = vsel %vm1444_vm5, %v9537_v26, %v9545_v63  ;;  %v16813_v4 = vsel %vm1444_vm5, %v9545_v63, %v16805_v9 }
 0x8fc   : > { %8431 = vrot.lane.b32.xlu0 %v8375_v29, %s11345_s27 }
 0x91d   : > { %v8410_v21 = vpop.permute.xlu0 %8409 }
 0x91e   : > { %v8550_v12 = vsel %vm656_vm7, %v11333_v7, %v8410_v21 }
 0x91f   : > { %v8778_v59 = vshrl.u32 %v8550_v12, 16  ;;  %v8781_v36 = vshll.u32 %v8550_v12, 16 }
 0x921   : > { %v8780_v53 = vrot.slane %v8778_v59, 7  ;;  %v9467_v47 = vrot.slane %v8778_v59, 3  ;;  %v9468_v2 = vrot.slane %v8781_v36, 4 }
 0x922   : > { %v16817_v52 = vpop.f32.mrb[168].mxu0 }
 0x923   : > { %18031 = vst [vmem:[#allocation33_spill] sm:$0xff] %v16817_v52  ;;  %v8783_v41 = vor.u32 %v8781_v36, %v8780_v53  ;;  %v9469_v26 = vor.u32 %v9468_v2, %v9467_v47  ;;  %v9147_v5 = vpop.f32.mrb[169].mxu0 }
 0x924   : > { %v16819_v18 = vpop.f32.mrb[170].mxu0  ;;  %v18033_v5 = vshrl.u32 %v16524_v62, 16 }
 0x925   : > { %18032 = vst [vmem:[#allocation15_spill] sm:$0xff] %v16819_v18  ;;  %v16823_v63 = vsel %vm1444_vm5, %v16687_v10, %v9469_v26  ;;  %v9150_v29 = vpop.f32.mrb[171].mxu0  ;;  %v8784_v21 = vsel %vm8575_vm14, %v16678_v3, %v8783_v41  ;;  %v18035_v3 = vshll.u32 %v16524_v62, 16 }
 0x926   : > { %v8412_v7 = vpop.permute.xlu1 %8411  ;;  %9248 = vmatmul.mubr.bf16.gmra.mrb[220].mxu0 %v8784_v21  ;;  %v8818_v59 = vrot.slane %v18033_v5, 7 }
 0x927   : > { %v8552_v12 = vsel %vm656_vm7, %v16316_v28, %v8412_v7  ;;  %10906 = vmatprep.mubr.msk.bf16.mxu0 %vm656_vm7, %v16435_v35 }
 0x928   : > { %v8793_v36 = vshrl.u32 %v8552_v12, 16  ;;  %v8796_v47 = vshll.u32 %v8552_v12, 16  ;;  %v8821_v41 = vor.u32 %v18035_v3, %v8818_v59 }
 0x92a   : > { %v8795_v2 = vrot.slane %v8793_v36, 7  ;;  %v9475_v10 = vrot.slane %v8793_v36, 3  ;;  %v9476_v49 = vrot.slane %v8796_v47, 4  ;;  %v8822_v62 = vsel %vm8575_vm14, %v16406_v25, %v8821_v41 }
 0x92b   : > { %v16833_v29 = vpop.f32.mrb[172].mxu0  ;;  %v8376_v25 = vshrl.u32 %v16745_v11, 16 }
 0x92c   : > { %18034 = vst [vmem:[#allocation57_spill] sm:$0xff] %v16833_v29  ;;  %v8798_v21 = vor.u32 %v8796_v47, %v8795_v2  ;;  %v9477_v18 = vor.u32 %v9476_v49, %v9475_v10  ;;  %v9155_v52 = vpop.f32.mrb[173].mxu0  ;;  %v18037_v47 = vshrl.u32 %v16585_v48, 16 }
 0x92d   : > { %v16837_v28 = vpop.f32.mrb[174].mxu0  ;;  %v8378_v29 = vor.u32 %v8376_v25, %v16782_v13  ;;  %v18040_v13 = vshll.u32 %v16598_v30, 16 }
 0x92e   : > { %18036 = vst [vmem:[#allocation58_spill] sm:$0xff] %v16837_v28  ;;  %v16840_v35 = vsel %vm1444_vm5, %v9469_v26, %v9477_v18  ;;  %v9158_v7 = vpop.f32.mrb[175].mxu0  ;;  %v8414_v5 = vpop.permute.xlu0 %8413  ;;  %v8799_v12 = vsel %vm8575_vm14, %v8780_v53, %v8798_v21  ;;  %v8833_v49 = vrot.slane %v18037_v47, 7  ;;  %v18038_v53 = vshll.u32 %v16585_v48, 16 }
 0x92f   : > { %v8554_v36 = vsel %vm656_vm7, %v16372_v8, %v8414_v5  ;;  %9256 = vmatmul.mubr.bf16.gmra.mrb[224].mxu0 %v8799_v12  ;;  %8433 = vrot.lane.b32.xlu1 %v8378_v29, %s11345_s27  ;;  %s11113_s27 = smul.u32 384, %s18076_s16 }
 0x930   : > { %v8808_v52 = vshrl.u32 %v8554_v36, 16  ;;  %v8811_v10 = vshll.u32 %v8554_v36, 16  ;;  %10907 = vmatprep.mubr.msk.bf16.mxu0 %vm656_vm7, %v8822_v62  ;;  %v8836_v21 = vor.u32 %v18038_v53, %v8833_v49 }
 0x931   : > { %s17204_s25 = scalar_lea.vmem %s17376_s4, %s11113_s27 }
 0x932   : > { %v8810_v26 = vrot.slane %v8808_v52, 7  ;;  %v9483_v3 = vrot.slane %v8808_v52, 3  ;;  %v9484_v7 = vrot.slane %v8811_v10, 4 }
 0x933   : > { %v16850_v28 = vpop.f32.mrb[176].mxu0 }
 0x934   : > { %v8813_v8 = vor.u32 %v8811_v10, %v8810_v26  ;;  %v9485_v5 = vor.u32 %v9484_v7, %v9483_v3  ;;  %v9163_v12 = vpop.f32.mrb[177].mxu0  ;;  %v8837_v10 = vsel %vm8575_vm14, %v8818_v59, %v8836_v21  ;;  %v18039_v3 = vshrl.u32 %v16598_v30, 16 }
 0x935   : > { %v16855_v41 = vpop.f32.mrb[178].mxu0 }
 0x936   : > { %v16858_v47 = vsel %vm1444_vm5, %v9477_v18, %v9485_v5  ;;  %v9166_v36 = vpop.f32.mrb[179].mxu0  ;;  %v8814_v52 = vsel %vm8575_vm14, %v8795_v2, %v8813_v8  ;;  %v8848_v7 = vrot.slane %v18039_v3, 7 }
 0x937   : > { %v8416_v62 = vpop.permute.xlu1 %8415  ;;  %9264 = vmatmul.mubr.bf16.gmra.mrb[228].mxu0 %v8814_v52 }
 0x938   : > { %v8556_v48 = vsel %vm656_vm7, %v16415_v43, %v8416_v62  ;;  %10908 = vmatprep.mubr.msk.bf16.mxu0 %vm656_vm7, %v8837_v10  ;;  %v8851_v8 = vor.u32 %v18040_v13, %v8848_v7 }
 0x939   : > { %v8823_v53 = vshrl.u32 %v8556_v48, 16  ;;  %v8826_v12 = vshll.u32 %v8556_v48, 16  ;;  %v18041_v48 = vshrl.u32 %v16622_v27, 16 }
 0x93a   : > { %v8852_v29 = vsel %vm8575_vm14, %v8833_v49, %v8851_v8 }
 0x93b   : > { %v8825_v18 = vrot.slane %v8823_v53, 7  ;;  %v9491_v36 = vrot.slane %v8823_v53, 3  ;;  %v9492_v2 = vrot.slane %v8826_v12, 4  ;;  %v8863_v10 = vrot.slane %v18041_v48, 7 }
 0x93d   : > { %v8828_v25 = vor.u32 %v8826_v12, %v8825_v18  ;;  %v9493_v43 = vor.u32 %v9492_v2, %v9491_v36  ;;  %v18042_v36 = vshll.u32 %v16622_v27, 16 }
 0x93f   : > { %v16872_v62 = vsel %vm1444_vm5, %v9485_v5, %v9493_v43  ;;  %v8829_v21 = vsel %vm8575_vm14, %v8810_v26, %v8828_v25  ;;  %v8866_v2 = vor.u32 %v18042_v36, %v8863_v10 }
 0x940   : > { %v8418_v59 = vpop.permute.xlu0 %8417  ;;  %9272 = vmatmul.mubr.bf16.gmra.mrb[232].mxu0 %v8829_v21  ;;  %v18043_v21 = vshrl.u32 %v16649_v44, 16 }
 0x941   : > { %v8558_v52 = vsel %vm656_vm7, %v16468_v55, %v8418_v59  ;;  %10909 = vmatprep.mubr.msk.bf16.mxu0 %vm656_vm7, %v8852_v29  ;;  %v8867_v59 = vsel %vm8575_vm14, %v8848_v7, %v8866_v2 }
 0x942   : > { %v8838_v3 = vshrl.u32 %v8558_v52, 16  ;;  %v8841_v30 = vshll.u32 %v8558_v52, 16  ;;  %v8878_v52 = vrot.slane %v18043_v21, 7 }
 0x944   : > { %v8840_v53 = vrot.slane %v8838_v3, 7  ;;  %v9499_v12 = vrot.slane %v8838_v3, 3  ;;  %v9500_v5 = vrot.slane %v8841_v30, 4 }
 0x946   : > { %v8843_v26 = vor.u32 %v8841_v30, %v8840_v53  ;;  %v9501_v13 = vor.u32 %v9500_v5, %v9499_v12  ;;  %v18044_v30 = vshll.u32 %v16649_v44, 16 }
 0x948   : > { %v16884_v55 = vsel %vm1444_vm5, %v9493_v43, %v9501_v13  ;;  %v8420_v25 = vpop.permute.xlu1 %8419  ;;  %v8844_v49 = vsel %vm8575_vm14, %v8825_v18, %v8843_v26  ;;  %v8881_v12 = vor.u32 %v18044_v30, %v8878_v52 }
 0x949   : > { %v8560_v8 = vsel %vm656_vm7, %v16514_v24, %v8420_v25  ;;  %9280 = vmatmul.mubr.bf16.gmra.mrb[236].mxu0 %v8844_v49  ;;  %v18045_v25 = vshrl.u32 %v16681_v34, 16 }
 0x94a   : > { %v8853_v29 = vshrl.u32 %v8560_v8, 16  ;;  %v8856_v27 = vshll.u32 %v8560_v8, 16  ;;  %10910 = vmatprep.mubr.msk.bf16.mxu0 %vm656_vm7, %v8867_v59  ;;  %v8882_v2 = vsel %vm8575_vm14, %v8863_v10, %v8881_v12 }
 0x94b   : > { %v8893_v44 = vrot.slane %v18045_v25, 7  ;;  %v18048_v25 = vshll.u32 %v16730_v54, 16 }
 0x94c   : > { %v8855_v48 = vrot.slane %v8853_v29, 7  ;;  %v9507_v3 = vrot.slane %v8853_v29, 3  ;;  %v9508_v43 = vrot.slane %v8856_v27, 4  ;;  %v18046_v29 = vshll.u32 %v16681_v34, 16 }
 0x94e   : > { %v8858_v18 = vor.u32 %v8856_v27, %v8855_v48  ;;  %v9509_v5 = vor.u32 %v9508_v43, %v9507_v3 }
 0x950   : > { %v16896_v24 = vsel %vm1444_vm5, %v9501_v13, %v9509_v5  ;;  %v8859_v7 = vsel %vm8575_vm14, %v8840_v53, %v8858_v18  ;;  %v8422_v36 = vpop.permute.xlu0 %8421  ;;  %v8896_v53 = vor.u32 %v18046_v29, %v8893_v44  ;;  %v18047_v18 = vshrl.u32 %v16730_v54, 16 }
 0x951   : > { %9288 = vmatmul.mubr.bf16.gmra.mrb[240].mxu0 %v8859_v7  ;;  %v8562_v26 = vsel %vm656_vm7, %v16568_v16, %v8422_v36 }
 0x952   : > { %10911 = vmatprep.mubr.msk.bf16.mxu0 %vm656_vm7, %v8882_v2  ;;  %v8868_v49 = vshrl.u32 %v8562_v26, 16  ;;  %v8871_v8 = vshll.u32 %v8562_v26, 16  ;;  %v8897_v12 = vsel %vm8575_vm14, %v8878_v52, %v8896_v53  ;;  %v8908_v7 = vrot.slane %v18047_v18, 7 }
 0x954   : > { %v8870_v59 = vrot.slane %v8868_v49, 7  ;;  %v9515_v21 = vrot.slane %v8868_v49, 3  ;;  %v9516_v13 = vrot.slane %v8871_v8, 4  ;;  %v8911_v49 = vor.u32 %v18048_v25, %v8908_v7 }
 0x956   : > { %v8873_v27 = vor.u32 %v8871_v8, %v8870_v59  ;;  %v9517_v3 = vor.u32 %v9516_v13, %v9515_v21 }
 0x958   : > { %v16908_v10 = vsel %vm1444_vm5, %v9509_v5, %v9517_v3  ;;  %v8424_v43 = vpop.permute.xlu1 %8423  ;;  %v8874_v16 = vsel %vm8575_vm14, %v8855_v48, %v8873_v27  ;;  %v8912_v27 = vsel %vm8575_vm14, %v8893_v44, %v8911_v49 }
 0x959   : > { %v8564_v30 = vsel %vm656_vm7, %v16618_v19, %v8424_v43  ;;  %9296 = vmatmul.mubr.bf16.gmra.mrb[244].mxu0 %v8874_v16  ;;  %v18049_v43 = vshrl.u32 %v16770_v40, 16 }
 0x95a   : > { %v8883_v36 = vshrl.u32 %v8564_v30, 16  ;;  %v8886_v34 = vshll.u32 %v8564_v30, 16  ;;  %10912 = vmatprep.mubr.msk.bf16.mxu0 %vm656_vm7, %v8897_v12 }
 0x95b   : > { %v8923_v54 = vrot.slane %v18049_v43, 7 }
 0x95c   : > { %v8885_v2 = vrot.slane %v8883_v36, 7  ;;  %v9523_v26 = vrot.slane %v8883_v36, 3  ;;  %v9524_v5 = vrot.slane %v8886_v34, 4  ;;  %v18050_v36 = vshll.u32 %v16770_v40, 16 }
 0x95e   : > { %v8888_v48 = vor.u32 %v8886_v34, %v8885_v2  ;;  %v9525_v8 = vor.u32 %v9524_v5, %v9523_v26 }
 0x95f   : > { %v8426_v21 = vpop.permute.xlu0 %8425 }
 0x960   : > { %v16920_v19 = vsel %vm1444_vm5, %v9517_v3, %v9525_v8  ;;  %v8566_v52 = vsel %vm656_vm7, %v16661_v60, %v8426_v21  ;;  %v8889_v13 = vsel %vm8575_vm14, %v8870_v59, %v8888_v48  ;;  %v8926_v60 = vor.u32 %v18050_v36, %v8923_v54  ;;  %v8126_v21 = vld [vmem:[#allocation3] sm:$0xf8] }
 0x961   : > { %v8898_v29 = vshrl.u32 %v8566_v52, 16  ;;  %v8901_v53 = vshll.u32 %v8566_v52, 16  ;;  %9304 = vmatmul.mubr.bf16.gmra.mrb[248].mxu0 %v8889_v13  ;;  %v18051_v52 = vshrl.u32 %v16775_v42, 16 }
 0x962   : > { %10913 = vmatprep.mubr.msk.bf16.mxu0 %vm656_vm7, %v8912_v27  ;;  %v8927_v49 = vsel %vm8575_vm14, %v8908_v7, %v8926_v60 }
 0x963   : > { %v8900_v16 = vrot.slane %v8898_v29, 7  ;;  %v9531_v30 = vrot.slane %v8898_v29, 3  ;;  %v9532_v12 = vrot.slane %v8901_v53, 4  ;;  %v8938_v40 = vrot.slane %v18051_v52, 7 }
 0x965   : > { %v8903_v3 = vor.u32 %v8901_v53, %v8900_v16  ;;  %v9533_v18 = vor.u32 %v9532_v12, %v9531_v30 }
 0x967   : > { %v16932_v59 = vsel %vm1444_vm5, %v9525_v8, %v9533_v18  ;;  %v8904_v26 = vsel %vm8575_vm14, %v8885_v2, %v8903_v3  ;;  %v18052_v3 = vshll.u32 %v16775_v42, 16 }
 0x968   : > { %v8428_v34 = vpop.permute.xlu1 %8427 }
 0x969   : > { %v8568_v44 = vsel %vm656_vm7, %v16706_v51, %v8428_v34  ;;  %9312 = vmatmul.mubr.bf16.gmra.mrb[252].mxu0 %v8904_v26  ;;  %v8941_v36 = vor.u32 %v18052_v3, %v8938_v40 }
 0x96a   : > { %v8913_v5 = vshrl.u32 %v8568_v44, 16  ;;  %v8916_v25 = vshll.u32 %v8568_v44, 16  ;;  %v8430_v48 = vpop.permute.xlu0 %8429  ;;  %10914 = vmatprep.mubr.msk.bf16.mxu0 %vm656_vm7, %v8927_v49 }
 0x96b   : > { %v8570_v8 = vsel %vm656_vm7, %v16758_v32, %v8430_v48  ;;  %v8942_v42 = vsel %vm8575_vm14, %v8923_v54, %v8941_v36  ;;  %v18057_v36 = vld [vmem:[#allocation22_spill] sm:$0xff] }
 0x96c   : > { %v8915_v13 = vrot.slane %v8913_v5, 7  ;;  %v9539_v2 = vrot.slane %v8913_v5, 3  ;;  %v9540_v29 = vrot.slane %v8916_v25, 4  ;;  %v8928_v53 = vshrl.u32 %v8570_v8, 16  ;;  %v8380_v51 = vpop.permute.xlu1 %8379 }
 0x96d   : > { %v8931_v27 = vshll.u32 %v8570_v8, 16  ;;  %v8520_v43 = vsel %vm656_vm7, %v8126_v21, %v8380_v51  ;;  %v16946_v44 = vpop.f32.mrb[180].mxu0  ;;  %v18054_v51 = vld [vmem:[#allocation16_spill] sm:$0xff] }
 0x96e   : > { %v8918_v30 = vor.u32 %v8916_v25, %v8915_v13  ;;  %v9541_v7 = vor.u32 %v9540_v29, %v9539_v2  ;;  %v9940_v12 = vrot.slane %v8928_v53, 3  ;;  %v9336_v34 = vshrl.u32 %v8520_v43, 16  ;;  %v9171_v49 = vpop.f32.mrb[181].mxu0  ;;  %v18053_v29 = vld [vmem:[#allocation50_spill] sm:$0xff] }
 0x96f   : > { %v9941_v60 = vrot.slane %v8931_v27, 4  ;;  %v9339_v26 = vshll.u32 %v8520_v43, 16  ;;  %v8930_v48 = vrot.slane %v8928_v53, 7  ;;  %v16954_v8 = vpop.f32.mrb[182].mxu0 }
 0x970   : > { %v8919_v32 = vsel %vm8575_vm14, %v8900_v16, %v8918_v30  ;;  %v16950_v5 = vsel %vm1444_vm5, %v9533_v18, %v9541_v7  ;;  %v9338_v25 = vrot.slane %v9336_v34, 3  ;;  %v9174_v40 = vpop.f32.mrb[183].mxu0 }
 0x971   : > { %v16952_v52 = vor.u32 %v9941_v60, %v9940_v12  ;;  %v9341_v21 = vrot.slane %v9339_v26, 4  ;;  %9320 = vmatmul.mubr.bf16.gmra.mrb[0].mxu0 %v8919_v32  ;;  %v8933_v18 = vor.u32 %v8931_v27, %v8930_v48  ;;  %v18055_v12 = vld [vmem:[#allocation24_spill] sm:$0xff]  ;;  %v18056_v27 = vld [vmem:[#allocation19_spill] sm:$0xff]  ;;  %v18058_v60 = vld [vmem:[#allocation14_spill] sm:$0xff] }
 0x972   : > { %10915 = vmatprep.mubr.msk.bf16.mxu0 %vm656_vm7, %v8942_v42  ;;  %v18060_v48 = vld [vmem:[#allocation6_spill] sm:$0xff] }
 0x973   : > { %v16959_v2 = vsel %vm1444_vm5, %v9541_v7, %v16952_v52  ;;  %v9342_v16 = vor.u32 %v9341_v21, %v9338_v25  ;;  %v8934_v43 = vsel %vm8575_vm14, %v8915_v13, %v8933_v18  ;;  %v18059_v13 = vld [vmem:[#allocation47_spill] sm:$0xff]  ;;  %v18061_v21 = vld [vmem:[#allocation30_spill] sm:$0xff] }
 0x975   : > { %v9348_v53 = vsel %vm1444_vm5, %v9342_v16, %v18053_v29  ;;  %v18062_v29 = vld [vmem:[#allocation38_spill] sm:$0xff] }
 0x976   : > { %9748 = vmatmul.mubr.bf16.vlgmr.msra.gmra.mrb[8].mxu1 %v9348_v53 }
 0x977   : > { %10929 = vmatprep.mubr.msk.bf16.mxu1 %vm656_vm7, %v18054_v51  ;;  %v16967_v30 = vpop.f32.mrb[184].mxu0 }
 0x978   : > { %v9179_v54 = vpop.f32.mrb[185].mxu0 }
 0x979   : > { %9328 = vmatmul.mubr.bf16.gmra.mrb[4].mxu0 %v8934_v43  ;;  %v16971_v7 = vpop.f32.mrb[186].mxu0 }
 0x97a   : > { %10964 = vmatprep.mubr.msk.bf16.mxu0 %vm656_vm7, %v18055_v12  ;;  %v9182_v3 = vpop.f32.mrb[187].mxu0 }
 0x97e   : > { %9756 = vmatmul.mubr.bf16.gmra.mrb[12].mxu1 %v18056_v27 }
 0x97f   : > { %10930 = vmatprep.mubr.msk.bf16.mxu1 %vm656_vm7, %v18057_v36 }
 0x980   : > { %v16977_v34 = vpop.f32.mrb[188].mxu0 }
 0x981   : > { %10099 = vmatmul.mubr.bf16.vlgmr.msra.gmra.mrb[8].mxu0 %v18058_v60  ;;  %v9187_v26 = vpop.f32.mrb[189].mxu0 }
 0x982   : > { %10965 = vmatprep.mubr.msk.bf16.mxu0 %vm656_vm7, %v18059_v13  ;;  %v16981_v32 = vpop.f32.mrb[190].mxu0 }
 0x983   : > { %v9190_v49 = vpop.f32.mrb[191].mxu0 }
 0x986   : > { %9764 = vmatmul.mubr.bf16.gmra.mrb[16].mxu1 %v18060_v48  ;;  %v18065_v48 = vld [vmem:[#allocation17_spill] sm:$0xff] }
 0x987   : > { %10931 = vmatprep.mubr.msk.bf16.mxu1 %vm656_vm7, %v18055_v12  ;;  %v18063_v12 = vld [vmem:[#allocation62_spill] sm:$0xff] }
 0x988   : > { %v16987_v25 = vpop.f32.mrb[192].mxu0 }
 0x989   : > { %10107 = vmatmul.mubr.bf16.gmra.mrb[12].mxu0 %v16274_v45  ;;  %v9195_v42 = vpop.f32.mrb[193].mxu0 }
 0x98a   : > { %10966 = vmatprep.mubr.msk.bf16.mxu0 %vm656_vm7, %v18061_v21  ;;  %v16991_v40 = vpop.f32.mrb[194].mxu0 }
 0x98b   : > { %v9198_v16 = vpop.f32.mrb[195].mxu0 }
 0x98e   : > { %9772 = vmatmul.mubr.bf16.gmra.mrb[20].mxu1 %v18058_v60  ;;  %v18064_v60 = vld [vmem:[#allocation35_spill] sm:$0xff] }
 0x98f   : > { %10932 = vmatprep.mubr.msk.bf16.mxu1 %vm656_vm7, %v18059_v13 }
 0x990   : > { %v16997_v18 = vpop.f32.mrb[196].mxu0 }
 0x991   : > { %10115 = vmatmul.mubr.bf16.gmra.mrb[16].mxu0 %v16306_v33  ;;  %v9203_v53 = vpop.f32.mrb[197].mxu0 }
 0x992   : > { %10967 = vmatprep.mubr.msk.bf16.mxu0 %vm656_vm7, %v18062_v29  ;;  %v17001_v51 = vpop.f32.mrb[198].mxu0 }
 0x993   : > { %v9206_v43 = vpop.f32.mrb[199].mxu0 }
 0x996   : > { %9780 = vmatmul.mubr.bf16.gmra.mrb[24].mxu1 %v16274_v45 }
 0x997   : > { %10933 = vmatprep.mubr.msk.bf16.mxu1 %vm656_vm7, %v18061_v21 }
 0x999   : > { %10123 = vmatmul.mubr.bf16.gmra.mrb[20].mxu0 %v16352_v56  ;;  %v17007_v54 = vpop.f32.mrb[200].mxu0 }
 0x99a   : > { %10968 = vmatprep.mubr.msk.bf16.mxu0 %vm656_vm7, %v18063_v12  ;;  %v9211_v3 = vpop.f32.mrb[201].mxu0 }
 0x99b   : > { %v17011_v27 = vpop.f32.mrb[202].mxu0  ;;  %v18067_v3 = vld [vmem:[#allocation25_spill] sm:$0xff] }
 0x99c   : > { %v9214_v36 = vpop.f32.mrb[203].mxu0 }
 0x99e   : > { %9788 = vmatmul.mubr.bf16.gmra.mrb[28].mxu1 %v16306_v33 }
 0x99f   : > { %10934 = vmatprep.mubr.msk.bf16.mxu1 %vm656_vm7, %v18062_v29  ;;  %v18066_v29 = vld [vmem:[#allocation23_spill] sm:$0xff] }
 0x9a1   : > { %10131 = vmatmul.mubr.bf16.gmra.mrb[24].mxu0 %v16399_v31 }
 0x9a2   : > { %v17017_v45 = vpop.f32.mrb[204].mxu0  ;;  %10969 = vmatprep.mubr.msk.bf16.mxu0 %vm656_vm7, %v18064_v60 }
 0x9a3   : > { %v9219_v13 = vpop.f32.mrb[205].mxu0 }
 0x9a4   : > { %v17021_v26 = vpop.f32.mrb[206].mxu0 }
 0x9a5   : > { %v9222_v49 = vpop.f32.mrb[207].mxu0 }
 0x9a6   : > { %9796 = vmatmul.mubr.bf16.gmra.mrb[32].mxu1 %v16352_v56  ;;  %v18069_v49 = vld [vmem:[#allocation65_spill] sm:$0xff] }
 0x9a7   : > { %10935 = vmatprep.mubr.msk.bf16.mxu1 %vm656_vm7, %v18063_v12 }
 0x9a9   : > { %10139 = vmatmul.mubr.bf16.gmra.mrb[28].mxu0 %v16450_v0 }
 0x9aa   : > { %v17027_v33 = vpop.f32.mrb[208].mxu0  ;;  %10970 = vmatprep.mubr.msk.bf16.mxu0 %vm656_vm7, %v18065_v48 }
 0x9ab   : > { %v9227_v21 = vpop.f32.mrb[209].mxu0 }
 0x9ac   : > { %v17031_v42 = vpop.f32.mrb[210].mxu0 }
 0x9ad   : > { %v9230_v16 = vpop.f32.mrb[211].mxu0 }
 0x9ae   : > { %9804 = vmatmul.mubr.bf16.gmra.mrb[36].mxu1 %v16399_v31 }
 0x9af   : > { %10936 = vmatprep.mubr.msk.bf16.mxu1 %vm656_vm7, %v18064_v60 }
 0x9b1   : > { %10147 = vmatmul.mubr.bf16.gmra.mrb[32].mxu0 %v16498_v38 }
 0x9b2   : > { %10971 = vmatprep.mubr.msk.bf16.mxu0 %vm656_vm7, %v18066_v29 }
 0x9b3   : > { %v17037_v56 = vpop.f32.mrb[212].mxu0 }
 0x9b4   : > { %v9235_v53 = vpop.f32.mrb[213].mxu0 }
 0x9b5   : > { %v17041_v43 = vpop.f32.mrb[214].mxu0 }
 0x9b6   : > { %v9238_v12 = vpop.f32.mrb[215].mxu0  ;;  %9812 = vmatmul.mubr.bf16.gmra.mrb[40].mxu1 %v16450_v0  ;;  %v18068_v0 = vld [vmem:[#allocation9_spill] sm:$0xff] }
 0x9b7   : > { %10937 = vmatprep.mubr.msk.bf16.mxu1 %vm656_vm7, %v18065_v48  ;;  %v8432_v12 = vpop.permute.xlu0 %8431 }
 0x9b9   : > { %10155 = vmatmul.mubr.bf16.gmra.mrb[36].mxu0 %v16554_v1 }
 0x9ba   : > { %10972 = vmatprep.mubr.msk.bf16.mxu0 %vm656_vm7, %v18067_v3 }
 0x9bb   : > { %v17047_v31 = vpop.f32.mrb[216].mxu0 }
 0x9bc   : > { %v9243_v36 = vpop.f32.mrb[217].mxu0 }
 0x9bd   : > { %v17051_v60 = vpop.f32.mrb[218].mxu0  ;;  %v8572_v36 = vsel %vm656_vm7, %v16735_v14, %v8432_v12 }
 0x9be   : > { %v9246_v13 = vpop.f32.mrb[219].mxu0  ;;  %9820 = vmatmul.mubr.bf16.gmra.mrb[44].mxu1 %v16498_v38 }
 0x9bf   : > { %10938 = vmatprep.mubr.msk.bf16.mxu1 %vm656_vm7, %v18066_v29 }
 0x9c1   : > { %10163 = vmatmul.mubr.bf16.gmra.mrb[40].mxu0 %v16601_v46 }
 0x9c2   : > { %10973 = vmatprep.mubr.msk.bf16.mxu0 %vm656_vm7, %v18068_v0 }
 0x9c6   : > { %9828 = vmatmul.mubr.bf16.gmra.mrb[48].mxu1 %v16554_v1 }
 0x9c7   : > { %10939 = vmatprep.mubr.msk.bf16.mxu1 %vm656_vm7, %v18067_v3 }
 0x9c9   : > { %10171 = vmatmul.mubr.bf16.gmra.mrb[44].mxu0 %v16653_v23 }
 0x9ca   : > { %10974 = vmatprep.mubr.msk.bf16.mxu0 %vm656_vm7, %v18069_v49 }
 0x9ce   : > { %9836 = vmatmul.mubr.bf16.gmra.mrb[52].mxu1 %v16601_v46 }
 0x9cf   : > { %10940 = vmatprep.mubr.msk.bf16.mxu1 %vm656_vm7, %v18068_v0 }
 0x9d1   : > { %10179 = vmatmul.mubr.bf16.gmra.mrb[48].mxu0 %v16699_v22 }
 0x9d2   : > { %10975 = vmatprep.mubr.msk.bf16.mxu0 %vm656_vm7, %v16474_v15 }
 0x9d6   : > { %9844 = vmatmul.mubr.bf16.gmra.mrb[56].mxu1 %v16653_v23 }
 0x9d7   : > { %10941 = vmatprep.mubr.msk.bf16.mxu1 %vm656_vm7, %v18069_v49 }
 0x9d9   : > { %10187 = vmatmul.mubr.bf16.gmra.mrb[52].mxu0 %v16823_v63 }
 0x9da   : > { %10976 = vmatprep.mubr.msk.bf16.mxu0 %vm656_vm7, %v16577_v39 }
 0x9de   : > { %9852 = vmatmul.mubr.bf16.gmra.mrb[60].mxu1 %v16699_v22 }
 0x9df   : > { %10942 = vmatprep.mubr.msk.bf16.mxu1 %vm656_vm7, %v16474_v15 }
 0x9e1   : > { %10195 = vmatmul.mubr.bf16.gmra.mrb[56].mxu0 %v16840_v35 }
 0x9e2   : > { %10977 = vmatprep.mubr.msk.bf16.mxu0 %vm656_vm7, %v16639_v57 }
 0x9e6   : > { %9860 = vmatmul.mubr.bf16.gmra.mrb[64].mxu1 %v16823_v63 }
 0x9e7   : > { %10943 = vmatprep.mubr.msk.bf16.mxu1 %vm656_vm7, %v16577_v39 }
 0x9e9   : > { %10203 = vmatmul.mubr.bf16.gmra.mrb[60].mxu0 %v16858_v47 }
 0x9ea   : > { %10978 = vmatprep.mubr.msk.bf16.mxu0 %vm656_vm7, %v16676_v37 }
 0x9ee   : > { %9868 = vmatmul.mubr.bf16.gmra.mrb[68].mxu1 %v16840_v35 }
 0x9ef   : > { %10944 = vmatprep.mubr.msk.bf16.mxu1 %vm656_vm7, %v16639_v57 }
 0x9f1   : > { %10211 = vmatmul.mubr.bf16.gmra.mrb[64].mxu0 %v16872_v62 }
 0x9f2   : > { %10979 = vmatprep.mubr.msk.bf16.mxu0 %vm656_vm7, %v16723_v20 }
 0x9f6   : > { %9876 = vmatmul.mubr.bf16.gmra.mrb[72].mxu1 %v16858_v47  ;;  %v8155_v47 = vld [vmem:[#allocation3 + $0xd8] sm:$0x1f] }
 0x9f7   : > { %10945 = vmatprep.mubr.msk.bf16.mxu1 %vm656_vm7, %v16676_v37  ;;  %v8516_v48 = vrot.slane %v8155_v47, 1 }
 0x9f9   : > { %10219 = vmatmul.mubr.bf16.gmra.mrb[68].mxu0 %v16884_v55  ;;  %v17101_v15 = vpop.f32.mrb[220].mxu0  ;;  %v9974_v49 = vshrl.u32 %v8516_v48, 16 }
 0x9fa   : > { %10980 = vmatprep.mubr.msk.bf16.mxu0 %vm656_vm7, %v16740_v58  ;;  %v9251_v38 = vpop.f32.mrb[221].mxu0 }
 0x9fb   : > { %v17103_v1 = vpop.f32.mrb[222].mxu0  ;;  %v9977_v38 = vshll.u32 %v8516_v48, 16  ;;  %v9976_v47 = vrot.slane %v9974_v49, 3 }
 0x9fc   : > { %v9254_v39 = vpop.f32.mrb[223].mxu0 }
 0x9fd   : > { %v9948_v39 = vshrl.u32 %v8572_v36, 16 }
 0x9fe   : > { %9884 = vmatmul.mubr.bf16.gmra.mrb[76].mxu1 %v16872_v62 }
 0x9ff   : > { %10946 = vmatprep.mubr.msk.bf16.mxu1 %vm656_vm7, %v16723_v20 }
 0xa01   : > { %10227 = vmatmul.mubr.bf16.gmra.mrb[72].mxu0 %v16896_v24 }
 0xa02   : > { %10981 = vmatprep.mubr.msk.bf16.mxu0 %vm656_vm7, %v16748_v17  ;;  %v17111_v46 = vpop.f32.mrb[224].mxu0 }
 0xa03   : > { %v9259_v57 = vpop.f32.mrb[225].mxu0 }
 0xa04   : > { %v17114_v23 = vpop.f32.mrb[226].mxu0  ;;  %v9951_v57 = vshll.u32 %v8572_v36, 16 }
 0xa05   : > { %v9262_v37 = vpop.f32.mrb[227].mxu0 }
 0xa06   : > { %9892 = vmatmul.mubr.bf16.gmra.mrb[80].mxu1 %v16884_v55 }
 0xa07   : > { %10947 = vmatprep.mubr.msk.bf16.mxu1 %vm656_vm7, %v16740_v58 }
 0xa09   : > { %10235 = vmatmul.mubr.bf16.gmra.mrb[76].mxu0 %v16908_v10 }
 0xa0a   : > { %10982 = vmatprep.mubr.msk.bf16.mxu0 %vm656_vm7, %v16756_v6  ;;  %v17121_v22 = vpop.f32.mrb[228].mxu0 }
 0xa0b   : > { %v9267_v20 = vpop.f32.mrb[229].mxu0 }
 0xa0c   : > { %v17124_v63 = vpop.f32.mrb[230].mxu0 }
 0xa0d   : > { %v9270_v35 = vpop.f32.mrb[231].mxu0 }
 0xa0e   : > { %9900 = vmatmul.mubr.bf16.gmra.mrb[84].mxu1 %v16896_v24  ;;  %v8434_v35 = vpop.permute.xlu1 %8433 }
 0xa0f   : > { %10948 = vmatprep.mubr.msk.bf16.mxu1 %vm656_vm7, %v16748_v17  ;;  %v18070_v17 = vrot.slane %v16735_v14, 1 }
 0xa11   : > { %10243 = vmatmul.mubr.bf16.gmra.mrb[80].mxu0 %v16920_v19  ;;  %v8517_v21 = vsel %vm2781_vm13, %v18070_v17, %v8516_v48  ;;  %v8574_v48 = vsel %vm656_vm7, %v16745_v11, %v8434_v35 }
 0xa12   : > { %10983 = vmatprep.mubr.msk.bf16.mxu0 %vm656_vm7, %v16766_v61  ;;  %v9957_v53 = vshrl.u32 %v8517_v21, 16 }
 0xa13   : > { %v17131_v58 = vpop.f32.mrb[232].mxu0 }
 0xa14   : > { %v9275_v62 = vpop.f32.mrb[233].mxu0  ;;  %v9959_v13 = vrot.slane %v9957_v53, 3 }
 0xa15   : > { %v17134_v55 = vpop.f32.mrb[234].mxu0  ;;  %v9979_v62 = vrot.slane %v9977_v38, 4 }
 0xa16   : > { %9908 = vmatmul.mubr.bf16.gmra.mrb[88].mxu1 %v16908_v10  ;;  %v9278_v24 = vpop.f32.mrb[235].mxu0 }
 0xa17   : > { %10949 = vmatprep.mubr.msk.bf16.mxu1 %vm656_vm7, %v16756_v6  ;;  %v9960_v6 = vshll.u32 %v8517_v21, 16  ;;  %v9953_v24 = vrot.slane %v9951_v57, 4  ;;  %v9980_v17 = vor.u32 %v9979_v62, %v9976_v47 }
 0xa19   : > { %10251 = vmatmul.mubr.bf16.gmra.mrb[84].mxu0 %v16932_v59  ;;  %v9962_v0 = vrot.slane %v9960_v6, 4 }
 0xa1a   : > { %10984 = vmatprep.mubr.msk.bf16.mxu0 %vm656_vm7, %v16809_v50 }
 0xa1b   : > { %v9963_v20 = vor.u32 %v9962_v0, %v9959_v13 }
 0xa1c   : > { %v17144_v16 = vpop.f32.mrb[236].mxu0 }
 0xa1d   : > { %v9283_v29 = vpop.f32.mrb[237].mxu0  ;;  %v9981_v11 = vsel %vm1444_vm5, %v9963_v20, %v9980_v17 }
 0xa1e   : > { %9916 = vmatmul.mubr.bf16.gmra.mrb[92].mxu1 %v16920_v19  ;;  %v17147_v10 = vpop.f32.mrb[238].mxu0  ;;  %v9965_v29 = vshrl.u32 %v8574_v48, 16 }
 0xa1f   : > { %10950 = vmatprep.mubr.msk.bf16.mxu1 %vm656_vm7, %v16766_v61  ;;  %v9286_v3 = vpop.f32.mrb[239].mxu0 }
 0xa21   : > { %10259 = vmatmul.mubr.bf16.gmra.mrb[88].mxu0 %v16950_v5 }
 0xa22   : > { %10985 = vmatprep.mubr.msk.bf16.mxu0 %vm656_vm7, %v16813_v4  ;;  %v9950_v4 = vrot.slane %v9948_v39, 3 }
 0xa24   : > { %v17156_v19 = vpop.f32.mrb[240].mxu0  ;;  %v9954_v21 = vor.u32 %v9953_v24, %v9950_v4  ;;  %v18071_v24 = vld [vmem:[#allocation33_spill] sm:$0xff] }
 0xa25   : > { %v9291_v37 = vpop.f32.mrb[241].mxu0 }
 0xa26   : > { %9924 = vmatmul.mubr.bf16.gmra.mrb[96].mxu1 %v16932_v59  ;;  %v17159_v61 = vpop.f32.mrb[242].mxu0  ;;  %v9964_v59 = vsel %vm1444_vm5, %v16805_v9, %v9963_v20  ;;  %v9967_v9 = vrot.slane %v9965_v29, 3 }
 0xa27   : > { %10951 = vmatprep.mubr.msk.bf16.mxu1 %vm656_vm7, %v16809_v50  ;;  %v9294_v14 = vpop.f32.mrb[243].mxu0  ;;  %v9968_v50 = vshll.u32 %v8574_v48, 16 }
 0xa29   : > { %10267 = vmatmul.mubr.bf16.gmra.mrb[92].mxu0 %v16959_v2  ;;  %v9955_v2 = vsel %vm1444_vm5, %v16952_v52, %v9954_v21  ;;  %v9970_v36 = vrot.slane %v9968_v50, 4 }
 0xa2a   : > { %10986 = vmatprep.mubr.msk.bf16.mxu0 %vm656_vm7, %v9964_v59 }
 0xa2b   : > { %v9971_v13 = vor.u32 %v9970_v36, %v9967_v9  ;;  %v11086_v36 = vld [vmem:[%s11386_s20 + $0x10] sm:$0xff]  }
 0xa2c   : > { %v17169_v53 = vpop.f32.mrb[244].mxu0 }
 0xa2d   : > { %v9299_v6 = vpop.f32.mrb[245].mxu0  ;;  %v9972_v39 = vsel %vm1444_vm5, %v9954_v21, %v9971_v13  ;;  %v18072_v21 = vld [vmem:[#allocation15_spill] sm:$0xff]  ;;  %v18073_v13 = vld [vmem:[#allocation57_spill] sm:$0xff] }
 0xa2e   : > { %9932 = vmatmul.mubr.bf16.gmra.mrb[100].mxu1 %v16950_v5  ;;  %v17172_v12 = vpop.f32.mrb[246].mxu0 }
 0xa2f   : > { %v9302_v3 = vpop.f32.mrb[247].mxu0 }
 0xa31   : > { %10275 = vmatmul.mubr.bf16.gmra.mrb[96].mxu0 %v9955_v2 }
 0xa32   : > { %10987 = vmatprep.mubr.msk.bf16.mxu0 %vm656_vm7, %v9981_v11 }
 0xa34   : > { %v17178_v0 = vpop.f32.mrb[248].mxu0 }
 0xa35   : > { %v9307_v49 = vpop.f32.mrb[249].mxu0 }
 0xa36   : > { %v17180_v38 = vpop.f32.mrb[250].mxu0 }
 0xa37   : > { %v9310_v5 = vpop.f32.mrb[251].mxu0 }
 0xa39   : > { %10283 = vmatmul.mubr.bf16.gmra.mrb[100].mxu0 %v9972_v39 }
 0xa3c   : > { %v17183_v57 = vpop.f32.mrb[252].mxu0 }
 0xa3d   : > { %v9315_v37 = vpop.f32.mrb[253].mxu0 }
 0xa3e   : > { %v17185_v20 = vpop.f32.mrb[254].mxu0  ;;  %v18074_v37 = vld [vmem:[#allocation58_spill] sm:$0xff] }
 0xa3f   : > { %v9318_v52 = vpop.f32.mrb[255].mxu0 }
 0xa44   : > { %v17187_v14 = vpop.f32.mrb[0].mxu0 }
 0xa45   : > { %v9323_v35 = vpop.f32.mrb[1].mxu0 }
 0xa46   : > { %v17189_v47 = vpop.f32.mrb[2].mxu0 }
 0xa47   : > { %v9326_v62 = vpop.f32.mrb[3].mxu0 }
 0xa48   : > { %v10992_v62 = vunpack.c.l.bf16 %v11086_v36 }
 0xa49   : > { %v9749_v4 = vpop.f32.mrb[8].mxu1 }
 0xa4a   : > { %v9750_v48 = vadd.f32 %v9749_v4, %v18071_v24  ;;  %v9751_v59 = vpop.f32.mrb[9].mxu1 }
 0xa4b   : > { %v9752_v17 = vpop.f32.mrb[10].mxu1 }
 0xa4c   : > { %v9753_v29 = vadd.f32 %v9752_v17, %v18072_v21  ;;  %v9754_v50 = vpop.f32.mrb[11].mxu1  ;;  %v17193_v6 = vpop.f32.mrb[4].mxu0  ;;  %v10993_v17 = vunpack.c.h.bf16 %v11086_v36 }
 0xa4d   : > { %v9331_v3 = vpop.f32.mrb[5].mxu0 }
 0xa4e   : > { %v17195_v11 = vpop.f32.mrb[6].mxu0 }
 0xa4f   : > { %v9334_v2 = vpop.f32.mrb[7].mxu0 }
 0xa51   : > { %v9757_v9 = vpop.f32.mrb[12].mxu1 }
 0xa52   : > { %v9758_v49 = vadd.f32 %v9757_v9, %v18073_v13  ;;  %v9759_v5 = vpop.f32.mrb[13].mxu1  ;;  %v11087_v13 = vld [vmem:[%s11386_s20 + $0x18] sm:$0xff]  }
 0xa53   : > { %v9760_v39 = vpop.f32.mrb[14].mxu1 }
 0xa54   : > { %v9761_v52 = vadd.f32 %v9760_v39, %v18074_v37  ;;  %v9762_v35 = vpop.f32.mrb[15].mxu1  ;;  %v10100_v4 = vpop.f32.mrb[8].mxu0 }
 0xa55   : > { %v10291_v24 = vadd.f32 %v10100_v4, %v9750_v48  ;;  %v10102_v59 = vpop.f32.mrb[9].mxu0  ;;  %v10996_v4 = vunpack.c.l.bf16 %v11087_v13 }
 0xa56   : > { %v10103_v21 = vpop.f32.mrb[10].mxu0  ;;  %v10997_v59 = vunpack.c.h.bf16 %v11087_v13 }
 0xa57   : > { %v10435_v50 = vadd.f32 %v10992_v62, %v10291_v24  ;;  %v10292_v3 = vadd.f32 %v10103_v21, %v9753_v29  ;;  %v10105_v2 = vpop.f32.mrb[11].mxu0 }
 0xa58   : > { %v11088_v2 = vld [vmem:[%s11386_s20 + $0x20] sm:$0xff]  }
 0xa59   : > { %v9765_v9 = vpop.f32.mrb[16].mxu1  ;;  %10483 = vst.msk [vmem:[%s17204_s25] sm:$0xff] %vm1302_vm3, %v10435_v50  ;;  %v10436_v5 = vadd.f32 %v10993_v17, %v10292_v3 }
 0xa5a   : > { %v9766_v48 = vadd.f32 %v9765_v9, %v16850_v28  ;;  %v9767_v36 = vpop.f32.mrb[17].mxu1 }
 0xa5b   : > { %v9768_v39 = vpop.f32.mrb[18].mxu1  ;;  %10484 = vst.msk [vmem:[%s17204_s25 + $0x8] sm:$0xff] %vm1302_vm3, %v10436_v5 }
 0xa5c   : > { %v9769_v37 = vadd.f32 %v9768_v39, %v16855_v41  ;;  %v9770_v35 = vpop.f32.mrb[19].mxu1  ;;  %v10108_v29 = vpop.f32.mrb[12].mxu0  ;;  %v11000_v39 = vunpack.c.l.bf16 %v11088_v2 }
 0xa5d   : > { %v10293_v62 = vadd.f32 %v10108_v29, %v9758_v49  ;;  %v10110_v24 = vpop.f32.mrb[13].mxu0  ;;  %v11001_v29 = vunpack.c.h.bf16 %v11088_v2 }
 0xa5e   : > { %v10111_v21 = vpop.f32.mrb[14].mxu0 }
 0xa5f   : > { %v10437_v50 = vadd.f32 %v10996_v4, %v10293_v62  ;;  %v10294_v17 = vadd.f32 %v10111_v21, %v9761_v52  ;;  %v10113_v3 = vpop.f32.mrb[15].mxu0 }
 0xa61   : > { %v9773_v28 = vpop.f32.mrb[20].mxu1  ;;  %10485 = vst.msk [vmem:[%s17204_s25 + $0x10] sm:$0xff] %vm1302_vm3, %v10437_v50  ;;  %v10438_v9 = vadd.f32 %v10997_v59, %v10294_v17  ;;  %v11089_v50 = vld [vmem:[%s11386_s20 + $0x28] sm:$0xff]  }
 0xa62   : > { %v9774_v5 = vadd.f32 %v9773_v28, %v16946_v44  ;;  %v9775_v41 = vpop.f32.mrb[21].mxu1 }
 0xa63   : > { %v9776_v36 = vpop.f32.mrb[22].mxu1  ;;  %10486 = vst.msk [vmem:[%s17204_s25 + $0x18] sm:$0xff] %vm1302_vm3, %v10438_v9  ;;  %v11004_v9 = vunpack.c.l.bf16 %v11089_v50 }
 0xa64   : > { %v9777_v49 = vadd.f32 %v9776_v36, %v16954_v8  ;;  %v9778_v13 = vpop.f32.mrb[23].mxu1  ;;  %v10116_v52 = vpop.f32.mrb[16].mxu0 }
 0xa65   : > { %v10295_v35 = vadd.f32 %v10116_v52, %v9766_v48  ;;  %v10118_v4 = vpop.f32.mrb[17].mxu0  ;;  %v11005_v13 = vunpack.c.h.bf16 %v11089_v50 }
 0xa66   : > { %v10119_v62 = vpop.f32.mrb[18].mxu0 }
 0xa67   : > { %v10439_v24 = vadd.f32 %v11000_v39, %v10295_v35  ;;  %v10296_v59 = vadd.f32 %v10119_v62, %v9769_v37  ;;  %v10121_v21 = vpop.f32.mrb[19].mxu0 }
 0xa69   : > { %v9781_v44 = vpop.f32.mrb[24].mxu1  ;;  %10487 = vst.msk [vmem:[%s17204_s25 + $0x20] sm:$0xff] %vm1302_vm3, %v10439_v24  ;;  %v10440_v17 = vadd.f32 %v11001_v29, %v10296_v59  ;;  %v11090_v29 = vld [vmem:[%s11386_s20 + $0x30] sm:$0xff]  }
 0xa6a   : > { %v9782_v3 = vadd.f32 %v9781_v44, %v16967_v30  ;;  %v9783_v8 = vpop.f32.mrb[25].mxu1  ;;  %v11008_v44 = vunpack.c.l.bf16 %v11090_v29 }
 0xa6b   : > { %v9784_v28 = vpop.f32.mrb[26].mxu1  ;;  %10488 = vst.msk [vmem:[%s17204_s25 + $0x28] sm:$0xff] %vm1302_vm3, %v10440_v17  ;;  %v11009_v8 = vunpack.c.h.bf16 %v11090_v29 }
 0xa6c   : > { %v9785_v48 = vadd.f32 %v9784_v28, %v16971_v7  ;;  %v9786_v2 = vpop.f32.mrb[27].mxu1  ;;  %v10124_v37 = vpop.f32.mrb[20].mxu0 }
 0xa6d   : > { %v10297_v41 = vadd.f32 %v10124_v37, %v9774_v5  ;;  %v10126_v36 = vpop.f32.mrb[21].mxu0 }
 0xa6e   : > { %v10127_v39 = vpop.f32.mrb[22].mxu0 }
 0xa6f   : > { %v10441_v52 = vadd.f32 %v11004_v9, %v10297_v41  ;;  %v10298_v35 = vadd.f32 %v10127_v39, %v9777_v49  ;;  %v10129_v4 = vpop.f32.mrb[23].mxu0  ;;  %v11091_v41 = vld [vmem:[%s11386_s20 + $0x38] sm:$0xff]  }
 0xa70   : > { %v11013_v29 = vunpack.c.h.bf16 %v11091_v41 }
 0xa71   : > { %v9789_v30 = vpop.f32.mrb[28].mxu1  ;;  %10489 = vst.msk [vmem:[%s17204_s25 + $0x30] sm:$0xff] %vm1302_vm3, %v10441_v52  ;;  %v10442_v62 = vadd.f32 %v11005_v13, %v10298_v35  ;;  %v11012_v35 = vunpack.c.l.bf16 %v11091_v41 }
 0xa72   : > { %v9790_v24 = vadd.f32 %v9789_v30, %v16977_v34  ;;  %v9791_v7 = vpop.f32.mrb[29].mxu1 }
 0xa73   : > { %v9792_v59 = vpop.f32.mrb[30].mxu1  ;;  %10490 = vst.msk [vmem:[%s17204_s25 + $0x38] sm:$0xff] %vm1302_vm3, %v10442_v62 }
 0xa74   : > { %v9793_v5 = vadd.f32 %v9792_v59, %v16981_v32  ;;  %v9794_v21 = vpop.f32.mrb[31].mxu1  ;;  %v10132_v49 = vpop.f32.mrb[24].mxu0 }
 0xa75   : > { %v10299_v50 = vadd.f32 %v10132_v49, %v9782_v3  ;;  %v10134_v17 = vpop.f32.mrb[25].mxu0 }
 0xa76   : > { %v10135_v28 = vpop.f32.mrb[26].mxu0 }
 0xa77   : > { %v10443_v2 = vadd.f32 %v11008_v44, %v10299_v50  ;;  %v10300_v9 = vadd.f32 %v10135_v28, %v9785_v48  ;;  %v10137_v37 = vpop.f32.mrb[27].mxu0  ;;  %v11092_v44 = vld [vmem:[%s11386_s20 + $0x40] sm:$0xff]  }
 0xa78   : > { %v11016_v28 = vunpack.c.l.bf16 %v11092_v44  ;;  %v11017_v37 = vunpack.c.h.bf16 %v11092_v44 }
 0xa79   : > { %v9797_v34 = vpop.f32.mrb[32].mxu1  ;;  %10491 = vst.msk [vmem:[%s17204_s25 + $0x40] sm:$0xff] %vm1302_vm3, %v10443_v2  ;;  %v10444_v36 = vadd.f32 %v11009_v8, %v10300_v9 }
 0xa7a   : > { %v9798_v13 = vadd.f32 %v9797_v34, %v16987_v25  ;;  %v9799_v32 = vpop.f32.mrb[33].mxu1 }
 0xa7b   : > { %v9800_v39 = vpop.f32.mrb[34].mxu1  ;;  %10492 = vst.msk [vmem:[%s17204_s25 + $0x48] sm:$0xff] %vm1302_vm3, %v10444_v36 }
 0xa7c   : > { %v9801_v3 = vadd.f32 %v9800_v39, %v16991_v40  ;;  %v9802_v52 = vpop.f32.mrb[35].mxu1  ;;  %v10140_v48 = vpop.f32.mrb[28].mxu0  ;;  %v11093_v39 = vld [vmem:[%s11386_s20 + $0x48] sm:$0xff]  }
 0xa7d   : > { %v10301_v4 = vadd.f32 %v10140_v48, %v9790_v24  ;;  %v10142_v30 = vpop.f32.mrb[29].mxu0 }
 0xa7e   : > { %v10143_v62 = vpop.f32.mrb[30].mxu0  ;;  %v11020_v30 = vunpack.c.l.bf16 %v11093_v39 }
 0xa7f   : > { %v10445_v7 = vadd.f32 %v11012_v35, %v10301_v4  ;;  %v10302_v59 = vadd.f32 %v10143_v62, %v9793_v5  ;;  %v10145_v21 = vpop.f32.mrb[31].mxu0 }
 0xa81   : > { %v9805_v25 = vpop.f32.mrb[36].mxu1  ;;  %10493 = vst.msk [vmem:[%s17204_s25 + $0x50] sm:$0xff] %vm1302_vm3, %v10445_v7  ;;  %v10446_v49 = vadd.f32 %v11013_v29, %v10302_v59  ;;  %v11021_v7 = vunpack.c.h.bf16 %v11093_v39 }
 0xa82   : > { %v9806_v50 = vadd.f32 %v9805_v25, %v16997_v18  ;;  %v9807_v40 = vpop.f32.mrb[37].mxu1 }
 0xa83   : > { %v9808_v17 = vpop.f32.mrb[38].mxu1  ;;  %10494 = vst.msk [vmem:[%s17204_s25 + $0x58] sm:$0xff] %vm1302_vm3, %v10446_v49  ;;  %v11094_v49 = vld [vmem:[%s11386_s20 + $0x50] sm:$0xff]  }
 0xa84   : > { %v9809_v24 = vadd.f32 %v9808_v17, %v17001_v51  ;;  %v9810_v8 = vpop.f32.mrb[39].mxu1  ;;  %v10148_v5 = vpop.f32.mrb[32].mxu0 }
 0xa85   : > { %v10303_v2 = vadd.f32 %v10148_v5, %v9798_v13  ;;  %v10150_v9 = vpop.f32.mrb[33].mxu0  ;;  %v11024_v5 = vunpack.c.l.bf16 %v11094_v49 }
 0xa86   : > { %v10151_v34 = vpop.f32.mrb[34].mxu0 }
 0xa87   : > { %v10447_v41 = vadd.f32 %v11016_v28, %v10303_v2  ;;  %v10304_v36 = vadd.f32 %v10151_v34, %v9801_v3  ;;  %v10153_v32 = vpop.f32.mrb[35].mxu0 }
 0xa89   : > { %v9813_v18 = vpop.f32.mrb[40].mxu1  ;;  %10495 = vst.msk [vmem:[%s17204_s25 + $0x60] sm:$0xff] %vm1302_vm3, %v10447_v41  ;;  %v10448_v52 = vadd.f32 %v11017_v37, %v10304_v36  ;;  %v11025_v37 = vunpack.c.h.bf16 %v11094_v49 }
 0xa8a   : > { %v9814_v35 = vadd.f32 %v9813_v18, %v17007_v54  ;;  %v9815_v51 = vpop.f32.mrb[41].mxu1  ;;  %v11095_v18 = vld [vmem:[%s11386_s20 + $0x58] sm:$0xff]  }
 0xa8b   : > { %v9816_v48 = vpop.f32.mrb[42].mxu1  ;;  %10496 = vst.msk [vmem:[%s17204_s25 + $0x68] sm:$0xff] %vm1302_vm3, %v10448_v52 }
 0xa8c   : > { %v9817_v13 = vadd.f32 %v9816_v48, %v17011_v27  ;;  %v9818_v4 = vpop.f32.mrb[43].mxu1  ;;  %v10156_v3 = vpop.f32.mrb[36].mxu0 }
 0xa8d   : > { %v10305_v29 = vadd.f32 %v10156_v3, %v9806_v50  ;;  %v10158_v62 = vpop.f32.mrb[37].mxu0  ;;  %v11028_v4 = vunpack.c.l.bf16 %v11095_v18 }
 0xa8e   : > { %v10159_v59 = vpop.f32.mrb[38].mxu0 }
 0xa8f   : > { %v10449_v21 = vadd.f32 %v11020_v30, %v10305_v29  ;;  %v10306_v25 = vadd.f32 %v10159_v59, %v9809_v24  ;;  %v10161_v44 = vpop.f32.mrb[39].mxu0  ;;  %v11029_v29 = vunpack.c.h.bf16 %v11095_v18 }
 0xa91   : > { %v9821_v54 = vpop.f32.mrb[44].mxu1  ;;  %10497 = vst.msk [vmem:[%s17204_s25 + $0x70] sm:$0xff] %vm1302_vm3, %v10449_v21  ;;  %v10450_v40 = vadd.f32 %v11021_v7, %v10306_v25  ;;  %v11096_v25 = vld [vmem:[%s11386_s20 + $0x60] sm:$0xff]  }
 0xa92   : > { %v9822_v17 = vadd.f32 %v9821_v54, %v17017_v45  ;;  %v9823_v27 = vpop.f32.mrb[45].mxu1 }
 0xa93   : > { %v9824_v8 = vpop.f32.mrb[46].mxu1  ;;  %10498 = vst.msk [vmem:[%s17204_s25 + $0x78] sm:$0xff] %vm1302_vm3, %v10450_v40  ;;  %v11032_v27 = vunpack.c.l.bf16 %v11096_v25 }
 0xa94   : > { %v9825_v50 = vadd.f32 %v9824_v8, %v17021_v26  ;;  %v9826_v28 = vpop.f32.mrb[47].mxu1  ;;  %v10164_v24 = vpop.f32.mrb[40].mxu0 }
 0xa95   : > { %v10307_v2 = vadd.f32 %v10164_v24, %v9814_v35  ;;  %v10166_v9 = vpop.f32.mrb[41].mxu0 }
 0xa96   : > { %v10167_v34 = vpop.f32.mrb[42].mxu0 }
 0xa97   : > { %v10451_v41 = vadd.f32 %v11024_v5, %v10307_v2  ;;  %v10308_v36 = vadd.f32 %v10167_v34, %v9817_v13  ;;  %v10169_v32 = vpop.f32.mrb[43].mxu0  ;;  %v11033_v5 = vunpack.c.h.bf16 %v11096_v25  ;;  %v11097_v34 = vld [vmem:[%s11386_s20 + $0x68] sm:$0xff]  }
 0xa99   : > { %v9829_v45 = vpop.f32.mrb[48].mxu1  ;;  %10499 = vst.msk [vmem:[%s17204_s25 + $0x80] sm:$0xff] %vm1302_vm3, %v10451_v41  ;;  %v10452_v39 = vadd.f32 %v11025_v37, %v10308_v36 }
 0xa9a   : > { %v9830_v52 = vadd.f32 %v9829_v45, %v17027_v33  ;;  %v9831_v26 = vpop.f32.mrb[49].mxu1 }
 0xa9b   : > { %v9832_v51 = vpop.f32.mrb[50].mxu1  ;;  %10500 = vst.msk [vmem:[%s17204_s25 + $0x88] sm:$0xff] %vm1302_vm3, %v10452_v39  ;;  %v11036_v39 = vunpack.c.l.bf16 %v11097_v34 }
 0xa9c   : > { %v9833_v35 = vadd.f32 %v9832_v51, %v17031_v42  ;;  %v9834_v48 = vpop.f32.mrb[51].mxu1  ;;  %v10172_v13 = vpop.f32.mrb[44].mxu0 }
 0xa9d   : > { %v10309_v30 = vadd.f32 %v10172_v13, %v9822_v17  ;;  %v10174_v3 = vpop.f32.mrb[45].mxu0 }
 0xa9e   : > { %v10175_v62 = vpop.f32.mrb[46].mxu0  ;;  %v11098_v3 = vld [vmem:[%s11386_s20 + $0x70] sm:$0xff]  }
 0xa9f   : > { %v10453_v7 = vadd.f32 %v11028_v4, %v10309_v30  ;;  %v10310_v59 = vadd.f32 %v10175_v62, %v9825_v50  ;;  %v10177_v21 = vpop.f32.mrb[47].mxu0 }
 0xaa1   : > { %v9837_v33 = vpop.f32.mrb[52].mxu1  ;;  %10501 = vst.msk [vmem:[%s17204_s25 + $0x90] sm:$0xff] %vm1302_vm3, %v10453_v7  ;;  %v10454_v44 = vadd.f32 %v11029_v29, %v10310_v59 }
 0xaa2   : > { %v9838_v54 = vadd.f32 %v9837_v33, %v17037_v56  ;;  %v9839_v42 = vpop.f32.mrb[53].mxu1  ;;  %v11040_v33 = vunpack.c.l.bf16 %v11098_v3 }
 0xaa3   : > { %v9840_v49 = vpop.f32.mrb[54].mxu1  ;;  %10502 = vst.msk [vmem:[%s17204_s25 + $0x98] sm:$0xff] %vm1302_vm3, %v10454_v44  ;;  %v11041_v42 = vunpack.c.h.bf16 %v11098_v3 }
 0xaa4   : > { %v9841_v40 = vadd.f32 %v9840_v49, %v17041_v43  ;;  %v9842_v17 = vpop.f32.mrb[55].mxu1  ;;  %v10180_v8 = vpop.f32.mrb[48].mxu0 }
 0xaa5   : > { %v10311_v50 = vadd.f32 %v10180_v8, %v9830_v52  ;;  %v10182_v28 = vpop.f32.mrb[49].mxu0  ;;  %v11099_v8 = vld [vmem:[%s11386_s20 + $0x78] sm:$0xff]  }
 0xaa6   : > { %v10183_v24 = vpop.f32.mrb[50].mxu0 }
 0xaa7   : > { %v10455_v2 = vadd.f32 %v11032_v27, %v10311_v50  ;;  %v10312_v9 = vadd.f32 %v10183_v24, %v9833_v35  ;;  %v10185_v37 = vpop.f32.mrb[51].mxu0  ;;  %v11037_v35 = vunpack.c.h.bf16 %v11097_v34 }
 0xaa9   : > { %v9845_v56 = vpop.f32.mrb[56].mxu1  ;;  %10503 = vst.msk [vmem:[%s17204_s25 + $0xa0] sm:$0xff] %vm1302_vm3, %v10455_v2  ;;  %v10456_v41 = vadd.f32 %v11033_v5, %v10312_v9  ;;  %v11044_v9 = vunpack.c.l.bf16 %v11099_v8 }
 0xaaa   : > { %v9846_v36 = vadd.f32 %v9845_v56, %v17047_v31  ;;  %v9847_v43 = vpop.f32.mrb[57].mxu1 }
 0xaab   : > { %v9848_v32 = vpop.f32.mrb[58].mxu1  ;;  %10504 = vst.msk [vmem:[%s17204_s25 + $0xa8] sm:$0xff] %vm1302_vm3, %v10456_v41  ;;  %v11045_v41 = vunpack.c.h.bf16 %v11099_v8 }
 0xaac   : > { %v9849_v45 = vadd.f32 %v9848_v32, %v17051_v60  ;;  %v9850_v18 = vpop.f32.mrb[59].mxu1  ;;  %v10188_v52 = vpop.f32.mrb[52].mxu0 }
 0xaad   : > { %v10313_v26 = vadd.f32 %v10188_v52, %v9838_v54  ;;  %v10190_v51 = vpop.f32.mrb[53].mxu0  ;;  %v11100_v18 = vld [vmem:[%s11386_s20 + $0x80] sm:$0xff]  }
 0xaae   : > { %v10191_v48 = vpop.f32.mrb[54].mxu0 }
 0xaaf   : > { %v10457_v4 = vadd.f32 %v11036_v39, %v10313_v26  ;;  %v10314_v13 = vadd.f32 %v10191_v48, %v9841_v40  ;;  %v10193_v30 = vpop.f32.mrb[55].mxu0  ;;  %v11048_v48 = vunpack.c.l.bf16 %v11100_v18 }
 0xab1   : > { %v9853_v31 = vpop.f32.mrb[60].mxu1  ;;  %10505 = vst.msk [vmem:[%s17204_s25 + $0xb0] sm:$0xff] %vm1302_vm3, %v10457_v4  ;;  %v10458_v29 = vadd.f32 %v11037_v35, %v10314_v13 }
 0xab2   : > { %v9854_v62 = vadd.f32 %v9853_v31, %v17101_v15  ;;  %v9855_v60 = vpop.f32.mrb[61].mxu1  ;;  %v11049_v31 = vunpack.c.h.bf16 %v11100_v18  ;;  %v11103_v18 = vld [vmem:[%s11386_s20 + $0x98] sm:$0xff]  }
 0xab3   : > { %v9856_v7 = vpop.f32.mrb[62].mxu1  ;;  %10506 = vst.msk [vmem:[%s17204_s25 + $0xb8] sm:$0xff] %vm1302_vm3, %v10458_v29 }
 0xab4   : > { %v9857_v59 = vadd.f32 %v9856_v7, %v17103_v1  ;;  %v9858_v21 = vpop.f32.mrb[63].mxu1  ;;  %v10196_v25 = vpop.f32.mrb[56].mxu0  ;;  %v11101_v7 = vld [vmem:[%s11386_s20 + $0x88] sm:$0xff]  }
 0xab5   : > { %v10315_v44 = vadd.f32 %v10196_v25, %v9846_v36  ;;  %v10198_v54 = vpop.f32.mrb[57].mxu0 }
 0xab6   : > { %v10199_v49 = vpop.f32.mrb[58].mxu0  ;;  %v11052_v54 = vunpack.c.l.bf16 %v11101_v7 }
 0xab7   : > { %v10459_v40 = vadd.f32 %v11040_v33, %v10315_v44  ;;  %v10316_v17 = vadd.f32 %v10199_v49, %v9849_v45  ;;  %v10201_v27 = vpop.f32.mrb[59].mxu0 }
 0xab9   : > { %v9861_v15 = vpop.f32.mrb[64].mxu1  ;;  %10507 = vst.msk [vmem:[%s17204_s25 + $0xc0] sm:$0xff] %vm1302_vm3, %v10459_v40  ;;  %v10460_v50 = vadd.f32 %v11041_v42, %v10316_v17  ;;  %v11053_v17 = vunpack.c.h.bf16 %v11101_v7 }
 0xaba   : > { %v9862_v28 = vadd.f32 %v9861_v15, %v17111_v46  ;;  %v9863_v1 = vpop.f32.mrb[65].mxu1 }
 0xabb   : > { %v9864_v5 = vpop.f32.mrb[66].mxu1  ;;  %10508 = vst.msk [vmem:[%s17204_s25 + $0xc8] sm:$0xff] %vm1302_vm3, %v10460_v50 }
 0xabc   : > { %v9865_v24 = vadd.f32 %v9864_v5, %v17114_v23  ;;  %v9866_v2 = vpop.f32.mrb[67].mxu1  ;;  %v10204_v37 = vpop.f32.mrb[60].mxu0 }
 0xabd   : > { %v10317_v56 = vadd.f32 %v10204_v37, %v9854_v62  ;;  %v10206_v34 = vpop.f32.mrb[61].mxu0 }
 0xabe   : > { %v10207_v36 = vpop.f32.mrb[62].mxu0 }
 0xabf   : > { %v10461_v43 = vadd.f32 %v11044_v9, %v10317_v56  ;;  %v10318_v32 = vadd.f32 %v10207_v36, %v9857_v59  ;;  %v10209_v45 = vpop.f32.mrb[63].mxu0 }
 0xac1   : > { %v9869_v46 = vpop.f32.mrb[68].mxu1  ;;  %10509 = vst.msk [vmem:[%s17204_s25 + $0xd0] sm:$0xff] %vm1302_vm3, %v10461_v43  ;;  %v10462_v39 = vadd.f32 %v11045_v41, %v10318_v32 }
 0xac2   : > { %v9870_v52 = vadd.f32 %v9869_v46, %v17121_v22  ;;  %v9871_v23 = vpop.f32.mrb[69].mxu1 }
 0xac3   : > { %v9872_v26 = vpop.f32.mrb[70].mxu1  ;;  %10510 = vst.msk [vmem:[%s17204_s25 + $0xd8] sm:$0xff] %vm1302_vm3, %v10462_v39 }
 0xac4   : > { %v9873_v51 = vadd.f32 %v9872_v26, %v17124_v63  ;;  %v9874_v35 = vpop.f32.mrb[71].mxu1  ;;  %v10212_v4 = vpop.f32.mrb[64].mxu0 }
 0xac5   : > { %v10319_v13 = vadd.f32 %v10212_v4, %v9862_v28  ;;  %v10214_v30 = vpop.f32.mrb[65].mxu0  ;;  %v11102_v28 = vld [vmem:[%s11386_s20 + $0x90] sm:$0xff]   ;;  %v11060_v35 = vunpack.c.l.bf16 %v11103_v18 }
 0xac6   : > { %v10215_v3 = vpop.f32.mrb[66].mxu0  ;;  %v11056_v37 = vunpack.c.l.bf16 %v11102_v28  ;;  %v11057_v36 = vunpack.c.h.bf16 %v11102_v28  ;;  %v11061_v30 = vunpack.c.h.bf16 %v11103_v18 }
 0xac7   : > { %v10463_v29 = vadd.f32 %v11048_v48, %v10319_v13  ;;  %v10320_v62 = vadd.f32 %v10215_v3, %v9865_v24  ;;  %v10217_v60 = vpop.f32.mrb[67].mxu0 }
 0xac8   : > { %v11104_v60 = vld [vmem:[%s11386_s20 + $0xa0] sm:$0xff]  }
 0xac9   : > { %v9877_v22 = vpop.f32.mrb[72].mxu1  ;;  %10511 = vst.msk [vmem:[%s17204_s25 + $0xe0] sm:$0xff] %vm1302_vm3, %v10463_v29  ;;  %v10464_v59 = vadd.f32 %v11049_v31, %v10320_v62 }
 0xaca   : > { %v9878_v21 = vadd.f32 %v9877_v22, %v17131_v58  ;;  %v9879_v63 = vpop.f32.mrb[73].mxu1 }
 0xacb   : > { %v9880_v33 = vpop.f32.mrb[74].mxu1  ;;  %10512 = vst.msk [vmem:[%s17204_s25 + $0xe8] sm:$0xff] %vm1302_vm3, %v10464_v59 }
 0xacc   : > { %v9881_v25 = vadd.f32 %v9880_v33, %v17134_v55  ;;  %v9882_v44 = vpop.f32.mrb[75].mxu1  ;;  %v10220_v42 = vpop.f32.mrb[68].mxu0  ;;  %v11064_v33 = vunpack.c.l.bf16 %v11104_v60 }
 0xacd   : > { %v10321_v49 = vadd.f32 %v10220_v42, %v9870_v52  ;;  %v10222_v40 = vpop.f32.mrb[69].mxu0  ;;  %v11065_v42 = vunpack.c.h.bf16 %v11104_v60 }
 0xace   : > { %v10223_v27 = vpop.f32.mrb[70].mxu0 }
 0xacf   : > { %v10465_v15 = vadd.f32 %v11052_v54, %v10321_v49  ;;  %v10322_v8 = vadd.f32 %v10223_v27, %v9873_v51  ;;  %v10225_v50 = vpop.f32.mrb[71].mxu0 }
 0xad1   : > { %v9885_v58 = vpop.f32.mrb[76].mxu1  ;;  %10513 = vst.msk [vmem:[%s17204_s25 + $0xf0] sm:$0xff] %vm1302_vm3, %v10465_v15  ;;  %v10466_v1 = vadd.f32 %v11053_v17, %v10322_v8  ;;  %v11105_v15 = vld [vmem:[%s11386_s20 + $0xa8] sm:$0xff]  }
 0xad2   : > { %v9886_v5 = vadd.f32 %v9885_v58, %v17144_v16  ;;  %v9887_v55 = vpop.f32.mrb[77].mxu1 }
 0xad3   : > { %v9888_v24 = vpop.f32.mrb[78].mxu1  ;;  %10514 = vst.msk [vmem:[%s17204_s25 + $0xf8] sm:$0xff] %vm1302_vm3, %v10466_v1 }
 0xad4   : > { %v9889_v2 = vadd.f32 %v9888_v24, %v17147_v10  ;;  %v9890_v9 = vpop.f32.mrb[79].mxu1  ;;  %v10228_v56 = vpop.f32.mrb[72].mxu0 }
 0xad5   : > { %v10323_v34 = vadd.f32 %v10228_v56, %v9878_v21  ;;  %v10230_v41 = vpop.f32.mrb[73].mxu0  ;;  %v11069_v9 = vunpack.c.h.bf16 %v11105_v15 }
 0xad6   : > { %v10231_v43 = vpop.f32.mrb[74].mxu0 }
 0xad7   : > { %v10467_v32 = vadd.f32 %v11056_v37, %v10323_v34  ;;  %v10324_v45 = vadd.f32 %v10231_v43, %v9881_v25  ;;  %v10233_v46 = vpop.f32.mrb[75].mxu0 }
 0xad9   : > { %v9893_v16 = vpop.f32.mrb[80].mxu1  ;;  %10515 = vst.msk [vmem:[%s17204_s25 + $0x100] sm:$0xff] %vm1302_vm3, %v10467_v32  ;;  %v10468_v39 = vadd.f32 %v11057_v36, %v10324_v45  ;;  %v11106_v36 = vld [vmem:[%s11386_s20 + $0xb0] sm:$0xff]  }
 0xada   : > { %v9894_v52 = vadd.f32 %v9893_v16, %v17156_v19  ;;  %v9895_v10 = vpop.f32.mrb[81].mxu1  ;;  %v11072_v18 = vunpack.c.l.bf16 %v11106_v36 }
 0xadb   : > { %v9896_v23 = vpop.f32.mrb[82].mxu1  ;;  %10516 = vst.msk [vmem:[%s17204_s25 + $0x108] sm:$0xff] %vm1302_vm3, %v10468_v39 }
 0xadc   : > { %v9897_v26 = vadd.f32 %v9896_v23, %v17159_v61  ;;  %v9898_v51 = vpop.f32.mrb[83].mxu1  ;;  %v10236_v48 = vpop.f32.mrb[76].mxu0  ;;  %v11073_v23 = vunpack.c.h.bf16 %v11106_v36 }
 0xadd   : > { %v10325_v4 = vadd.f32 %v10236_v48, %v9886_v5  ;;  %v10238_v13 = vpop.f32.mrb[77].mxu0  ;;  %v11068_v5 = vunpack.c.l.bf16 %v11105_v15 }
 0xade   : > { %v10239_v31 = vpop.f32.mrb[78].mxu0 }
 0xadf   : > { %v10469_v3 = vadd.f32 %v11060_v35, %v10325_v4  ;;  %v10326_v29 = vadd.f32 %v10239_v31, %v9889_v2  ;;  %v10241_v62 = vpop.f32.mrb[79].mxu0  ;;  %v11107_v4 = vld [vmem:[%s11386_s20 + $0xb8] sm:$0xff]  }
 0xae0   : > { %v11076_v62 = vunpack.c.l.bf16 %v11107_v4 }
 0xae1   : > { %v9901_v19 = vpop.f32.mrb[84].mxu1  ;;  %10517 = vst.msk [vmem:[%s17204_s25 + $0x110] sm:$0xff] %vm1302_vm3, %v10469_v3  ;;  %v10470_v22 = vadd.f32 %v11061_v30, %v10326_v29 }
 0xae2   : > { %v9902_v7 = vadd.f32 %v9901_v19, %v17169_v53  ;;  %v9903_v61 = vpop.f32.mrb[85].mxu1 }
 0xae3   : > { %v9904_v59 = vpop.f32.mrb[86].mxu1  ;;  %10518 = vst.msk [vmem:[%s17204_s25 + $0x118] sm:$0xff] %vm1302_vm3, %v10470_v22 }
 0xae4   : > { %v9905_v21 = vadd.f32 %v9904_v59, %v17172_v12  ;;  %v9906_v63 = vpop.f32.mrb[87].mxu1  ;;  %v10244_v25 = vpop.f32.mrb[80].mxu0 }
 0xae5   : > { %v10327_v44 = vadd.f32 %v10244_v25, %v9894_v52  ;;  %v10246_v54 = vpop.f32.mrb[81].mxu0 }
 0xae6   : > { %v10247_v49 = vpop.f32.mrb[82].mxu0 }
 0xae7   : > { %v10471_v40 = vadd.f32 %v11064_v33, %v10327_v44  ;;  %v10328_v17 = vadd.f32 %v10247_v49, %v9897_v26  ;;  %v10249_v27 = vpop.f32.mrb[83].mxu0  ;;  %v11108_v33 = vld [vmem:[%s11386_s20 + $0xc0] sm:$0xff]  }
 0xae8   : > { %v11081_v15 = vunpack.c.h.bf16 %v11108_v33 }
 0xae9   : > { %v9909_v53 = vpop.f32.mrb[88].mxu1  ;;  %10519 = vst.msk [vmem:[%s17204_s25 + $0x120] sm:$0xff] %vm1302_vm3, %v10471_v40  ;;  %v10472_v8 = vadd.f32 %v11065_v42, %v10328_v17  ;;  %v11080_v40 = vunpack.c.l.bf16 %v11108_v33 }
 0xaea   : > { %v9910_v50 = vadd.f32 %v9909_v53, %v17178_v0  ;;  %v9911_v12 = vpop.f32.mrb[89].mxu1 }
 0xaeb   : > { %v9912_v58 = vpop.f32.mrb[90].mxu1  ;;  %10520 = vst.msk [vmem:[%s17204_s25 + $0x128] sm:$0xff] %vm1302_vm3, %v10472_v8 }
 0xaec   : > { %v9913_v28 = vadd.f32 %v9912_v58, %v17180_v38  ;;  %v9914_v1 = vpop.f32.mrb[91].mxu1  ;;  %v10252_v55 = vpop.f32.mrb[84].mxu0 }
 0xaed   : > { %v10329_v24 = vadd.f32 %v10252_v55, %v9902_v7  ;;  %v10254_v2 = vpop.f32.mrb[85].mxu0  ;;  %v11077_v7 = vunpack.c.h.bf16 %v11107_v4 }
 0xaee   : > { %v10255_v37 = vpop.f32.mrb[86].mxu0 }
 0xaef   : > { %v10473_v56 = vadd.f32 %v11068_v5, %v10329_v24  ;;  %v10330_v34 = vadd.f32 %v10255_v37, %v9905_v21  ;;  %v10257_v41 = vpop.f32.mrb[87].mxu0 }
 0xaf1   : > { %v9917_v0 = vpop.f32.mrb[92].mxu1  ;;  %10521 = vst.msk [vmem:[%s17204_s25 + $0x130] sm:$0xff] %vm1302_vm3, %v10473_v56  ;;  %v10474_v43 = vadd.f32 %v11069_v9, %v10330_v34 }
 0xaf2   : > { %v9918_v32 = vadd.f32 %v9917_v0, %v17183_v57  ;;  %v9919_v38 = vpop.f32.mrb[93].mxu1 }
 0xaf3   : > { %v9920_v45 = vpop.f32.mrb[94].mxu1  ;;  %10522 = vst.msk [vmem:[%s17204_s25 + $0x138] sm:$0xff] %vm1302_vm3, %v10474_v43 }
 0xaf4   : > { %v9921_v46 = vadd.f32 %v9920_v45, %v17185_v20  ;;  %v9922_v16 = vpop.f32.mrb[95].mxu1  ;;  %v10260_v39 = vpop.f32.mrb[88].mxu0 }
 0xaf5   : > { %v10331_v52 = vadd.f32 %v10260_v39, %v9910_v50  ;;  %v10262_v10 = vpop.f32.mrb[89].mxu0 }
 0xaf6   : > { %v10263_v26 = vpop.f32.mrb[90].mxu0 }
 0xaf7   : > { %v10475_v51 = vadd.f32 %v11072_v18, %v10331_v52  ;;  %v10332_v35 = vadd.f32 %v10263_v26, %v9913_v28  ;;  %v10265_v48 = vpop.f32.mrb[91].mxu0 }
 0xaf9   : > { %v9925_v57 = vpop.f32.mrb[96].mxu1  ;;  %10523 = vst.msk [vmem:[%s17204_s25 + $0x140] sm:$0xff] %vm1302_vm3, %v10475_v51  ;;  %v10476_v13 = vadd.f32 %v11073_v23, %v10332_v35 }
 0xafa   : > { %v9926_v30 = vadd.f32 %v9925_v57, %v17187_v14  ;;  %v9927_v20 = vpop.f32.mrb[97].mxu1 }
 0xafb   : > { %v9928_v31 = vpop.f32.mrb[98].mxu1  ;;  %10524 = vst.msk [vmem:[%s17204_s25 + $0x148] sm:$0xff] %vm1302_vm3, %v10476_v13 }
 0xafc   : > { %v9929_v3 = vadd.f32 %v9928_v31, %v17189_v47  ;;  %v9930_v29 = vpop.f32.mrb[99].mxu1  ;;  %v10268_v19 = vpop.f32.mrb[92].mxu0 }
 0xafd   : > { %v10333_v60 = vadd.f32 %v10268_v19, %v9918_v32  ;;  %v10270_v22 = vpop.f32.mrb[93].mxu0 }
 0xafe   : > { %v10271_v61 = vpop.f32.mrb[94].mxu0 }
 0xaff   : > { %v10477_v59 = vadd.f32 %v11076_v62, %v10333_v60  ;;  %v10334_v21 = vadd.f32 %v10271_v61, %v9921_v46  ;;  %v10273_v63 = vpop.f32.mrb[95].mxu0 }
 0xb01   : > { %v9933_v14 = vpop.f32.mrb[100].mxu1  ;;  %10525 = vst.msk [vmem:[%s17204_s25 + $0x150] sm:$0xff] %vm1302_vm3, %v10477_v59  ;;  %v10478_v25 = vadd.f32 %v11077_v7, %v10334_v21 }
 0xb02   : > { %v9934_v44 = vadd.f32 %v9933_v14, %v17193_v6  ;;  %v9935_v47 = vpop.f32.mrb[101].mxu1  ;;  %v11109_v6 = vld [vmem:[%s11386_s20 + $0xc8] sm:$0xff]  }
 0xb03   : > { %v9936_v54 = vpop.f32.mrb[102].mxu1  ;;  %10526 = vst.msk [vmem:[%s17204_s25 + $0x158] sm:$0xff] %vm1302_vm3, %v10478_v25  ;;  %v11084_v1 = vunpack.c.l.bf16 %v11109_v6  ;;  %v11085_v24 = vunpack.c.h.bf16 %v11109_v6 }
 0xb04   : > { %v9937_v42 = vadd.f32 %v9936_v54, %v17195_v11  ;;  %v9938_v49 = vpop.f32.mrb[103].mxu1  ;;  %v10276_v17 = vpop.f32.mrb[96].mxu0 }
 0xb05   : > { %v10335_v27 = vadd.f32 %v10276_v17, %v9926_v30  ;;  %v10278_v53 = vpop.f32.mrb[97].mxu0 }
 0xb06   : > { %v10279_v8 = vpop.f32.mrb[98].mxu0 }
 0xb07   : > { %v10479_v50 = vadd.f32 %v11080_v40, %v10335_v27  ;;  %v10336_v12 = vadd.f32 %v10279_v8, %v9929_v3  ;;  %v10281_v58 = vpop.f32.mrb[99].mxu0 }
 0xb09   : > { %10527 = vst.msk [vmem:[%s17204_s25 + $0x160] sm:$0xff] %vm1302_vm3, %v10479_v50  ;;  %v10480_v28 = vadd.f32 %v11081_v15, %v10336_v12 }
 0xb0b   : > { %10528 = vst.msk [vmem:[%s17204_s25 + $0x168] sm:$0xff] %vm1302_vm3, %v10480_v28 }
 0xb0c   : > { %v10284_v11 = vpop.f32.mrb[100].mxu0 }
 0xb0d   : > { %v10337_v5 = vadd.f32 %v10284_v11, %v9934_v44  ;;  %v10286_v55 = vpop.f32.mrb[101].mxu0 }
 0xb0e   : > { %v10287_v2 = vpop.f32.mrb[102].mxu0 }
 0xb0f   : > { %v10481_v9 = vadd.f32 %v11084_v1, %v10337_v5  ;;  %v10338_v37 = vadd.f32 %v10287_v2, %v9937_v42  ;;  %v10289_v56 = vpop.f32.mrb[103].mxu0 }
 0xb11   : > { %10529 = vst.msk [vmem:[%s17204_s25 + $0x170] sm:$0xff] %vm1302_vm3, %v10481_v9  ;;  %v10482_v34 = vadd.f32 %v11085_v24, %v10338_v37 }
 0xb13   : > { %10530 = vst.msk [vmem:[%s17204_s25 + $0x178] sm:$0xff] %vm1302_vm3, %v10482_v34 }
 0xb14 PF: > { %s14_s15 = sadd.s32 1, %s11340_s15  }
 0xb15   : > { %p11_p4 = scmp.ge.s32.totalorder %s14_s15, 4  }
 0xb17   :  { %13 = sbr.rel (!%p11_p4) target bundleno = 1 (0x1), region = 68 }

</bundles_post_ra>
